<compile_context>
chip_gen: v6e
topology: v6e:2x2x1
jax: 0.10.0
libtpu: 0.0.40
codegen_flags: <defaults>
</compile_context>

<pallas_src>
import functools

import jax
import jax.numpy as jnp
from jax.experimental import pallas as pl
from jax.experimental.pallas import tpu as pltpu

ACT_NONE, ACT_LEAKY, ACT_RELU, ACT_TANH = 0, 1, 2, 3
BN_EPS = 1e-5
BN_SCALE = (1.0 + BN_EPS) ** -0.5  # gamma=1, beta=0, mean=0, var=1 (eval mode)
DEPTH = 4


def _round_up(x, m):
    return ((x + m - 1) // m) * m


def _apply_act(y, act):
    if act == ACT_LEAKY:
        return jnp.where(y >= 0.0, y, 0.2 * y)
    if act == ACT_RELU:
        return jnp.maximum(y, 0.0)
    if act == ACT_TANH:
        return jnp.tanh(y)
    return y


# ----------------------------------------------------------------------------
# Pallas kernel: tiled MXU matmul (bf16 in / f32 acc) + fused bias + activation
# ----------------------------------------------------------------------------
def _mm_fused_kernel(a_ref, b_ref, *rest, act, multi_k, has_bias):
    if has_bias:
        bias_ref, rest = rest[0], rest[1:]
    if multi_k:
        o_ref, acc_ref = rest

        # NOTE: the accumulator pattern requires K to stay the LAST
        # ("arbitrary", innermost) grid axis with the output block index
        # constant over k.  Do not reorder the grid.
        @pl.when(pl.program_id(2) == 0)
        def _init():
            acc_ref[...] = jnp.zeros_like(acc_ref)

        acc_ref[...] += jnp.dot(a_ref[...], b_ref[...],
                                preferred_element_type=jnp.float32)

        @pl.when(pl.program_id(2) == pl.num_programs(2) - 1)
        def _finalize():
            y = acc_ref[...]
            if has_bias:
                y = y + bias_ref[...]
            o_ref[...] = _apply_act(y, act).astype(o_ref.dtype)
    else:
        (o_ref,) = rest
        y = jnp.dot(a_ref[...], b_ref[...], preferred_element_type=jnp.float32)
        if has_bias:
            y = y + bias_ref[...]
        o_ref[...] = _apply_act(y, act).astype(o_ref.dtype)


def pallas_matmul_fused(A, B, act, bias=None):
    """act((M,K) @ (K,N) [+ bias[N]]).  A/B are fed to the MXU in bf16, the
    accumulator / output stay f32.  N is never padded (full-extent last block
    dims are legal); M/K tiles are sized to the problem."""
    M, K = A.shape
    K2, N = B.shape
    assert K == K2

    # --- adaptive tile selection -------------------------------------------
    if M <= 512:
        tm, Mp = M, M                     # full-extent M block (no padding)
    else:
        tm = 512
        Mp = _round_up(M, tm)
    if K <= 2048:
        Kp = _round_up(K, 128)
        tk = Kp                           # single K step
    else:
        tk = 512
        Kp = _round_up(K, tk)
    if N % 256 == 0:
        tn = 256                          # feed v6e's 256-wide MXU when possible
    elif N % 128 == 0:
        tn = 128
    else:
        tn = N                            # full-extent last block dim (legal)

    Ap = A.astype(jnp.bfloat16)
    if (Mp, Kp) != (M, K):
        Ap = jnp.pad(Ap, ((0, Mp - M), (0, Kp - K)))
    Bp = B.astype(jnp.bfloat16)
    if Kp != K:
        Bp = jnp.pad(Bp, ((0, Kp - K), (0, 0)))

    nm, nn, nk = Mp // tm, N // tn, Kp // tk
    multi_k = nk > 1
    has_bias = bias is not None

    in_specs = [
        pl.BlockSpec((tm, tk), lambda i, j, k: (i, k)),
        pl.BlockSpec((tk, tn), lambda i, j, k: (k, j)),
    ]
    inputs = [Ap, Bp]
    if has_bias:
        in_specs.append(pl.BlockSpec((1, tn), lambda i, j, k: (0, j)))
        inputs.append(jnp.asarray(bias, jnp.float32).reshape(1, N))

    scratch = [pltpu.VMEM((tm, tn), jnp.float32)] if multi_k else []

    cost = pl.CostEstimate(
        flops=2 * Mp * Kp * N,
        transcendentals=(Mp * N if act == ACT_TANH else 0),
        bytes_accessed=Mp * Kp * 2 + Kp * N * 2 + Mp * N * 4)

    out = pl.pallas_call(
        functools.partial(_mm_fused_kernel, act=act, multi_k=multi_k,
                          has_bias=has_bias),
        out_shape=jax.ShapeDtypeStruct((Mp, N), jnp.float32),
        grid_spec=pltpu.PrefetchScalarGridSpec(
            num_scalar_prefetch=0,
            grid=(nm, nn, nk),
            in_specs=in_specs,
            out_specs=pl.BlockSpec((tm, tn), lambda i, j, k: (i, j)),
            scratch_shapes=scratch),
        compiler_params=pltpu.CompilerParams(
            dimension_semantics=("parallel", "parallel", "arbitrary"),
            vmem_limit_bytes=32 * 1024 * 1024),
        cost_estimate=cost,
    )(*inputs)
    return out if Mp == M else out[:M]


# ----------------------------------------------------------------------------
# Conv / ConvTranspose built on the Pallas matmul (im2col glue in plain JAX)
# ----------------------------------------------------------------------------
def _im2col(x, kh, kw, stride, pad):
    # x: NHWC (bf16 to halve the duplicated-patch HBM traffic)
    N, H, W, C = x.shape
    xp = jnp.pad(x, ((0, 0), (pad, pad), (pad, pad), (0, 0)))
    Ho = (H + 2 * pad - kh) // stride + 1
    Wo = (W + 2 * pad - kw) // stride + 1
    cols = []
    for i in range(kh):
        for j in range(kw):
            cols.append(xp[:, i:i + stride * Ho:stride,
                           j:j + stride * Wo:stride, :])
    cols = jnp.concatenate(cols, axis=-1)          # (N, Ho, Wo, kh*kw*C)
    return cols.reshape(N * Ho * Wo, kh * kw * C), N, Ho, Wo


def conv2d_fused(x, w, stride, pad, scale, act, bias=None):
    # x: NHWC f32, w: (Cout, Cin, KH, KW) PyTorch layout, scale: (Cout,)
    Cout, Cin, KH, KW = w.shape
    cols, N, Ho, Wo = _im2col(x.astype(jnp.bfloat16), KH, KW, stride, pad)
    wmat = jnp.transpose(w, (2, 3, 1, 0)).reshape(KH * KW * Cin, Cout)
    wmat = (wmat * scale.reshape(1, Cout)).astype(jnp.bfloat16)  # fold BN scale
    out = pallas_matmul_fused(cols, wmat, act, bias=bias)
    return out.reshape(N, Ho, Wo, Cout)


def conv_transpose2d_fused(x, w_t, scale, act, bias=None):
    """ConvTranspose2d(k=4, s=2, p=1) via sub-pixel phase decomposition:
    one stride-1 3x3-window matmul with the four 2x2 phase kernels packed
    along the output-channel axis, then interleave into the 2x grid."""
    Cin, Cout, KH, KW = w_t.shape
    assert KH == 4 and KW == 4
    N, H, W, C = x.shape
    assert C == Cin
    # regular-conv view of the transposed weight
    w_conv = jnp.transpose(jnp.flip(w_t, (2, 3)), (1, 0, 2, 3))   # (Cout,Cin,4,4)
    # phase ry uses kernel rows p in {ry, ry+2}; tap p reads input offset dy-1
    # of the 3x3 window:  (ry, dy, p) in {(0,0,0),(0,1,2),(1,1,1),(1,2,3)}.
    tap = {0: ((0, 0), (1, 2)), 1: ((1, 1), (2, 3))}
    Wc = jnp.zeros((3, 3, Cin, 2, 2, Cout), jnp.float32)
    for ry in (0, 1):
        for dy, p in tap[ry]:
            for rx in (0, 1):
                for dx, q in tap[rx]:
                    Wc = Wc.at[dy, dx, :, ry, rx, :].set(w_conv[:, :, p, q].T)
    wmat = Wc.reshape(9 * Cin, 4 * Cout)
    scale4 = jnp.tile(scale.reshape(1, Cout), (1, 4))             # per-phase copy
    wmat = (wmat * scale4).astype(jnp.bfloat16)
    bias4 = None if bias is None else jnp.tile(bias.reshape(1, Cout), (1, 4))

    cols, Nb, Ho, Wo = _im2col(x.astype(jnp.bfloat16), 3, 3, 1, 1)  # Ho=H, Wo=W
    out = pallas_matmul_fused(cols, wmat, act, bias=bias4)          # (N*H*W, 4*Cout)
    out = out.reshape(Nb, H, W, 2, 2, Cout)
    out = jnp.transpose(out, (0, 1, 3, 2, 4, 5)).reshape(Nb, 2 * H, 2 * W, Cout)
    return out


# ----------------------------------------------------------------------------
# DepthNet parameters (deterministic init) and forward pass
# ----------------------------------------------------------------------------
def init_params(nc, nf, key):
    keys = iter(jax.random.split(key, 32))

    def w(shape):
        return jax.random.normal(next(keys), shape, jnp.float32) * 0.1

    params = {"start": w((nf, nc, 7, 7)), "down": [], "up": []}
    ch = nf
    down_ch = []
    for _ in range(DEPTH):
        params["down"].append(w((2 * ch, ch, 4, 4)))
        down_ch.append(ch)
        ch *= 2
    for d in range(DEPTH):
        nxt = ch // 2
        params["up"].append(w((ch, nxt, 4, 4)))          # ConvTranspose weight
        ch = nxt + down_ch[DEPTH - d - 1]
    params["end1"] = w((2 * nf, 5 * nf, 3, 3))
    params["end2"] = w((nf, 2 * nf, 3, 3))
    params["end3"] = w((1, nf, 3, 3))
    return params


def depthnet_forward(x_nchw, params, nf):
    ones = lambda c: jnp.ones((c,), jnp.float32)
    bns = lambda c: jnp.full((c,), BN_SCALE, jnp.float32)

    x = jnp.transpose(x_nchw, (0, 2, 3, 1))  # NCHW -> NHWC
    # startconv: Conv2d(nc, nf, 7, 1, 3) + LeakyReLU(0.2)
    x = conv2d_fused(x, params["start"], 1, 3, ones(nf), ACT_LEAKY)
    skips = []
    for d in range(DEPTH):
        skips.append(x)
        w = params["down"][d]
        # Conv2d(ch, 2ch, 4, 2, 1) + BN + LeakyReLU(0.2)
        x = conv2d_fused(x, w, 2, 1, bns(w.shape[0]), ACT_LEAKY)
    for d in range(DEPTH):
        w_t = params["up"][d]
        # ConvTranspose2d(ch, ch/2, 4, 2, 1) + BN + ReLU
        x = conv_transpose2d_fused(x, w_t, bns(w_t.shape[1]), ACT_RELU)
        # TODO(synk): fold this concat into the next conv's K reduction.
        x = jnp.concatenate([x, skips[DEPTH - d - 1]], axis=-1)
    x = conv2d_fused(x, params["end1"], 1, 1, bns(2 * nf), ACT_RELU)
    x = conv2d_fused(x, params["end2"], 1, 1, bns(nf), ACT_RELU)
    x = conv2d_fused(x, params["end3"], 1, 1, ones(1), ACT_TANH)
    return jnp.transpose(x, (0, 3, 1, 2))  # NHWC -> NCHW, (N, 1, H, W)


# ----------------------------------------------------------------------------
# Pure-JAX (lax.conv) reference with the same bf16-operand / f32-accumulate
# numerics as the Pallas kernel, for a tight correctness check.
# ----------------------------------------------------------------------------
def _ref_conv(x, w, stride, pad):
    return jax.lax.conv_general_dilated(
        x.astype(jnp.bfloat16), w.astype(jnp.bfloat16),
        (stride, stride), [(pad, pad), (pad, pad)],
        dimension_numbers=("NCHW", "OIHW", "NCHW"),
        preferred_element_type=jnp.float32)


def _ref_convT(x, w_t, stride, pad):
    KH = w_t.shape[2]
    w = jnp.transpose(jnp.flip(w_t, (2, 3)), (1, 0, 2, 3))
    p = KH - 1 - pad
    return jax.lax.conv_general_dilated(
        x.astype(jnp.bfloat16), w.astype(jnp.bfloat16),
        (1, 1), [(p, p), (p, p)], lhs_dilation=(stride, stride),
        dimension_numbers=("NCHW", "OIHW", "NCHW"),
        preferred_element_type=jnp.float32)


def depthnet_reference(x, params, nf):
    lrelu = lambda v: jnp.where(v >= 0.0, v, 0.2 * v)
    x = lrelu(_ref_conv(x, params["start"], 1, 3))
    skips = []
    for d in range(DEPTH):
        skips.append(x)
        x = lrelu(_ref_conv(x, params["down"][d] * BN_SCALE, 2, 1))
    for d in range(DEPTH):
        x = jax.nn.relu(_ref_convT(x, params["up"][d] * BN_SCALE, 2, 1))
        x = jnp.concatenate([x, skips[DEPTH - d - 1]], axis=1)
    x = jax.nn.relu(_ref_conv(x, params["end1"] * BN_SCALE, 1, 1))
    x = jax.nn.relu(_ref_conv(x, params["end2"] * BN_SCALE, 1, 1))
    x = jnp.tanh(_ref_conv(x, params["end3"], 1, 1))
    return x


# ----------------------------------------------------------------------------
if __name__ == "__main__":
    batch, nc, nf, H, W = 2, 3, 8, 16, 16  # H, W must be divisible by 2**DEPTH
    key = jax.random.PRNGKey(0)
    k_in, k_par = jax.random.split(key)
    x = jax.random.normal(k_in, (batch, nc, H, W), jnp.float32)  # NCHW input
    params = init_params(nc, nf, k_par)

    fwd = jax.jit(lambda inp: depthnet_forward(inp, params, nf))
    out = jax.block_until_ready(fwd(x))
    assert out.shape == (batch, 1, H, W), out.shape

    ref = jax.block_until_ready(
        jax.jit(lambda inp: depthnet_reference(inp, params, nf))(x))
    err = float(jnp.max(jnp.abs(out - ref)))
    assert err < 5e-3, err

    print("KERNEL_OK")
</pallas_src>

<mosaic_0001>
module attributes {stable_mosaic.version = 11 : i64} {
  func.func @_mm_fused_kernel(%arg0: i32, %arg1: i32, %arg2: i32, %arg3: memref<512x256xbf16, #tpu.memory_space<vmem>>, %arg4: memref<256x8xbf16, #tpu.memory_space<vmem>>, %arg5: memref<512x8xf32, #tpu.memory_space<vmem>>) attributes {dimension_semantics = [#tpu.dimension_semantics<parallel>, #tpu.dimension_semantics<parallel>, #tpu.dimension_semantics<arbitrary>], iteration_bounds = array<i64: 1, 1, 1>, scalar_prefetch = 0 : i64, scratch_operands = 0 : i64, tpu.core_type = #tpu.core_type<tc>, window_params = [{transform_indices = @transform_0, window_bounds = array<i64: 512, 256>}, {transform_indices = @transform_1, window_bounds = array<i64: 256, 8>}, {transform_indices = @transform_2, window_bounds = array<i64: 512, 8>}]} {
    %c0 = arith.constant 0 : index
    %c0_0 = arith.constant 0 : index
    %0 = vector.load %arg3[%c0, %c0_0] : memref<512x256xbf16, #tpu.memory_space<vmem>>, vector<512x256xbf16>
    %c0_1 = arith.constant 0 : index
    %c0_2 = arith.constant 0 : index
    %1 = vector.load %arg4[%c0_1, %c0_2] : memref<256x8xbf16, #tpu.memory_space<vmem>>, vector<256x8xbf16>
    %cst = arith.constant dense<0.000000e+00> : vector<512x8xf32>
    %2 = tpu.matmul %0, %1, %cst {dimension_numbers = #tpu.dot_dimension_numbers<[1], [0], [0], [1], [0, 0, 1, 1], [], []>} : vector<512x256xbf16>, vector<256x8xbf16>, vector<512x8xf32> -> vector<512x8xf32>
    %cst_3 = arith.constant 0.000000e+00 : f32
    %3 = vector.broadcast %cst_3 : f32 to vector<512x8xf32>
    %4 = arith.cmpf oge, %2, %3 : vector<512x8xf32>
    %cst_4 = arith.constant 2.000000e-01 : f32
    %5 = vector.broadcast %cst_4 : f32 to vector<512x8xf32>
    %6 = arith.mulf %5, %2 : vector<512x8xf32>
    %7 = arith.select %4, %2, %6 : vector<512x8xi1>, vector<512x8xf32>
    %c0_5 = arith.constant 0 : index
    %c0_6 = arith.constant 0 : index
    %8 = vector.load %arg5[%c0_5, %c0_6] : memref<512x8xf32, #tpu.memory_space<vmem>>, vector<512x8xf32>
    tpu.vector_store %arg5[%c0_5, %c0_6], %7 {strides = array<i32>} : memref<512x8xf32, #tpu.memory_space<vmem>>, vector<512x8xf32>,
    return
  }
  func.func @transform_0(%arg0: i32, %arg1: i32, %arg2: i32) -> (i32, i32) {
    %c0_i32 = arith.constant 0 : i32
    return %arg0, %arg2 : i32, i32
  }
  func.func @transform_1(%arg0: i32, %arg1: i32, %arg2: i32) -> (i32, i32) {
    %c0_i32 = arith.constant 0 : i32
    return %arg2, %arg1 : i32, i32
  }
  func.func @transform_2(%arg0: i32, %arg1: i32, %arg2: i32) -> (i32, i32) {
    %c0_i32 = arith.constant 0 : i32
    return %arg0, %arg1 : i32, i32
  }
}

module attributes {stable_mosaic.version = 11 : i64} {
  func.func @_mm_fused_kernel(%arg0: i32, %arg1: i32, %arg2: i32, %arg3: memref<128x128xbf16, #tpu.memory_space<vmem>>, %arg4: memref<128x16xbf16, #tpu.memory_space<vmem>>, %arg5: memref<128x16xf32, #tpu.memory_space<vmem>>) attributes {dimension_semantics = [#tpu.dimension_semantics<parallel>, #tpu.dimension_semantics<parallel>, #tpu.dimension_semantics<arbitrary>], iteration_bounds = array<i64: 1, 1, 1>, scalar_prefetch = 0 : i64, scratch_operands = 0 : i64, tpu.core_type = #tpu.core_type<tc>, window_params = [{transform_indices = @transform_0, window_bounds = array<i64: 128, 128>}, {transform_indices = @transform_1, window_bounds = array<i64: 128, 16>}, {transform_indices = @transform_2, window_bounds = array<i64: 128, 16>}]} {
    %c0 = arith.constant 0 : index
    %c0_0 = arith.constant 0 : index
    %0 = vector.load %arg3[%c0, %c0_0] : memref<128x128xbf16, #tpu.memory_space<vmem>>, vector<128x128xbf16>
    %c0_1 = arith.constant 0 : index
    %c0_2 = arith.constant 0 : index
    %1 = vector.load %arg4[%c0_1, %c0_2] : memref<128x16xbf16, #tpu.memory_space<vmem>>, vector<128x16xbf16>
    %cst = arith.constant dense<0.000000e+00> : vector<128x16xf32>
    %2 = tpu.matmul %0, %1, %cst {dimension_numbers = #tpu.dot_dimension_numbers<[1], [0], [0], [1], [0, 0, 1, 1], [], []>} : vector<128x128xbf16>, vector<128x16xbf16>, vector<128x16xf32> -> vector<128x16xf32>
    %cst_3 = arith.constant 0.000000e+00 : f32
    %3 = vector.broadcast %cst_3 : f32 to vector<128x16xf32>
    %4 = arith.cmpf oge, %2, %3 : vector<128x16xf32>
    %cst_4 = arith.constant 2.000000e-01 : f32
    %5 = vector.broadcast %cst_4 : f32 to vector<128x16xf32>
    %6 = arith.mulf %5, %2 : vector<128x16xf32>
    %7 = arith.select %4, %2, %6 : vector<128x16xi1>, vector<128x16xf32>
    %c0_5 = arith.constant 0 : index
    %c0_6 = arith.constant 0 : index
    %8 = vector.load %arg5[%c0_5, %c0_6] : memref<128x16xf32, #tpu.memory_space<vmem>>, vector<128x16xf32>
    tpu.vector_store %arg5[%c0_5, %c0_6], %7 {strides = array<i32>} : memref<128x16xf32, #tpu.memory_space<vmem>>, vector<128x16xf32>,
    return
  }
  func.func @transform_0(%arg0: i32, %arg1: i32, %arg2: i32) -> (i32, i32) {
    %c0_i32 = arith.constant 0 : i32
    return %arg0, %arg2 : i32, i32
  }
  func.func @transform_1(%arg0: i32, %arg1: i32, %arg2: i32) -> (i32, i32) {
    %c0_i32 = arith.constant 0 : i32
    return %arg2, %arg1 : i32, i32
  }
  func.func @transform_2(%arg0: i32, %arg1: i32, %arg2: i32) -> (i32, i32) {
    %c0_i32 = arith.constant 0 : i32
    return %arg0, %arg1 : i32, i32
  }
}

module attributes {stable_mosaic.version = 11 : i64} {
  func.func @_mm_fused_kernel(%arg0: i32, %arg1: i32, %arg2: i32, %arg3: memref<32x256xbf16, #tpu.memory_space<vmem>>, %arg4: memref<256x32xbf16, #tpu.memory_space<vmem>>, %arg5: memref<32x32xf32, #tpu.memory_space<vmem>>) attributes {dimension_semantics = [#tpu.dimension_semantics<parallel>, #tpu.dimension_semantics<parallel>, #tpu.dimension_semantics<arbitrary>], iteration_bounds = array<i64: 1, 1, 1>, scalar_prefetch = 0 : i64, scratch_operands = 0 : i64, tpu.core_type = #tpu.core_type<tc>, window_params = [{transform_indices = @transform_0, window_bounds = array<i64: 32, 256>}, {transform_indices = @transform_1, window_bounds = array<i64: 256, 32>}, {transform_indices = @transform_2, window_bounds = array<i64: 32, 32>}]} {
    %c0 = arith.constant 0 : index
    %c0_0 = arith.constant 0 : index
    %0 = vector.load %arg3[%c0, %c0_0] : memref<32x256xbf16, #tpu.memory_space<vmem>>, vector<32x256xbf16>
    %c0_1 = arith.constant 0 : index
    %c0_2 = arith.constant 0 : index
    %1 = vector.load %arg4[%c0_1, %c0_2] : memref<256x32xbf16, #tpu.memory_space<vmem>>, vector<256x32xbf16>
    %cst = arith.constant dense<0.000000e+00> : vector<32x32xf32>
    %2 = tpu.matmul %0, %1, %cst {dimension_numbers = #tpu.dot_dimension_numbers<[1], [0], [0], [1], [0, 0, 1, 1], [], []>} : vector<32x256xbf16>, vector<256x32xbf16>, vector<32x32xf32> -> vector<32x32xf32>
    %cst_3 = arith.constant 0.000000e+00 : f32
    %3 = vector.broadcast %cst_3 : f32 to vector<32x32xf32>
    %4 = arith.cmpf oge, %2, %3 : vector<32x32xf32>
    %cst_4 = arith.constant 2.000000e-01 : f32
    %5 = vector.broadcast %cst_4 : f32 to vector<32x32xf32>
    %6 = arith.mulf %5, %2 : vector<32x32xf32>
    %7 = arith.select %4, %2, %6 : vector<32x32xi1>, vector<32x32xf32>
    %c0_5 = arith.constant 0 : index
    %c0_6 = arith.constant 0 : index
    %8 = vector.load %arg5[%c0_5, %c0_6] : memref<32x32xf32, #tpu.memory_space<vmem>>, vector<32x32xf32>
    tpu.vector_store %arg5[%c0_5, %c0_6], %7 {strides = array<i32>} : memref<32x32xf32, #tpu.memory_space<vmem>>, vector<32x32xf32>,
    return
  }
  func.func @transform_0(%arg0: i32, %arg1: i32, %arg2: i32) -> (i32, i32) {
    %c0_i32 = arith.constant 0 : i32
    return %arg0, %arg2 : i32, i32
  }
  func.func @transform_1(%arg0: i32, %arg1: i32, %arg2: i32) -> (i32, i32) {
    %c0_i32 = arith.constant 0 : i32
    return %arg2, %arg1 : i32, i32
  }
  func.func @transform_2(%arg0: i32, %arg1: i32, %arg2: i32) -> (i32, i32) {
    %c0_i32 = arith.constant 0 : i32
    return %arg0, %arg1 : i32, i32
  }
}

module attributes {stable_mosaic.version = 11 : i64} {
  func.func @_mm_fused_kernel(%arg0: i32, %arg1: i32, %arg2: i32, %arg3: memref<8x512xbf16, #tpu.memory_space<vmem>>, %arg4: memref<512x64xbf16, #tpu.memory_space<vmem>>, %arg5: memref<8x64xf32, #tpu.memory_space<vmem>>) attributes {dimension_semantics = [#tpu.dimension_semantics<parallel>, #tpu.dimension_semantics<parallel>, #tpu.dimension_semantics<arbitrary>], iteration_bounds = array<i64: 1, 1, 1>, scalar_prefetch = 0 : i64, scratch_operands = 0 : i64, tpu.core_type = #tpu.core_type<tc>, window_params = [{transform_indices = @transform_0, window_bounds = array<i64: 8, 512>}, {transform_indices = @transform_1, window_bounds = array<i64: 512, 64>}, {transform_indices = @transform_2, window_bounds = array<i64: 8, 64>}]} {
    %c0 = arith.constant 0 : index
    %c0_0 = arith.constant 0 : index
    %0 = vector.load %arg3[%c0, %c0_0] : memref<8x512xbf16, #tpu.memory_space<vmem>>, vector<8x512xbf16>
    %c0_1 = arith.constant 0 : index
    %c0_2 = arith.constant 0 : index
    %1 = vector.load %arg4[%c0_1, %c0_2] : memref<512x64xbf16, #tpu.memory_space<vmem>>, vector<512x64xbf16>
    %cst = arith.constant dense<0.000000e+00> : vector<8x64xf32>
    %2 = tpu.matmul %0, %1, %cst {dimension_numbers = #tpu.dot_dimension_numbers<[1], [0], [0], [1], [0, 0, 1, 1], [], []>} : vector<8x512xbf16>, vector<512x64xbf16>, vector<8x64xf32> -> vector<8x64xf32>
    %cst_3 = arith.constant 0.000000e+00 : f32
    %3 = vector.broadcast %cst_3 : f32 to vector<8x64xf32>
    %4 = arith.cmpf oge, %2, %3 : vector<8x64xf32>
    %cst_4 = arith.constant 2.000000e-01 : f32
    %5 = vector.broadcast %cst_4 : f32 to vector<8x64xf32>
    %6 = arith.mulf %5, %2 : vector<8x64xf32>
    %7 = arith.select %4, %2, %6 : vector<8x64xi1>, vector<8x64xf32>
    %c0_5 = arith.constant 0 : index
    %c0_6 = arith.constant 0 : index
    %8 = vector.load %arg5[%c0_5, %c0_6] : memref<8x64xf32, #tpu.memory_space<vmem>>, vector<8x64xf32>
    tpu.vector_store %arg5[%c0_5, %c0_6], %7 {strides = array<i32>} : memref<8x64xf32, #tpu.memory_space<vmem>>, vector<8x64xf32>,
    return
  }
  func.func @transform_0(%arg0: i32, %arg1: i32, %arg2: i32) -> (i32, i32) {
    %c0_i32 = arith.constant 0 : i32
    return %arg0, %arg2 : i32, i32
  }
  func.func @transform_1(%arg0: i32, %arg1: i32, %arg2: i32) -> (i32, i32) {
    %c0_i32 = arith.constant 0 : i32
    return %arg2, %arg1 : i32, i32
  }
  func.func @transform_2(%arg0: i32, %arg1: i32, %arg2: i32) -> (i32, i32) {
    %c0_i32 = arith.constant 0 : i32
    return %arg0, %arg1 : i32, i32
  }
}

module attributes {stable_mosaic.version = 11 : i64} {
  func.func @_mm_fused_kernel(%arg0: i32, %arg1: i32, %arg2: i32, %arg3: memref<2x1024xbf16, #tpu.memory_space<vmem>>, %arg4: memref<1024x128xbf16, #tpu.memory_space<vmem>>, %arg5: memref<2x128xf32, #tpu.memory_space<vmem>>) attributes {dimension_semantics = [#tpu.dimension_semantics<parallel>, #tpu.dimension_semantics<parallel>, #tpu.dimension_semantics<arbitrary>], iteration_bounds = array<i64: 1, 1, 1>, scalar_prefetch = 0 : i64, scratch_operands = 0 : i64, tpu.core_type = #tpu.core_type<tc>, window_params = [{transform_indices = @transform_0, window_bounds = array<i64: 2, 1024>}, {transform_indices = @transform_1, window_bounds = array<i64: 1024, 128>}, {transform_indices = @transform_2, window_bounds = array<i64: 2, 128>}]} {
    %c0 = arith.constant 0 : index
    %c0_0 = arith.constant 0 : index
    %0 = vector.load %arg3[%c0, %c0_0] : memref<2x1024xbf16, #tpu.memory_space<vmem>>, vector<2x1024xbf16>
    %c0_1 = arith.constant 0 : index
    %c0_2 = arith.constant 0 : index
    %1 = vector.load %arg4[%c0_1, %c0_2] : memref<1024x128xbf16, #tpu.memory_space<vmem>>, vector<1024x128xbf16>
    %cst = arith.constant dense<0.000000e+00> : vector<2x128xf32>
    %2 = tpu.matmul %0, %1, %cst {dimension_numbers = #tpu.dot_dimension_numbers<[1], [0], [0], [1], [0, 0, 1, 1], [], []>} : vector<2x1024xbf16>, vector<1024x128xbf16>, vector<2x128xf32> -> vector<2x128xf32>
    %cst_3 = arith.constant 0.000000e+00 : f32
    %3 = vector.broadcast %cst_3 : f32 to vector<2x128xf32>
    %4 = arith.cmpf oge, %2, %3 : vector<2x128xf32>
    %cst_4 = arith.constant 2.000000e-01 : f32
    %5 = vector.broadcast %cst_4 : f32 to vector<2x128xf32>
    %6 = arith.mulf %5, %2 : vector<2x128xf32>
    %7 = arith.select %4, %2, %6 : vector<2x128xi1>, vector<2x128xf32>
    %c0_5 = arith.constant 0 : index
    %c0_6 = arith.constant 0 : index
    %8 = vector.load %arg5[%c0_5, %c0_6] : memref<2x128xf32, #tpu.memory_space<vmem>>, vector<2x128xf32>
    tpu.vector_store %arg5[%c0_5, %c0_6], %7 {strides = array<i32>} : memref<2x128xf32, #tpu.memory_space<vmem>>, vector<2x128xf32>,
    return
  }
  func.func @transform_0(%arg0: i32, %arg1: i32, %arg2: i32) -> (i32, i32) {
    %c0_i32 = arith.constant 0 : i32
    return %arg0, %arg2 : i32, i32
  }
  func.func @transform_1(%arg0: i32, %arg1: i32, %arg2: i32) -> (i32, i32) {
    %c0_i32 = arith.constant 0 : i32
    return %arg2, %arg1 : i32, i32
  }
  func.func @transform_2(%arg0: i32, %arg1: i32, %arg2: i32) -> (i32, i32) {
    %c0_i32 = arith.constant 0 : i32
    return %arg0, %arg1 : i32, i32
  }
}

module attributes {stable_mosaic.version = 11 : i64} {
  func.func @_mm_fused_kernel(%arg0: i32, %arg1: i32, %arg2: i32, %arg3: memref<2x1152xbf16, #tpu.memory_space<vmem>>, %arg4: memref<1152x256xbf16, #tpu.memory_space<vmem>>, %arg5: memref<2x256xf32, #tpu.memory_space<vmem>>) attributes {dimension_semantics = [#tpu.dimension_semantics<parallel>, #tpu.dimension_semantics<parallel>, #tpu.dimension_semantics<arbitrary>], iteration_bounds = array<i64: 1, 1, 1>, scalar_prefetch = 0 : i64, scratch_operands = 0 : i64, tpu.core_type = #tpu.core_type<tc>, window_params = [{transform_indices = @transform_0, window_bounds = array<i64: 2, 1152>}, {transform_indices = @transform_1, window_bounds = array<i64: 1152, 256>}, {transform_indices = @transform_2, window_bounds = array<i64: 2, 256>}]} {
    %c0 = arith.constant 0 : index
    %c0_0 = arith.constant 0 : index
    %0 = vector.load %arg3[%c0, %c0_0] : memref<2x1152xbf16, #tpu.memory_space<vmem>>, vector<2x1152xbf16>
    %c0_1 = arith.constant 0 : index
    %c0_2 = arith.constant 0 : index
    %1 = vector.load %arg4[%c0_1, %c0_2] : memref<1152x256xbf16, #tpu.memory_space<vmem>>, vector<1152x256xbf16>
    %cst = arith.constant dense<0.000000e+00> : vector<2x256xf32>
    %2 = tpu.matmul %0, %1, %cst {dimension_numbers = #tpu.dot_dimension_numbers<[1], [0], [0], [1], [0, 0, 1, 1], [], []>} : vector<2x1152xbf16>, vector<1152x256xbf16>, vector<2x256xf32> -> vector<2x256xf32>
    %cst_3 = arith.constant 0.000000e+00 : f32
    %3 = vector.broadcast %cst_3 : f32 to vector<2x256xf32>
    %4 = arith.maximumf %2, %3 : vector<2x256xf32>
    %c0_4 = arith.constant 0 : index
    %c0_5 = arith.constant 0 : index
    %5 = vector.load %arg5[%c0_4, %c0_5] : memref<2x256xf32, #tpu.memory_space<vmem>>, vector<2x256xf32>
    tpu.vector_store %arg5[%c0_4, %c0_5], %4 {strides = array<i32>} : memref<2x256xf32, #tpu.memory_space<vmem>>, vector<2x256xf32>,
    return
  }
  func.func @transform_0(%arg0: i32, %arg1: i32, %arg2: i32) -> (i32, i32) {
    %c0_i32 = arith.constant 0 : i32
    return %arg0, %arg2 : i32, i32
  }
  func.func @transform_1(%arg0: i32, %arg1: i32, %arg2: i32) -> (i32, i32) {
    %c0_i32 = arith.constant 0 : i32
    return %arg2, %arg1 : i32, i32
  }
  func.func @transform_2(%arg0: i32, %arg1: i32, %arg2: i32) -> (i32, i32) {
    %c0_i32 = arith.constant 0 : i32
    return %arg0, %arg1 : i32, i32
  }
}

module attributes {stable_mosaic.version = 11 : i64} {
  func.func @_mm_fused_kernel(%arg0: i32, %arg1: i32, %arg2: i32, %arg3: memref<8x1152xbf16, #tpu.memory_space<vmem>>, %arg4: memref<1152x256xbf16, #tpu.memory_space<vmem>>, %arg5: memref<8x256xf32, #tpu.memory_space<vmem>>) attributes {dimension_semantics = [#tpu.dimension_semantics<parallel>, #tpu.dimension_semantics<parallel>, #tpu.dimension_semantics<arbitrary>], iteration_bounds = array<i64: 1, 1, 1>, scalar_prefetch = 0 : i64, scratch_operands = 0 : i64, tpu.core_type = #tpu.core_type<tc>, window_params = [{transform_indices = @transform_0, window_bounds = array<i64: 8, 1152>}, {transform_indices = @transform_1, window_bounds = array<i64: 1152, 256>}, {transform_indices = @transform_2, window_bounds = array<i64: 8, 256>}]} {
    %c0 = arith.constant 0 : index
    %c0_0 = arith.constant 0 : index
    %0 = vector.load %arg3[%c0, %c0_0] : memref<8x1152xbf16, #tpu.memory_space<vmem>>, vector<8x1152xbf16>
    %c0_1 = arith.constant 0 : index
    %c0_2 = arith.constant 0 : index
    %1 = vector.load %arg4[%c0_1, %c0_2] : memref<1152x256xbf16, #tpu.memory_space<vmem>>, vector<1152x256xbf16>
    %cst = arith.constant dense<0.000000e+00> : vector<8x256xf32>
    %2 = tpu.matmul %0, %1, %cst {dimension_numbers = #tpu.dot_dimension_numbers<[1], [0], [0], [1], [0, 0, 1, 1], [], []>} : vector<8x1152xbf16>, vector<1152x256xbf16>, vector<8x256xf32> -> vector<8x256xf32>
    %cst_3 = arith.constant 0.000000e+00 : f32
    %3 = vector.broadcast %cst_3 : f32 to vector<8x256xf32>
    %4 = arith.maximumf %2, %3 : vector<8x256xf32>
    %c0_4 = arith.constant 0 : index
    %c0_5 = arith.constant 0 : index
    %5 = vector.load %arg5[%c0_4, %c0_5] : memref<8x256xf32, #tpu.memory_space<vmem>>, vector<8x256xf32>
    tpu.vector_store %arg5[%c0_4, %c0_5], %4 {strides = array<i32>} : memref<8x256xf32, #tpu.memory_space<vmem>>, vector<8x256xf32>,
    return
  }
  func.func @transform_0(%arg0: i32, %arg1: i32, %arg2: i32) -> (i32, i32) {
    %c0_i32 = arith.constant 0 : i32
    return %arg0, %arg2 : i32, i32
  }
  func.func @transform_1(%arg0: i32, %arg1: i32, %arg2: i32) -> (i32, i32) {
    %c0_i32 = arith.constant 0 : i32
    return %arg2, %arg1 : i32, i32
  }
  func.func @transform_2(%arg0: i32, %arg1: i32, %arg2: i32) -> (i32, i32) {
    %c0_i32 = arith.constant 0 : i32
    return %arg0, %arg1 : i32, i32
  }
}

module attributes {stable_mosaic.version = 11 : i64} {
  func.func @_mm_fused_kernel(%arg0: i32, %arg1: i32, %arg2: i32, %arg3: memref<32x896xbf16, #tpu.memory_space<vmem>>, %arg4: memref<896x192xbf16, #tpu.memory_space<vmem>>, %arg5: memref<32x192xf32, #tpu.memory_space<vmem>>) attributes {dimension_semantics = [#tpu.dimension_semantics<parallel>, #tpu.dimension_semantics<parallel>, #tpu.dimension_semantics<arbitrary>], iteration_bounds = array<i64: 1, 1, 1>, scalar_prefetch = 0 : i64, scratch_operands = 0 : i64, tpu.core_type = #tpu.core_type<tc>, window_params = [{transform_indices = @transform_0, window_bounds = array<i64: 32, 896>}, {transform_indices = @transform_1, window_bounds = array<i64: 896, 192>}, {transform_indices = @transform_2, window_bounds = array<i64: 32, 192>}]} {
    %c0 = arith.constant 0 : index
    %c0_0 = arith.constant 0 : index
    %0 = vector.load %arg3[%c0, %c0_0] : memref<32x896xbf16, #tpu.memory_space<vmem>>, vector<32x896xbf16>
    %c0_1 = arith.constant 0 : index
    %c0_2 = arith.constant 0 : index
    %1 = vector.load %arg4[%c0_1, %c0_2] : memref<896x192xbf16, #tpu.memory_space<vmem>>, vector<896x192xbf16>
    %cst = arith.constant dense<0.000000e+00> : vector<32x192xf32>
    %2 = tpu.matmul %0, %1, %cst {dimension_numbers = #tpu.dot_dimension_numbers<[1], [0], [0], [1], [0, 0, 1, 1], [], []>} : vector<32x896xbf16>, vector<896x192xbf16>, vector<32x192xf32> -> vector<32x192xf32>
    %cst_3 = arith.constant 0.000000e+00 : f32
    %3 = vector.broadcast %cst_3 : f32 to vector<32x192xf32>
    %4 = arith.maximumf %2, %3 : vector<32x192xf32>
    %c0_4 = arith.constant 0 : index
    %c0_5 = arith.constant 0 : index
    %5 = vector.load %arg5[%c0_4, %c0_5] : memref<32x192xf32, #tpu.memory_space<vmem>>, vector<32x192xf32>
    tpu.vector_store %arg5[%c0_4, %c0_5], %4 {strides = array<i32>} : memref<32x192xf32, #tpu.memory_space<vmem>>, vector<32x192xf32>,
    return
  }
  func.func @transform_0(%arg0: i32, %arg1: i32, %arg2: i32) -> (i32, i32) {
    %c0_i32 = arith.constant 0 : i32
    return %arg0, %arg2 : i32, i32
  }
  func.func @transform_1(%arg0: i32, %arg1: i32, %arg2: i32) -> (i32, i32) {
    %c0_i32 = arith.constant 0 : i32
    return %arg2, %arg1 : i32, i32
  }
  func.func @transform_2(%arg0: i32, %arg1: i32, %arg2: i32) -> (i32, i32) {
    %c0_i32 = arith.constant 0 : i32
    return %arg0, %arg1 : i32, i32
  }
}

module attributes {stable_mosaic.version = 11 : i64} {
  func.func @_mm_fused_kernel(%arg0: i32, %arg1: i32, %arg2: i32, %arg3: memref<128x640xbf16, #tpu.memory_space<vmem>>, %arg4: memref<640x128xbf16, #tpu.memory_space<vmem>>, %arg5: memref<128x128xf32, #tpu.memory_space<vmem>>) attributes {dimension_semantics = [#tpu.dimension_semantics<parallel>, #tpu.dimension_semantics<parallel>, #tpu.dimension_semantics<arbitrary>], iteration_bounds = array<i64: 1, 1, 1>, scalar_prefetch = 0 : i64, scratch_operands = 0 : i64, tpu.core_type = #tpu.core_type<tc>, window_params = [{transform_indices = @transform_0, window_bounds = array<i64: 128, 640>}, {transform_indices = @transform_1, window_bounds = array<i64: 640, 128>}, {transform_indices = @transform_2, window_bounds = array<i64: 128, 128>}]} {
    %c0 = arith.constant 0 : index
    %c0_0 = arith.constant 0 : index
    %0 = vector.load %arg3[%c0, %c0_0] : memref<128x640xbf16, #tpu.memory_space<vmem>>, vector<128x640xbf16>
    %c0_1 = arith.constant 0 : index
    %c0_2 = arith.constant 0 : index
    %1 = vector.load %arg4[%c0_1, %c0_2] : memref<640x128xbf16, #tpu.memory_space<vmem>>, vector<640x128xbf16>
    %cst = arith.constant dense<0.000000e+00> : vector<128x128xf32>
    %2 = tpu.matmul %0, %1, %cst {dimension_numbers = #tpu.dot_dimension_numbers<[1], [0], [0], [1], [0, 0, 1, 1], [], []>} : vector<128x640xbf16>, vector<640x128xbf16>, vector<128x128xf32> -> vector<128x128xf32>
    %cst_3 = arith.constant 0.000000e+00 : f32
    %3 = vector.broadcast %cst_3 : f32 to vector<128x128xf32>
    %4 = arith.maximumf %2, %3 : vector<128x128xf32>
    %c0_4 = arith.constant 0 : index
    %c0_5 = arith.constant 0 : index
    %5 = vector.load %arg5[%c0_4, %c0_5] : memref<128x128xf32, #tpu.memory_space<vmem>>, vector<128x128xf32>
    tpu.vector_store %arg5[%c0_4, %c0_5], %4 {strides = array<i32>} : memref<128x128xf32, #tpu.memory_space<vmem>>, vector<128x128xf32>,
    return
  }
  func.func @transform_0(%arg0: i32, %arg1: i32, %arg2: i32) -> (i32, i32) {
    %c0_i32 = arith.constant 0 : i32
    return %arg0, %arg2 : i32, i32
  }
  func.func @transform_1(%arg0: i32, %arg1: i32, %arg2: i32) -> (i32, i32) {
    %c0_i32 = arith.constant 0 : i32
    return %arg2, %arg1 : i32, i32
  }
  func.func @transform_2(%arg0: i32, %arg1: i32, %arg2: i32) -> (i32, i32) {
    %c0_i32 = arith.constant 0 : i32
    return %arg0, %arg1 : i32, i32
  }
}

module attributes {stable_mosaic.version = 11 : i64} {
  func.func @_mm_fused_kernel(%arg0: i32, %arg1: i32, %arg2: i32, %arg3: memref<512x384xbf16, #tpu.memory_space<vmem>>, %arg4: memref<384x16xbf16, #tpu.memory_space<vmem>>, %arg5: memref<512x16xf32, #tpu.memory_space<vmem>>) attributes {dimension_semantics = [#tpu.dimension_semantics<parallel>, #tpu.dimension_semantics<parallel>, #tpu.dimension_semantics<arbitrary>], iteration_bounds = array<i64: 1, 1, 1>, scalar_prefetch = 0 : i64, scratch_operands = 0 : i64, tpu.core_type = #tpu.core_type<tc>, window_params = [{transform_indices = @transform_0, window_bounds = array<i64: 512, 384>}, {transform_indices = @transform_1, window_bounds = array<i64: 384, 16>}, {transform_indices = @transform_2, window_bounds = array<i64: 512, 16>}]} {
    %c0 = arith.constant 0 : index
    %c0_0 = arith.constant 0 : index
    %0 = vector.load %arg3[%c0, %c0_0] : memref<512x384xbf16, #tpu.memory_space<vmem>>, vector<512x384xbf16>
    %c0_1 = arith.constant 0 : index
    %c0_2 = arith.constant 0 : index
    %1 = vector.load %arg4[%c0_1, %c0_2] : memref<384x16xbf16, #tpu.memory_space<vmem>>, vector<384x16xbf16>
    %cst = arith.constant dense<0.000000e+00> : vector<512x16xf32>
    %2 = tpu.matmul %0, %1, %cst {dimension_numbers = #tpu.dot_dimension_numbers<[1], [0], [0], [1], [0, 0, 1, 1], [], []>} : vector<512x384xbf16>, vector<384x16xbf16>, vector<512x16xf32> -> vector<512x16xf32>
    %cst_3 = arith.constant 0.000000e+00 : f32
    %3 = vector.broadcast %cst_3 : f32 to vector<512x16xf32>
    %4 = arith.maximumf %2, %3 : vector<512x16xf32>
    %c0_4 = arith.constant 0 : index
    %c0_5 = arith.constant 0 : index
    %5 = vector.load %arg5[%c0_4, %c0_5] : memref<512x16xf32, #tpu.memory_space<vmem>>, vector<512x16xf32>
    tpu.vector_store %arg5[%c0_4, %c0_5], %4 {strides = array<i32>} : memref<512x16xf32, #tpu.memory_space<vmem>>, vector<512x16xf32>,
    return
  }
  func.func @transform_0(%arg0: i32, %arg1: i32, %arg2: i32) -> (i32, i32) {
    %c0_i32 = arith.constant 0 : i32
    return %arg0, %arg2 : i32, i32
  }
  func.func @transform_1(%arg0: i32, %arg1: i32, %arg2: i32) -> (i32, i32) {
    %c0_i32 = arith.constant 0 : i32
    return %arg2, %arg1 : i32, i32
  }
  func.func @transform_2(%arg0: i32, %arg1: i32, %arg2: i32) -> (i32, i32) {
    %c0_i32 = arith.constant 0 : i32
    return %arg0, %arg1 : i32, i32
  }
}

module attributes {stable_mosaic.version = 11 : i64} {
  func.func @_mm_fused_kernel(%arg0: i32, %arg1: i32, %arg2: i32, %arg3: memref<512x256xbf16, #tpu.memory_space<vmem>>, %arg4: memref<256x8xbf16, #tpu.memory_space<vmem>>, %arg5: memref<512x8xf32, #tpu.memory_space<vmem>>) attributes {dimension_semantics = [#tpu.dimension_semantics<parallel>, #tpu.dimension_semantics<parallel>, #tpu.dimension_semantics<arbitrary>], iteration_bounds = array<i64: 1, 1, 1>, scalar_prefetch = 0 : i64, scratch_operands = 0 : i64, tpu.core_type = #tpu.core_type<tc>, window_params = [{transform_indices = @transform_0, window_bounds = array<i64: 512, 256>}, {transform_indices = @transform_1, window_bounds = array<i64: 256, 8>}, {transform_indices = @transform_2, window_bounds = array<i64: 512, 8>}]} {
    %c0 = arith.constant 0 : index
    %c0_0 = arith.constant 0 : index
    %0 = vector.load %arg3[%c0, %c0_0] : memref<512x256xbf16, #tpu.memory_space<vmem>>, vector<512x256xbf16>
    %c0_1 = arith.constant 0 : index
    %c0_2 = arith.constant 0 : index
    %1 = vector.load %arg4[%c0_1, %c0_2] : memref<256x8xbf16, #tpu.memory_space<vmem>>, vector<256x8xbf16>
    %cst = arith.constant dense<0.000000e+00> : vector<512x8xf32>
    %2 = tpu.matmul %0, %1, %cst {dimension_numbers = #tpu.dot_dimension_numbers<[1], [0], [0], [1], [0, 0, 1, 1], [], []>} : vector<512x256xbf16>, vector<256x8xbf16>, vector<512x8xf32> -> vector<512x8xf32>
    %cst_3 = arith.constant 0.000000e+00 : f32
    %3 = vector.broadcast %cst_3 : f32 to vector<512x8xf32>
    %4 = arith.maximumf %2, %3 : vector<512x8xf32>
    %c0_4 = arith.constant 0 : index
    %c0_5 = arith.constant 0 : index
    %5 = vector.load %arg5[%c0_4, %c0_5] : memref<512x8xf32, #tpu.memory_space<vmem>>, vector<512x8xf32>
    tpu.vector_store %arg5[%c0_4, %c0_5], %4 {strides = array<i32>} : memref<512x8xf32, #tpu.memory_space<vmem>>, vector<512x8xf32>,
    return
  }
  func.func @transform_0(%arg0: i32, %arg1: i32, %arg2: i32) -> (i32, i32) {
    %c0_i32 = arith.constant 0 : i32
    return %arg0, %arg2 : i32, i32
  }
  func.func @transform_1(%arg0: i32, %arg1: i32, %arg2: i32) -> (i32, i32) {
    %c0_i32 = arith.constant 0 : i32
    return %arg2, %arg1 : i32, i32
  }
  func.func @transform_2(%arg0: i32, %arg1: i32, %arg2: i32) -> (i32, i32) {
    %c0_i32 = arith.constant 0 : i32
    return %arg0, %arg1 : i32, i32
  }
}

module attributes {stable_mosaic.version = 11 : i64} {
  func.func @_mm_fused_kernel(%arg0: i32, %arg1: i32, %arg2: i32, %arg3: memref<512x128xbf16, #tpu.memory_space<vmem>>, %arg4: memref<128x1xbf16, #tpu.memory_space<vmem>>, %arg5: memref<512x1xf32, #tpu.memory_space<vmem>>) attributes {dimension_semantics = [#tpu.dimension_semantics<parallel>, #tpu.dimension_semantics<parallel>, #tpu.dimension_semantics<arbitrary>], iteration_bounds = array<i64: 1, 1, 1>, scalar_prefetch = 0 : i64, scratch_operands = 0 : i64, tpu.core_type = #tpu.core_type<tc>, window_params = [{transform_indices = @transform_0, window_bounds = array<i64: 512, 128>}, {transform_indices = @transform_1, window_bounds = array<i64: 128, 1>}, {transform_indices = @transform_2, window_bounds = array<i64: 512, 1>}]} {
    %c0 = arith.constant 0 : index
    %c0_0 = arith.constant 0 : index
    %0 = vector.load %arg3[%c0, %c0_0] : memref<512x128xbf16, #tpu.memory_space<vmem>>, vector<512x128xbf16>
    %c0_1 = arith.constant 0 : index
    %c0_2 = arith.constant 0 : index
    %1 = vector.load %arg4[%c0_1, %c0_2] : memref<128x1xbf16, #tpu.memory_space<vmem>>, vector<128x1xbf16>
    %cst = arith.constant dense<0.000000e+00> : vector<512x1xf32>
    %2 = tpu.matmul %0, %1, %cst {dimension_numbers = #tpu.dot_dimension_numbers<[1], [0], [0], [1], [0, 0, 1, 1], [], []>} : vector<512x128xbf16>, vector<128x1xbf16>, vector<512x1xf32> -> vector<512x1xf32>
    %3 = math.tanh %2 : vector<512x1xf32>
    %c0_3 = arith.constant 0 : index
    %c0_4 = arith.constant 0 : index
    %4 = vector.load %arg5[%c0_3, %c0_4] : memref<512x1xf32, #tpu.memory_space<vmem>>, vector<512x1xf32>
    tpu.vector_store %arg5[%c0_3, %c0_4], %3 {strides = array<i32>} : memref<512x1xf32, #tpu.memory_space<vmem>>, vector<512x1xf32>,
    return
  }
  func.func @transform_0(%arg0: i32, %arg1: i32, %arg2: i32) -> (i32, i32) {
    %c0_i32 = arith.constant 0 : i32
    return %arg0, %arg2 : i32, i32
  }
  func.func @transform_1(%arg0: i32, %arg1: i32, %arg2: i32) -> (i32, i32) {
    %c0_i32 = arith.constant 0 : i32
    return %arg2, %arg1 : i32, i32
  }
  func.func @transform_2(%arg0: i32, %arg1: i32, %arg2: i32) -> (i32, i32) {
    %c0_i32 = arith.constant 0 : i32
    return %arg0, %arg1 : i32, i32
  }
}

</mosaic_0001>

<bundles_post_ra>
// kernel: _lambda_.13
= control target key start
LH: loop header
LB: loop body
LE: loop exit
PB: predicated region body
PF: predicated region fallthrough
CT: control target
= control target key end

     0   :  { %vm285_vm0 = vcmask 130048   ;;  %s529_s1 = inlined_call_operand.vmem [shape: bf16[128,16], index: 1, kind: input, shape index: {}]   ;;  %s530_s0 = inlined_call_operand.vmem [shape: bf16[128,128], index: 0, kind: input, shape index: {}]   ;;  %s531_s2 = inlined_call_operand.vmem [shape: f32[128,16], index: 2, kind: output, shape index: {}]  }
   0x1   :  { %v386_v0 = vld [vmem:[%s529_s1 + $0x38] sm:$0xff]   ;;  %v387_v1 = vld [vmem:[%s529_s1 + $0x30] sm:$0xff]   ;;  %v388_v2 = vld [vmem:[%s529_s1 + $0x28] sm:$0xff]  }
   0x2   :  { %338 = vmatprep.subr.bf16.mxu0 %v386_v0  ;;  %370 = vmatprep.subr.bf16.mxu1 %v386_v0  ;;  %v389_v3 = vld [vmem:[%s529_s1 + $0x20] sm:$0xff]   ;;  %v390_v6 = vld [vmem:[%s529_s1 + $0x18] sm:$0xff]   ;;  %v391_v7 = vld [vmem:[%s529_s1 + $0x10] sm:$0xff]  }
   0x3   :  { %339 = vmatpush3.bf16.msra.mxu0 %v386_v0  ;;  %378 = vmatpush3.bf16.msra.mxu1 %v386_v0  ;;  %v394_v4 = vld [vmem:[%s530_s0] sm:$0xff]   ;;  %v392_v8 = vld [vmem:[%s529_s1 + $0x8] sm:$0xff]   ;;  %v398_v12 = vld [vmem:[%s530_s0 + $0x10] sm:$0xff]  }
   0x4   :  { %340 = vmatprep.subr.bf16.mxu0 %v387_v1  ;;  %371 = vmatprep.subr.bf16.mxu1 %v387_v1  ;;  %v395_v5 = vld [vmem:[%s530_s0 + $0x20] sm:$0xff]   ;;  %v396_v10 = vld [vmem:[%s530_s0 + $0x8] sm:$0xff]   ;;  %v399_v13 = vld [vmem:[%s530_s0 + $0x30] sm:$0xff]  }
   0x5   :  { %354 = vmatprep.mubr.bf16.mxu0 %v394_v4  ;;  %362 = vmatprep.mubr.bf16.mxu1 %v395_v5  ;;  %v393_v9 = vld [vmem:[%s529_s1] sm:$0xff]   ;;  %v397_v11 = vld [vmem:[%s530_s0 + $0x28] sm:$0xff]   ;;  %v400_v14 = vld [vmem:[%s530_s0 + $0x18] sm:$0xff]  }
   0x6   :  { %v401_v15 = vld [vmem:[%s530_s0 + $0x38] sm:$0xff]  }
   0x7   :  { %341 = vmatpush3.bf16.msra.mxu0 %v387_v1  ;;  %379 = vmatpush3.bf16.msra.mxu1 %v387_v1 }
   0x8   :  { %342 = vmatprep.subr.bf16.mxu0 %v388_v2  ;;  %372 = vmatprep.subr.bf16.mxu1 %v388_v2 }
   0xb   :  { %343 = vmatpush3.bf16.msra.mxu0 %v388_v2  ;;  %380 = vmatpush3.bf16.msra.mxu1 %v388_v2 }
   0xc   :  { %344 = vmatprep.subr.bf16.mxu0 %v389_v3  ;;  %373 = vmatprep.subr.bf16.mxu1 %v389_v3 }
   0xf   :  { %345 = vmatpush3.bf16.msra.mxu0 %v389_v3  ;;  %381 = vmatpush3.bf16.msra.mxu1 %v389_v3 }
  0x10   :  { %346 = vmatprep.subr.bf16.mxu0 %v390_v6  ;;  %374 = vmatprep.subr.bf16.mxu1 %v390_v6 }
  0x13   :  { %347 = vmatpush3.bf16.msra.mxu0 %v390_v6  ;;  %382 = vmatpush3.bf16.msra.mxu1 %v390_v6 }
  0x14   :  { %348 = vmatprep.subr.bf16.mxu0 %v391_v7  ;;  %375 = vmatprep.subr.bf16.mxu1 %v391_v7 }
  0x17   :  { %349 = vmatpush3.bf16.msra.mxu0 %v391_v7  ;;  %383 = vmatpush3.bf16.msra.mxu1 %v391_v7 }
  0x18   :  { %350 = vmatprep.subr.bf16.mxu0 %v392_v8  ;;  %376 = vmatprep.subr.bf16.mxu1 %v392_v8 }
  0x1b   :  { %351 = vmatpush3.bf16.msra.mxu0 %v392_v8  ;;  %384 = vmatpush3.bf16.msra.mxu1 %v392_v8 }
  0x1c   :  { %352 = vmatprep.subr.bf16.mxu0 %v393_v9  ;;  %377 = vmatprep.subr.bf16.mxu1 %v393_v9 }
  0x1f   :  { %353 = vmatpush3.bf16.msra.mxu0 %v393_v9  ;;  %385 = vmatpush3.bf16.msra.mxu1 %v393_v9 }
  0x22   :  { %355 = vmatmul.mubr.bf16.vlgmr.msra.gmra.mxu0 %v396_v10  ;;  %363 = vmatmul.mubr.bf16.vlgmr.msra.gmra.mxu1 %v397_v11 }
  0x23   :  { %358 = vmatprep.mubr.bf16.mxu0 %v398_v12  ;;  %366 = vmatprep.mubr.bf16.mxu1 %v399_v13 }
  0x2a   :  { %359 = vmatmul.mubr.bf16.gmra.mxu0 %v400_v14  ;;  %367 = vmatmul.mubr.bf16.gmra.mxu1 %v401_v15 }
  0xe2   :  { %v356_v16 = vpop.f32.mrf.mxu0  ;;  %v364_v17 = vpop.f32.mrf.mxu1 }
  0xe3   :  { %vm239_vm1 = vcmp.ge.f32.partialorder %v356_v16, 0.0  ;;  %v255_v18 = vmul.f32 0.2, %v356_v16  ;;  %vm247_vm2 = vcmp.ge.f32.partialorder %v364_v17, 0.0  ;;  %v263_v19 = vmul.f32 0.2, %v364_v17 }
  0xe4   :  { %v174_v20 = vpop.f32.mrf.mxu0  ;;  %v206_v21 = vpop.f32.mrf.mxu1 }
  0xe5   :  { %v271_v22 = vsel %vm239_vm1, %v356_v16, %v255_v18  ;;  %v279_v23 = vsel %vm247_vm2, %v364_v17, %v263_v19  ;;  %vm237_vm3 = vcmp.ge.f32.partialorder %v174_v20, 0.0  ;;  %v253_v24 = vmul.f32 0.2, %v174_v20 }
  0xe6   :  { %288 = vst.msk [vmem:[%s531_s2 + $0x10] sm:$0xff] %vm285_vm0, %v271_v22  ;;  %296 = vst.msk [vmem:[%s531_s2 + $0x50] sm:$0xff] %vm285_vm0, %v279_v23  ;;  %vm245_vm4 = vcmp.ge.f32.partialorder %v206_v21, 0.0  ;;  %v261_v25 = vmul.f32 0.2, %v206_v21  ;;  %v357_v26 = vpop.f32.mrf.mxu0  ;;  %v365_v27 = vpop.f32.mrf.mxu1 }
  0xe7   :  { %v269_v28 = vsel %vm237_vm3, %v174_v20, %v253_v24  ;;  %vm240_vm5 = vcmp.ge.f32.partialorder %v357_v26, 0.0  ;;  %v256_v29 = vmul.f32 0.2, %v357_v26  ;;  %vm248_vm6 = vcmp.ge.f32.partialorder %v365_v27, 0.0 }
  0xe8   :  { %286 = vst.msk [vmem:[%s531_s2] sm:$0xff] %vm285_vm0, %v269_v28  ;;  %v277_v30 = vsel %vm245_vm4, %v206_v21, %v261_v25  ;;  %v264_v31 = vmul.f32 0.2, %v365_v27  ;;  %v177_v32 = vpop.f32.mrf.mxu0  ;;  %v209_v33 = vpop.f32.mrf.mxu1 }
  0xe9   :  { %294 = vst.msk [vmem:[%s531_s2 + $0x40] sm:$0xff] %vm285_vm0, %v277_v30  ;;  %v272_v34 = vsel %vm240_vm5, %v357_v26, %v256_v29  ;;  %vm238_vm7 = vcmp.ge.f32.partialorder %v177_v32, 0.0  ;;  %v254_v35 = vmul.f32 0.2, %v177_v32  ;;  %vm246_vm8 = vcmp.ge.f32.partialorder %v209_v33, 0.0 }
  0xea   :  { %289 = vst.msk [vmem:[%s531_s2 + $0x18] sm:$0xff] %vm285_vm0, %v272_v34  ;;  %v280_v36 = vsel %vm248_vm6, %v365_v27, %v264_v31  ;;  %v262_v37 = vmul.f32 0.2, %v209_v33  ;;  %v360_v38 = vpop.f32.mrf.mxu0  ;;  %v368_v39 = vpop.f32.mrf.mxu1 }
  0xeb   :  { %297 = vst.msk [vmem:[%s531_s2 + $0x58] sm:$0xff] %vm285_vm0, %v280_v36  ;;  %v270_v40 = vsel %vm238_vm7, %v177_v32, %v254_v35  ;;  %vm243_vm9 = vcmp.ge.f32.partialorder %v360_v38, 0.0  ;;  %v259_v41 = vmul.f32 0.2, %v360_v38  ;;  %vm251_vm10 = vcmp.ge.f32.partialorder %v368_v39, 0.0 }
  0xec   :  { %287 = vst.msk [vmem:[%s531_s2 + $0x8] sm:$0xff] %vm285_vm0, %v270_v40  ;;  %v278_v42 = vsel %vm246_vm8, %v209_v33, %v262_v37  ;;  %v267_v43 = vmul.f32 0.2, %v368_v39  ;;  %v190_v44 = vpop.f32.mrf.mxu0  ;;  %v222_v45 = vpop.f32.mrf.mxu1 }
  0xed   :  { %295 = vst.msk [vmem:[%s531_s2 + $0x48] sm:$0xff] %vm285_vm0, %v278_v42  ;;  %v275_v46 = vsel %vm243_vm9, %v360_v38, %v259_v41  ;;  %vm241_vm11 = vcmp.ge.f32.partialorder %v190_v44, 0.0  ;;  %v257_v47 = vmul.f32 0.2, %v190_v44  ;;  %vm249_vm12 = vcmp.ge.f32.partialorder %v222_v45, 0.0 }
  0xee   :  { %292 = vst.msk [vmem:[%s531_s2 + $0x30] sm:$0xff] %vm285_vm0, %v275_v46  ;;  %v283_v48 = vsel %vm251_vm10, %v368_v39, %v267_v43  ;;  %v265_v49 = vmul.f32 0.2, %v222_v45  ;;  %v361_v50 = vpop.f32.mrf.mxu0  ;;  %v369_v51 = vpop.f32.mrf.mxu1 }
  0xef   :  { %300 = vst.msk [vmem:[%s531_s2 + $0x70] sm:$0xff] %vm285_vm0, %v283_v48  ;;  %v273_v52 = vsel %vm241_vm11, %v190_v44, %v257_v47  ;;  %vm244_vm13 = vcmp.ge.f32.partialorder %v361_v50, 0.0  ;;  %v260_v53 = vmul.f32 0.2, %v361_v50  ;;  %vm252_vm14 = vcmp.ge.f32.partialorder %v369_v51, 0.0 }
  0xf0   :  { %290 = vst.msk [vmem:[%s531_s2 + $0x20] sm:$0xff] %vm285_vm0, %v273_v52  ;;  %v281_v54 = vsel %vm249_vm12, %v222_v45, %v265_v49  ;;  %v268_v55 = vmul.f32 0.2, %v369_v51  ;;  %v193_v56 = vpop.f32.mrf.mxu0  ;;  %v225_v57 = vpop.f32.mrf.mxu1 }
  0xf1   :  { %298 = vst.msk [vmem:[%s531_s2 + $0x60] sm:$0xff] %vm285_vm0, %v281_v54  ;;  %v276_v58 = vsel %vm244_vm13, %v361_v50, %v260_v53  ;;  %vm242_vm15 = vcmp.ge.f32.partialorder %v193_v56, 0.0  ;;  %v258_v59 = vmul.f32 0.2, %v193_v56  ;;  %vm250_vm1 = vcmp.ge.f32.partialorder %v225_v57, 0.0 }
  0xf2   :  { %293 = vst.msk [vmem:[%s531_s2 + $0x38] sm:$0xff] %vm285_vm0, %v276_v58  ;;  %v284_v60 = vsel %vm252_vm14, %v369_v51, %v268_v55  ;;  %v266_v61 = vmul.f32 0.2, %v225_v57 }
  0xf3   :  { %301 = vst.msk [vmem:[%s531_s2 + $0x78] sm:$0xff] %vm285_vm0, %v284_v60  ;;  %v274_v62 = vsel %vm242_vm15, %v193_v56, %v258_v59 }
  0xf4   :  { %291 = vst.msk [vmem:[%s531_s2 + $0x28] sm:$0xff] %vm285_vm0, %v274_v62  ;;  %v282_v63 = vsel %vm250_vm1, %v225_v57, %v266_v61 }
  0xf5   :  { %299 = vst.msk [vmem:[%s531_s2 + $0x68] sm:$0xff] %vm285_vm0, %v282_v63 }

// kernel: _lambda_.12
= control target key start
LH: loop header
LB: loop body
LE: loop exit
PB: predicated region body
PF: predicated region fallthrough
CT: control target
= control target key end

     0   :  { %v1299_v0 = vmov 0   ;;  %vm1005_vm0 = vcmask 64512   ;;  %s1843_s1 = inlined_call_operand.vmem [shape: bf16[256,8], index: 1, kind: input, shape index: {}]   ;;  %s1844_s0 = inlined_call_operand.vmem [shape: bf16[512,256], index: 0, kind: input, shape index: {}]   ;;  %s1845_s2 = inlined_call_operand.vmem [shape: f32[512,8], index: 2, kind: output, shape index: {}]  }
   0x1   :  { %524 = vmatprep.subr.bf16.mxu0 %v1299_v0  ;;  %1154 = vmatprep.subr.bf16.mxu1 %v1299_v0  ;;  %v1187_v1 = vld [vmem:[%s1843_s1 + $0x38] sm:$0xff]   ;;  %v1188_v2 = vld [vmem:[%s1843_s1 + $0x30] sm:$0xff]   ;;  %v1189_v3 = vld [vmem:[%s1843_s1 + $0x28] sm:$0xff]  }
   0x2   :  { %525 = vmatpush1.bf16.msra.mxu0 %v1187_v1  ;;  %1170 = vmatpush1.bf16.msra.mxu1 %v1187_v1  ;;  %v1190_v4 = vld [vmem:[%s1843_s1 + $0x20] sm:$0xff]   ;;  %v1191_v5 = vld [vmem:[%s1843_s1 + $0x18] sm:$0xff]   ;;  %v1192_v7 = vld [vmem:[%s1843_s1 + $0x10] sm:$0xff]  }
   0x3   :  { %526 = vmatprep.subr.bf16.mxu0 %v1299_v0  ;;  %1155 = vmatprep.subr.bf16.mxu1 %v1299_v0  ;;  %v1205_v6 = vld [vmem:[%s1844_s0 + $0x4] ss:$8 sps:$4 sm:$0xff]   ;;  %v1195_v11 = vld [vmem:[%s1843_s1 + $0x78] sm:$0xff]   ;;  %v1196_v12 = vld [vmem:[%s1843_s1 + $0x70] sm:$0xff]  }
   0x4   :  { %v1208_v8 = vld [vmem:[%s1844_s0 + $0x104] ss:$8 sps:$4 sm:$0xff]   ;;  %556 = vmatprep.mubr.bf16.mxu0 %v1205_v6  ;;  %v1199_v15 = vld [vmem:[%s1843_s1 + $0x58] sm:$0xff]   ;;  %v1200_v16 = vld [vmem:[%s1843_s1 + $0x50] sm:$0xff]  }
   0x5   :  { %684 = vmatprep.mubr.bf16.mxu1 %v1208_v8  ;;  %v1193_v9 = vld [vmem:[%s1843_s1 + $0x8] sm:$0xff]   ;;  %v1194_v10 = vld [vmem:[%s1843_s1] sm:$0xff]   ;;  %v1209_v21 = vld [vmem:[%s1844_s0 + $0x14] ss:$8 sps:$4 sm:$0xff]  }
   0x6   :  { %527 = vmatpush1.bf16.msra.mxu0 %v1188_v2  ;;  %1171 = vmatpush1.bf16.msra.mxu1 %v1188_v2  ;;  %v1197_v13 = vld [vmem:[%s1843_s1 + $0x68] sm:$0xff]   ;;  %v1198_v14 = vld [vmem:[%s1843_s1 + $0x60] sm:$0xff]   ;;  %v1211_v22 = vld [vmem:[%s1844_s0 + $0x114] ss:$8 sps:$4 sm:$0xff]  }
   0x7   :  { %528 = vmatprep.subr.bf16.mxu0 %v1299_v0  ;;  %1156 = vmatprep.subr.bf16.mxu1 %v1299_v0  ;;  %v1201_v17 = vld [vmem:[%s1843_s1 + $0x48] sm:$0xff]   ;;  %v1202_v18 = vld [vmem:[%s1843_s1 + $0x40] sm:$0xff]   ;;  %v1213_v23 = vld [vmem:[%s1844_s0 + $0x10] ss:$8 sps:$4 sm:$0xff]  }
   0x8   :  { %v1203_v19 = vld [vmem:[%s1844_s0] ss:$8 sps:$4 sm:$0xff]   ;;  %v1214_v24 = vld [vmem:[%s1844_s0 + $0x110] ss:$8 sps:$4 sm:$0xff]   ;;  %v1215_v25 = vld [vmem:[%s1844_s0 + $0x24] ss:$8 sps:$4 sm:$0xff]  }
   0x9   :  { %v1206_v20 = vld [vmem:[%s1844_s0 + $0x100] ss:$8 sps:$4 sm:$0xff]   ;;  %v1217_v26 = vld [vmem:[%s1844_s0 + $0x124] ss:$8 sps:$4 sm:$0xff]   ;;  %v1221_v29 = vld [vmem:[%s1844_s0 + $0x34] ss:$8 sps:$4 sm:$0xff]  }
   0xa   :  { %529 = vmatpush1.bf16.msra.mxu0 %v1189_v3  ;;  %1172 = vmatpush1.bf16.msra.mxu1 %v1189_v3  ;;  %v1219_v27 = vld [vmem:[%s1844_s0 + $0x20] ss:$8 sps:$4 sm:$0xff]   ;;  %v1223_v30 = vld [vmem:[%s1844_s0 + $0x134] ss:$8 sps:$4 sm:$0xff]   ;;  %v1225_v31 = vld [vmem:[%s1844_s0 + $0x30] ss:$8 sps:$4 sm:$0xff]  }
   0xb   :  { %530 = vmatprep.subr.bf16.mxu0 %v1299_v0  ;;  %1157 = vmatprep.subr.bf16.mxu1 %v1299_v0  ;;  %v1220_v28 = vld [vmem:[%s1844_s0 + $0x120] ss:$8 sps:$4 sm:$0xff]   ;;  %v1226_v32 = vld [vmem:[%s1844_s0 + $0x130] ss:$8 sps:$4 sm:$0xff]   ;;  %v1227_v33 = vld [vmem:[%s1844_s0 + $0x44] ss:$8 sps:$4 sm:$0xff]  }
   0xc   :  { %v1229_v34 = vld [vmem:[%s1844_s0 + $0x144] ss:$8 sps:$4 sm:$0xff]   ;;  %v1231_v35 = vld [vmem:[%s1844_s0 + $0x40] ss:$8 sps:$4 sm:$0xff]   ;;  %v1233_v37 = vld [vmem:[%s1844_s0 + $0x54] ss:$8 sps:$4 sm:$0xff]  }
   0xd   :  { %v1232_v36 = vld [vmem:[%s1844_s0 + $0x140] ss:$8 sps:$4 sm:$0xff]   ;;  %v1235_v38 = vld [vmem:[%s1844_s0 + $0x154] ss:$8 sps:$4 sm:$0xff]   ;;  %v1237_v39 = vld [vmem:[%s1844_s0 + $0x50] ss:$8 sps:$4 sm:$0xff]  }
   0xe   :  { %531 = vmatpush1.bf16.msra.mxu0 %v1190_v4  ;;  %1173 = vmatpush1.bf16.msra.mxu1 %v1190_v4  ;;  %v1238_v40 = vld [vmem:[%s1844_s0 + $0x150] ss:$8 sps:$4 sm:$0xff]   ;;  %v1239_v41 = vld [vmem:[%s1844_s0 + $0x64] ss:$8 sps:$4 sm:$0xff]   ;;  %v1243_v43 = vld [vmem:[%s1844_s0 + $0x60] ss:$8 sps:$4 sm:$0xff]  }
   0xf   :  { %532 = vmatprep.subr.bf16.mxu0 %v1299_v0  ;;  %1158 = vmatprep.subr.bf16.mxu1 %v1299_v0  ;;  %v1241_v42 = vld [vmem:[%s1844_s0 + $0x164] ss:$8 sps:$4 sm:$0xff]   ;;  %v1244_v44 = vld [vmem:[%s1844_s0 + $0x160] ss:$8 sps:$4 sm:$0xff]   ;;  %v1245_v45 = vld [vmem:[%s1844_s0 + $0x74] ss:$8 sps:$4 sm:$0xff]  }
  0x10   :  { %v1247_v46 = vld [vmem:[%s1844_s0 + $0x174] ss:$8 sps:$4 sm:$0xff]   ;;  %v1249_v47 = vld [vmem:[%s1844_s0 + $0x70] ss:$8 sps:$4 sm:$0xff]   ;;  %v1251_v49 = vld [vmem:[%s1844_s0 + $0x84] ss:$8 sps:$4 sm:$0xff]  }
  0x11   :  { %v1250_v48 = vld [vmem:[%s1844_s0 + $0x170] ss:$8 sps:$4 sm:$0xff]   ;;  %v1253_v50 = vld [vmem:[%s1844_s0 + $0x184] ss:$8 sps:$4 sm:$0xff]   ;;  %v1255_v51 = vld [vmem:[%s1844_s0 + $0x80] ss:$8 sps:$4 sm:$0xff]  }
  0x12   :  { %533 = vmatpush1.bf16.msra.mxu0 %v1191_v5  ;;  %1174 = vmatpush1.bf16.msra.mxu1 %v1191_v5  ;;  %v1256_v52 = vld [vmem:[%s1844_s0 + $0x180] ss:$8 sps:$4 sm:$0xff]   ;;  %v1257_v53 = vld [vmem:[%s1844_s0 + $0x94] ss:$8 sps:$4 sm:$0xff]   ;;  %v1261_v55 = vld [vmem:[%s1844_s0 + $0x90] ss:$8 sps:$4 sm:$0xff]  }
  0x13   :  { %534 = vmatprep.subr.bf16.mxu0 %v1299_v0  ;;  %1159 = vmatprep.subr.bf16.mxu1 %v1299_v0  ;;  %v1259_v54 = vld [vmem:[%s1844_s0 + $0x194] ss:$8 sps:$4 sm:$0xff]   ;;  %v1262_v56 = vld [vmem:[%s1844_s0 + $0x190] ss:$8 sps:$4 sm:$0xff]   ;;  %v1263_v57 = vld [vmem:[%s1844_s0 + $0xa4] ss:$8 sps:$4 sm:$0xff]  }
  0x14   :  { %v1265_v58 = vld [vmem:[%s1844_s0 + $0x1a4] ss:$8 sps:$4 sm:$0xff]   ;;  %v1267_v59 = vld [vmem:[%s1844_s0 + $0xa0] ss:$8 sps:$4 sm:$0xff]   ;;  %v1269_v61 = vld [vmem:[%s1844_s0 + $0xb4] ss:$8 sps:$4 sm:$0xff]  }
  0x15   :  { %v1268_v60 = vld [vmem:[%s1844_s0 + $0x1a0] ss:$8 sps:$4 sm:$0xff]   ;;  %v1271_v62 = vld [vmem:[%s1844_s0 + $0x1b4] ss:$8 sps:$4 sm:$0xff]   ;;  %v1273_v63 = vld [vmem:[%s1844_s0 + $0xb0] ss:$8 sps:$4 sm:$0xff]  }
  0x16   :  { %535 = vmatpush1.bf16.msra.mxu0 %v1192_v7  ;;  %1175 = vmatpush1.bf16.msra.mxu1 %v1192_v7  ;;  %v1275_v1 = vld [vmem:[%s1844_s0 + $0xc4] ss:$8 sps:$4 sm:$0xff]   ;;  %v1279_v3 = vld [vmem:[%s1844_s0 + $0xc0] ss:$8 sps:$4 sm:$0xff]   ;;  %v1281_v5 = vld [vmem:[%s1844_s0 + $0xd4] ss:$8 sps:$4 sm:$0xff]  }
  0x17   :  { %536 = vmatprep.subr.bf16.mxu0 %v1299_v0  ;;  %1160 = vmatprep.subr.bf16.mxu1 %v1299_v0  ;;  %v1277_v2 = vld [vmem:[%s1844_s0 + $0x1c4] ss:$8 sps:$4 sm:$0xff]   ;;  %v1280_v4 = vld [vmem:[%s1844_s0 + $0x1c0] ss:$8 sps:$4 sm:$0xff]   ;;  %v1283_v6 = vld [vmem:[%s1844_s0 + $0x1d4] ss:$8 sps:$4 sm:$0xff]  }
  0x18   :  { %v1285_v7 = vld [vmem:[%s1844_s0 + $0xd0] ss:$8 sps:$4 sm:$0xff]  }
  0x19   :  { %v1286_v8 = vld [vmem:[%s1844_s0 + $0x1d0] ss:$8 sps:$4 sm:$0xff]  }
  0x1a   :  { %537 = vmatpush1.bf16.msra.mxu0 %v1193_v9  ;;  %1176 = vmatpush1.bf16.msra.mxu1 %v1193_v9  ;;  %v1287_v9 = vld [vmem:[%s1844_s0 + $0xe4] ss:$8 sps:$4 sm:$0xff]  }
  0x1b   :  { %538 = vmatprep.subr.bf16.mxu0 %v1299_v0  ;;  %1161 = vmatprep.subr.bf16.mxu1 %v1299_v0 }
  0x1e   :  { %539 = vmatpush1.bf16.msra.mxu0 %v1194_v10  ;;  %1177 = vmatpush1.bf16.msra.mxu1 %v1194_v10  ;;  %v1289_v10 = vld [vmem:[%s1844_s0 + $0x1e4] ss:$8 sps:$4 sm:$0xff]  }
  0x1f   :  { %540 = vmatprep.subr.bf16.mxu0 %v1299_v0  ;;  %1162 = vmatprep.subr.bf16.mxu1 %v1299_v0 }
  0x22   :  { %541 = vmatpush2.bf16.msra.mxu0 %v1195_v11  ;;  %1178 = vmatpush2.bf16.msra.mxu1 %v1195_v11  ;;  %v1291_v11 = vld [vmem:[%s1844_s0 + $0xe0] ss:$8 sps:$4 sm:$0xff]  }
  0x23   :  { %542 = vmatprep.subr.bf16.mxu0 %v1299_v0  ;;  %1163 = vmatprep.subr.bf16.mxu1 %v1299_v0 }
  0x26   :  { %543 = vmatpush2.bf16.msra.mxu0 %v1196_v12  ;;  %1179 = vmatpush2.bf16.msra.mxu1 %v1196_v12  ;;  %v1292_v12 = vld [vmem:[%s1844_s0 + $0x1e0] ss:$8 sps:$4 sm:$0xff]  }
  0x27   :  { %544 = vmatprep.subr.bf16.mxu0 %v1299_v0  ;;  %1164 = vmatprep.subr.bf16.mxu1 %v1299_v0 }
  0x2a   :  { %545 = vmatpush2.bf16.msra.mxu0 %v1197_v13  ;;  %1180 = vmatpush2.bf16.msra.mxu1 %v1197_v13  ;;  %v1293_v13 = vld [vmem:[%s1844_s0 + $0xf4] ss:$8 sps:$4 sm:$0xff]  }
  0x2b   :  { %546 = vmatprep.subr.bf16.mxu0 %v1299_v0  ;;  %1165 = vmatprep.subr.bf16.mxu1 %v1299_v0 }
  0x2e   :  { %547 = vmatpush2.bf16.msra.mxu0 %v1198_v14  ;;  %1181 = vmatpush2.bf16.msra.mxu1 %v1198_v14  ;;  %v1295_v14 = vld [vmem:[%s1844_s0 + $0x1f4] ss:$8 sps:$4 sm:$0xff]  }
  0x2f   :  { %548 = vmatprep.subr.bf16.mxu0 %v1299_v0  ;;  %1166 = vmatprep.subr.bf16.mxu1 %v1299_v0 }
  0x32   :  { %549 = vmatpush2.bf16.msra.mxu0 %v1199_v15  ;;  %1182 = vmatpush2.bf16.msra.mxu1 %v1199_v15  ;;  %v1297_v15 = vld [vmem:[%s1844_s0 + $0xf0] ss:$8 sps:$4 sm:$0xff]  }
  0x33   :  { %550 = vmatprep.subr.bf16.mxu0 %v1299_v0  ;;  %1167 = vmatprep.subr.bf16.mxu1 %v1299_v0 }
  0x36   :  { %551 = vmatpush2.bf16.msra.mxu0 %v1200_v16  ;;  %1183 = vmatpush2.bf16.msra.mxu1 %v1200_v16  ;;  %v1298_v16 = vld [vmem:[%s1844_s0 + $0x1f0] ss:$8 sps:$4 sm:$0xff]  }
  0x37   :  { %552 = vmatprep.subr.bf16.mxu0 %v1299_v0  ;;  %1168 = vmatprep.subr.bf16.mxu1 %v1299_v0 }
  0x3a   :  { %553 = vmatpush2.bf16.msra.mxu0 %v1201_v17  ;;  %1184 = vmatpush2.bf16.msra.mxu1 %v1201_v17 }
  0x3b   :  { %554 = vmatprep.subr.bf16.mxu0 %v1299_v0  ;;  %1169 = vmatprep.subr.bf16.mxu1 %v1299_v0  ;;  %v1274_v0 = vld [vmem:[%s1844_s0 + $0x1b0] ss:$8 sps:$4 sm:$0xff]  }
  0x3e   :  { %555 = vmatpush2.bf16.msra.mxu0 %v1202_v18  ;;  %1185 = vmatpush2.bf16.msra.mxu1 %v1202_v18 }
  0x41   :  { %557 = vmatmul.mubr.bf16.vlgmr.msra.gmra.mxu0 %v1203_v19  ;;  %685 = vmatmul.mubr.bf16.vlgmr.msra.gmra.mxu1 %v1206_v20 }
  0x42   :  { %564 = vmatprep.mubr.bf16.mxu0 %v1209_v21  ;;  %692 = vmatprep.mubr.bf16.mxu1 %v1211_v22 }
  0x49   :  { %565 = vmatmul.mubr.bf16.gmra.mxu0 %v1213_v23  ;;  %693 = vmatmul.mubr.bf16.gmra.mxu1 %v1214_v24 }
  0x4a   :  { %572 = vmatprep.mubr.bf16.mxu0 %v1215_v25  ;;  %700 = vmatprep.mubr.bf16.mxu1 %v1217_v26 }
  0x51   :  { %573 = vmatmul.mubr.bf16.gmra.mxu0 %v1219_v27  ;;  %701 = vmatmul.mubr.bf16.gmra.mxu1 %v1220_v28 }
  0x52   :  { %580 = vmatprep.mubr.bf16.mxu0 %v1221_v29  ;;  %708 = vmatprep.mubr.bf16.mxu1 %v1223_v30 }
  0x59   :  { %581 = vmatmul.mubr.bf16.gmra.mxu0 %v1225_v31  ;;  %709 = vmatmul.mubr.bf16.gmra.mxu1 %v1226_v32 }
  0x5a   :  { %588 = vmatprep.mubr.bf16.mxu0 %v1227_v33  ;;  %716 = vmatprep.mubr.bf16.mxu1 %v1229_v34 }
  0x61   :  { %589 = vmatmul.mubr.bf16.gmra.mxu0 %v1231_v35  ;;  %717 = vmatmul.mubr.bf16.gmra.mxu1 %v1232_v36 }
  0x62   :  { %596 = vmatprep.mubr.bf16.mxu0 %v1233_v37  ;;  %724 = vmatprep.mubr.bf16.mxu1 %v1235_v38 }
  0x69   :  { %597 = vmatmul.mubr.bf16.gmra.mxu0 %v1237_v39  ;;  %725 = vmatmul.mubr.bf16.gmra.mxu1 %v1238_v40 }
  0x6a   :  { %604 = vmatprep.mubr.bf16.mxu0 %v1239_v41  ;;  %732 = vmatprep.mubr.bf16.mxu1 %v1241_v42 }
  0x71   :  { %605 = vmatmul.mubr.bf16.gmra.mxu0 %v1243_v43  ;;  %733 = vmatmul.mubr.bf16.gmra.mxu1 %v1244_v44 }
  0x72   :  { %612 = vmatprep.mubr.bf16.mxu0 %v1245_v45  ;;  %740 = vmatprep.mubr.bf16.mxu1 %v1247_v46 }
  0x79   :  { %613 = vmatmul.mubr.bf16.gmra.mxu0 %v1249_v47  ;;  %741 = vmatmul.mubr.bf16.gmra.mxu1 %v1250_v48 }
  0x7a   :  { %620 = vmatprep.mubr.bf16.mxu0 %v1251_v49  ;;  %748 = vmatprep.mubr.bf16.mxu1 %v1253_v50 }
  0x81   :  { %621 = vmatmul.mubr.bf16.gmra.mxu0 %v1255_v51  ;;  %749 = vmatmul.mubr.bf16.gmra.mxu1 %v1256_v52 }
  0x82   :  { %628 = vmatprep.mubr.bf16.mxu0 %v1257_v53  ;;  %756 = vmatprep.mubr.bf16.mxu1 %v1259_v54 }
  0x89   :  { %629 = vmatmul.mubr.bf16.gmra.mxu0 %v1261_v55  ;;  %757 = vmatmul.mubr.bf16.gmra.mxu1 %v1262_v56 }
  0x8a   :  { %636 = vmatprep.mubr.bf16.mxu0 %v1263_v57  ;;  %764 = vmatprep.mubr.bf16.mxu1 %v1265_v58 }
  0x91   :  { %637 = vmatmul.mubr.bf16.gmra.mxu0 %v1267_v59  ;;  %765 = vmatmul.mubr.bf16.gmra.mxu1 %v1268_v60 }
  0x92   :  { %644 = vmatprep.mubr.bf16.mxu0 %v1269_v61  ;;  %772 = vmatprep.mubr.bf16.mxu1 %v1271_v62 }
  0x99   :  { %645 = vmatmul.mubr.bf16.gmra.mxu0 %v1273_v63  ;;  %773 = vmatmul.mubr.bf16.gmra.mxu1 %v1274_v0 }
  0x9a   :  { %652 = vmatprep.mubr.bf16.mxu0 %v1275_v1  ;;  %780 = vmatprep.mubr.bf16.mxu1 %v1277_v2 }
  0xa1   :  { %653 = vmatmul.mubr.bf16.gmra.mxu0 %v1279_v3  ;;  %781 = vmatmul.mubr.bf16.gmra.mxu1 %v1280_v4 }
  0xa2   :  { %660 = vmatprep.mubr.bf16.mxu0 %v1281_v5  ;;  %788 = vmatprep.mubr.bf16.mxu1 %v1283_v6 }
  0xa9   :  { %661 = vmatmul.mubr.bf16.gmra.mxu0 %v1285_v7  ;;  %789 = vmatmul.mubr.bf16.gmra.mxu1 %v1286_v8 }
  0xaa   :  { %668 = vmatprep.mubr.bf16.mxu0 %v1287_v9  ;;  %796 = vmatprep.mubr.bf16.mxu1 %v1289_v10 }
  0xb1   :  { %669 = vmatmul.mubr.bf16.gmra.mxu0 %v1291_v11  ;;  %797 = vmatmul.mubr.bf16.gmra.mxu1 %v1292_v12 }
  0xb2   :  { %676 = vmatprep.mubr.bf16.mxu0 %v1293_v13  ;;  %804 = vmatprep.mubr.bf16.mxu1 %v1295_v14 }
  0xb9   :  { %677 = vmatmul.mubr.bf16.gmra.mxu0 %v1297_v15  ;;  %805 = vmatmul.mubr.bf16.gmra.mxu1 %v1298_v16 }
 0x101   :  { %v558_v17 = vpop.f32.mrf.mxu0  ;;  %v686_v18 = vpop.f32.mrf.mxu1 }
 0x102   :  { %vm813_vm1 = vcmp.ge.f32.partialorder %v558_v17, 0.0  ;;  %v877_v19 = vmul.f32 0.2, %v558_v17  ;;  %vm845_vm2 = vcmp.ge.f32.partialorder %v686_v18, 0.0  ;;  %v909_v20 = vmul.f32 0.2, %v686_v18 }
 0x103   :  { %v560_v21 = vpop.f32.mrf.mxu0  ;;  %v688_v22 = vpop.f32.mrf.mxu1 }
 0x104   :  { %v941_v23 = vsel %vm813_vm1, %v558_v17, %v877_v19  ;;  %v973_v24 = vsel %vm845_vm2, %v686_v18, %v909_v20 }
 0x105   :  { %1006 = vst.msk [vmem:[%s1845_s2] sm:$0xff] %vm1005_vm0, %v941_v23  ;;  %1038 = vst.msk [vmem:[%s1845_s2 + $0x100] sm:$0xff] %vm1005_vm0, %v973_v24  ;;  %v561_v25 = vpop.f32.mrf.mxu0  ;;  %v689_v26 = vpop.f32.mrf.mxu1 }
 0x106   :  { %vm814_vm3 = vcmp.ge.f32.partialorder %v561_v25, 0.0  ;;  %v878_v27 = vmul.f32 0.2, %v561_v25  ;;  %vm846_vm4 = vcmp.ge.f32.partialorder %v689_v26, 0.0  ;;  %v910_v28 = vmul.f32 0.2, %v689_v26 }
 0x107   :  { %v563_v29 = vpop.f32.mrf.mxu0  ;;  %v691_v30 = vpop.f32.mrf.mxu1 }
 0x108   :  { %v942_v31 = vsel %vm814_vm3, %v561_v25, %v878_v27  ;;  %v974_v32 = vsel %vm846_vm4, %v689_v26, %v910_v28 }
 0x109   :  { %1007 = vst.msk [vmem:[%s1845_s2 + $0x8] sm:$0xff] %vm1005_vm0, %v942_v31  ;;  %1039 = vst.msk [vmem:[%s1845_s2 + $0x108] sm:$0xff] %vm1005_vm0, %v974_v32  ;;  %v566_v33 = vpop.f32.mrf.mxu0  ;;  %v694_v34 = vpop.f32.mrf.mxu1 }
 0x10a   :  { %vm815_vm5 = vcmp.ge.f32.partialorder %v566_v33, 0.0  ;;  %v879_v35 = vmul.f32 0.2, %v566_v33  ;;  %vm847_vm6 = vcmp.ge.f32.partialorder %v694_v34, 0.0  ;;  %v911_v36 = vmul.f32 0.2, %v694_v34 }
 0x10b   :  { %v568_v37 = vpop.f32.mrf.mxu0  ;;  %v696_v38 = vpop.f32.mrf.mxu1 }
 0x10c   :  { %v943_v39 = vsel %vm815_vm5, %v566_v33, %v879_v35  ;;  %v975_v40 = vsel %vm847_vm6, %v694_v34, %v911_v36 }
 0x10d   :  { %1008 = vst.msk [vmem:[%s1845_s2 + $0x10] sm:$0xff] %vm1005_vm0, %v943_v39  ;;  %1040 = vst.msk [vmem:[%s1845_s2 + $0x110] sm:$0xff] %vm1005_vm0, %v975_v40  ;;  %v569_v41 = vpop.f32.mrf.mxu0  ;;  %v697_v42 = vpop.f32.mrf.mxu1 }
 0x10e   :  { %vm816_vm7 = vcmp.ge.f32.partialorder %v569_v41, 0.0  ;;  %v880_v43 = vmul.f32 0.2, %v569_v41  ;;  %vm848_vm8 = vcmp.ge.f32.partialorder %v697_v42, 0.0  ;;  %v912_v44 = vmul.f32 0.2, %v697_v42 }
 0x10f   :  { %v571_v45 = vpop.f32.mrf.mxu0  ;;  %v699_v46 = vpop.f32.mrf.mxu1 }
 0x110   :  { %v944_v47 = vsel %vm816_vm7, %v569_v41, %v880_v43  ;;  %v976_v48 = vsel %vm848_vm8, %v697_v42, %v912_v44 }
 0x111   :  { %1009 = vst.msk [vmem:[%s1845_s2 + $0x18] sm:$0xff] %vm1005_vm0, %v944_v47  ;;  %1041 = vst.msk [vmem:[%s1845_s2 + $0x118] sm:$0xff] %vm1005_vm0, %v976_v48  ;;  %v574_v49 = vpop.f32.mrf.mxu0  ;;  %v702_v50 = vpop.f32.mrf.mxu1 }
 0x112   :  { %vm817_vm9 = vcmp.ge.f32.partialorder %v574_v49, 0.0  ;;  %v881_v51 = vmul.f32 0.2, %v574_v49  ;;  %vm849_vm10 = vcmp.ge.f32.partialorder %v702_v50, 0.0  ;;  %v913_v52 = vmul.f32 0.2, %v702_v50 }
 0x113   :  { %v576_v53 = vpop.f32.mrf.mxu0  ;;  %v704_v54 = vpop.f32.mrf.mxu1 }
 0x114   :  { %v945_v55 = vsel %vm817_vm9, %v574_v49, %v881_v51  ;;  %v977_v56 = vsel %vm849_vm10, %v702_v50, %v913_v52 }
 0x115   :  { %1010 = vst.msk [vmem:[%s1845_s2 + $0x20] sm:$0xff] %vm1005_vm0, %v945_v55  ;;  %1042 = vst.msk [vmem:[%s1845_s2 + $0x120] sm:$0xff] %vm1005_vm0, %v977_v56  ;;  %v577_v57 = vpop.f32.mrf.mxu0  ;;  %v705_v58 = vpop.f32.mrf.mxu1 }
 0x116   :  { %vm818_vm11 = vcmp.ge.f32.partialorder %v577_v57, 0.0  ;;  %v882_v59 = vmul.f32 0.2, %v577_v57  ;;  %vm850_vm12 = vcmp.ge.f32.partialorder %v705_v58, 0.0  ;;  %v914_v60 = vmul.f32 0.2, %v705_v58 }
 0x117   :  { %v579_v61 = vpop.f32.mrf.mxu0  ;;  %v707_v62 = vpop.f32.mrf.mxu1 }
 0x118   :  { %v946_v63 = vsel %vm818_vm11, %v577_v57, %v882_v59  ;;  %v978_v0 = vsel %vm850_vm12, %v705_v58, %v914_v60 }
 0x119   :  { %1011 = vst.msk [vmem:[%s1845_s2 + $0x28] sm:$0xff] %vm1005_vm0, %v946_v63  ;;  %1043 = vst.msk [vmem:[%s1845_s2 + $0x128] sm:$0xff] %vm1005_vm0, %v978_v0  ;;  %v582_v1 = vpop.f32.mrf.mxu0  ;;  %v710_v2 = vpop.f32.mrf.mxu1 }
 0x11a   :  { %vm819_vm13 = vcmp.ge.f32.partialorder %v582_v1, 0.0  ;;  %v883_v3 = vmul.f32 0.2, %v582_v1  ;;  %vm851_vm14 = vcmp.ge.f32.partialorder %v710_v2, 0.0  ;;  %v915_v4 = vmul.f32 0.2, %v710_v2 }
 0x11b   :  { %v584_v5 = vpop.f32.mrf.mxu0  ;;  %v712_v6 = vpop.f32.mrf.mxu1 }
 0x11c   :  { %v947_v7 = vsel %vm819_vm13, %v582_v1, %v883_v3  ;;  %v979_v8 = vsel %vm851_vm14, %v710_v2, %v915_v4 }
 0x11d   :  { %1012 = vst.msk [vmem:[%s1845_s2 + $0x30] sm:$0xff] %vm1005_vm0, %v947_v7  ;;  %1044 = vst.msk [vmem:[%s1845_s2 + $0x130] sm:$0xff] %vm1005_vm0, %v979_v8  ;;  %v585_v9 = vpop.f32.mrf.mxu0  ;;  %v713_v10 = vpop.f32.mrf.mxu1 }
 0x11e   :  { %vm820_vm15 = vcmp.ge.f32.partialorder %v585_v9, 0.0  ;;  %v884_v11 = vmul.f32 0.2, %v585_v9  ;;  %vm852_vm1 = vcmp.ge.f32.partialorder %v713_v10, 0.0  ;;  %v916_v12 = vmul.f32 0.2, %v713_v10 }
 0x11f   :  { %v587_v13 = vpop.f32.mrf.mxu0  ;;  %v715_v14 = vpop.f32.mrf.mxu1 }
 0x120   :  { %v948_v15 = vsel %vm820_vm15, %v585_v9, %v884_v11  ;;  %v980_v16 = vsel %vm852_vm1, %v713_v10, %v916_v12 }
 0x121   :  { %1013 = vst.msk [vmem:[%s1845_s2 + $0x38] sm:$0xff] %vm1005_vm0, %v948_v15  ;;  %1045 = vst.msk [vmem:[%s1845_s2 + $0x138] sm:$0xff] %vm1005_vm0, %v980_v16  ;;  %v590_v17 = vpop.f32.mrf.mxu0  ;;  %v718_v18 = vpop.f32.mrf.mxu1 }
 0x122   :  { %vm821_vm2 = vcmp.ge.f32.partialorder %v590_v17, 0.0  ;;  %v885_v19 = vmul.f32 0.2, %v590_v17  ;;  %vm853_vm3 = vcmp.ge.f32.partialorder %v718_v18, 0.0  ;;  %v917_v20 = vmul.f32 0.2, %v718_v18 }
 0x123   :  { %v592_v21 = vpop.f32.mrf.mxu0  ;;  %v720_v22 = vpop.f32.mrf.mxu1 }
 0x124   :  { %v949_v23 = vsel %vm821_vm2, %v590_v17, %v885_v19  ;;  %v981_v24 = vsel %vm853_vm3, %v718_v18, %v917_v20 }
 0x125   :  { %1014 = vst.msk [vmem:[%s1845_s2 + $0x40] sm:$0xff] %vm1005_vm0, %v949_v23  ;;  %1046 = vst.msk [vmem:[%s1845_s2 + $0x140] sm:$0xff] %vm1005_vm0, %v981_v24  ;;  %v593_v25 = vpop.f32.mrf.mxu0  ;;  %v721_v26 = vpop.f32.mrf.mxu1 }
 0x126   :  { %vm822_vm4 = vcmp.ge.f32.partialorder %v593_v25, 0.0  ;;  %v886_v27 = vmul.f32 0.2, %v593_v25  ;;  %vm854_vm5 = vcmp.ge.f32.partialorder %v721_v26, 0.0  ;;  %v918_v28 = vmul.f32 0.2, %v721_v26 }
 0x127   :  { %v595_v29 = vpop.f32.mrf.mxu0  ;;  %v723_v30 = vpop.f32.mrf.mxu1 }
 0x128   :  { %v950_v31 = vsel %vm822_vm4, %v593_v25, %v886_v27  ;;  %v982_v32 = vsel %vm854_vm5, %v721_v26, %v918_v28 }
 0x129   :  { %1015 = vst.msk [vmem:[%s1845_s2 + $0x48] sm:$0xff] %vm1005_vm0, %v950_v31  ;;  %1047 = vst.msk [vmem:[%s1845_s2 + $0x148] sm:$0xff] %vm1005_vm0, %v982_v32  ;;  %v598_v33 = vpop.f32.mrf.mxu0  ;;  %v726_v34 = vpop.f32.mrf.mxu1 }
 0x12a   :  { %vm823_vm6 = vcmp.ge.f32.partialorder %v598_v33, 0.0  ;;  %v887_v35 = vmul.f32 0.2, %v598_v33  ;;  %vm855_vm7 = vcmp.ge.f32.partialorder %v726_v34, 0.0  ;;  %v919_v36 = vmul.f32 0.2, %v726_v34 }
 0x12b   :  { %v600_v37 = vpop.f32.mrf.mxu0  ;;  %v728_v38 = vpop.f32.mrf.mxu1 }
 0x12c   :  { %v951_v39 = vsel %vm823_vm6, %v598_v33, %v887_v35  ;;  %v983_v40 = vsel %vm855_vm7, %v726_v34, %v919_v36 }
 0x12d   :  { %1016 = vst.msk [vmem:[%s1845_s2 + $0x50] sm:$0xff] %vm1005_vm0, %v951_v39  ;;  %1048 = vst.msk [vmem:[%s1845_s2 + $0x150] sm:$0xff] %vm1005_vm0, %v983_v40  ;;  %v601_v41 = vpop.f32.mrf.mxu0  ;;  %v729_v42 = vpop.f32.mrf.mxu1 }
 0x12e   :  { %vm824_vm8 = vcmp.ge.f32.partialorder %v601_v41, 0.0  ;;  %v888_v43 = vmul.f32 0.2, %v601_v41  ;;  %vm856_vm9 = vcmp.ge.f32.partialorder %v729_v42, 0.0  ;;  %v920_v44 = vmul.f32 0.2, %v729_v42 }
 0x12f   :  { %v603_v45 = vpop.f32.mrf.mxu0  ;;  %v731_v46 = vpop.f32.mrf.mxu1 }
 0x130   :  { %v952_v47 = vsel %vm824_vm8, %v601_v41, %v888_v43  ;;  %v984_v48 = vsel %vm856_vm9, %v729_v42, %v920_v44 }
 0x131   :  { %1017 = vst.msk [vmem:[%s1845_s2 + $0x58] sm:$0xff] %vm1005_vm0, %v952_v47  ;;  %1049 = vst.msk [vmem:[%s1845_s2 + $0x158] sm:$0xff] %vm1005_vm0, %v984_v48  ;;  %v606_v49 = vpop.f32.mrf.mxu0  ;;  %v734_v50 = vpop.f32.mrf.mxu1 }
 0x132   :  { %vm825_vm10 = vcmp.ge.f32.partialorder %v606_v49, 0.0  ;;  %v889_v51 = vmul.f32 0.2, %v606_v49  ;;  %vm857_vm11 = vcmp.ge.f32.partialorder %v734_v50, 0.0  ;;  %v921_v52 = vmul.f32 0.2, %v734_v50 }
 0x133   :  { %v608_v53 = vpop.f32.mrf.mxu0  ;;  %v736_v54 = vpop.f32.mrf.mxu1 }
 0x134   :  { %v953_v55 = vsel %vm825_vm10, %v606_v49, %v889_v51  ;;  %v985_v56 = vsel %vm857_vm11, %v734_v50, %v921_v52 }
 0x135   :  { %1018 = vst.msk [vmem:[%s1845_s2 + $0x60] sm:$0xff] %vm1005_vm0, %v953_v55  ;;  %1050 = vst.msk [vmem:[%s1845_s2 + $0x160] sm:$0xff] %vm1005_vm0, %v985_v56  ;;  %v609_v57 = vpop.f32.mrf.mxu0  ;;  %v737_v58 = vpop.f32.mrf.mxu1 }
 0x136   :  { %vm826_vm12 = vcmp.ge.f32.partialorder %v609_v57, 0.0  ;;  %v890_v59 = vmul.f32 0.2, %v609_v57  ;;  %vm858_vm13 = vcmp.ge.f32.partialorder %v737_v58, 0.0  ;;  %v922_v60 = vmul.f32 0.2, %v737_v58 }
 0x137   :  { %v611_v61 = vpop.f32.mrf.mxu0  ;;  %v739_v62 = vpop.f32.mrf.mxu1 }
 0x138   :  { %v954_v63 = vsel %vm826_vm12, %v609_v57, %v890_v59  ;;  %v986_v0 = vsel %vm858_vm13, %v737_v58, %v922_v60 }
 0x139   :  { %1019 = vst.msk [vmem:[%s1845_s2 + $0x68] sm:$0xff] %vm1005_vm0, %v954_v63  ;;  %1051 = vst.msk [vmem:[%s1845_s2 + $0x168] sm:$0xff] %vm1005_vm0, %v986_v0  ;;  %v614_v1 = vpop.f32.mrf.mxu0  ;;  %v742_v2 = vpop.f32.mrf.mxu1 }
 0x13a   :  { %vm827_vm14 = vcmp.ge.f32.partialorder %v614_v1, 0.0  ;;  %v891_v3 = vmul.f32 0.2, %v614_v1  ;;  %vm859_vm15 = vcmp.ge.f32.partialorder %v742_v2, 0.0  ;;  %v923_v4 = vmul.f32 0.2, %v742_v2 }
 0x13b   :  { %v616_v5 = vpop.f32.mrf.mxu0  ;;  %v744_v6 = vpop.f32.mrf.mxu1 }
 0x13c   :  { %v955_v7 = vsel %vm827_vm14, %v614_v1, %v891_v3  ;;  %v987_v8 = vsel %vm859_vm15, %v742_v2, %v923_v4 }
 0x13d   :  { %1020 = vst.msk [vmem:[%s1845_s2 + $0x70] sm:$0xff] %vm1005_vm0, %v955_v7  ;;  %1052 = vst.msk [vmem:[%s1845_s2 + $0x170] sm:$0xff] %vm1005_vm0, %v987_v8  ;;  %v617_v9 = vpop.f32.mrf.mxu0  ;;  %v745_v10 = vpop.f32.mrf.mxu1 }
 0x13e   :  { %vm828_vm1 = vcmp.ge.f32.partialorder %v617_v9, 0.0  ;;  %v892_v11 = vmul.f32 0.2, %v617_v9  ;;  %vm860_vm2 = vcmp.ge.f32.partialorder %v745_v10, 0.0  ;;  %v924_v12 = vmul.f32 0.2, %v745_v10 }
 0x13f   :  { %v619_v13 = vpop.f32.mrf.mxu0  ;;  %v747_v14 = vpop.f32.mrf.mxu1 }
 0x140   :  { %v956_v15 = vsel %vm828_vm1, %v617_v9, %v892_v11  ;;  %v988_v16 = vsel %vm860_vm2, %v745_v10, %v924_v12 }
 0x141   :  { %1021 = vst.msk [vmem:[%s1845_s2 + $0x78] sm:$0xff] %vm1005_vm0, %v956_v15  ;;  %1053 = vst.msk [vmem:[%s1845_s2 + $0x178] sm:$0xff] %vm1005_vm0, %v988_v16  ;;  %v622_v17 = vpop.f32.mrf.mxu0  ;;  %v750_v18 = vpop.f32.mrf.mxu1 }
 0x142   :  { %vm829_vm3 = vcmp.ge.f32.partialorder %v622_v17, 0.0  ;;  %v893_v19 = vmul.f32 0.2, %v622_v17  ;;  %vm861_vm4 = vcmp.ge.f32.partialorder %v750_v18, 0.0  ;;  %v925_v20 = vmul.f32 0.2, %v750_v18 }
 0x143   :  { %v624_v21 = vpop.f32.mrf.mxu0  ;;  %v752_v22 = vpop.f32.mrf.mxu1 }
 0x144   :  { %v957_v23 = vsel %vm829_vm3, %v622_v17, %v893_v19  ;;  %v989_v24 = vsel %vm861_vm4, %v750_v18, %v925_v20 }
 0x145   :  { %1022 = vst.msk [vmem:[%s1845_s2 + $0x80] sm:$0xff] %vm1005_vm0, %v957_v23  ;;  %1054 = vst.msk [vmem:[%s1845_s2 + $0x180] sm:$0xff] %vm1005_vm0, %v989_v24  ;;  %v625_v25 = vpop.f32.mrf.mxu0  ;;  %v753_v26 = vpop.f32.mrf.mxu1 }
 0x146   :  { %vm830_vm5 = vcmp.ge.f32.partialorder %v625_v25, 0.0  ;;  %v894_v27 = vmul.f32 0.2, %v625_v25  ;;  %vm862_vm6 = vcmp.ge.f32.partialorder %v753_v26, 0.0  ;;  %v926_v28 = vmul.f32 0.2, %v753_v26 }
 0x147   :  { %v627_v29 = vpop.f32.mrf.mxu0  ;;  %v755_v30 = vpop.f32.mrf.mxu1 }
 0x148   :  { %v958_v31 = vsel %vm830_vm5, %v625_v25, %v894_v27  ;;  %v990_v32 = vsel %vm862_vm6, %v753_v26, %v926_v28 }
 0x149   :  { %1023 = vst.msk [vmem:[%s1845_s2 + $0x88] sm:$0xff] %vm1005_vm0, %v958_v31  ;;  %1055 = vst.msk [vmem:[%s1845_s2 + $0x188] sm:$0xff] %vm1005_vm0, %v990_v32  ;;  %v630_v33 = vpop.f32.mrf.mxu0  ;;  %v758_v34 = vpop.f32.mrf.mxu1 }
 0x14a   :  { %vm831_vm7 = vcmp.ge.f32.partialorder %v630_v33, 0.0  ;;  %v895_v35 = vmul.f32 0.2, %v630_v33  ;;  %vm863_vm8 = vcmp.ge.f32.partialorder %v758_v34, 0.0  ;;  %v927_v36 = vmul.f32 0.2, %v758_v34 }
 0x14b   :  { %v632_v37 = vpop.f32.mrf.mxu0  ;;  %v760_v38 = vpop.f32.mrf.mxu1 }
 0x14c   :  { %v959_v39 = vsel %vm831_vm7, %v630_v33, %v895_v35  ;;  %v991_v40 = vsel %vm863_vm8, %v758_v34, %v927_v36 }
 0x14d   :  { %1024 = vst.msk [vmem:[%s1845_s2 + $0x90] sm:$0xff] %vm1005_vm0, %v959_v39  ;;  %1056 = vst.msk [vmem:[%s1845_s2 + $0x190] sm:$0xff] %vm1005_vm0, %v991_v40  ;;  %v633_v41 = vpop.f32.mrf.mxu0  ;;  %v761_v42 = vpop.f32.mrf.mxu1 }
 0x14e   :  { %vm832_vm9 = vcmp.ge.f32.partialorder %v633_v41, 0.0  ;;  %v896_v43 = vmul.f32 0.2, %v633_v41  ;;  %vm864_vm10 = vcmp.ge.f32.partialorder %v761_v42, 0.0  ;;  %v928_v44 = vmul.f32 0.2, %v761_v42 }
 0x14f   :  { %v635_v45 = vpop.f32.mrf.mxu0  ;;  %v763_v46 = vpop.f32.mrf.mxu1 }
 0x150   :  { %v960_v47 = vsel %vm832_vm9, %v633_v41, %v896_v43  ;;  %v992_v48 = vsel %vm864_vm10, %v761_v42, %v928_v44 }
 0x151   :  { %1025 = vst.msk [vmem:[%s1845_s2 + $0x98] sm:$0xff] %vm1005_vm0, %v960_v47  ;;  %1057 = vst.msk [vmem:[%s1845_s2 + $0x198] sm:$0xff] %vm1005_vm0, %v992_v48  ;;  %v638_v49 = vpop.f32.mrf.mxu0  ;;  %v766_v50 = vpop.f32.mrf.mxu1 }
 0x152   :  { %vm833_vm11 = vcmp.ge.f32.partialorder %v638_v49, 0.0  ;;  %v897_v51 = vmul.f32 0.2, %v638_v49  ;;  %vm865_vm12 = vcmp.ge.f32.partialorder %v766_v50, 0.0  ;;  %v929_v52 = vmul.f32 0.2, %v766_v50 }
 0x153   :  { %v640_v53 = vpop.f32.mrf.mxu0  ;;  %v768_v54 = vpop.f32.mrf.mxu1 }
 0x154   :  { %v961_v55 = vsel %vm833_vm11, %v638_v49, %v897_v51  ;;  %v993_v56 = vsel %vm865_vm12, %v766_v50, %v929_v52 }
 0x155   :  { %1026 = vst.msk [vmem:[%s1845_s2 + $0xa0] sm:$0xff] %vm1005_vm0, %v961_v55  ;;  %1058 = vst.msk [vmem:[%s1845_s2 + $0x1a0] sm:$0xff] %vm1005_vm0, %v993_v56  ;;  %v641_v57 = vpop.f32.mrf.mxu0  ;;  %v769_v58 = vpop.f32.mrf.mxu1 }
 0x156   :  { %vm834_vm13 = vcmp.ge.f32.partialorder %v641_v57, 0.0  ;;  %v898_v59 = vmul.f32 0.2, %v641_v57  ;;  %vm866_vm14 = vcmp.ge.f32.partialorder %v769_v58, 0.0  ;;  %v930_v60 = vmul.f32 0.2, %v769_v58 }
 0x157   :  { %v643_v61 = vpop.f32.mrf.mxu0  ;;  %v771_v62 = vpop.f32.mrf.mxu1 }
 0x158   :  { %v962_v63 = vsel %vm834_vm13, %v641_v57, %v898_v59  ;;  %v994_v0 = vsel %vm866_vm14, %v769_v58, %v930_v60 }
 0x159   :  { %1027 = vst.msk [vmem:[%s1845_s2 + $0xa8] sm:$0xff] %vm1005_vm0, %v962_v63  ;;  %1059 = vst.msk [vmem:[%s1845_s2 + $0x1a8] sm:$0xff] %vm1005_vm0, %v994_v0  ;;  %v646_v1 = vpop.f32.mrf.mxu0  ;;  %v774_v2 = vpop.f32.mrf.mxu1 }
 0x15a   :  { %vm835_vm15 = vcmp.ge.f32.partialorder %v646_v1, 0.0  ;;  %v899_v3 = vmul.f32 0.2, %v646_v1  ;;  %vm867_vm1 = vcmp.ge.f32.partialorder %v774_v2, 0.0  ;;  %v931_v4 = vmul.f32 0.2, %v774_v2 }
 0x15b   :  { %v648_v5 = vpop.f32.mrf.mxu0  ;;  %v776_v6 = vpop.f32.mrf.mxu1 }
 0x15c   :  { %v963_v7 = vsel %vm835_vm15, %v646_v1, %v899_v3  ;;  %v995_v8 = vsel %vm867_vm1, %v774_v2, %v931_v4 }
 0x15d   :  { %1028 = vst.msk [vmem:[%s1845_s2 + $0xb0] sm:$0xff] %vm1005_vm0, %v963_v7  ;;  %1060 = vst.msk [vmem:[%s1845_s2 + $0x1b0] sm:$0xff] %vm1005_vm0, %v995_v8  ;;  %v649_v9 = vpop.f32.mrf.mxu0  ;;  %v777_v10 = vpop.f32.mrf.mxu1 }
 0x15e   :  { %vm836_vm2 = vcmp.ge.f32.partialorder %v649_v9, 0.0  ;;  %v900_v11 = vmul.f32 0.2, %v649_v9  ;;  %vm868_vm3 = vcmp.ge.f32.partialorder %v777_v10, 0.0  ;;  %v932_v12 = vmul.f32 0.2, %v777_v10 }
 0x15f   :  { %v651_v13 = vpop.f32.mrf.mxu0  ;;  %v779_v14 = vpop.f32.mrf.mxu1 }
 0x160   :  { %v964_v15 = vsel %vm836_vm2, %v649_v9, %v900_v11  ;;  %v996_v16 = vsel %vm868_vm3, %v777_v10, %v932_v12 }
 0x161   :  { %1029 = vst.msk [vmem:[%s1845_s2 + $0xb8] sm:$0xff] %vm1005_vm0, %v964_v15  ;;  %1061 = vst.msk [vmem:[%s1845_s2 + $0x1b8] sm:$0xff] %vm1005_vm0, %v996_v16  ;;  %v654_v17 = vpop.f32.mrf.mxu0  ;;  %v782_v18 = vpop.f32.mrf.mxu1 }
 0x162   :  { %vm837_vm4 = vcmp.ge.f32.partialorder %v654_v17, 0.0  ;;  %v901_v19 = vmul.f32 0.2, %v654_v17  ;;  %vm869_vm5 = vcmp.ge.f32.partialorder %v782_v18, 0.0  ;;  %v933_v20 = vmul.f32 0.2, %v782_v18 }
 0x163   :  { %v656_v21 = vpop.f32.mrf.mxu0  ;;  %v784_v22 = vpop.f32.mrf.mxu1 }
 0x164   :  { %v965_v23 = vsel %vm837_vm4, %v654_v17, %v901_v19  ;;  %v997_v24 = vsel %vm869_vm5, %v782_v18, %v933_v20 }
 0x165   :  { %1030 = vst.msk [vmem:[%s1845_s2 + $0xc0] sm:$0xff] %vm1005_vm0, %v965_v23  ;;  %1062 = vst.msk [vmem:[%s1845_s2 + $0x1c0] sm:$0xff] %vm1005_vm0, %v997_v24  ;;  %v657_v25 = vpop.f32.mrf.mxu0  ;;  %v785_v26 = vpop.f32.mrf.mxu1 }
 0x166   :  { %vm838_vm6 = vcmp.ge.f32.partialorder %v657_v25, 0.0  ;;  %v902_v27 = vmul.f32 0.2, %v657_v25  ;;  %vm870_vm7 = vcmp.ge.f32.partialorder %v785_v26, 0.0  ;;  %v934_v28 = vmul.f32 0.2, %v785_v26 }
 0x167   :  { %v659_v29 = vpop.f32.mrf.mxu0  ;;  %v787_v30 = vpop.f32.mrf.mxu1 }
 0x168   :  { %v966_v31 = vsel %vm838_vm6, %v657_v25, %v902_v27  ;;  %v998_v32 = vsel %vm870_vm7, %v785_v26, %v934_v28 }
 0x169   :  { %1031 = vst.msk [vmem:[%s1845_s2 + $0xc8] sm:$0xff] %vm1005_vm0, %v966_v31  ;;  %1063 = vst.msk [vmem:[%s1845_s2 + $0x1c8] sm:$0xff] %vm1005_vm0, %v998_v32  ;;  %v662_v33 = vpop.f32.mrf.mxu0  ;;  %v790_v34 = vpop.f32.mrf.mxu1 }
 0x16a   :  { %vm839_vm8 = vcmp.ge.f32.partialorder %v662_v33, 0.0  ;;  %v903_v35 = vmul.f32 0.2, %v662_v33  ;;  %vm871_vm9 = vcmp.ge.f32.partialorder %v790_v34, 0.0  ;;  %v935_v36 = vmul.f32 0.2, %v790_v34 }
 0x16b   :  { %v664_v37 = vpop.f32.mrf.mxu0  ;;  %v792_v38 = vpop.f32.mrf.mxu1 }
 0x16c   :  { %v967_v39 = vsel %vm839_vm8, %v662_v33, %v903_v35  ;;  %v999_v40 = vsel %vm871_vm9, %v790_v34, %v935_v36 }
 0x16d   :  { %1032 = vst.msk [vmem:[%s1845_s2 + $0xd0] sm:$0xff] %vm1005_vm0, %v967_v39  ;;  %1064 = vst.msk [vmem:[%s1845_s2 + $0x1d0] sm:$0xff] %vm1005_vm0, %v999_v40  ;;  %v665_v41 = vpop.f32.mrf.mxu0  ;;  %v793_v42 = vpop.f32.mrf.mxu1 }
 0x16e   :  { %vm840_vm10 = vcmp.ge.f32.partialorder %v665_v41, 0.0  ;;  %v904_v43 = vmul.f32 0.2, %v665_v41  ;;  %vm872_vm11 = vcmp.ge.f32.partialorder %v793_v42, 0.0  ;;  %v936_v44 = vmul.f32 0.2, %v793_v42 }
 0x16f   :  { %v667_v45 = vpop.f32.mrf.mxu0  ;;  %v795_v46 = vpop.f32.mrf.mxu1 }
 0x170   :  { %v968_v47 = vsel %vm840_vm10, %v665_v41, %v904_v43  ;;  %v1000_v48 = vsel %vm872_vm11, %v793_v42, %v936_v44 }
 0x171   :  { %1033 = vst.msk [vmem:[%s1845_s2 + $0xd8] sm:$0xff] %vm1005_vm0, %v968_v47  ;;  %1065 = vst.msk [vmem:[%s1845_s2 + $0x1d8] sm:$0xff] %vm1005_vm0, %v1000_v48  ;;  %v670_v49 = vpop.f32.mrf.mxu0  ;;  %v798_v50 = vpop.f32.mrf.mxu1 }
 0x172   :  { %vm841_vm12 = vcmp.ge.f32.partialorder %v670_v49, 0.0  ;;  %v905_v51 = vmul.f32 0.2, %v670_v49  ;;  %vm873_vm13 = vcmp.ge.f32.partialorder %v798_v50, 0.0  ;;  %v937_v52 = vmul.f32 0.2, %v798_v50 }
 0x173   :  { %v672_v53 = vpop.f32.mrf.mxu0  ;;  %v800_v54 = vpop.f32.mrf.mxu1 }
 0x174   :  { %v969_v55 = vsel %vm841_vm12, %v670_v49, %v905_v51  ;;  %v1001_v56 = vsel %vm873_vm13, %v798_v50, %v937_v52 }
 0x175   :  { %1034 = vst.msk [vmem:[%s1845_s2 + $0xe0] sm:$0xff] %vm1005_vm0, %v969_v55  ;;  %1066 = vst.msk [vmem:[%s1845_s2 + $0x1e0] sm:$0xff] %vm1005_vm0, %v1001_v56  ;;  %v673_v57 = vpop.f32.mrf.mxu0  ;;  %v801_v58 = vpop.f32.mrf.mxu1 }
 0x176   :  { %vm842_vm14 = vcmp.ge.f32.partialorder %v673_v57, 0.0  ;;  %v906_v59 = vmul.f32 0.2, %v673_v57  ;;  %vm874_vm15 = vcmp.ge.f32.partialorder %v801_v58, 0.0  ;;  %v938_v60 = vmul.f32 0.2, %v801_v58 }
 0x177   :  { %v675_v61 = vpop.f32.mrf.mxu0  ;;  %v803_v62 = vpop.f32.mrf.mxu1 }
 0x178   :  { %v970_v63 = vsel %vm842_vm14, %v673_v57, %v906_v59  ;;  %v1002_v0 = vsel %vm874_vm15, %v801_v58, %v938_v60 }
 0x179   :  { %1035 = vst.msk [vmem:[%s1845_s2 + $0xe8] sm:$0xff] %vm1005_vm0, %v970_v63  ;;  %1067 = vst.msk [vmem:[%s1845_s2 + $0x1e8] sm:$0xff] %vm1005_vm0, %v1002_v0  ;;  %v678_v1 = vpop.f32.mrf.mxu0  ;;  %v806_v2 = vpop.f32.mrf.mxu1 }
 0x17a   :  { %vm843_vm1 = vcmp.ge.f32.partialorder %v678_v1, 0.0  ;;  %v907_v3 = vmul.f32 0.2, %v678_v1  ;;  %vm875_vm2 = vcmp.ge.f32.partialorder %v806_v2, 0.0  ;;  %v939_v4 = vmul.f32 0.2, %v806_v2 }
 0x17b   :  { %v680_v5 = vpop.f32.mrf.mxu0  ;;  %v808_v6 = vpop.f32.mrf.mxu1 }
 0x17c   :  { %v971_v7 = vsel %vm843_vm1, %v678_v1, %v907_v3  ;;  %v1003_v8 = vsel %vm875_vm2, %v806_v2, %v939_v4 }
 0x17d   :  { %1036 = vst.msk [vmem:[%s1845_s2 + $0xf0] sm:$0xff] %vm1005_vm0, %v971_v7  ;;  %1068 = vst.msk [vmem:[%s1845_s2 + $0x1f0] sm:$0xff] %vm1005_vm0, %v1003_v8  ;;  %v681_v9 = vpop.f32.mrf.mxu0  ;;  %v809_v10 = vpop.f32.mrf.mxu1 }
 0x17e   :  { %vm844_vm3 = vcmp.ge.f32.partialorder %v681_v9, 0.0  ;;  %v908_v11 = vmul.f32 0.2, %v681_v9  ;;  %vm876_vm4 = vcmp.ge.f32.partialorder %v809_v10, 0.0  ;;  %v940_v12 = vmul.f32 0.2, %v809_v10 }
 0x17f   :  { %v683_v13 = vpop.f32.mrf.mxu0  ;;  %v811_v14 = vpop.f32.mrf.mxu1 }
 0x180   :  { %v972_v15 = vsel %vm844_vm3, %v681_v9, %v908_v11  ;;  %v1004_v16 = vsel %vm876_vm4, %v809_v10, %v940_v12 }
 0x181   :  { %1037 = vst.msk [vmem:[%s1845_s2 + $0xf8] sm:$0xff] %vm1005_vm0, %v972_v15  ;;  %1069 = vst.msk [vmem:[%s1845_s2 + $0x1f8] sm:$0xff] %vm1005_vm0, %v1004_v16 }

// kernel: _lambda_.14
= control target key start
LH: loop header
LB: loop body
LE: loop exit
PB: predicated region body
PF: predicated region fallthrough
CT: control target
= control target key end

     0   :  { %vm225_vm0 = vcmask 261120   ;;  %s411_s1 = inlined_call_operand.vmem [shape: bf16[256,32], index: 1, kind: input, shape index: {}]   ;;  %s412_s0 = inlined_call_operand.vmem [shape: bf16[32,256], index: 0, kind: input, shape index: {}]   ;;  %s413_s2 = inlined_call_operand.vmem [shape: f32[32,32], index: 2, kind: output, shape index: {}]  }
   0x1   :  { %v298_v0 = vld [vmem:[%s411_s1 + $0x78] sm:$0xff]   ;;  %v300_v2 = vld [vmem:[%s411_s1 + $0x70] sm:$0xff]   ;;  %v302_v4 = vld [vmem:[%s411_s1 + $0x68] sm:$0xff]  }
   0x2   :  { %v299_v1 = vld [vmem:[%s411_s1 + $0x38] sm:$0xff]   ;;  %254 = vmatprep.subr.bf16.mxu0 %v298_v0  ;;  %282 = vmatprep.subr.bf16.mxu1 %v298_v0  ;;  %v301_v3 = vld [vmem:[%s411_s1 + $0x30] sm:$0xff]   ;;  %v303_v5 = vld [vmem:[%s411_s1 + $0x28] sm:$0xff]  }
   0x3   :  { %255 = vmatpush3.bf16.msra.mxu0 %v299_v1  ;;  %290 = vmatpush3.bf16.msra.mxu1 %v299_v1  ;;  %v304_v6 = vld [vmem:[%s411_s1 + $0x60] sm:$0xff]   ;;  %v306_v8 = vld [vmem:[%s411_s1 + $0x58] sm:$0xff]   ;;  %v308_v10 = vld [vmem:[%s411_s1 + $0x50] sm:$0xff]  }
   0x4   :  { %256 = vmatprep.subr.bf16.mxu0 %v300_v2  ;;  %283 = vmatprep.subr.bf16.mxu1 %v300_v2  ;;  %v305_v7 = vld [vmem:[%s411_s1 + $0x20] sm:$0xff]   ;;  %v307_v9 = vld [vmem:[%s411_s1 + $0x18] sm:$0xff]   ;;  %v309_v13 = vld [vmem:[%s411_s1 + $0x10] sm:$0xff]  }
   0x5   :  { %v316_v11 = vld [vmem:[%s412_s0 + $0x4] ss:$8 sps:$4 sm:$0xff]   ;;  %v319_v12 = vld [vmem:[%s412_s0 + $0x14] ss:$8 sps:$4 sm:$0xff]   ;;  %v314_v18 = vld [vmem:[%s412_s0] ss:$8 sps:$4 sm:$0xff]  }
   0x6   :  { %v310_v14 = vld [vmem:[%s411_s1 + $0x48] sm:$0xff]   ;;  %196 = vmatprep.mubr.bf16.mxu0 %v316_v11  ;;  %204 = vmatprep.mubr.bf16.mxu1 %v319_v12  ;;  %v312_v16 = vld [vmem:[%s411_s1 + $0x40] sm:$0xff]   ;;  %v317_v19 = vld [vmem:[%s412_s0 + $0x10] ss:$8 sps:$4 sm:$0xff]  }
   0x7   :  { %257 = vmatpush3.bf16.msra.mxu0 %v301_v3  ;;  %291 = vmatpush3.bf16.msra.mxu1 %v301_v3  ;;  %v311_v15 = vld [vmem:[%s411_s1 + $0x8] sm:$0xff]   ;;  %v313_v17 = vld [vmem:[%s411_s1] sm:$0xff]  }
   0x8   :  { %258 = vmatprep.subr.bf16.mxu0 %v302_v4  ;;  %284 = vmatprep.subr.bf16.mxu1 %v302_v4 }
   0xb   :  { %259 = vmatpush3.bf16.msra.mxu0 %v303_v5  ;;  %292 = vmatpush3.bf16.msra.mxu1 %v303_v5 }
   0xc   :  { %260 = vmatprep.subr.bf16.mxu0 %v304_v6  ;;  %285 = vmatprep.subr.bf16.mxu1 %v304_v6 }
   0xf   :  { %261 = vmatpush3.bf16.msra.mxu0 %v305_v7  ;;  %293 = vmatpush3.bf16.msra.mxu1 %v305_v7 }
  0x10   :  { %262 = vmatprep.subr.bf16.mxu0 %v306_v8  ;;  %286 = vmatprep.subr.bf16.mxu1 %v306_v8 }
  0x13   :  { %263 = vmatpush3.bf16.msra.mxu0 %v307_v9  ;;  %294 = vmatpush3.bf16.msra.mxu1 %v307_v9 }
  0x14   :  { %264 = vmatprep.subr.bf16.mxu0 %v308_v10  ;;  %287 = vmatprep.subr.bf16.mxu1 %v308_v10 }
  0x17   :  { %265 = vmatpush3.bf16.msra.mxu0 %v309_v13  ;;  %295 = vmatpush3.bf16.msra.mxu1 %v309_v13 }
  0x18   :  { %266 = vmatprep.subr.bf16.mxu0 %v310_v14  ;;  %288 = vmatprep.subr.bf16.mxu1 %v310_v14 }
  0x1b   :  { %267 = vmatpush3.bf16.msra.mxu0 %v311_v15  ;;  %296 = vmatpush3.bf16.msra.mxu1 %v311_v15 }
  0x1c   :  { %268 = vmatprep.subr.bf16.mxu0 %v312_v16  ;;  %289 = vmatprep.subr.bf16.mxu1 %v312_v16 }
  0x1f   :  { %269 = vmatpush3.bf16.msra.mxu0 %v313_v17  ;;  %297 = vmatpush3.bf16.msra.mxu1 %v313_v17 }
  0x22   :  { %197 = vmatmul.mubr.bf16.vlgmr.msra.gmra.mxu0 %v314_v18  ;;  %205 = vmatmul.mubr.bf16.vlgmr.msra.gmra.mxu1 %v317_v19 }
  0xe2   :  { %v270_v20 = vpop.f32.mrf.mxu0  ;;  %v276_v21 = vpop.f32.mrf.mxu1 }
  0xe4   :  { %v271_v22 = vpop.f32.mrf.mxu0  ;;  %v277_v23 = vpop.f32.mrf.mxu1 }
  0xe5   :  { %v272_v24 = vadd.f32 %v271_v22, %v270_v20  ;;  %v278_v25 = vadd.f32 %v277_v23, %v276_v21 }
  0xe6   :  { %v273_v26 = vpop.f32.mrf.mxu0  ;;  %v279_v27 = vpop.f32.mrf.mxu1 }
  0xe7   :  { %vm213_vm1 = vcmp.ge.f32.partialorder %v272_v24, 0.0  ;;  %v217_v28 = vmul.f32 0.2, %v272_v24  ;;  %vm215_vm2 = vcmp.ge.f32.partialorder %v278_v25, 0.0  ;;  %v219_v29 = vmul.f32 0.2, %v278_v25 }
  0xe8   :  { %v274_v30 = vpop.f32.mrf.mxu0  ;;  %v280_v31 = vpop.f32.mrf.mxu1 }
  0xe9   :  { %v221_v32 = vsel %vm213_vm1, %v272_v24, %v217_v28  ;;  %v223_v33 = vsel %vm215_vm2, %v278_v25, %v219_v29  ;;  %v275_v34 = vadd.f32 %v274_v30, %v273_v26  ;;  %v281_v35 = vadd.f32 %v280_v31, %v279_v27 }
  0xea   :  { %226 = vst.msk [vmem:[%s413_s2] sm:$0xff] %vm225_vm0, %v221_v32  ;;  %228 = vst.msk [vmem:[%s413_s2 + $0x10] sm:$0xff] %vm225_vm0, %v223_v33 }
  0xeb   :  { %vm214_vm3 = vcmp.ge.f32.partialorder %v275_v34, 0.0  ;;  %v218_v36 = vmul.f32 0.2, %v275_v34  ;;  %vm216_vm4 = vcmp.ge.f32.partialorder %v281_v35, 0.0  ;;  %v220_v37 = vmul.f32 0.2, %v281_v35 }
  0xed   :  { %v222_v38 = vsel %vm214_vm3, %v275_v34, %v218_v36  ;;  %v224_v39 = vsel %vm216_vm4, %v281_v35, %v220_v37 }
  0xee   :  { %227 = vst.msk [vmem:[%s413_s2 + $0x8] sm:$0xff] %vm225_vm0, %v222_v38  ;;  %229 = vst.msk [vmem:[%s413_s2 + $0x18] sm:$0xff] %vm225_vm0, %v224_v39 }

// kernel: _lambda_.15
= control target key start
LH: loop header
LB: loop body
LE: loop exit
PB: predicated region body
PF: predicated region fallthrough
CT: control target
= control target key end

     0   :  { %vm367_vm1 = vcmask 523264   ;;  %s609_s1 = inlined_call_operand.vmem [shape: bf16[512,64], index: 1, kind: input, shape index: {}]   ;;  %s610_s0 = inlined_call_operand.vmem [shape: bf16[8,512], index: 0, kind: input, shape index: {}]   ;;  %s611_s2 = inlined_call_operand.vmem [shape: f32[8,64], index: 2, kind: output, shape index: {}]  }
   0x1   :  { %v453_v0 = vld [vmem:[%s609_s1 + $0x78] sm:$0xff]   ;;  %v457_v4 = vld [vmem:[%s609_s1 + $0x70] sm:$0xff]   ;;  %v461_v8 = vld [vmem:[%s609_s1 + $0x68] sm:$0xff]  }
   0x2   :  { %v454_v1 = vld [vmem:[%s609_s1 + $0xf8] sm:$0xff]   ;;  %409 = vmatprep.subr.bf16.mxu0 %v453_v0  ;;  %v458_v5 = vld [vmem:[%s609_s1 + $0xf0] sm:$0xff]   ;;  %v462_v9 = vld [vmem:[%s609_s1 + $0xe8] sm:$0xff]  }
   0x3   :  { %v455_v2 = vld [vmem:[%s609_s1 + $0x38] sm:$0xff]   ;;  %431 = vmatprep.subr.bf16.mxu1 %v454_v1  ;;  %v459_v6 = vld [vmem:[%s609_s1 + $0x30] sm:$0xff]   ;;  %v463_v10 = vld [vmem:[%s609_s1 + $0x28] sm:$0xff]  }
   0x4   :  { %v456_v3 = vld [vmem:[%s609_s1 + $0xb8] sm:$0xff]   ;;  %410 = vmatpush3.bf16.msra.mxu0 %v455_v2  ;;  %v460_v7 = vld [vmem:[%s609_s1 + $0xb0] sm:$0xff]   ;;  %v464_v11 = vld [vmem:[%s609_s1 + $0xa8] sm:$0xff]  }
   0x5   :  { %432 = vmatpush3.bf16.msra.mxu1 %v456_v3  ;;  %411 = vmatprep.subr.bf16.mxu0 %v457_v4  ;;  %v465_v12 = vld [vmem:[%s609_s1 + $0x60] sm:$0xff]   ;;  %v469_v16 = vld [vmem:[%s609_s1 + $0x58] sm:$0xff]   ;;  %v473_v20 = vld [vmem:[%s609_s1 + $0x50] sm:$0xff]  }
   0x6   :  { %433 = vmatprep.subr.bf16.mxu1 %v458_v5  ;;  %v466_v13 = vld [vmem:[%s609_s1 + $0xe0] sm:$0xff]   ;;  %v470_v17 = vld [vmem:[%s609_s1 + $0xd8] sm:$0xff]   ;;  %v474_v21 = vld [vmem:[%s609_s1 + $0xd0] sm:$0xff]  }
   0x7   :  { %v467_v14 = vld [vmem:[%s609_s1 + $0x20] sm:$0xff]   ;;  %v471_v18 = vld [vmem:[%s609_s1 + $0x18] sm:$0xff]   ;;  %v475_v22 = vld [vmem:[%s609_s1 + $0x10] sm:$0xff]  }
   0x8   :  { %412 = vmatpush3.bf16.msra.mxu0 %v459_v6  ;;  %v468_v15 = vld [vmem:[%s609_s1 + $0xa0] sm:$0xff]   ;;  %v472_v19 = vld [vmem:[%s609_s1 + $0x98] sm:$0xff]   ;;  %v476_v23 = vld [vmem:[%s609_s1 + $0x90] sm:$0xff]  }
   0x9   :  { %434 = vmatpush3.bf16.msra.mxu1 %v460_v7  ;;  %413 = vmatprep.subr.bf16.mxu0 %v461_v8  ;;  %v477_v24 = vld [vmem:[%s609_s1 + $0x48] sm:$0xff]   ;;  %v481_v28 = vld [vmem:[%s609_s1 + $0x40] sm:$0xff]  }
   0xa   :  { %435 = vmatprep.subr.bf16.mxu1 %v462_v9  ;;  %v478_v25 = vld [vmem:[%s609_s1 + $0xc8] sm:$0xff]   ;;  %v482_v29 = vld [vmem:[%s609_s1 + $0xc0] sm:$0xff]  }
   0xb   :  { %v479_v26 = vld [vmem:[%s609_s1 + $0x8] sm:$0xff]   ;;  %v483_v30 = vld [vmem:[%s609_s1] sm:$0xff]  }
   0xc   :  { %414 = vmatpush3.bf16.msra.mxu0 %v463_v10  ;;  %v480_v27 = vld [vmem:[%s609_s1 + $0x88] sm:$0xff]   ;;  %v484_v31 = vld [vmem:[%s609_s1 + $0x80] sm:$0xff]  }
   0xd   :  { %436 = vmatpush3.bf16.msra.mxu1 %v464_v11  ;;  %415 = vmatprep.subr.bf16.mxu0 %v465_v12  ;;  %v12_v32 = vld [vmem:[%s610_s0] sm:$0xff]  ;;  %v13_v33 = vld [vmem:[%s610_s0 + $0x8] sm:$0xff] }
   0xe   :  { %437 = vmatprep.subr.bf16.mxu1 %v466_v13  ;;  %v373_v34 = vcombine.low %v12_v32, %v12_v32  ;;  %v374_v35 = vcombine.high %v12_v32, %v12_v32  ;;  %v375_v36 = vcombine.low %v13_v33, %v13_v33  ;;  %v376_v37 = vcombine.high %v13_v33, %v13_v33 }
  0x10   :  { %416 = vmatpush3.bf16.msra.mxu0 %v467_v14  ;;  %316 = vmatprep.mubr.bf16.mxu0 %v374_v35 }
  0x11   :  { %438 = vmatpush3.bf16.msra.mxu1 %v468_v15  ;;  %417 = vmatprep.subr.bf16.mxu0 %v469_v16 }
  0x12   :  { %439 = vmatprep.subr.bf16.mxu1 %v470_v17  ;;  %356 = vmatprep.mubr.bf16.mxu1 %v376_v37 }
  0x14   :  { %418 = vmatpush3.bf16.msra.mxu0 %v471_v18 }
  0x15   :  { %440 = vmatpush3.bf16.msra.mxu1 %v472_v19  ;;  %419 = vmatprep.subr.bf16.mxu0 %v473_v20 }
  0x16   :  { %441 = vmatprep.subr.bf16.mxu1 %v474_v21 }
  0x18   :  { %420 = vmatpush3.bf16.msra.mxu0 %v475_v22 }
  0x19   :  { %442 = vmatpush3.bf16.msra.mxu1 %v476_v23  ;;  %421 = vmatprep.subr.bf16.mxu0 %v477_v24 }
  0x1a   :  { %443 = vmatprep.subr.bf16.mxu1 %v478_v25 }
  0x1c   :  { %422 = vmatpush3.bf16.msra.mxu0 %v479_v26 }
  0x1d   :  { %444 = vmatpush3.bf16.msra.mxu1 %v480_v27  ;;  %423 = vmatprep.subr.bf16.mxu0 %v481_v28 }
  0x1e   :  { %445 = vmatprep.subr.bf16.mxu1 %v482_v29 }
  0x20   :  { %424 = vmatpush3.bf16.msra.mxu0 %v483_v30 }
  0x21   :  { %446 = vmatpush3.bf16.msra.mxu1 %v484_v31 }
  0x23   :  { %317 = vmatmul.mubr.bf16.vlgmr.msra.gmra.mxu0 %v373_v34 }
  0x24   :  { %357 = vmatmul.mubr.bf16.vlgmr.msra.gmra.mxu1 %v375_v36 }
  0xe3   :  { %v425_v38 = vpop.f32.mrf.mxu0 }
  0xe4   :  { %v447_v39 = vpop.f32.mrf.mxu1 }
  0xe5   :  { %v426_v40 = vpop.f32.mrf.mxu0 }
  0xe6   :  { %v448_v41 = vpop.f32.mrf.mxu1  ;;  %v427_v42 = vadd.f32 %v426_v40, %v425_v38 }
  0xe7   :  { %v449_v43 = vadd.f32 %v448_v41, %v447_v39  ;;  %v428_v44 = vpop.f32.mrf.mxu0 }
  0xe8   :  { %v450_v45 = vpop.f32.mrf.mxu1 }
  0xe9   :  { %v359_v46 = vadd.f32 %v449_v43, %v427_v42  ;;  %v429_v47 = vpop.f32.mrf.mxu0 }
  0xea   :  { %v451_v48 = vpop.f32.mrf.mxu1 }
  0xeb   :  { %vm364_vm0 = vcmp.ge.f32.partialorder %v359_v46, 0.0  ;;  %v365_v49 = vmul.f32 0.2, %v359_v46 }
  0xed   :  { %v366_v50 = vsel %vm364_vm0, %v359_v46, %v365_v49 }
  0xee   :  { %368 = vst.msk [vmem:[%s611_s2] sm:$0xff] %vm367_vm1, %v366_v50 }

// kernel: _lambda_.16
= control target key start
LH: loop header
LB: loop body
LE: loop exit
PB: predicated region body
PF: predicated region fallthrough
CT: control target
= control target key end

     0   :  { %v969_v22 = vmov 1966171168   ;;  %v146_v24 = vlaneseq  ;;  %s1196_s1 = inlined_call_operand.vmem [shape: bf16[1024,128], index: 1, kind: input, shape index: {}]   ;;  %s1197_s0 = inlined_call_operand.vmem [shape: bf16[2,1024], index: 0, kind: input, shape index: {}]   ;;  %s1198_s2 = inlined_call_operand.vmem [shape: f32[2,128], index: 2, kind: output, shape index: {}]  }
   0x1   :  { %v904_v0 = vld [vmem:[%s1196_s1 + $0x78] sm:$0xff]   ;;  %v908_v4 = vld [vmem:[%s1196_s1 + $0x70] sm:$0xff]   ;;  %v912_v8 = vld [vmem:[%s1196_s1 + $0x68] sm:$0xff]   ;;  %v144_v23 = vunpack.c.l.s4 %v969_v22 }
   0x2   :  { %v905_v1 = vld [vmem:[%s1196_s1 + $0xf8] sm:$0xff]   ;;  %815 = vmatprep.subr.bf16.mxu0 %v904_v0  ;;  %v909_v5 = vld [vmem:[%s1196_s1 + $0xf0] sm:$0xff]   ;;  %v913_v9 = vld [vmem:[%s1196_s1 + $0xe8] sm:$0xff]   ;;  %v147_v30 = vshrl.u32 %v146_v24, 7 }
   0x3   :  { %v906_v2 = vld [vmem:[%s1196_s1 + $0x38] sm:$0xff]   ;;  %837 = vmatprep.subr.bf16.mxu1 %v905_v1  ;;  %v910_v6 = vld [vmem:[%s1196_s1 + $0x30] sm:$0xff]   ;;  %v914_v10 = vld [vmem:[%s1196_s1 + $0x28] sm:$0xff]   ;;  %v145_v29 = vunpack.c.0.s8 %v144_v23 }
   0x4   :  { %v907_v3 = vld [vmem:[%s1196_s1 + $0xb8] sm:$0xff]   ;;  %816 = vmatpush3.bf16.msra.mxu0 %v906_v2  ;;  %v911_v7 = vld [vmem:[%s1196_s1 + $0xb0] sm:$0xff]   ;;  %v915_v11 = vld [vmem:[%s1196_s1 + $0xa8] sm:$0xff]  }
   0x5   :  { %838 = vmatpush3.bf16.msra.mxu1 %v907_v3  ;;  %817 = vmatprep.subr.bf16.mxu0 %v908_v4  ;;  %v916_v12 = vld [vmem:[%s1196_s1 + $0x60] sm:$0xff]   ;;  %v920_v16 = vld [vmem:[%s1196_s1 + $0x58] sm:$0xff]   ;;  %v924_v20 = vld [vmem:[%s1196_s1 + $0x50] sm:$0xff]   ;;  %v1075_v35 = vsub.s32 %v145_v29, %v147_v30 }
   0x6   :  { %839 = vmatprep.subr.bf16.mxu1 %v909_v5  ;;  %v917_v13 = vld [vmem:[%s1196_s1 + $0xe0] sm:$0xff]   ;;  %v921_v17 = vld [vmem:[%s1196_s1 + $0xd8] sm:$0xff]   ;;  %v925_v21 = vld [vmem:[%s1196_s1 + $0xd0] sm:$0xff]  }
   0x7   :  { %v918_v14 = vld [vmem:[%s1196_s1 + $0x20] sm:$0xff]   ;;  %v922_v18 = vld [vmem:[%s1196_s1 + $0x18] sm:$0xff]   ;;  %v926_v25 = vld [vmem:[%s1196_s1 + $0x10] sm:$0xff]  }
   0x8   :  { %818 = vmatpush3.bf16.msra.mxu0 %v910_v6  ;;  %v919_v15 = vld [vmem:[%s1196_s1 + $0xa0] sm:$0xff]   ;;  %v923_v19 = vld [vmem:[%s1196_s1 + $0x98] sm:$0xff]   ;;  %v927_v26 = vld [vmem:[%s1196_s1 + $0x90] sm:$0xff]  }
   0x9   :  { %840 = vmatpush3.bf16.msra.mxu1 %v911_v7  ;;  %819 = vmatprep.subr.bf16.mxu0 %v912_v8  ;;  %v928_v27 = vld [vmem:[%s1196_s1 + $0x48] sm:$0xff]   ;;  %v932_v33 = vld [vmem:[%s1196_s1 + $0x40] sm:$0xff]   ;;  %v937_v41 = vld [vmem:[%s1196_s1 + $0x178] sm:$0xff]  }
   0xa   :  { %841 = vmatprep.subr.bf16.mxu1 %v913_v9  ;;  %v929_v28 = vld [vmem:[%s1196_s1 + $0xc8] sm:$0xff]   ;;  %v933_v34 = vld [vmem:[%s1196_s1 + $0xc0] sm:$0xff]   ;;  %v938_v42 = vld [vmem:[%s1196_s1 + $0x1f8] sm:$0xff]  }
   0xb   :  { %v930_v31 = vld [vmem:[%s1196_s1 + $0x8] sm:$0xff]   ;;  %v934_v36 = vld [vmem:[%s1196_s1] sm:$0xff]   ;;  %v939_v47 = vld [vmem:[%s1196_s1 + $0x138] sm:$0xff]  }
   0xc   :  { %820 = vmatpush3.bf16.msra.mxu0 %v914_v10  ;;  %v931_v32 = vld [vmem:[%s1196_s1 + $0x88] sm:$0xff]   ;;  %v935_v37 = vld [vmem:[%s1196_s1 + $0x80] sm:$0xff]   ;;  %v941_v50 = vld [vmem:[%s1196_s1 + $0x170] sm:$0xff]  }
   0xd   :  { %842 = vmatpush3.bf16.msra.mxu1 %v915_v11  ;;  %821 = vmatprep.subr.bf16.mxu0 %v916_v12  ;;  %v12_v38 = vld [vmem:[%s1197_s0] sm:$0xff]  ;;  %v940_v52 = vld [vmem:[%s1196_s1 + $0x1b8] sm:$0xff]   ;;  %v942_v54 = vld [vmem:[%s1196_s1 + $0x1f0] sm:$0xff]  }
   0xe   :  { %843 = vmatprep.subr.bf16.mxu1 %v917_v13  ;;  %v142_v39 = vcombine.high %v12_v38, %v12_v38  ;;  %v149_v40 = vrot.slane %v12_v38, %v1075_v35  ;;  %v943_v55 = vld [vmem:[%s1196_s1 + $0x130] sm:$0xff]   ;;  %v945_v57 = vld [vmem:[%s1196_s1 + $0x168] sm:$0xff]   ;;  %v949_v61 = vld [vmem:[%s1196_s1 + $0x160] sm:$0xff]  }
   0xf   :  { %v944_v58 = vld [vmem:[%s1196_s1 + $0x1b0] sm:$0xff]   ;;  %v946_v59 = vld [vmem:[%s1196_s1 + $0x1e8] sm:$0xff]   ;;  %v950_v63 = vld [vmem:[%s1196_s1 + $0x1e0] sm:$0xff]  }
  0x10   :  { %822 = vmatpush3.bf16.msra.mxu0 %v918_v14  ;;  %v157_v43 = vcombine.high %v149_v40, %v149_v40  ;;  %v165_v44 = vrot.slane %v149_v40, %v1075_v35  ;;  %v1095_v45 = vrot.slane %v142_v39, %v1075_v35  ;;  %v947_v60 = vld [vmem:[%s1196_s1 + $0x128] sm:$0xff]   ;;  %v951_v0 = vld [vmem:[%s1196_s1 + $0x120] sm:$0xff]   ;;  %v953_v1 = vld [vmem:[%s1196_s1 + $0x158] sm:$0xff]  }
  0x11   :  { %844 = vmatpush3.bf16.msra.mxu1 %v919_v15  ;;  %823 = vmatprep.subr.bf16.mxu0 %v920_v16  ;;  %v948_v62 = vld [vmem:[%s1196_s1 + $0x1a8] sm:$0xff]   ;;  %v952_v2 = vld [vmem:[%s1196_s1 + $0x1a0] sm:$0xff]   ;;  %v954_v3 = vld [vmem:[%s1196_s1 + $0x1d8] sm:$0xff]  }
  0x12   :  { %845 = vmatprep.subr.bf16.mxu1 %v921_v17  ;;  %v179_v46 = vrot.slane %v157_v43, %v1075_v35  ;;  %v158_v48 = vcombine.high %v1095_v45, %v1095_v45  ;;  %v187_v49 = vcombine.high %v165_v44, %v165_v44  ;;  %v955_v4 = vld [vmem:[%s1196_s1 + $0x118] sm:$0xff]   ;;  %v957_v5 = vld [vmem:[%s1196_s1 + $0x150] sm:$0xff]   ;;  %v961_v9 = vld [vmem:[%s1196_s1 + $0x148] sm:$0xff]   ;;  %v172_v17 = vrot.slane %v1095_v45, %v1075_v35 }
  0x13   :  { %v956_v6 = vld [vmem:[%s1196_s1 + $0x198] sm:$0xff]   ;;  %v958_v7 = vld [vmem:[%s1196_s1 + $0x1d0] sm:$0xff]   ;;  %v962_v11 = vld [vmem:[%s1196_s1 + $0x1c8] sm:$0xff]  }
  0x14   :  { %824 = vmatpush3.bf16.msra.mxu0 %v922_v18  ;;  %615 = vmatprep.mubr.bf16.mxu0 %v179_v46  ;;  %v189_v51 = vcombine.high %v179_v46, %v179_v46  ;;  %v186_v53 = vrot.slane %v158_v48, %v1075_v35  ;;  %v959_v8 = vld [vmem:[%s1196_s1 + $0x110] sm:$0xff]   ;;  %v963_v12 = vld [vmem:[%s1196_s1 + $0x108] sm:$0xff]   ;;  %v965_v13 = vld [vmem:[%s1196_s1 + $0x140] sm:$0xff]  }
  0x15   :  { %846 = vmatpush3.bf16.msra.mxu1 %v923_v19  ;;  %825 = vmatprep.subr.bf16.mxu0 %v924_v20  ;;  %v960_v10 = vld [vmem:[%s1196_s1 + $0x190] sm:$0xff]   ;;  %v964_v14 = vld [vmem:[%s1196_s1 + $0x188] sm:$0xff]   ;;  %v966_v15 = vld [vmem:[%s1196_s1 + $0x1c0] sm:$0xff]   ;;  %v188_v19 = vcombine.high %v172_v17, %v172_v17 }
  0x16   :  { %847 = vmatprep.subr.bf16.mxu1 %v925_v21  ;;  %655 = vmatprep.mubr.bf16.mxu1 %v189_v51  ;;  %v190_v56 = vcombine.high %v186_v53, %v186_v53  ;;  %v967_v16 = vld [vmem:[%s1196_s1 + $0x100] sm:$0xff]  }
  0x17   :  { %v968_v18 = vld [vmem:[%s1196_s1 + $0x180] sm:$0xff]  }
  0x18   :  { %826 = vmatpush3.bf16.msra.mxu0 %v926_v25 }
  0x19   :  { %848 = vmatpush3.bf16.msra.mxu1 %v927_v26  ;;  %827 = vmatprep.subr.bf16.mxu0 %v928_v27 }
  0x1a   :  { %849 = vmatprep.subr.bf16.mxu1 %v929_v28 }
  0x1c   :  { %828 = vmatpush3.bf16.msra.mxu0 %v930_v31 }
  0x1d   :  { %850 = vmatpush3.bf16.msra.mxu1 %v931_v32  ;;  %829 = vmatprep.subr.bf16.mxu0 %v932_v33 }
  0x1e   :  { %851 = vmatprep.subr.bf16.mxu1 %v933_v34 }
  0x20   :  { %830 = vmatpush3.bf16.msra.mxu0 %v934_v36 }
  0x21   :  { %852 = vmatpush3.bf16.msra.mxu1 %v935_v37  ;;  %859 = vmatprep.subr.bf16.mxu0 %v937_v41 }
  0x22   :  { %881 = vmatprep.subr.bf16.mxu1 %v938_v42 }
  0x23   :  { %616 = vmatmul.mubr.bf16.vlgmr.msra.gmra.mxu0 %v165_v44 }
  0x24   :  { %860 = vmatpush3.bf16.msra.mxu0 %v939_v47  ;;  %656 = vmatmul.mubr.bf16.vlgmr.msra.gmra.mxu1 %v187_v49 }
  0x25   :  { %861 = vmatprep.subr.bf16.mxu0 %v941_v50  ;;  %882 = vmatpush3.bf16.msra.mxu1 %v940_v52 }
  0x26   :  { %695 = vmatprep.mubr.bf16.mxu0 %v186_v53  ;;  %883 = vmatprep.subr.bf16.mxu1 %v942_v54 }
  0x27   :  { %735 = vmatprep.mubr.bf16.mxu1 %v190_v56 }
  0x28   :  { %862 = vmatpush3.bf16.msra.mxu0 %v943_v55 }
  0x29   :  { %863 = vmatprep.subr.bf16.mxu0 %v945_v57  ;;  %884 = vmatpush3.bf16.msra.mxu1 %v944_v58 }
  0x2a   :  { %885 = vmatprep.subr.bf16.mxu1 %v946_v59 }
  0x2c   :  { %864 = vmatpush3.bf16.msra.mxu0 %v947_v60 }
  0x2d   :  { %865 = vmatprep.subr.bf16.mxu0 %v949_v61  ;;  %886 = vmatpush3.bf16.msra.mxu1 %v948_v62 }
  0x2e   :  { %887 = vmatprep.subr.bf16.mxu1 %v950_v63 }
  0x30   :  { %866 = vmatpush3.bf16.msra.mxu0 %v951_v0 }
  0x31   :  { %867 = vmatprep.subr.bf16.mxu0 %v953_v1  ;;  %888 = vmatpush3.bf16.msra.mxu1 %v952_v2 }
  0x32   :  { %889 = vmatprep.subr.bf16.mxu1 %v954_v3 }
  0x34   :  { %868 = vmatpush3.bf16.msra.mxu0 %v955_v4 }
  0x35   :  { %869 = vmatprep.subr.bf16.mxu0 %v957_v5  ;;  %890 = vmatpush3.bf16.msra.mxu1 %v956_v6 }
  0x36   :  { %891 = vmatprep.subr.bf16.mxu1 %v958_v7 }
  0x38   :  { %870 = vmatpush3.bf16.msra.mxu0 %v959_v8 }
  0x39   :  { %871 = vmatprep.subr.bf16.mxu0 %v961_v9  ;;  %892 = vmatpush3.bf16.msra.mxu1 %v960_v10 }
  0x3a   :  { %893 = vmatprep.subr.bf16.mxu1 %v962_v11 }
  0x3c   :  { %872 = vmatpush3.bf16.msra.mxu0 %v963_v12 }
  0x3d   :  { %873 = vmatprep.subr.bf16.mxu0 %v965_v13  ;;  %894 = vmatpush3.bf16.msra.mxu1 %v964_v14 }
  0x3e   :  { %895 = vmatprep.subr.bf16.mxu1 %v966_v15 }
  0x40   :  { %874 = vmatpush3.bf16.msra.mxu0 %v967_v16 }
  0x41   :  { %896 = vmatpush3.bf16.msra.mxu1 %v968_v18 }
  0x43   :  { %696 = vmatmul.mubr.bf16.vlgmr.msra.gmra.mxu0 %v172_v17 }
  0x44   :  { %736 = vmatmul.mubr.bf16.vlgmr.msra.gmra.mxu1 %v188_v19 }
  0xe3   :  { %v831_v20 = vpop.f32.mrf.mxu0 }
  0xe4   :  { %v853_v21 = vpop.f32.mrf.mxu1 }
  0xe5   :  { %v832_v22 = vpop.f32.mrf.mxu0 }
  0xe6   :  { %v854_v23 = vpop.f32.mrf.mxu1  ;;  %v833_v28 = vadd.f32 %v832_v22, %v831_v20 }
  0xe7   :  { %v834_v24 = vpop.f32.mrf.mxu0  ;;  %v855_v29 = vadd.f32 %v854_v23, %v853_v21 }
  0xe8   :  { %v856_v25 = vpop.f32.mrf.mxu1 }
  0xe9   :  { %v835_v26 = vpop.f32.mrf.mxu0  ;;  %v658_v33 = vadd.f32 %v855_v29, %v833_v28 }
  0xea   :  { %v857_v27 = vpop.f32.mrf.mxu1 }
 0x103   :  { %v875_v30 = vpop.f32.mrf.mxu0 }
 0x104   :  { %v897_v31 = vpop.f32.mrf.mxu1 }
 0x105   :  { %v876_v32 = vpop.f32.mrf.mxu0 }
 0x106   :  { %v877_v34 = vadd.f32 %v876_v32, %v875_v30  ;;  %v898_v35 = vpop.f32.mrf.mxu1 }
 0x107   :  { %v878_v36 = vpop.f32.mrf.mxu0  ;;  %v899_v38 = vadd.f32 %v898_v35, %v897_v31 }
 0x108   :  { %v698_v37 = vadd.f32 %v877_v34, %v658_v33  ;;  %v900_v39 = vpop.f32.mrf.mxu1 }
 0x109   :  { %v879_v40 = vpop.f32.mrf.mxu0 }
 0x10a   :  { %v738_v41 = vadd.f32 %v899_v38, %v698_v37  ;;  %v901_v42 = vpop.f32.mrf.mxu1 }
 0x10c   :  { %vm743_vm0 = vcmp.ge.f32.partialorder %v738_v41, 0.0  ;;  %v744_v43 = vmul.f32 0.2, %v738_v41 }
 0x10e   :  { %v745_v44 = vsel %vm743_vm0, %v738_v41, %v744_v43 }
 0x10f   :  { %746 = vst [vmem:[%s1198_s2] sm:$0x3] %v745_v44 }

// kernel: _lambda_.17
= control target key start
LH: loop header
LB: loop body
LE: loop exit
PB: predicated region body
PF: predicated region fallthrough
CT: control target
= control target key end

     0   :  { %v1540_v36 = vmov 1966171168   ;;  %v164_v38 = vlaneseq  ;;  %s2018_s1 = inlined_call_operand.vmem [shape: bf16[1152,256], index: 1, kind: input, shape index: {}]   ;;  %s2019_s0 = inlined_call_operand.vmem [shape: bf16[2,1152], index: 0, kind: input, shape index: {}]   ;;  %s2020_s2 = inlined_call_operand.vmem [shape: f32[2,256], index: 2, kind: output, shape index: {}]  }
   0x1   :  { %v1323_v0 = vld [vmem:[%s2018_s1 + $0x74] ss:$8 sps:$4 sm:$0xff]   ;;  %v1327_v2 = vld [vmem:[%s2018_s1 + $0x70] ss:$8 sps:$4 sm:$0xff]   ;;  %v1329_v4 = vld [vmem:[%s2018_s1 + $0x64] ss:$8 sps:$4 sm:$0xff]   ;;  %v162_v37 = vunpack.c.l.s4 %v1540_v36 }
   0x2   :  { %v1325_v1 = vld [vmem:[%s2018_s1 + $0x174] ss:$8 sps:$4 sm:$0xff]   ;;  %952 = vmatprep.subr.bf16.mxu0 %v1323_v0  ;;  %v1328_v3 = vld [vmem:[%s2018_s1 + $0x170] ss:$8 sps:$4 sm:$0xff]   ;;  %v1331_v5 = vld [vmem:[%s2018_s1 + $0x164] ss:$8 sps:$4 sm:$0xff]  }
   0x3   :  { %993 = vmatprep.subr.bf16.mxu1 %v1325_v1  ;;  %953 = vmatpush1.bf16.msra.mxu0 %v1327_v2  ;;  %v1333_v6 = vld [vmem:[%s2018_s1 + $0x60] ss:$8 sps:$4 sm:$0xff]   ;;  %v1335_v8 = vld [vmem:[%s2018_s1 + $0x54] ss:$8 sps:$4 sm:$0xff]   ;;  %v1339_v10 = vld [vmem:[%s2018_s1 + $0x50] ss:$8 sps:$4 sm:$0xff]   ;;  %v163_v42 = vunpack.c.0.s8 %v162_v37 }
   0x4   :  { %994 = vmatpush1.bf16.msra.mxu1 %v1328_v3  ;;  %954 = vmatprep.subr.bf16.mxu0 %v1329_v4  ;;  %v1334_v7 = vld [vmem:[%s2018_s1 + $0x160] ss:$8 sps:$4 sm:$0xff]   ;;  %v1337_v9 = vld [vmem:[%s2018_s1 + $0x154] ss:$8 sps:$4 sm:$0xff]   ;;  %v1340_v11 = vld [vmem:[%s2018_s1 + $0x150] ss:$8 sps:$4 sm:$0xff]  }
   0x5   :  { %995 = vmatprep.subr.bf16.mxu1 %v1331_v5  ;;  %v1341_v12 = vld [vmem:[%s2018_s1 + $0x44] ss:$8 sps:$4 sm:$0xff]   ;;  %v1345_v14 = vld [vmem:[%s2018_s1 + $0x40] ss:$8 sps:$4 sm:$0xff]   ;;  %v1347_v16 = vld [vmem:[%s2018_s1 + $0x34] ss:$8 sps:$4 sm:$0xff]  }
   0x6   :  { %v1343_v13 = vld [vmem:[%s2018_s1 + $0x144] ss:$8 sps:$4 sm:$0xff]   ;;  %v1346_v15 = vld [vmem:[%s2018_s1 + $0x140] ss:$8 sps:$4 sm:$0xff]   ;;  %v1349_v17 = vld [vmem:[%s2018_s1 + $0x134] ss:$8 sps:$4 sm:$0xff]  }
   0x7   :  { %955 = vmatpush1.bf16.msra.mxu0 %v1333_v6  ;;  %v1351_v18 = vld [vmem:[%s2018_s1 + $0x30] ss:$8 sps:$4 sm:$0xff]   ;;  %v1353_v20 = vld [vmem:[%s2018_s1 + $0x24] ss:$8 sps:$4 sm:$0xff]   ;;  %v1357_v22 = vld [vmem:[%s2018_s1 + $0x20] ss:$8 sps:$4 sm:$0xff]  }
   0x8   :  { %996 = vmatpush1.bf16.msra.mxu1 %v1334_v7  ;;  %956 = vmatprep.subr.bf16.mxu0 %v1335_v8  ;;  %v1352_v19 = vld [vmem:[%s2018_s1 + $0x130] ss:$8 sps:$4 sm:$0xff]   ;;  %v1355_v21 = vld [vmem:[%s2018_s1 + $0x124] ss:$8 sps:$4 sm:$0xff]   ;;  %v1358_v23 = vld [vmem:[%s2018_s1 + $0x120] ss:$8 sps:$4 sm:$0xff]  }
   0x9   :  { %997 = vmatprep.subr.bf16.mxu1 %v1337_v9  ;;  %v1359_v24 = vld [vmem:[%s2018_s1 + $0x14] ss:$8 sps:$4 sm:$0xff]   ;;  %v1363_v26 = vld [vmem:[%s2018_s1 + $0x10] ss:$8 sps:$4 sm:$0xff]   ;;  %v1365_v28 = vld [vmem:[%s2018_s1 + $0x4] ss:$8 sps:$4 sm:$0xff]  }
   0xa   :  { %v1361_v25 = vld [vmem:[%s2018_s1 + $0x114] ss:$8 sps:$4 sm:$0xff]   ;;  %v1364_v27 = vld [vmem:[%s2018_s1 + $0x110] ss:$8 sps:$4 sm:$0xff]   ;;  %v1367_v29 = vld [vmem:[%s2018_s1 + $0x104] ss:$8 sps:$4 sm:$0xff]  }
   0xb   :  { %957 = vmatpush1.bf16.msra.mxu0 %v1339_v10  ;;  %v1369_v30 = vld [vmem:[%s2018_s1] ss:$8 sps:$4 sm:$0xff]   ;;  %v1371_v32 = vld [vmem:[%s2018_s1 + $0xf4] ss:$8 sps:$4 sm:$0xff]   ;;  %v1375_v34 = vld [vmem:[%s2018_s1 + $0xf0] ss:$8 sps:$4 sm:$0xff]  }
   0xc   :  { %998 = vmatpush1.bf16.msra.mxu1 %v1340_v11  ;;  %958 = vmatprep.subr.bf16.mxu0 %v1341_v12  ;;  %v1370_v31 = vld [vmem:[%s2018_s1 + $0x100] ss:$8 sps:$4 sm:$0xff]   ;;  %v1373_v33 = vld [vmem:[%s2018_s1 + $0x1f4] ss:$8 sps:$4 sm:$0xff]   ;;  %v1376_v35 = vld [vmem:[%s2018_s1 + $0x1f0] ss:$8 sps:$4 sm:$0xff]  }
   0xd   :  { %999 = vmatprep.subr.bf16.mxu1 %v1343_v13  ;;  %v1377_v39 = vld [vmem:[%s2018_s1 + $0xe4] ss:$8 sps:$4 sm:$0xff]   ;;  %v1381_v41 = vld [vmem:[%s2018_s1 + $0xe0] ss:$8 sps:$4 sm:$0xff]   ;;  %v165_v43 = vshrl.u32 %v164_v38, 7 }
   0xe   :  { %v1379_v40 = vld [vmem:[%s2018_s1 + $0x1e4] ss:$8 sps:$4 sm:$0xff]   ;;  %v1382_v44 = vld [vmem:[%s2018_s1 + $0x1e0] ss:$8 sps:$4 sm:$0xff]   ;;  %v1383_v45 = vld [vmem:[%s2018_s1 + $0xd4] ss:$8 sps:$4 sm:$0xff]  }
   0xf   :  { %959 = vmatpush1.bf16.msra.mxu0 %v1345_v14  ;;  %v1385_v46 = vld [vmem:[%s2018_s1 + $0x1d4] ss:$8 sps:$4 sm:$0xff]   ;;  %v1387_v47 = vld [vmem:[%s2018_s1 + $0xd0] ss:$8 sps:$4 sm:$0xff]   ;;  %v1689_v49 = vsub.s32 %v163_v42, %v165_v43  ;;  %v1389_v50 = vld [vmem:[%s2018_s1 + $0xc4] ss:$8 sps:$4 sm:$0xff]  }
  0x10   :  { %1000 = vmatpush1.bf16.msra.mxu1 %v1346_v15  ;;  %960 = vmatprep.subr.bf16.mxu0 %v1347_v16  ;;  %v1388_v48 = vld [vmem:[%s2018_s1 + $0x1d0] ss:$8 sps:$4 sm:$0xff]   ;;  %v1391_v51 = vld [vmem:[%s2018_s1 + $0x1c4] ss:$8 sps:$4 sm:$0xff]   ;;  %v1393_v53 = vld [vmem:[%s2018_s1 + $0xc0] ss:$8 sps:$4 sm:$0xff]  }
  0x11   :  { %1001 = vmatprep.subr.bf16.mxu1 %v1349_v17  ;;  %v12_v52 = vld [vmem:[%s2019_s0] sm:$0xff]  ;;  %v1395_v57 = vld [vmem:[%s2018_s1 + $0xb4] ss:$8 sps:$4 sm:$0xff]   ;;  %v1399_v61 = vld [vmem:[%s2018_s1 + $0xb0] ss:$8 sps:$4 sm:$0xff]  }
  0x12   :  { %v160_v54 = vcombine.high %v12_v52, %v12_v52  ;;  %v167_v55 = vrot.slane %v12_v52, %v1689_v49  ;;  %v1394_v56 = vld [vmem:[%s2018_s1 + $0x1c0] ss:$8 sps:$4 sm:$0xff]   ;;  %v1397_v58 = vld [vmem:[%s2018_s1 + $0x1b4] ss:$8 sps:$4 sm:$0xff]   ;;  %v1400_v0 = vld [vmem:[%s2018_s1 + $0x1b0] ss:$8 sps:$4 sm:$0xff]  }
  0x13   :  { %961 = vmatpush1.bf16.msra.mxu0 %v1351_v18  ;;  %v1401_v1 = vld [vmem:[%s2018_s1 + $0xa4] ss:$8 sps:$4 sm:$0xff]   ;;  %v1405_v4 = vld [vmem:[%s2018_s1 + $0xa0] ss:$8 sps:$4 sm:$0xff]   ;;  %v1407_v6 = vld [vmem:[%s2018_s1 + $0x94] ss:$8 sps:$4 sm:$0xff]  }
  0x14   :  { %1002 = vmatpush1.bf16.msra.mxu1 %v1352_v19  ;;  %962 = vmatprep.subr.bf16.mxu0 %v1353_v20  ;;  %v175_v59 = vcombine.high %v167_v55, %v167_v55  ;;  %v174_v60 = vrot.slane %v160_v54, %v1689_v49  ;;  %v1403_v2 = vld [vmem:[%s2018_s1 + $0x1a4] ss:$8 sps:$4 sm:$0xff]   ;;  %v1406_v5 = vld [vmem:[%s2018_s1 + $0x1a0] ss:$8 sps:$4 sm:$0xff]   ;;  %v1409_v7 = vld [vmem:[%s2018_s1 + $0x194] ss:$8 sps:$4 sm:$0xff]   ;;  %v183_v14 = vrot.slane %v167_v55, %v1689_v49 }
  0x15   :  { %1003 = vmatprep.subr.bf16.mxu1 %v1355_v21  ;;  %v1411_v8 = vld [vmem:[%s2018_s1 + $0x90] ss:$8 sps:$4 sm:$0xff]   ;;  %v1413_v10 = vld [vmem:[%s2018_s1 + $0x84] ss:$8 sps:$4 sm:$0xff]   ;;  %v1417_v13 = vld [vmem:[%s2018_s1 + $0x80] ss:$8 sps:$4 sm:$0xff]  }
  0x16   :  { %v197_v62 = vrot.slane %v175_v59, %v1689_v49  ;;  %v1719_v63 = vrot.slane %v174_v60, %v1689_v49  ;;  %v1412_v9 = vld [vmem:[%s2018_s1 + $0x190] ss:$8 sps:$4 sm:$0xff]   ;;  %v1415_v11 = vld [vmem:[%s2018_s1 + $0x184] ss:$8 sps:$4 sm:$0xff]   ;;  %v176_v12 = vcombine.high %v174_v60, %v174_v60  ;;  %v1418_v15 = vld [vmem:[%s2018_s1 + $0x180] ss:$8 sps:$4 sm:$0xff]   ;;  %v205_v19 = vcombine.high %v183_v14, %v183_v14 }
  0x17   :  { %963 = vmatpush1.bf16.msra.mxu0 %v1357_v22  ;;  %v1422_v16 = vld [vmem:[%s2018_s1 + $0x274] ss:$8 sps:$4 sm:$0xff]   ;;  %v1420_v20 = vld [vmem:[%s2018_s1 + $0x270] ss:$8 sps:$4 sm:$0xff]   ;;  %v1428_v22 = vld [vmem:[%s2018_s1 + $0x264] ss:$8 sps:$4 sm:$0xff]  }
  0x18   :  { %1004 = vmatpush1.bf16.msra.mxu1 %v1358_v23  ;;  %964 = vmatprep.subr.bf16.mxu0 %v1359_v24  ;;  %v207_v3 = vcombine.high %v197_v62, %v197_v62  ;;  %v1425_v17 = vld [vmem:[%s2018_s1 + $0x374] ss:$8 sps:$4 sm:$0xff]   ;;  %v204_v18 = vrot.slane %v176_v12, %v1689_v49  ;;  %v1423_v21 = vld [vmem:[%s2018_s1 + $0x370] ss:$8 sps:$4 sm:$0xff]   ;;  %v1431_v23 = vld [vmem:[%s2018_s1 + $0x364] ss:$8 sps:$4 sm:$0xff]  }
  0x19   :  { %1005 = vmatprep.subr.bf16.mxu1 %v1361_v25  ;;  %984 = vmatprep.mubr.bf16.mxu0 %v197_v62  ;;  %v1426_v25 = vld [vmem:[%s2018_s1 + $0x260] ss:$8 sps:$4 sm:$0xff]   ;;  %v1449_v36 = vld [vmem:[%s2018_s1 + $0x334] ss:$8 sps:$4 sm:$0xff]   ;;  %v1444_v37 = vld [vmem:[%s2018_s1 + $0x230] ss:$8 sps:$4 sm:$0xff]  }
  0x1a   :  { %1025 = vmatprep.mubr.bf16.mxu1 %v207_v3  ;;  %v208_v24 = vcombine.high %v204_v18, %v204_v18  ;;  %v1447_v38 = vld [vmem:[%s2018_s1 + $0x330] ss:$8 sps:$4 sm:$0xff]   ;;  %v1453_v42 = vld [vmem:[%s2018_s1 + $0x320] ss:$8 sps:$4 sm:$0xff]   ;;  %v1458_v43 = vld [vmem:[%s2018_s1 + $0x214] ss:$8 sps:$4 sm:$0xff]  }
  0x1b   :  { %965 = vmatpush1.bf16.msra.mxu0 %v1363_v26  ;;  %v1429_v26 = vld [vmem:[%s2018_s1 + $0x360] ss:$8 sps:$4 sm:$0xff]   ;;  %v1470_v52 = vld [vmem:[%s2018_s1 + $0x2f4] ss:$8 sps:$4 sm:$0xff]   ;;  %v1468_v54 = vld [vmem:[%s2018_s1 + $0x2f0] ss:$8 sps:$4 sm:$0xff]  }
  0x1c   :  { %1006 = vmatpush1.bf16.msra.mxu1 %v1364_v27  ;;  %966 = vmatprep.subr.bf16.mxu0 %v1365_v28  ;;  %v1434_v27 = vld [vmem:[%s2018_s1 + $0x254] ss:$8 sps:$4 sm:$0xff]   ;;  %v1471_v55 = vld [vmem:[%s2018_s1 + $0x3f0] ss:$8 sps:$4 sm:$0xff]   ;;  %v1474_v60 = vld [vmem:[%s2018_s1 + $0x2e0] ss:$8 sps:$4 sm:$0xff]  }
  0x1d   :  { %1007 = vmatprep.subr.bf16.mxu1 %v1367_v29  ;;  %v1437_v28 = vld [vmem:[%s2018_s1 + $0x354] ss:$8 sps:$4 sm:$0xff]   ;;  %v1432_v29 = vld [vmem:[%s2018_s1 + $0x250] ss:$8 sps:$4 sm:$0xff]   ;;  %v1488_v3 = vld [vmem:[%s2018_s1 + $0x2c4] ss:$8 sps:$4 sm:$0xff]  }
  0x1e   :  { %v1482_v62 = vld [vmem:[%s2018_s1 + $0x2d4] ss:$8 sps:$4 sm:$0xff]   ;;  %v1503_v12 = vld [vmem:[%s2018_s1 + $0x3a4] ss:$8 sps:$4 sm:$0xff]  }
  0x1f   :  { %967 = vmatpush1.bf16.msra.mxu0 %v1369_v30  ;;  %v1435_v30 = vld [vmem:[%s2018_s1 + $0x350] ss:$8 sps:$4 sm:$0xff]  }
  0x20   :  { %1008 = vmatpush1.bf16.msra.mxu1 %v1370_v31  ;;  %968 = vmatprep.subr.bf16.mxu0 %v1371_v32  ;;  %v1440_v31 = vld [vmem:[%s2018_s1 + $0x244] ss:$8 sps:$4 sm:$0xff]  }
  0x21   :  { %1009 = vmatprep.subr.bf16.mxu1 %v1373_v33  ;;  %v1443_v32 = vld [vmem:[%s2018_s1 + $0x344] ss:$8 sps:$4 sm:$0xff]   ;;  %v1438_v33 = vld [vmem:[%s2018_s1 + $0x240] ss:$8 sps:$4 sm:$0xff]  }
  0x23   :  { %969 = vmatpush2.bf16.msra.mxu0 %v1375_v34  ;;  %v1441_v34 = vld [vmem:[%s2018_s1 + $0x340] ss:$8 sps:$4 sm:$0xff]  }
  0x24   :  { %1010 = vmatpush2.bf16.msra.mxu1 %v1376_v35  ;;  %970 = vmatprep.subr.bf16.mxu0 %v1377_v39  ;;  %v1446_v35 = vld [vmem:[%s2018_s1 + $0x234] ss:$8 sps:$4 sm:$0xff]   ;;  %v1452_v39 = vld [vmem:[%s2018_s1 + $0x224] ss:$8 sps:$4 sm:$0xff]  }
  0x25   :  { %1011 = vmatprep.subr.bf16.mxu1 %v1379_v40  ;;  %v1455_v40 = vld [vmem:[%s2018_s1 + $0x324] ss:$8 sps:$4 sm:$0xff]  }
  0x27   :  { %971 = vmatpush2.bf16.msra.mxu0 %v1381_v41  ;;  %v1450_v41 = vld [vmem:[%s2018_s1 + $0x220] ss:$8 sps:$4 sm:$0xff]  }
  0x28   :  { %1012 = vmatpush2.bf16.msra.mxu1 %v1382_v44  ;;  %972 = vmatprep.subr.bf16.mxu0 %v1383_v45  ;;  %v1461_v44 = vld [vmem:[%s2018_s1 + $0x314] ss:$8 sps:$4 sm:$0xff]   ;;  %v1456_v45 = vld [vmem:[%s2018_s1 + $0x210] ss:$8 sps:$4 sm:$0xff]  }
  0x29   :  { %1013 = vmatprep.subr.bf16.mxu1 %v1385_v46  ;;  %v1459_v46 = vld [vmem:[%s2018_s1 + $0x310] ss:$8 sps:$4 sm:$0xff]  }
  0x2b   :  { %973 = vmatpush2.bf16.msra.mxu0 %v1387_v47  ;;  %v1464_v47 = vld [vmem:[%s2018_s1 + $0x204] ss:$8 sps:$4 sm:$0xff]  }
  0x2c   :  { %1014 = vmatpush2.bf16.msra.mxu1 %v1388_v48  ;;  %974 = vmatprep.subr.bf16.mxu0 %v1389_v50  ;;  %v1467_v48 = vld [vmem:[%s2018_s1 + $0x304] ss:$8 sps:$4 sm:$0xff]   ;;  %v1462_v50 = vld [vmem:[%s2018_s1 + $0x200] ss:$8 sps:$4 sm:$0xff]  }
  0x2d   :  { %1015 = vmatprep.subr.bf16.mxu1 %v1391_v51  ;;  %v1465_v51 = vld [vmem:[%s2018_s1 + $0x300] ss:$8 sps:$4 sm:$0xff]  }
  0x2f   :  { %975 = vmatpush2.bf16.msra.mxu0 %v1393_v53  ;;  %v1473_v53 = vld [vmem:[%s2018_s1 + $0x3f4] ss:$8 sps:$4 sm:$0xff]  }
  0x30   :  { %1016 = vmatpush2.bf16.msra.mxu1 %v1394_v56  ;;  %976 = vmatprep.subr.bf16.mxu0 %v1395_v57  ;;  %v1873_v56 = vld.sshfl [vmem:[%s2019_s0 + $0x8] sm:$0x1 pattern:$0x75316420]  ;;  %v1476_v57 = vld [vmem:[%s2018_s1 + $0x2e4] ss:$8 sps:$4 sm:$0xff]  }
  0x31   :  { %1017 = vmatprep.subr.bf16.mxu1 %v1397_v58  ;;  %v1479_v58 = vld [vmem:[%s2018_s1 + $0x3e4] ss:$8 sps:$4 sm:$0xff]   ;;  %v222_v59 = vrot.slane %v1873_v56, %v1689_v49 }
  0x33   :  { %977 = vmatpush2.bf16.msra.mxu0 %v1399_v61  ;;  %v1477_v61 = vld [vmem:[%s2018_s1 + $0x3e0] ss:$8 sps:$4 sm:$0xff]  }
  0x34   :  { %1018 = vmatpush2.bf16.msra.mxu1 %v1400_v0  ;;  %978 = vmatprep.subr.bf16.mxu0 %v1401_v1  ;;  %v1485_v0 = vld [vmem:[%s2018_s1 + $0x3d4] ss:$8 sps:$4 sm:$0xff]   ;;  %v1480_v1 = vld [vmem:[%s2018_s1 + $0x2d0] ss:$8 sps:$4 sm:$0xff]  }
  0x35   :  { %1019 = vmatprep.subr.bf16.mxu1 %v1403_v2  ;;  %v1483_v2 = vld [vmem:[%s2018_s1 + $0x3d0] ss:$8 sps:$4 sm:$0xff]  }
  0x37   :  { %979 = vmatpush2.bf16.msra.mxu0 %v1405_v4  ;;  %v1491_v4 = vld [vmem:[%s2018_s1 + $0x3c4] ss:$8 sps:$4 sm:$0xff]  }
  0x38   :  { %1020 = vmatpush2.bf16.msra.mxu1 %v1406_v5  ;;  %980 = vmatprep.subr.bf16.mxu0 %v1407_v6  ;;  %v1486_v5 = vld [vmem:[%s2018_s1 + $0x2c0] ss:$8 sps:$4 sm:$0xff]  }
  0x39   :  { %1021 = vmatprep.subr.bf16.mxu1 %v1409_v7  ;;  %v1489_v6 = vld [vmem:[%s2018_s1 + $0x3c0] ss:$8 sps:$4 sm:$0xff]   ;;  %v1494_v7 = vld [vmem:[%s2018_s1 + $0x2b4] ss:$8 sps:$4 sm:$0xff]  }
  0x3b   :  { %981 = vmatpush2.bf16.msra.mxu0 %v1411_v8  ;;  %v1497_v8 = vld [vmem:[%s2018_s1 + $0x3b4] ss:$8 sps:$4 sm:$0xff]  }
  0x3c   :  { %1022 = vmatpush2.bf16.msra.mxu1 %v1412_v9  ;;  %982 = vmatprep.subr.bf16.mxu0 %v1413_v10  ;;  %v1492_v9 = vld [vmem:[%s2018_s1 + $0x2b0] ss:$8 sps:$4 sm:$0xff]  }
  0x3d   :  { %1023 = vmatprep.subr.bf16.mxu1 %v1415_v11  ;;  %v1495_v10 = vld [vmem:[%s2018_s1 + $0x3b0] ss:$8 sps:$4 sm:$0xff]   ;;  %v1500_v11 = vld [vmem:[%s2018_s1 + $0x2a4] ss:$8 sps:$4 sm:$0xff]  }
  0x3f   :  { %983 = vmatpush2.bf16.msra.mxu0 %v1417_v13  ;;  %v1498_v13 = vld [vmem:[%s2018_s1 + $0x2a0] ss:$8 sps:$4 sm:$0xff]  }
  0x40   :  { %1024 = vmatpush2.bf16.msra.mxu1 %v1418_v15  ;;  %1034 = vmatprep.subr.bf16.mxu0 %v1422_v16  ;;  %v1506_v15 = vld [vmem:[%s2018_s1 + $0x294] ss:$8 sps:$4 sm:$0xff]  }
  0x41   :  { %1075 = vmatprep.subr.bf16.mxu1 %v1425_v17  ;;  %v1509_v16 = vld [vmem:[%s2018_s1 + $0x394] ss:$8 sps:$4 sm:$0xff]   ;;  %v1504_v17 = vld [vmem:[%s2018_s1 + $0x290] ss:$8 sps:$4 sm:$0xff]  }
  0x42   :  { %985 = vmatmul.mubr.bf16.vlgmr.msra.gmra.mxu0 %v183_v14  ;;  %v1501_v14 = vld [vmem:[%s2018_s1 + $0x3a0] ss:$8 sps:$4 sm:$0xff]  }
  0x43   :  { %1026 = vmatmul.mubr.bf16.vlgmr.msra.gmra.mxu1 %v205_v19  ;;  %1035 = vmatpush1.bf16.msra.mxu0 %v1420_v20  ;;  %v1512_v19 = vld [vmem:[%s2018_s1 + $0x284] ss:$8 sps:$4 sm:$0xff]  }
  0x44   :  { %1076 = vmatpush1.bf16.msra.mxu1 %v1423_v21  ;;  %1036 = vmatprep.subr.bf16.mxu0 %v1428_v22  ;;  %v1515_v20 = vld [vmem:[%s2018_s1 + $0x384] ss:$8 sps:$4 sm:$0xff]   ;;  %v1510_v21 = vld [vmem:[%s2018_s1 + $0x280] ss:$8 sps:$4 sm:$0xff]  }
  0x45   :  { %1077 = vmatprep.subr.bf16.mxu1 %v1431_v23  ;;  %1066 = vmatprep.mubr.bf16.mxu0 %v204_v18  ;;  %v1507_v18 = vld [vmem:[%s2018_s1 + $0x390] ss:$8 sps:$4 sm:$0xff]   ;;  %v1513_v22 = vld [vmem:[%s2018_s1 + $0x380] ss:$8 sps:$4 sm:$0xff]   ;;  %v1518_v23 = vld [vmem:[%s2018_s1 + $0x474] ss:$8 sps:$4 sm:$0xff]  }
  0x46   :  { %1107 = vmatprep.mubr.bf16.mxu1 %v208_v24  ;;  %v206_v24 = vcombine.high %v1719_v63, %v1719_v63 }
  0x47   :  { %1037 = vmatpush1.bf16.msra.mxu0 %v1426_v25  ;;  %v1516_v25 = vld [vmem:[%s2018_s1 + $0x470] ss:$8 sps:$4 sm:$0xff]  }
  0x48   :  { %1078 = vmatpush1.bf16.msra.mxu1 %v1429_v26  ;;  %1038 = vmatprep.subr.bf16.mxu0 %v1434_v27  ;;  %v1521_v26 = vld [vmem:[%s2018_s1 + $0x464] ss:$8 sps:$4 sm:$0xff]   ;;  %v1519_v27 = vld [vmem:[%s2018_s1 + $0x460] ss:$8 sps:$4 sm:$0xff]  }
  0x49   :  { %1079 = vmatprep.subr.bf16.mxu1 %v1437_v28  ;;  %v1541_v28 = vmov 0  }
  0x4b   :  { %1039 = vmatpush1.bf16.msra.mxu0 %v1432_v29  ;;  %v1524_v29 = vld [vmem:[%s2018_s1 + $0x454] ss:$8 sps:$4 sm:$0xff]  }
  0x4c   :  { %1080 = vmatpush1.bf16.msra.mxu1 %v1435_v30  ;;  %1040 = vmatprep.subr.bf16.mxu0 %v1440_v31  ;;  %v1522_v30 = vld [vmem:[%s2018_s1 + $0x450] ss:$8 sps:$4 sm:$0xff]   ;;  %v1525_v31 = vld [vmem:[%s2018_s1 + $0x440] ss:$8 sps:$4 sm:$0xff]  }
  0x4d   :  { %1081 = vmatprep.subr.bf16.mxu1 %v1443_v32  ;;  %v1530_v32 = vld [vmem:[%s2018_s1 + $0x434] ss:$8 sps:$4 sm:$0xff]  }
  0x4f   :  { %1041 = vmatpush1.bf16.msra.mxu0 %v1438_v33  ;;  %v1528_v33 = vld [vmem:[%s2018_s1 + $0x430] ss:$8 sps:$4 sm:$0xff]  }
  0x50   :  { %1082 = vmatpush1.bf16.msra.mxu1 %v1441_v34  ;;  %1042 = vmatprep.subr.bf16.mxu0 %v1446_v35  ;;  %v1533_v34 = vld [vmem:[%s2018_s1 + $0x424] ss:$8 sps:$4 sm:$0xff]   ;;  %v1531_v35 = vld [vmem:[%s2018_s1 + $0x420] ss:$8 sps:$4 sm:$0xff]  }
  0x51   :  { %1083 = vmatprep.subr.bf16.mxu1 %v1449_v36  ;;  %v1536_v36 = vld [vmem:[%s2018_s1 + $0x414] ss:$8 sps:$4 sm:$0xff]  }
  0x53   :  { %1043 = vmatpush1.bf16.msra.mxu0 %v1444_v37  ;;  %v1534_v37 = vld [vmem:[%s2018_s1 + $0x410] ss:$8 sps:$4 sm:$0xff]  }
  0x54   :  { %1084 = vmatpush1.bf16.msra.mxu1 %v1447_v38  ;;  %1044 = vmatprep.subr.bf16.mxu0 %v1452_v39  ;;  %v1539_v38 = vld [vmem:[%s2018_s1 + $0x404] ss:$8 sps:$4 sm:$0xff]   ;;  %v1537_v39 = vld [vmem:[%s2018_s1 + $0x400] ss:$8 sps:$4 sm:$0xff]  }
  0x55   :  { %1085 = vmatprep.subr.bf16.mxu1 %v1455_v40 }
  0x57   :  { %1045 = vmatpush1.bf16.msra.mxu0 %v1450_v41 }
  0x58   :  { %1086 = vmatpush1.bf16.msra.mxu1 %v1453_v42  ;;  %1046 = vmatprep.subr.bf16.mxu0 %v1458_v43 }
  0x59   :  { %1087 = vmatprep.subr.bf16.mxu1 %v1461_v44 }
  0x5b   :  { %1047 = vmatpush1.bf16.msra.mxu0 %v1456_v45 }
  0x5c   :  { %1088 = vmatpush1.bf16.msra.mxu1 %v1459_v46  ;;  %1048 = vmatprep.subr.bf16.mxu0 %v1464_v47 }
  0x5d   :  { %1089 = vmatprep.subr.bf16.mxu1 %v1467_v48 }
  0x5f   :  { %1049 = vmatpush1.bf16.msra.mxu0 %v1462_v50 }
  0x60   :  { %1090 = vmatpush1.bf16.msra.mxu1 %v1465_v51  ;;  %1050 = vmatprep.subr.bf16.mxu0 %v1470_v52 }
  0x61   :  { %1091 = vmatprep.subr.bf16.mxu1 %v1473_v53 }
  0x63   :  { %1051 = vmatpush2.bf16.msra.mxu0 %v1468_v54 }
  0x64   :  { %1092 = vmatpush2.bf16.msra.mxu1 %v1471_v55  ;;  %1052 = vmatprep.subr.bf16.mxu0 %v1476_v57 }
  0x65   :  { %1093 = vmatprep.subr.bf16.mxu1 %v1479_v58 }
  0x67   :  { %1053 = vmatpush2.bf16.msra.mxu0 %v1474_v60 }
  0x68   :  { %1094 = vmatpush2.bf16.msra.mxu1 %v1477_v61  ;;  %1054 = vmatprep.subr.bf16.mxu0 %v1482_v62 }
  0x69   :  { %1095 = vmatprep.subr.bf16.mxu1 %v1485_v0 }
  0x6b   :  { %1055 = vmatpush2.bf16.msra.mxu0 %v1480_v1 }
  0x6c   :  { %1096 = vmatpush2.bf16.msra.mxu1 %v1483_v2  ;;  %1056 = vmatprep.subr.bf16.mxu0 %v1488_v3 }
  0x6d   :  { %1097 = vmatprep.subr.bf16.mxu1 %v1491_v4 }
  0x6f   :  { %1057 = vmatpush2.bf16.msra.mxu0 %v1486_v5 }
  0x70   :  { %1098 = vmatpush2.bf16.msra.mxu1 %v1489_v6  ;;  %1058 = vmatprep.subr.bf16.mxu0 %v1494_v7 }
  0x71   :  { %1099 = vmatprep.subr.bf16.mxu1 %v1497_v8 }
  0x73   :  { %1059 = vmatpush2.bf16.msra.mxu0 %v1492_v9 }
  0x74   :  { %1100 = vmatpush2.bf16.msra.mxu1 %v1495_v10  ;;  %1060 = vmatprep.subr.bf16.mxu0 %v1500_v11 }
  0x75   :  { %1101 = vmatprep.subr.bf16.mxu1 %v1503_v12 }
  0x77   :  { %1061 = vmatpush2.bf16.msra.mxu0 %v1498_v13 }
  0x78   :  { %1102 = vmatpush2.bf16.msra.mxu1 %v1501_v14  ;;  %1062 = vmatprep.subr.bf16.mxu0 %v1506_v15 }
  0x79   :  { %1103 = vmatprep.subr.bf16.mxu1 %v1509_v16 }
  0x7b   :  { %1063 = vmatpush2.bf16.msra.mxu0 %v1504_v17 }
  0x7c   :  { %1104 = vmatpush2.bf16.msra.mxu1 %v1507_v18  ;;  %1064 = vmatprep.subr.bf16.mxu0 %v1512_v19 }
  0x7d   :  { %1105 = vmatprep.subr.bf16.mxu1 %v1515_v20 }
  0x7f   :  { %1065 = vmatpush2.bf16.msra.mxu0 %v1510_v21 }
  0x80   :  { %1106 = vmatpush2.bf16.msra.mxu1 %v1513_v22  ;;  %1116 = vmatprep.subr.bf16.mxu0 %v1518_v23 }
  0x82   :  { %1067 = vmatmul.mubr.bf16.vlgmr.msra.gmra.mxu0 %v1719_v63  ;;  %v1527_v63 = vld [vmem:[%s2018_s1 + $0x444] ss:$8 sps:$4 sm:$0xff]  }
  0x83   :  { %1108 = vmatmul.mubr.bf16.vlgmr.msra.gmra.mxu1 %v206_v24  ;;  %1117 = vmatpush1.bf16.msra.mxu0 %v1516_v25 }
  0x84   :  { %1148 = vmatprep.mubr.bf16.mxu0 %v1541_v28  ;;  %1118 = vmatprep.subr.bf16.mxu0 %v1521_v26 }
  0x87   :  { %1119 = vmatpush1.bf16.msra.mxu0 %v1519_v27 }
  0x88   :  { %1120 = vmatprep.subr.bf16.mxu0 %v1524_v29 }
  0x8b   :  { %1121 = vmatpush1.bf16.msra.mxu0 %v1522_v30 }
  0x8c   :  { %1122 = vmatprep.subr.bf16.mxu0 %v1527_v63 }
  0x8f   :  { %1123 = vmatpush1.bf16.msra.mxu0 %v1525_v31 }
  0x90   :  { %1124 = vmatprep.subr.bf16.mxu0 %v1530_v32 }
  0x93   :  { %1125 = vmatpush1.bf16.msra.mxu0 %v1528_v33 }
  0x94   :  { %1126 = vmatprep.subr.bf16.mxu0 %v1533_v34 }
  0x97   :  { %1127 = vmatpush1.bf16.msra.mxu0 %v1531_v35 }
  0x98   :  { %1128 = vmatprep.subr.bf16.mxu0 %v1536_v36 }
  0x9b   :  { %1129 = vmatpush1.bf16.msra.mxu0 %v1534_v37 }
  0x9c   :  { %1130 = vmatprep.subr.bf16.mxu0 %v1539_v38 }
  0x9f   :  { %1131 = vmatpush1.bf16.msra.mxu0 %v1537_v39 }
  0xa2   :  { %1149 = vmatmul.mubr.bf16.vlgmr.msra.gmra.mxu0 %v222_v59 }
 0x102   :  { %v986_v40 = vpop.f32.mrf.mxu0 }
 0x103   :  { %v1027_v41 = vpop.f32.mrf.mxu1 }
 0x104   :  { %v1028_v42 = vadd.f32 %v1027_v41, %v986_v40  ;;  %v988_v43 = vpop.f32.mrf.mxu0 }
 0x105   :  { %v1029_v44 = vpop.f32.mrf.mxu1 }
 0x106   :  { %v1030_v45 = vadd.f32 %v1029_v44, %v988_v43  ;;  %v990_v46 = vpop.f32.mrf.mxu0 }
 0x107   :  { %v1031_v47 = vpop.f32.mrf.mxu1 }
 0x108   :  { %v991_v48 = vpop.f32.mrf.mxu0 }
 0x109   :  { %v1032_v50 = vpop.f32.mrf.mxu1 }
 0x142   :  { %v1068_v51 = vpop.f32.mrf.mxu0 }
 0x143   :  { %v1109_v52 = vpop.f32.mrf.mxu1  ;;  %v1069_v49 = vadd.f32 %v1068_v51, %v1028_v42 }
 0x144   :  { %v1070_v53 = vpop.f32.mrf.mxu0 }
 0x145   :  { %v1111_v54 = vpop.f32.mrf.mxu1  ;;  %v1071_v56 = vadd.f32 %v1070_v53, %v1030_v45  ;;  %v1110_v59 = vadd.f32 %v1109_v52, %v1069_v49 }
 0x146   :  { %v1072_v55 = vpop.f32.mrf.mxu0 }
 0x147   :  { %v1113_v57 = vpop.f32.mrf.mxu1  ;;  %v1112_v62 = vadd.f32 %v1111_v54, %v1071_v56 }
 0x148   :  { %v1073_v58 = vpop.f32.mrf.mxu0 }
 0x149   :  { %v1114_v60 = vpop.f32.mrf.mxu1 }
 0x162   :  { %v1150_v61 = vpop.f32.mrf.mxu0 }
 0x163   :  { %v1151_v0 = vadd.f32 %v1150_v61, %v1110_v59 }
 0x164   :  { %v1152_v1 = vpop.f32.mrf.mxu0 }
 0x165   :  { %v1153_v2 = vadd.f32 %v1152_v1, %v1112_v62  ;;  %v1157_v4 = vmax.f32 %v1151_v0, 0.0 }
 0x166   :  { %v1154_v3 = vpop.f32.mrf.mxu0 }
 0x167   :  { %v1158_v5 = vmax.f32 %v1153_v2, 0.0 }
 0x168   :  { %v1155_v6 = vpop.f32.mrf.mxu0 }
 0x169   :  { %v1161_v7 = vcombine.low %v1157_v4, %v1158_v5 }
 0x16b   :  { %1320 = vst.sshfl [vmem:[%s2020_s2] sm:$0x33 pattern:$0x76325410] %v1161_v7 }

// kernel: _lambda_.18
= control target key start
LH: loop header
LB: loop body
LE: loop exit
PB: predicated region body
PF: predicated region fallthrough
CT: control target
= control target key end

     0   :  { %s1986_s1 = inlined_call_operand.vmem [shape: bf16[1152,256], index: 1, kind: input, shape index: {}]   ;;  %s1987_s0 = inlined_call_operand.vmem [shape: bf16[8,1152], index: 0, kind: input, shape index: {}]   ;;  %s1988_s2 = inlined_call_operand.vmem [shape: f32[8,256], index: 2, kind: output, shape index: {}]  }
   0x1   :  { %v1280_v0 = vld [vmem:[%s1986_s1 + $0x74] ss:$8 sps:$4 sm:$0xff]   ;;  %v1284_v2 = vld [vmem:[%s1986_s1 + $0x70] ss:$8 sps:$4 sm:$0xff]   ;;  %v1286_v4 = vld [vmem:[%s1986_s1 + $0x64] ss:$8 sps:$4 sm:$0xff]  }
   0x2   :  { %v1282_v1 = vld [vmem:[%s1986_s1 + $0x174] ss:$8 sps:$4 sm:$0xff]   ;;  %913 = vmatprep.subr.bf16.mxu0 %v1280_v0  ;;  %v1285_v3 = vld [vmem:[%s1986_s1 + $0x170] ss:$8 sps:$4 sm:$0xff]   ;;  %v1288_v5 = vld [vmem:[%s1986_s1 + $0x164] ss:$8 sps:$4 sm:$0xff]  }
   0x3   :  { %954 = vmatprep.subr.bf16.mxu1 %v1282_v1  ;;  %914 = vmatpush1.bf16.msra.mxu0 %v1284_v2  ;;  %v1290_v6 = vld [vmem:[%s1986_s1 + $0x60] ss:$8 sps:$4 sm:$0xff]   ;;  %v1292_v8 = vld [vmem:[%s1986_s1 + $0x54] ss:$8 sps:$4 sm:$0xff]   ;;  %v1296_v10 = vld [vmem:[%s1986_s1 + $0x50] ss:$8 sps:$4 sm:$0xff]  }
   0x4   :  { %955 = vmatpush1.bf16.msra.mxu1 %v1285_v3  ;;  %915 = vmatprep.subr.bf16.mxu0 %v1286_v4  ;;  %v1291_v7 = vld [vmem:[%s1986_s1 + $0x160] ss:$8 sps:$4 sm:$0xff]   ;;  %v1294_v9 = vld [vmem:[%s1986_s1 + $0x154] ss:$8 sps:$4 sm:$0xff]   ;;  %v1297_v11 = vld [vmem:[%s1986_s1 + $0x150] ss:$8 sps:$4 sm:$0xff]  }
   0x5   :  { %956 = vmatprep.subr.bf16.mxu1 %v1288_v5  ;;  %v1298_v12 = vld [vmem:[%s1986_s1 + $0x44] ss:$8 sps:$4 sm:$0xff]   ;;  %v1302_v14 = vld [vmem:[%s1986_s1 + $0x40] ss:$8 sps:$4 sm:$0xff]   ;;  %v1304_v16 = vld [vmem:[%s1986_s1 + $0x34] ss:$8 sps:$4 sm:$0xff]  }
   0x6   :  { %v1300_v13 = vld [vmem:[%s1986_s1 + $0x144] ss:$8 sps:$4 sm:$0xff]   ;;  %v1303_v15 = vld [vmem:[%s1986_s1 + $0x140] ss:$8 sps:$4 sm:$0xff]   ;;  %v1306_v17 = vld [vmem:[%s1986_s1 + $0x134] ss:$8 sps:$4 sm:$0xff]  }
   0x7   :  { %916 = vmatpush1.bf16.msra.mxu0 %v1290_v6  ;;  %v1308_v18 = vld [vmem:[%s1986_s1 + $0x30] ss:$8 sps:$4 sm:$0xff]   ;;  %v1310_v20 = vld [vmem:[%s1986_s1 + $0x24] ss:$8 sps:$4 sm:$0xff]   ;;  %v1314_v22 = vld [vmem:[%s1986_s1 + $0x20] ss:$8 sps:$4 sm:$0xff]  }
   0x8   :  { %957 = vmatpush1.bf16.msra.mxu1 %v1291_v7  ;;  %917 = vmatprep.subr.bf16.mxu0 %v1292_v8  ;;  %v1309_v19 = vld [vmem:[%s1986_s1 + $0x130] ss:$8 sps:$4 sm:$0xff]   ;;  %v1312_v21 = vld [vmem:[%s1986_s1 + $0x124] ss:$8 sps:$4 sm:$0xff]   ;;  %v1315_v23 = vld [vmem:[%s1986_s1 + $0x120] ss:$8 sps:$4 sm:$0xff]  }
   0x9   :  { %958 = vmatprep.subr.bf16.mxu1 %v1294_v9  ;;  %v1316_v24 = vld [vmem:[%s1986_s1 + $0x14] ss:$8 sps:$4 sm:$0xff]   ;;  %v1320_v26 = vld [vmem:[%s1986_s1 + $0x10] ss:$8 sps:$4 sm:$0xff]   ;;  %v1322_v28 = vld [vmem:[%s1986_s1 + $0x4] ss:$8 sps:$4 sm:$0xff]  }
   0xa   :  { %v1318_v25 = vld [vmem:[%s1986_s1 + $0x114] ss:$8 sps:$4 sm:$0xff]   ;;  %v1321_v27 = vld [vmem:[%s1986_s1 + $0x110] ss:$8 sps:$4 sm:$0xff]   ;;  %v1324_v29 = vld [vmem:[%s1986_s1 + $0x104] ss:$8 sps:$4 sm:$0xff]  }
   0xb   :  { %918 = vmatpush1.bf16.msra.mxu0 %v1296_v10  ;;  %v1326_v30 = vld [vmem:[%s1986_s1] ss:$8 sps:$4 sm:$0xff]   ;;  %v1328_v32 = vld [vmem:[%s1986_s1 + $0xf4] ss:$8 sps:$4 sm:$0xff]   ;;  %v1332_v34 = vld [vmem:[%s1986_s1 + $0xf0] ss:$8 sps:$4 sm:$0xff]  }
   0xc   :  { %959 = vmatpush1.bf16.msra.mxu1 %v1297_v11  ;;  %919 = vmatprep.subr.bf16.mxu0 %v1298_v12  ;;  %v1327_v31 = vld [vmem:[%s1986_s1 + $0x100] ss:$8 sps:$4 sm:$0xff]   ;;  %v1330_v33 = vld [vmem:[%s1986_s1 + $0x1f4] ss:$8 sps:$4 sm:$0xff]   ;;  %v1333_v35 = vld [vmem:[%s1986_s1 + $0x1f0] ss:$8 sps:$4 sm:$0xff]  }
   0xd   :  { %960 = vmatprep.subr.bf16.mxu1 %v1300_v13  ;;  %v1334_v36 = vld [vmem:[%s1986_s1 + $0xe4] ss:$8 sps:$4 sm:$0xff]   ;;  %v1338_v38 = vld [vmem:[%s1986_s1 + $0xe0] ss:$8 sps:$4 sm:$0xff]   ;;  %v1340_v40 = vld [vmem:[%s1986_s1 + $0xd4] ss:$8 sps:$4 sm:$0xff]  }
   0xe   :  { %v1336_v37 = vld [vmem:[%s1986_s1 + $0x1e4] ss:$8 sps:$4 sm:$0xff]   ;;  %v1339_v39 = vld [vmem:[%s1986_s1 + $0x1e0] ss:$8 sps:$4 sm:$0xff]   ;;  %v1342_v41 = vld [vmem:[%s1986_s1 + $0x1d4] ss:$8 sps:$4 sm:$0xff]  }
   0xf   :  { %920 = vmatpush1.bf16.msra.mxu0 %v1302_v14  ;;  %v1344_v42 = vld [vmem:[%s1986_s1 + $0xd0] ss:$8 sps:$4 sm:$0xff]   ;;  %v1346_v44 = vld [vmem:[%s1986_s1 + $0xc4] ss:$8 sps:$4 sm:$0xff]   ;;  %v1350_v49 = vld [vmem:[%s1986_s1 + $0xc0] ss:$8 sps:$4 sm:$0xff]  }
  0x10   :  { %961 = vmatpush1.bf16.msra.mxu1 %v1303_v15  ;;  %921 = vmatprep.subr.bf16.mxu0 %v1304_v16  ;;  %v1345_v43 = vld [vmem:[%s1986_s1 + $0x1d0] ss:$8 sps:$4 sm:$0xff]   ;;  %v1348_v45 = vld [vmem:[%s1986_s1 + $0x1c4] ss:$8 sps:$4 sm:$0xff]   ;;  %v1351_v50 = vld [vmem:[%s1986_s1 + $0x1c0] ss:$8 sps:$4 sm:$0xff]  }
  0x11   :  { %962 = vmatprep.subr.bf16.mxu1 %v1306_v17  ;;  %v12_v46 = vld [vmem:[%s1987_s0] sm:$0xff]  ;;  %v13_v48 = vld [vmem:[%s1987_s0 + $0x8] sm:$0xff]  ;;  %v1352_v52 = vld [vmem:[%s1986_s1 + $0xb4] ss:$8 sps:$4 sm:$0xff]  }
  0x12   :  { %v1127_v47 = vcombine.high %v12_v46, %v12_v46  ;;  %v1129_v51 = vcombine.high %v13_v48, %v13_v48  ;;  %v1354_v53 = vld [vmem:[%s1986_s1 + $0x1b4] ss:$8 sps:$4 sm:$0xff]   ;;  %v1356_v54 = vld [vmem:[%s1986_s1 + $0xb0] ss:$8 sps:$4 sm:$0xff]   ;;  %v1358_v56 = vld [vmem:[%s1986_s1 + $0xa4] ss:$8 sps:$4 sm:$0xff]   ;;  %v1126_v6 = vcombine.low %v12_v46, %v12_v46  ;;  %v1128_v7 = vcombine.low %v13_v48, %v13_v48 }
  0x13   :  { %922 = vmatpush1.bf16.msra.mxu0 %v1308_v18  ;;  %v1357_v55 = vld [vmem:[%s1986_s1 + $0x1b0] ss:$8 sps:$4 sm:$0xff]   ;;  %v1360_v57 = vld [vmem:[%s1986_s1 + $0x1a4] ss:$8 sps:$4 sm:$0xff]   ;;  %v1362_v58 = vld [vmem:[%s1986_s1 + $0xa0] ss:$8 sps:$4 sm:$0xff]  }
  0x14   :  { %963 = vmatpush1.bf16.msra.mxu1 %v1309_v19  ;;  %923 = vmatprep.subr.bf16.mxu0 %v1310_v20  ;;  %v1363_v59 = vld [vmem:[%s1986_s1 + $0x1a0] ss:$8 sps:$4 sm:$0xff]   ;;  %v1364_v60 = vld [vmem:[%s1986_s1 + $0x94] ss:$8 sps:$4 sm:$0xff]   ;;  %v1368_v62 = vld [vmem:[%s1986_s1 + $0x90] ss:$8 sps:$4 sm:$0xff]  }
  0x15   :  { %964 = vmatprep.subr.bf16.mxu1 %v1312_v21  ;;  %945 = vmatprep.mubr.bf16.mxu0 %v1127_v47  ;;  %v1366_v61 = vld [vmem:[%s1986_s1 + $0x194] ss:$8 sps:$4 sm:$0xff]   ;;  %v1369_v63 = vld [vmem:[%s1986_s1 + $0x190] ss:$8 sps:$4 sm:$0xff]   ;;  %v1370_v0 = vld [vmem:[%s1986_s1 + $0x84] ss:$8 sps:$4 sm:$0xff]  }
  0x16   :  { %986 = vmatprep.mubr.bf16.mxu1 %v1129_v51  ;;  %v1372_v1 = vld [vmem:[%s1986_s1 + $0x184] ss:$8 sps:$4 sm:$0xff]   ;;  %v1374_v2 = vld [vmem:[%s1986_s1 + $0x80] ss:$8 sps:$4 sm:$0xff]   ;;  %v1382_v4 = vld [vmem:[%s1986_s1 + $0x274] ss:$8 sps:$4 sm:$0xff]  }
  0x17   :  { %924 = vmatpush1.bf16.msra.mxu0 %v1314_v22  ;;  %v1375_v3 = vld [vmem:[%s1986_s1 + $0x180] ss:$8 sps:$4 sm:$0xff]   ;;  %v1385_v5 = vld [vmem:[%s1986_s1 + $0x374] ss:$8 sps:$4 sm:$0xff]   ;;  %v1380_v8 = vld [vmem:[%s1986_s1 + $0x270] ss:$8 sps:$4 sm:$0xff]  }
  0x18   :  { %965 = vmatpush1.bf16.msra.mxu1 %v1315_v23  ;;  %925 = vmatprep.subr.bf16.mxu0 %v1316_v24  ;;  %v1383_v9 = vld [vmem:[%s1986_s1 + $0x370] ss:$8 sps:$4 sm:$0xff]   ;;  %v1388_v10 = vld [vmem:[%s1986_s1 + $0x264] ss:$8 sps:$4 sm:$0xff]   ;;  %v1386_v12 = vld [vmem:[%s1986_s1 + $0x260] ss:$8 sps:$4 sm:$0xff]  }
  0x19   :  { %966 = vmatprep.subr.bf16.mxu1 %v1318_v25  ;;  %v1391_v11 = vld [vmem:[%s1986_s1 + $0x364] ss:$8 sps:$4 sm:$0xff]   ;;  %v1389_v13 = vld [vmem:[%s1986_s1 + $0x360] ss:$8 sps:$4 sm:$0xff]   ;;  %v1394_v14 = vld [vmem:[%s1986_s1 + $0x254] ss:$8 sps:$4 sm:$0xff]  }
  0x1a   :  { %v1397_v15 = vld [vmem:[%s1986_s1 + $0x354] ss:$8 sps:$4 sm:$0xff]   ;;  %v1392_v16 = vld [vmem:[%s1986_s1 + $0x250] ss:$8 sps:$4 sm:$0xff]   ;;  %v1400_v18 = vld [vmem:[%s1986_s1 + $0x244] ss:$8 sps:$4 sm:$0xff]  }
  0x1b   :  { %926 = vmatpush1.bf16.msra.mxu0 %v1320_v26  ;;  %v1395_v17 = vld [vmem:[%s1986_s1 + $0x350] ss:$8 sps:$4 sm:$0xff]   ;;  %v1403_v19 = vld [vmem:[%s1986_s1 + $0x344] ss:$8 sps:$4 sm:$0xff]   ;;  %v1398_v20 = vld [vmem:[%s1986_s1 + $0x240] ss:$8 sps:$4 sm:$0xff]  }
  0x1c   :  { %967 = vmatpush1.bf16.msra.mxu1 %v1321_v27  ;;  %927 = vmatprep.subr.bf16.mxu0 %v1322_v28  ;;  %v1401_v21 = vld [vmem:[%s1986_s1 + $0x340] ss:$8 sps:$4 sm:$0xff]   ;;  %v1406_v22 = vld [vmem:[%s1986_s1 + $0x234] ss:$8 sps:$4 sm:$0xff]   ;;  %v1404_v24 = vld [vmem:[%s1986_s1 + $0x230] ss:$8 sps:$4 sm:$0xff]  }
  0x1d   :  { %968 = vmatprep.subr.bf16.mxu1 %v1324_v29  ;;  %v1409_v23 = vld [vmem:[%s1986_s1 + $0x334] ss:$8 sps:$4 sm:$0xff]   ;;  %v1407_v25 = vld [vmem:[%s1986_s1 + $0x330] ss:$8 sps:$4 sm:$0xff]   ;;  %v1412_v26 = vld [vmem:[%s1986_s1 + $0x224] ss:$8 sps:$4 sm:$0xff]  }
  0x1e   :  { %v1415_v27 = vld [vmem:[%s1986_s1 + $0x324] ss:$8 sps:$4 sm:$0xff]   ;;  %v1410_v28 = vld [vmem:[%s1986_s1 + $0x220] ss:$8 sps:$4 sm:$0xff]   ;;  %v1445_v51 = vld [vmem:[%s1986_s1 + $0x3d4] ss:$8 sps:$4 sm:$0xff]  }
  0x1f   :  { %928 = vmatpush1.bf16.msra.mxu0 %v1326_v30  ;;  %v1413_v29 = vld [vmem:[%s1986_s1 + $0x320] ss:$8 sps:$4 sm:$0xff]   ;;  %v1418_v30 = vld [vmem:[%s1986_s1 + $0x214] ss:$8 sps:$4 sm:$0xff]   ;;  %v1436_v46 = vld [vmem:[%s1986_s1 + $0x2e4] ss:$8 sps:$4 sm:$0xff]  }
  0x20   :  { %969 = vmatpush1.bf16.msra.mxu1 %v1327_v31  ;;  %929 = vmatprep.subr.bf16.mxu0 %v1328_v32  ;;  %v1421_v31 = vld [vmem:[%s1986_s1 + $0x314] ss:$8 sps:$4 sm:$0xff]   ;;  %v1439_v47 = vld [vmem:[%s1986_s1 + $0x3e4] ss:$8 sps:$4 sm:$0xff]   ;;  %v1434_v48 = vld [vmem:[%s1986_s1 + $0x2e0] ss:$8 sps:$4 sm:$0xff]  }
  0x21   :  { %970 = vmatprep.subr.bf16.mxu1 %v1330_v33  ;;  %v1800_v32 = vld [vmem:[%s1987_s0 + $0x10] sm:$0xff] }
  0x22   :  { %v1416_v33 = vld [vmem:[%s1986_s1 + $0x210] ss:$8 sps:$4 sm:$0xff]  }
  0x23   :  { %930 = vmatpush2.bf16.msra.mxu0 %v1332_v34  ;;  %v1419_v34 = vld [vmem:[%s1986_s1 + $0x310] ss:$8 sps:$4 sm:$0xff]  }
  0x24   :  { %971 = vmatpush2.bf16.msra.mxu1 %v1333_v35  ;;  %931 = vmatprep.subr.bf16.mxu0 %v1334_v36  ;;  %v1131_v35 = vcombine.high %v1800_v32, %v1800_v32  ;;  %v1813_v36 = vld [vmem:[%s1987_s0 + $0x18] sm:$0xff] }
  0x25   :  { %972 = vmatprep.subr.bf16.mxu1 %v1336_v37  ;;  %v1424_v37 = vld [vmem:[%s1986_s1 + $0x204] ss:$8 sps:$4 sm:$0xff]  }
  0x27   :  { %932 = vmatpush2.bf16.msra.mxu0 %v1338_v38  ;;  %v1133_v38 = vcombine.high %v1813_v36, %v1813_v36 }
  0x28   :  { %973 = vmatpush2.bf16.msra.mxu1 %v1339_v39  ;;  %933 = vmatprep.subr.bf16.mxu0 %v1340_v40  ;;  %v1427_v39 = vld [vmem:[%s1986_s1 + $0x304] ss:$8 sps:$4 sm:$0xff]   ;;  %v1422_v40 = vld [vmem:[%s1986_s1 + $0x200] ss:$8 sps:$4 sm:$0xff]  }
  0x29   :  { %974 = vmatprep.subr.bf16.mxu1 %v1342_v41  ;;  %v1425_v41 = vld [vmem:[%s1986_s1 + $0x300] ss:$8 sps:$4 sm:$0xff]  }
  0x2b   :  { %934 = vmatpush2.bf16.msra.mxu0 %v1344_v42  ;;  %v1430_v42 = vld [vmem:[%s1986_s1 + $0x2f4] ss:$8 sps:$4 sm:$0xff]  }
  0x2c   :  { %975 = vmatpush2.bf16.msra.mxu1 %v1345_v43  ;;  %935 = vmatprep.subr.bf16.mxu0 %v1346_v44  ;;  %v1433_v43 = vld [vmem:[%s1986_s1 + $0x3f4] ss:$8 sps:$4 sm:$0xff]   ;;  %v1428_v44 = vld [vmem:[%s1986_s1 + $0x2f0] ss:$8 sps:$4 sm:$0xff]  }
  0x2d   :  { %976 = vmatprep.subr.bf16.mxu1 %v1348_v45  ;;  %v1431_v45 = vld [vmem:[%s1986_s1 + $0x3f0] ss:$8 sps:$4 sm:$0xff]  }
  0x2f   :  { %936 = vmatpush2.bf16.msra.mxu0 %v1350_v49  ;;  %v1437_v49 = vld [vmem:[%s1986_s1 + $0x3e0] ss:$8 sps:$4 sm:$0xff]  }
  0x30   :  { %977 = vmatpush2.bf16.msra.mxu1 %v1351_v50  ;;  %937 = vmatprep.subr.bf16.mxu0 %v1352_v52  ;;  %v1442_v50 = vld [vmem:[%s1986_s1 + $0x2d4] ss:$8 sps:$4 sm:$0xff]   ;;  %v1440_v52 = vld [vmem:[%s1986_s1 + $0x2d0] ss:$8 sps:$4 sm:$0xff]  }
  0x31   :  { %978 = vmatprep.subr.bf16.mxu1 %v1354_v53  ;;  %v1443_v53 = vld [vmem:[%s1986_s1 + $0x3d0] ss:$8 sps:$4 sm:$0xff]  }
  0x33   :  { %938 = vmatpush2.bf16.msra.mxu0 %v1356_v54  ;;  %v1448_v54 = vld [vmem:[%s1986_s1 + $0x2c4] ss:$8 sps:$4 sm:$0xff]  }
  0x34   :  { %979 = vmatpush2.bf16.msra.mxu1 %v1357_v55  ;;  %939 = vmatprep.subr.bf16.mxu0 %v1358_v56  ;;  %v1451_v55 = vld [vmem:[%s1986_s1 + $0x3c4] ss:$8 sps:$4 sm:$0xff]   ;;  %v1446_v56 = vld [vmem:[%s1986_s1 + $0x2c0] ss:$8 sps:$4 sm:$0xff]  }
  0x35   :  { %980 = vmatprep.subr.bf16.mxu1 %v1360_v57  ;;  %v1449_v57 = vld [vmem:[%s1986_s1 + $0x3c0] ss:$8 sps:$4 sm:$0xff]  }
  0x37   :  { %940 = vmatpush2.bf16.msra.mxu0 %v1362_v58  ;;  %v1454_v58 = vld [vmem:[%s1986_s1 + $0x2b4] ss:$8 sps:$4 sm:$0xff]  }
  0x38   :  { %981 = vmatpush2.bf16.msra.mxu1 %v1363_v59  ;;  %941 = vmatprep.subr.bf16.mxu0 %v1364_v60  ;;  %v1457_v59 = vld [vmem:[%s1986_s1 + $0x3b4] ss:$8 sps:$4 sm:$0xff]   ;;  %v1452_v60 = vld [vmem:[%s1986_s1 + $0x2b0] ss:$8 sps:$4 sm:$0xff]  }
  0x39   :  { %982 = vmatprep.subr.bf16.mxu1 %v1366_v61  ;;  %v1455_v61 = vld [vmem:[%s1986_s1 + $0x3b0] ss:$8 sps:$4 sm:$0xff]  }
  0x3b   :  { %942 = vmatpush2.bf16.msra.mxu0 %v1368_v62  ;;  %v1460_v62 = vld [vmem:[%s1986_s1 + $0x2a4] ss:$8 sps:$4 sm:$0xff]  }
  0x3c   :  { %983 = vmatpush2.bf16.msra.mxu1 %v1369_v63  ;;  %943 = vmatprep.subr.bf16.mxu0 %v1370_v0  ;;  %v1463_v63 = vld [vmem:[%s1986_s1 + $0x3a4] ss:$8 sps:$4 sm:$0xff]   ;;  %v1458_v0 = vld [vmem:[%s1986_s1 + $0x2a0] ss:$8 sps:$4 sm:$0xff]  }
  0x3d   :  { %984 = vmatprep.subr.bf16.mxu1 %v1372_v1  ;;  %v1461_v1 = vld [vmem:[%s1986_s1 + $0x3a0] ss:$8 sps:$4 sm:$0xff]  }
  0x3f   :  { %944 = vmatpush2.bf16.msra.mxu0 %v1374_v2  ;;  %v1466_v2 = vld [vmem:[%s1986_s1 + $0x294] ss:$8 sps:$4 sm:$0xff]  }
  0x40   :  { %985 = vmatpush2.bf16.msra.mxu1 %v1375_v3  ;;  %995 = vmatprep.subr.bf16.mxu0 %v1382_v4  ;;  %v1469_v3 = vld [vmem:[%s1986_s1 + $0x394] ss:$8 sps:$4 sm:$0xff]   ;;  %v1464_v4 = vld [vmem:[%s1986_s1 + $0x290] ss:$8 sps:$4 sm:$0xff]  }
  0x41   :  { %1036 = vmatprep.subr.bf16.mxu1 %v1385_v5  ;;  %v1467_v5 = vld [vmem:[%s1986_s1 + $0x390] ss:$8 sps:$4 sm:$0xff]  }
  0x42   :  { %946 = vmatmul.mubr.bf16.vlgmr.msra.gmra.mxu0 %v1126_v6  ;;  %v1472_v6 = vld [vmem:[%s1986_s1 + $0x284] ss:$8 sps:$4 sm:$0xff]  }
  0x43   :  { %987 = vmatmul.mubr.bf16.vlgmr.msra.gmra.mxu1 %v1128_v7  ;;  %996 = vmatpush1.bf16.msra.mxu0 %v1380_v8  ;;  %v1475_v7 = vld [vmem:[%s1986_s1 + $0x384] ss:$8 sps:$4 sm:$0xff]   ;;  %v1470_v8 = vld [vmem:[%s1986_s1 + $0x280] ss:$8 sps:$4 sm:$0xff]  }
  0x44   :  { %1037 = vmatpush1.bf16.msra.mxu1 %v1383_v9  ;;  %997 = vmatprep.subr.bf16.mxu0 %v1388_v10  ;;  %v1473_v9 = vld [vmem:[%s1986_s1 + $0x380] ss:$8 sps:$4 sm:$0xff]   ;;  %v1480_v10 = vld [vmem:[%s1986_s1 + $0x474] ss:$8 sps:$4 sm:$0xff]  }
  0x45   :  { %1038 = vmatprep.subr.bf16.mxu1 %v1391_v11  ;;  %1027 = vmatprep.mubr.bf16.mxu0 %v1131_v35  ;;  %v1130_v11 = vcombine.low %v1800_v32, %v1800_v32 }
  0x46   :  { %1068 = vmatprep.mubr.bf16.mxu1 %v1133_v38 }
  0x47   :  { %998 = vmatpush1.bf16.msra.mxu0 %v1386_v12  ;;  %v1132_v12 = vcombine.low %v1813_v36, %v1813_v36 }
  0x48   :  { %1039 = vmatpush1.bf16.msra.mxu1 %v1389_v13  ;;  %999 = vmatprep.subr.bf16.mxu0 %v1394_v14  ;;  %v1478_v13 = vld [vmem:[%s1986_s1 + $0x470] ss:$8 sps:$4 sm:$0xff]   ;;  %v1485_v14 = vld [vmem:[%s1986_s1 + $0x464] ss:$8 sps:$4 sm:$0xff]  }
  0x49   :  { %1040 = vmatprep.subr.bf16.mxu1 %v1397_v15  ;;  %v1483_v15 = vld [vmem:[%s1986_s1 + $0x460] ss:$8 sps:$4 sm:$0xff]  }
  0x4b   :  { %1000 = vmatpush1.bf16.msra.mxu0 %v1392_v16  ;;  %v1505_v16 = vmov 0  }
  0x4c   :  { %1041 = vmatpush1.bf16.msra.mxu1 %v1395_v17  ;;  %1001 = vmatprep.subr.bf16.mxu0 %v1400_v18  ;;  %v1488_v17 = vld [vmem:[%s1986_s1 + $0x454] ss:$8 sps:$4 sm:$0xff]   ;;  %v1486_v18 = vld [vmem:[%s1986_s1 + $0x450] ss:$8 sps:$4 sm:$0xff]  }
  0x4d   :  { %1042 = vmatprep.subr.bf16.mxu1 %v1403_v19  ;;  %v1491_v19 = vld [vmem:[%s1986_s1 + $0x444] ss:$8 sps:$4 sm:$0xff]  }
  0x4f   :  { %1002 = vmatpush1.bf16.msra.mxu0 %v1398_v20  ;;  %v1489_v20 = vld [vmem:[%s1986_s1 + $0x440] ss:$8 sps:$4 sm:$0xff]  }
  0x50   :  { %1043 = vmatpush1.bf16.msra.mxu1 %v1401_v21  ;;  %1003 = vmatprep.subr.bf16.mxu0 %v1406_v22  ;;  %v1494_v21 = vld [vmem:[%s1986_s1 + $0x434] ss:$8 sps:$4 sm:$0xff]   ;;  %v1492_v22 = vld [vmem:[%s1986_s1 + $0x430] ss:$8 sps:$4 sm:$0xff]  }
  0x51   :  { %1044 = vmatprep.subr.bf16.mxu1 %v1409_v23  ;;  %v1497_v23 = vld [vmem:[%s1986_s1 + $0x424] ss:$8 sps:$4 sm:$0xff]  }
  0x53   :  { %1004 = vmatpush1.bf16.msra.mxu0 %v1404_v24  ;;  %v1495_v24 = vld [vmem:[%s1986_s1 + $0x420] ss:$8 sps:$4 sm:$0xff]  }
  0x54   :  { %1045 = vmatpush1.bf16.msra.mxu1 %v1407_v25  ;;  %1005 = vmatprep.subr.bf16.mxu0 %v1412_v26  ;;  %v1500_v25 = vld [vmem:[%s1986_s1 + $0x414] ss:$8 sps:$4 sm:$0xff]   ;;  %v1498_v26 = vld [vmem:[%s1986_s1 + $0x410] ss:$8 sps:$4 sm:$0xff]  }
  0x55   :  { %1046 = vmatprep.subr.bf16.mxu1 %v1415_v27  ;;  %v1503_v27 = vld [vmem:[%s1986_s1 + $0x404] ss:$8 sps:$4 sm:$0xff]  }
  0x57   :  { %1006 = vmatpush1.bf16.msra.mxu0 %v1410_v28  ;;  %v1501_v28 = vld [vmem:[%s1986_s1 + $0x400] ss:$8 sps:$4 sm:$0xff]  }
  0x58   :  { %1047 = vmatpush1.bf16.msra.mxu1 %v1413_v29  ;;  %1007 = vmatprep.subr.bf16.mxu0 %v1418_v30  ;;  %v1504_v29 = vld [vmem:[%s1987_s0 + $0x20] ss:$0 sps:$4 sm:$0xff]  }
  0x59   :  { %1048 = vmatprep.subr.bf16.mxu1 %v1421_v31 }
  0x5b   :  { %1008 = vmatpush1.bf16.msra.mxu0 %v1416_v33 }
  0x5c   :  { %1049 = vmatpush1.bf16.msra.mxu1 %v1419_v34  ;;  %1009 = vmatprep.subr.bf16.mxu0 %v1424_v37 }
  0x5d   :  { %1050 = vmatprep.subr.bf16.mxu1 %v1427_v39 }
  0x5f   :  { %1010 = vmatpush1.bf16.msra.mxu0 %v1422_v40 }
  0x60   :  { %1051 = vmatpush1.bf16.msra.mxu1 %v1425_v41  ;;  %1011 = vmatprep.subr.bf16.mxu0 %v1430_v42 }
  0x61   :  { %1052 = vmatprep.subr.bf16.mxu1 %v1433_v43 }
  0x63   :  { %1012 = vmatpush2.bf16.msra.mxu0 %v1428_v44 }
  0x64   :  { %1053 = vmatpush2.bf16.msra.mxu1 %v1431_v45  ;;  %1013 = vmatprep.subr.bf16.mxu0 %v1436_v46 }
  0x65   :  { %1054 = vmatprep.subr.bf16.mxu1 %v1439_v47 }
  0x67   :  { %1014 = vmatpush2.bf16.msra.mxu0 %v1434_v48 }
  0x68   :  { %1055 = vmatpush2.bf16.msra.mxu1 %v1437_v49  ;;  %1015 = vmatprep.subr.bf16.mxu0 %v1442_v50 }
  0x69   :  { %1056 = vmatprep.subr.bf16.mxu1 %v1445_v51 }
  0x6b   :  { %1016 = vmatpush2.bf16.msra.mxu0 %v1440_v52 }
  0x6c   :  { %1057 = vmatpush2.bf16.msra.mxu1 %v1443_v53  ;;  %1017 = vmatprep.subr.bf16.mxu0 %v1448_v54 }
  0x6d   :  { %1058 = vmatprep.subr.bf16.mxu1 %v1451_v55 }
  0x6f   :  { %1018 = vmatpush2.bf16.msra.mxu0 %v1446_v56 }
  0x70   :  { %1059 = vmatpush2.bf16.msra.mxu1 %v1449_v57  ;;  %1019 = vmatprep.subr.bf16.mxu0 %v1454_v58 }
  0x71   :  { %1060 = vmatprep.subr.bf16.mxu1 %v1457_v59 }
  0x73   :  { %1020 = vmatpush2.bf16.msra.mxu0 %v1452_v60 }
  0x74   :  { %1061 = vmatpush2.bf16.msra.mxu1 %v1455_v61  ;;  %1021 = vmatprep.subr.bf16.mxu0 %v1460_v62 }
  0x75   :  { %1062 = vmatprep.subr.bf16.mxu1 %v1463_v63 }
  0x77   :  { %1022 = vmatpush2.bf16.msra.mxu0 %v1458_v0 }
  0x78   :  { %1063 = vmatpush2.bf16.msra.mxu1 %v1461_v1  ;;  %1023 = vmatprep.subr.bf16.mxu0 %v1466_v2 }
  0x79   :  { %1064 = vmatprep.subr.bf16.mxu1 %v1469_v3 }
  0x7b   :  { %1024 = vmatpush2.bf16.msra.mxu0 %v1464_v4 }
  0x7c   :  { %1065 = vmatpush2.bf16.msra.mxu1 %v1467_v5  ;;  %1025 = vmatprep.subr.bf16.mxu0 %v1472_v6 }
  0x7d   :  { %1066 = vmatprep.subr.bf16.mxu1 %v1475_v7 }
  0x7f   :  { %1026 = vmatpush2.bf16.msra.mxu0 %v1470_v8 }
  0x80   :  { %1067 = vmatpush2.bf16.msra.mxu1 %v1473_v9  ;;  %1077 = vmatprep.subr.bf16.mxu0 %v1480_v10 }
  0x82   :  { %1028 = vmatmul.mubr.bf16.vlgmr.msra.gmra.mxu0 %v1130_v11 }
  0x83   :  { %1069 = vmatmul.mubr.bf16.vlgmr.msra.gmra.mxu1 %v1132_v12  ;;  %1078 = vmatpush1.bf16.msra.mxu0 %v1478_v13 }
  0x84   :  { %1109 = vmatprep.mubr.bf16.mxu0 %v1505_v16  ;;  %1079 = vmatprep.subr.bf16.mxu0 %v1485_v14 }
  0x87   :  { %1080 = vmatpush1.bf16.msra.mxu0 %v1483_v15 }
  0x88   :  { %1081 = vmatprep.subr.bf16.mxu0 %v1488_v17 }
  0x8b   :  { %1082 = vmatpush1.bf16.msra.mxu0 %v1486_v18 }
  0x8c   :  { %1083 = vmatprep.subr.bf16.mxu0 %v1491_v19 }
  0x8f   :  { %1084 = vmatpush1.bf16.msra.mxu0 %v1489_v20 }
  0x90   :  { %1085 = vmatprep.subr.bf16.mxu0 %v1494_v21 }
  0x93   :  { %1086 = vmatpush1.bf16.msra.mxu0 %v1492_v22 }
  0x94   :  { %1087 = vmatprep.subr.bf16.mxu0 %v1497_v23 }
  0x97   :  { %1088 = vmatpush1.bf16.msra.mxu0 %v1495_v24 }
  0x98   :  { %1089 = vmatprep.subr.bf16.mxu0 %v1500_v25 }
  0x9b   :  { %1090 = vmatpush1.bf16.msra.mxu0 %v1498_v26 }
  0x9c   :  { %1091 = vmatprep.subr.bf16.mxu0 %v1503_v27 }
  0x9f   :  { %1092 = vmatpush1.bf16.msra.mxu0 %v1501_v28 }
  0xa2   :  { %1110 = vmatmul.mubr.bf16.vlgmr.msra.gmra.mxu0 %v1504_v29 }
 0x102   :  { %v947_v30 = vpop.f32.mrf.mxu0 }
 0x103   :  { %v988_v31 = vpop.f32.mrf.mxu1 }
 0x104   :  { %v989_v32 = vadd.f32 %v988_v31, %v947_v30  ;;  %v949_v33 = vpop.f32.mrf.mxu0 }
 0x105   :  { %v990_v34 = vpop.f32.mrf.mxu1 }
 0x106   :  { %v991_v35 = vadd.f32 %v990_v34, %v949_v33  ;;  %v951_v36 = vpop.f32.mrf.mxu0 }
 0x107   :  { %v992_v37 = vpop.f32.mrf.mxu1 }
 0x108   :  { %v952_v38 = vpop.f32.mrf.mxu0 }
 0x109   :  { %v993_v39 = vpop.f32.mrf.mxu1 }
 0x142   :  { %v1029_v40 = vpop.f32.mrf.mxu0 }
 0x143   :  { %v1070_v41 = vpop.f32.mrf.mxu1  ;;  %v1030_v48 = vadd.f32 %v1029_v40, %v989_v32 }
 0x144   :  { %v1031_v42 = vpop.f32.mrf.mxu0 }
 0x145   :  { %v1072_v43 = vpop.f32.mrf.mxu1  ;;  %v1032_v49 = vadd.f32 %v1031_v42, %v991_v35  ;;  %v1071_v50 = vadd.f32 %v1070_v41, %v1030_v48 }
 0x146   :  { %v1033_v44 = vpop.f32.mrf.mxu0 }
 0x147   :  { %v1074_v45 = vpop.f32.mrf.mxu1  ;;  %v1073_v52 = vadd.f32 %v1072_v43, %v1032_v49 }
 0x148   :  { %v1034_v46 = vpop.f32.mrf.mxu0 }
 0x149   :  { %v1075_v47 = vpop.f32.mrf.mxu1 }
 0x162   :  { %v1111_v51 = vpop.f32.mrf.mxu0 }
 0x163   :  { %v1112_v53 = vadd.f32 %v1111_v51, %v1071_v50 }
 0x164   :  { %v1113_v54 = vpop.f32.mrf.mxu0 }
 0x165   :  { %v1118_v55 = vmax.f32 %v1112_v53, 0.0  ;;  %v1114_v56 = vadd.f32 %v1113_v54, %v1073_v52 }
 0x166   :  { %v1115_v57 = vpop.f32.mrf.mxu0 }
 0x167   :  { %1120 = vst [vmem:[%s1988_s2] sm:$0xff] %v1118_v55  ;;  %v1119_v58 = vmax.f32 %v1114_v56, 0.0 }
 0x168   :  { %v1116_v59 = vpop.f32.mrf.mxu0 }
 0x169   :  { %1121 = vst [vmem:[%s1988_s2 + $0x8] sm:$0xff] %v1119_v58 }

// kernel: _lambda_.19
= control target key start
LH: loop header
LB: loop body
LE: loop exit
PB: predicated region body
PF: predicated region fallthrough
CT: control target
= control target key end

     0   :  { %vm993_vm0 = vcmask 523264   ;;  %s1742_s1 = inlined_call_operand.vmem [shape: bf16[896,192], index: 1, kind: input, shape index: {}]   ;;  %s1743_s0 = inlined_call_operand.vmem [shape: bf16[32,896], index: 0, kind: input, shape index: {}]   ;;  %s1744_s2 = inlined_call_operand.vmem [shape: f32[32,192], index: 2, kind: output, shape index: {}]  }
   0x1   :  { %v1132_v0 = vld [vmem:[%s1742_s1 + $0x74] ss:$8 sps:$4 sm:$0xff]   ;;  %v1136_v2 = vld [vmem:[%s1742_s1 + $0x70] ss:$8 sps:$4 sm:$0xff]   ;;  %v1138_v4 = vld [vmem:[%s1742_s1 + $0x64] ss:$8 sps:$4 sm:$0xff]  }
   0x2   :  { %v1134_v1 = vld [vmem:[%s1742_s1 + $0x174] ss:$8 sps:$4 sm:$0xff]   ;;  %772 = vmatprep.subr.bf16.mxu0 %v1132_v0  ;;  %v1137_v3 = vld [vmem:[%s1742_s1 + $0x170] ss:$8 sps:$4 sm:$0xff]   ;;  %v1140_v5 = vld [vmem:[%s1742_s1 + $0x164] ss:$8 sps:$4 sm:$0xff]  }
   0x3   :  { %825 = vmatprep.subr.bf16.mxu1 %v1134_v1  ;;  %773 = vmatpush1.bf16.msra.mxu0 %v1136_v2  ;;  %v1142_v6 = vld [vmem:[%s1742_s1 + $0x60] ss:$8 sps:$4 sm:$0xff]   ;;  %v1144_v8 = vld [vmem:[%s1742_s1 + $0x54] ss:$8 sps:$4 sm:$0xff]   ;;  %v1148_v10 = vld [vmem:[%s1742_s1 + $0x50] ss:$8 sps:$4 sm:$0xff]  }
   0x4   :  { %826 = vmatpush1.bf16.msra.mxu1 %v1137_v3  ;;  %774 = vmatprep.subr.bf16.mxu0 %v1138_v4  ;;  %v1143_v7 = vld [vmem:[%s1742_s1 + $0x160] ss:$8 sps:$4 sm:$0xff]   ;;  %v1146_v9 = vld [vmem:[%s1742_s1 + $0x154] ss:$8 sps:$4 sm:$0xff]   ;;  %v1149_v11 = vld [vmem:[%s1742_s1 + $0x150] ss:$8 sps:$4 sm:$0xff]  }
   0x5   :  { %827 = vmatprep.subr.bf16.mxu1 %v1140_v5  ;;  %v1150_v12 = vld [vmem:[%s1742_s1 + $0x44] ss:$8 sps:$4 sm:$0xff]   ;;  %v1154_v14 = vld [vmem:[%s1742_s1 + $0x40] ss:$8 sps:$4 sm:$0xff]   ;;  %v1156_v16 = vld [vmem:[%s1742_s1 + $0x34] ss:$8 sps:$4 sm:$0xff]  }
   0x6   :  { %v1152_v13 = vld [vmem:[%s1742_s1 + $0x144] ss:$8 sps:$4 sm:$0xff]   ;;  %v1155_v15 = vld [vmem:[%s1742_s1 + $0x140] ss:$8 sps:$4 sm:$0xff]   ;;  %v1158_v17 = vld [vmem:[%s1742_s1 + $0x134] ss:$8 sps:$4 sm:$0xff]  }
   0x7   :  { %775 = vmatpush1.bf16.msra.mxu0 %v1142_v6  ;;  %v1160_v18 = vld [vmem:[%s1742_s1 + $0x30] ss:$8 sps:$4 sm:$0xff]   ;;  %v1162_v20 = vld [vmem:[%s1742_s1 + $0x24] ss:$8 sps:$4 sm:$0xff]   ;;  %v1166_v22 = vld [vmem:[%s1742_s1 + $0x20] ss:$8 sps:$4 sm:$0xff]  }
   0x8   :  { %828 = vmatpush1.bf16.msra.mxu1 %v1143_v7  ;;  %776 = vmatprep.subr.bf16.mxu0 %v1144_v8  ;;  %v1161_v19 = vld [vmem:[%s1742_s1 + $0x130] ss:$8 sps:$4 sm:$0xff]   ;;  %v1164_v21 = vld [vmem:[%s1742_s1 + $0x124] ss:$8 sps:$4 sm:$0xff]   ;;  %v1167_v23 = vld [vmem:[%s1742_s1 + $0x120] ss:$8 sps:$4 sm:$0xff]  }
   0x9   :  { %829 = vmatprep.subr.bf16.mxu1 %v1146_v9  ;;  %v1168_v24 = vld [vmem:[%s1742_s1 + $0x14] ss:$8 sps:$4 sm:$0xff]   ;;  %v1172_v26 = vld [vmem:[%s1742_s1 + $0x10] ss:$8 sps:$4 sm:$0xff]   ;;  %v1174_v28 = vld [vmem:[%s1742_s1 + $0x4] ss:$8 sps:$4 sm:$0xff]  }
   0xa   :  { %v1170_v25 = vld [vmem:[%s1742_s1 + $0x114] ss:$8 sps:$4 sm:$0xff]   ;;  %v1173_v27 = vld [vmem:[%s1742_s1 + $0x110] ss:$8 sps:$4 sm:$0xff]   ;;  %v1176_v29 = vld [vmem:[%s1742_s1 + $0x104] ss:$8 sps:$4 sm:$0xff]  }
   0xb   :  { %777 = vmatpush1.bf16.msra.mxu0 %v1148_v10  ;;  %v1178_v30 = vld [vmem:[%s1742_s1] ss:$8 sps:$4 sm:$0xff]   ;;  %v1180_v32 = vld [vmem:[%s1742_s1 + $0xf4] ss:$8 sps:$4 sm:$0xff]   ;;  %v1184_v34 = vld [vmem:[%s1742_s1 + $0xf0] ss:$8 sps:$4 sm:$0xff]  }
   0xc   :  { %830 = vmatpush1.bf16.msra.mxu1 %v1149_v11  ;;  %778 = vmatprep.subr.bf16.mxu0 %v1150_v12  ;;  %v1179_v31 = vld [vmem:[%s1742_s1 + $0x100] ss:$8 sps:$4 sm:$0xff]   ;;  %v1182_v33 = vld [vmem:[%s1742_s1 + $0x1f4] ss:$8 sps:$4 sm:$0xff]   ;;  %v1185_v35 = vld [vmem:[%s1742_s1 + $0x1f0] ss:$8 sps:$4 sm:$0xff]  }
   0xd   :  { %831 = vmatprep.subr.bf16.mxu1 %v1152_v13  ;;  %v1186_v36 = vld [vmem:[%s1742_s1 + $0xe4] ss:$8 sps:$4 sm:$0xff]   ;;  %v1190_v38 = vld [vmem:[%s1742_s1 + $0xe0] ss:$8 sps:$4 sm:$0xff]   ;;  %v1192_v40 = vld [vmem:[%s1742_s1 + $0xd4] ss:$8 sps:$4 sm:$0xff]  }
   0xe   :  { %v1188_v37 = vld [vmem:[%s1742_s1 + $0x1e4] ss:$8 sps:$4 sm:$0xff]   ;;  %v1191_v39 = vld [vmem:[%s1742_s1 + $0x1e0] ss:$8 sps:$4 sm:$0xff]   ;;  %v1194_v41 = vld [vmem:[%s1742_s1 + $0x1d4] ss:$8 sps:$4 sm:$0xff]  }
   0xf   :  { %779 = vmatpush1.bf16.msra.mxu0 %v1154_v14  ;;  %v1196_v42 = vld [vmem:[%s1742_s1 + $0xd0] ss:$8 sps:$4 sm:$0xff]   ;;  %v1198_v44 = vld [vmem:[%s1742_s1 + $0xc4] ss:$8 sps:$4 sm:$0xff]   ;;  %v1202_v46 = vld [vmem:[%s1742_s1 + $0xc0] ss:$8 sps:$4 sm:$0xff]  }
  0x10   :  { %832 = vmatpush1.bf16.msra.mxu1 %v1155_v15  ;;  %780 = vmatprep.subr.bf16.mxu0 %v1156_v16  ;;  %v1197_v43 = vld [vmem:[%s1742_s1 + $0x1d0] ss:$8 sps:$4 sm:$0xff]   ;;  %v1200_v45 = vld [vmem:[%s1742_s1 + $0x1c4] ss:$8 sps:$4 sm:$0xff]   ;;  %v1203_v47 = vld [vmem:[%s1742_s1 + $0x1c0] ss:$8 sps:$4 sm:$0xff]  }
  0x11   :  { %833 = vmatprep.subr.bf16.mxu1 %v1158_v17  ;;  %v1204_v48 = vld [vmem:[%s1742_s1 + $0xb4] ss:$8 sps:$4 sm:$0xff]   ;;  %v1230_v49 = vld [vmem:[%s1743_s0 + $0x4] ss:$28 sps:$4 sm:$0xff]   ;;  %v1233_v51 = vld [vmem:[%s1743_s0 + $0xc] ss:$28 sps:$4 sm:$0xff]  }
  0x12   :  { %v1206_v50 = vld [vmem:[%s1742_s1 + $0x1b4] ss:$8 sps:$4 sm:$0xff]   ;;  %804 = vmatprep.mubr.bf16.mxu0 %v1230_v49  ;;  %v1208_v52 = vld [vmem:[%s1742_s1 + $0xb0] ss:$8 sps:$4 sm:$0xff]   ;;  %857 = vmatprep.mubr.bf16.mxu1 %v1233_v51  ;;  %v1210_v54 = vld [vmem:[%s1742_s1 + $0xa4] ss:$8 sps:$4 sm:$0xff]  }
  0x13   :  { %781 = vmatpush1.bf16.msra.mxu0 %v1160_v18  ;;  %v1209_v53 = vld [vmem:[%s1742_s1 + $0x1b0] ss:$8 sps:$4 sm:$0xff]   ;;  %v1212_v55 = vld [vmem:[%s1742_s1 + $0x1a4] ss:$8 sps:$4 sm:$0xff]   ;;  %v1214_v56 = vld [vmem:[%s1742_s1 + $0xa0] ss:$8 sps:$4 sm:$0xff]  }
  0x14   :  { %834 = vmatpush1.bf16.msra.mxu1 %v1161_v19  ;;  %782 = vmatprep.subr.bf16.mxu0 %v1162_v20  ;;  %v1215_v57 = vld [vmem:[%s1742_s1 + $0x1a0] ss:$8 sps:$4 sm:$0xff]   ;;  %v1216_v58 = vld [vmem:[%s1742_s1 + $0x94] ss:$8 sps:$4 sm:$0xff]   ;;  %v1220_v60 = vld [vmem:[%s1742_s1 + $0x90] ss:$8 sps:$4 sm:$0xff]  }
  0x15   :  { %835 = vmatprep.subr.bf16.mxu1 %v1164_v21  ;;  %v1218_v59 = vld [vmem:[%s1742_s1 + $0x194] ss:$8 sps:$4 sm:$0xff]   ;;  %v1221_v61 = vld [vmem:[%s1742_s1 + $0x190] ss:$8 sps:$4 sm:$0xff]   ;;  %v1222_v62 = vld [vmem:[%s1742_s1 + $0x84] ss:$8 sps:$4 sm:$0xff]  }
  0x16   :  { %v1224_v63 = vld [vmem:[%s1742_s1 + $0x184] ss:$8 sps:$4 sm:$0xff]   ;;  %v1226_v0 = vld [vmem:[%s1742_s1 + $0x80] ss:$8 sps:$4 sm:$0xff]   ;;  %v1236_v2 = vld [vmem:[%s1742_s1 + $0x274] ss:$8 sps:$4 sm:$0xff]  }
  0x17   :  { %783 = vmatpush1.bf16.msra.mxu0 %v1166_v22  ;;  %v1227_v1 = vld [vmem:[%s1742_s1 + $0x180] ss:$8 sps:$4 sm:$0xff]   ;;  %v1260_v3 = vld [vmem:[%s1742_s1 + $0x374] ss:$8 sps:$4 sm:$0xff]   ;;  %v1234_v6 = vld [vmem:[%s1742_s1 + $0x270] ss:$8 sps:$4 sm:$0xff]  }
  0x18   :  { %836 = vmatpush1.bf16.msra.mxu1 %v1167_v23  ;;  %784 = vmatprep.subr.bf16.mxu0 %v1168_v24  ;;  %v1228_v4 = vld [vmem:[%s1743_s0] ss:$28 sps:$4 sm:$0xff]   ;;  %v1231_v5 = vld [vmem:[%s1743_s0 + $0x8] ss:$28 sps:$4 sm:$0xff]   ;;  %v1258_v8 = vld [vmem:[%s1742_s1 + $0x370] ss:$8 sps:$4 sm:$0xff]  }
  0x19   :  { %837 = vmatprep.subr.bf16.mxu1 %v1170_v25  ;;  %v1239_v7 = vld [vmem:[%s1742_s1 + $0x264] ss:$8 sps:$4 sm:$0xff]   ;;  %v1237_v10 = vld [vmem:[%s1742_s1 + $0x260] ss:$8 sps:$4 sm:$0xff]   ;;  %v1242_v11 = vld [vmem:[%s1742_s1 + $0x254] ss:$8 sps:$4 sm:$0xff]  }
  0x1a   :  { %v1266_v9 = vld [vmem:[%s1742_s1 + $0x364] ss:$8 sps:$4 sm:$0xff]   ;;  %v1264_v12 = vld [vmem:[%s1742_s1 + $0x360] ss:$8 sps:$4 sm:$0xff]   ;;  %v1272_v13 = vld [vmem:[%s1742_s1 + $0x354] ss:$8 sps:$4 sm:$0xff]  }
  0x1b   :  { %785 = vmatpush1.bf16.msra.mxu0 %v1172_v26  ;;  %v1240_v14 = vld [vmem:[%s1742_s1 + $0x250] ss:$8 sps:$4 sm:$0xff]   ;;  %v1245_v16 = vld [vmem:[%s1742_s1 + $0x244] ss:$8 sps:$4 sm:$0xff]   ;;  %v1296_v21 = vld [vmem:[%s1743_s0 + $0x40] ss:$28 sps:$4 sm:$0xff]  }
  0x1c   :  { %838 = vmatpush1.bf16.msra.mxu1 %v1173_v27  ;;  %786 = vmatprep.subr.bf16.mxu0 %v1174_v28  ;;  %v1270_v15 = vld [vmem:[%s1742_s1 + $0x350] ss:$8 sps:$4 sm:$0xff]   ;;  %v1278_v17 = vld [vmem:[%s1742_s1 + $0x344] ss:$8 sps:$4 sm:$0xff]   ;;  %v1243_v22 = vld [vmem:[%s1742_s1 + $0x240] ss:$8 sps:$4 sm:$0xff]  }
  0x1d   :  { %839 = vmatprep.subr.bf16.mxu1 %v1176_v29  ;;  %v1291_v18 = vld [vmem:[%s1743_s0 + $0x3c] ss:$28 sps:$4 sm:$0xff]   ;;  %v1293_v19 = vld [vmem:[%s1743_s0 + $0x44] ss:$28 sps:$4 sm:$0xff]   ;;  %v1320_v26 = vmov 0  }
  0x1e   :  { %v1295_v20 = vld [vmem:[%s1743_s0 + $0x38] ss:$28 sps:$4 sm:$0xff]   ;;  %v1276_v24 = vld [vmem:[%s1742_s1 + $0x340] ss:$8 sps:$4 sm:$0xff]   ;;  %v1251_v28 = vld [vmem:[%s1742_s1 + $0x224] ss:$8 sps:$4 sm:$0xff]  }
  0x1f   :  { %787 = vmatpush1.bf16.msra.mxu0 %v1178_v30  ;;  %v1248_v23 = vld [vmem:[%s1742_s1 + $0x234] ss:$8 sps:$4 sm:$0xff]   ;;  %v1246_v27 = vld [vmem:[%s1742_s1 + $0x230] ss:$8 sps:$4 sm:$0xff]   ;;  %v1290_v30 = vld [vmem:[%s1742_s1 + $0x324] ss:$8 sps:$4 sm:$0xff]  }
  0x20   :  { %840 = vmatpush1.bf16.msra.mxu1 %v1179_v31  ;;  %788 = vmatprep.subr.bf16.mxu0 %v1180_v32  ;;  %v1284_v25 = vld [vmem:[%s1742_s1 + $0x334] ss:$8 sps:$4 sm:$0xff]   ;;  %v1282_v29 = vld [vmem:[%s1742_s1 + $0x330] ss:$8 sps:$4 sm:$0xff]   ;;  %v1249_v32 = vld [vmem:[%s1742_s1 + $0x220] ss:$8 sps:$4 sm:$0xff]  }
  0x21   :  { %841 = vmatprep.subr.bf16.mxu1 %v1182_v33  ;;  %v1315_v31 = vld [vmem:[%s1743_s0 + $0x14] ss:$28 sps:$4 sm:$0xff]   ;;  %v1288_v33 = vld [vmem:[%s1742_s1 + $0x320] ss:$8 sps:$4 sm:$0xff]  }
  0x22   :  { %v1273_v49 = vld [vmem:[%s1742_s1 + $0x2d0] ss:$8 sps:$4 sm:$0xff]   ;;  %v1279_v51 = vld [vmem:[%s1742_s1 + $0x2c0] ss:$8 sps:$4 sm:$0xff]  }
  0x23   :  { %789 = vmatpush2.bf16.msra.mxu0 %v1184_v34  ;;  %v1254_v34 = vld [vmem:[%s1742_s1 + $0x214] ss:$8 sps:$4 sm:$0xff]  }
  0x24   :  { %842 = vmatpush2.bf16.msra.mxu1 %v1185_v35  ;;  %790 = vmatprep.subr.bf16.mxu0 %v1186_v36  ;;  %v1302_v35 = vld [vmem:[%s1742_s1 + $0x314] ss:$8 sps:$4 sm:$0xff]   ;;  %v1252_v36 = vld [vmem:[%s1742_s1 + $0x210] ss:$8 sps:$4 sm:$0xff]  }
  0x25   :  { %843 = vmatprep.subr.bf16.mxu1 %v1188_v37  ;;  %v1300_v37 = vld [vmem:[%s1742_s1 + $0x310] ss:$8 sps:$4 sm:$0xff]  }
  0x27   :  { %791 = vmatpush2.bf16.msra.mxu0 %v1190_v38  ;;  %v1257_v38 = vld [vmem:[%s1742_s1 + $0x204] ss:$8 sps:$4 sm:$0xff]  }
  0x28   :  { %844 = vmatpush2.bf16.msra.mxu1 %v1191_v39  ;;  %792 = vmatprep.subr.bf16.mxu0 %v1192_v40  ;;  %v1308_v39 = vld [vmem:[%s1742_s1 + $0x304] ss:$8 sps:$4 sm:$0xff]   ;;  %v1255_v40 = vld [vmem:[%s1742_s1 + $0x200] ss:$8 sps:$4 sm:$0xff]  }
  0x29   :  { %845 = vmatprep.subr.bf16.mxu1 %v1194_v41  ;;  %v1306_v41 = vld [vmem:[%s1742_s1 + $0x300] ss:$8 sps:$4 sm:$0xff]  }
  0x2b   :  { %793 = vmatpush2.bf16.msra.mxu0 %v1196_v42  ;;  %v1263_v42 = vld [vmem:[%s1742_s1 + $0x2f4] ss:$8 sps:$4 sm:$0xff]  }
  0x2c   :  { %846 = vmatpush2.bf16.msra.mxu1 %v1197_v43  ;;  %794 = vmatprep.subr.bf16.mxu0 %v1198_v44  ;;  %v1312_v43 = vld [vmem:[%s1743_s0 + $0x18] ss:$28 sps:$4 sm:$0xff]  }
  0x2d   :  { %847 = vmatprep.subr.bf16.mxu1 %v1200_v45  ;;  %v1261_v44 = vld [vmem:[%s1742_s1 + $0x2f0] ss:$8 sps:$4 sm:$0xff]   ;;  %v1269_v45 = vld [vmem:[%s1742_s1 + $0x2e4] ss:$8 sps:$4 sm:$0xff]  }
  0x2f   :  { %795 = vmatpush2.bf16.msra.mxu0 %v1202_v46  ;;  %v1267_v46 = vld [vmem:[%s1742_s1 + $0x2e0] ss:$8 sps:$4 sm:$0xff]  }
  0x30   :  { %848 = vmatpush2.bf16.msra.mxu1 %v1203_v47  ;;  %796 = vmatprep.subr.bf16.mxu0 %v1204_v48  ;;  %v1275_v47 = vld [vmem:[%s1742_s1 + $0x2d4] ss:$8 sps:$4 sm:$0xff]   ;;  %v1316_v48 = vld [vmem:[%s1743_s0 + $0x50] ss:$28 sps:$4 sm:$0xff]  }
  0x31   :  { %849 = vmatprep.subr.bf16.mxu1 %v1206_v50  ;;  %v1281_v50 = vld [vmem:[%s1742_s1 + $0x2c4] ss:$8 sps:$4 sm:$0xff]  }
  0x33   :  { %797 = vmatpush2.bf16.msra.mxu0 %v1208_v52  ;;  %v1287_v52 = vld [vmem:[%s1742_s1 + $0x2b4] ss:$8 sps:$4 sm:$0xff]  }
  0x34   :  { %850 = vmatpush2.bf16.msra.mxu1 %v1209_v53  ;;  %798 = vmatprep.subr.bf16.mxu0 %v1210_v54  ;;  %v1285_v53 = vld [vmem:[%s1742_s1 + $0x2b0] ss:$8 sps:$4 sm:$0xff]   ;;  %v1299_v54 = vld [vmem:[%s1742_s1 + $0x2a4] ss:$8 sps:$4 sm:$0xff]  }
  0x35   :  { %851 = vmatprep.subr.bf16.mxu1 %v1212_v55  ;;  %v1297_v55 = vld [vmem:[%s1742_s1 + $0x2a0] ss:$8 sps:$4 sm:$0xff]  }
  0x37   :  { %799 = vmatpush2.bf16.msra.mxu0 %v1214_v56  ;;  %v1305_v56 = vld [vmem:[%s1742_s1 + $0x294] ss:$8 sps:$4 sm:$0xff]  }
  0x38   :  { %852 = vmatpush2.bf16.msra.mxu1 %v1215_v57  ;;  %800 = vmatprep.subr.bf16.mxu0 %v1216_v58  ;;  %v1303_v57 = vld [vmem:[%s1742_s1 + $0x290] ss:$8 sps:$4 sm:$0xff]   ;;  %v1311_v58 = vld [vmem:[%s1742_s1 + $0x284] ss:$8 sps:$4 sm:$0xff]  }
  0x39   :  { %853 = vmatprep.subr.bf16.mxu1 %v1218_v59  ;;  %v1309_v59 = vld [vmem:[%s1742_s1 + $0x280] ss:$8 sps:$4 sm:$0xff]  }
  0x3b   :  { %801 = vmatpush2.bf16.msra.mxu0 %v1220_v60  ;;  %v1313_v60 = vld [vmem:[%s1743_s0 + $0x10] ss:$28 sps:$4 sm:$0xff]  }
  0x3c   :  { %854 = vmatpush2.bf16.msra.mxu1 %v1221_v61  ;;  %802 = vmatprep.subr.bf16.mxu0 %v1222_v62  ;;  %v1317_v61 = vld [vmem:[%s1743_s0 + $0x4c] ss:$28 sps:$4 sm:$0xff]  }
  0x3d   :  { %855 = vmatprep.subr.bf16.mxu1 %v1224_v63  ;;  %v1319_v62 = vld [vmem:[%s1743_s0 + $0x48] ss:$28 sps:$4 sm:$0xff]  }
  0x3f   :  { %803 = vmatpush2.bf16.msra.mxu0 %v1226_v0 }
  0x40   :  { %856 = vmatpush2.bf16.msra.mxu1 %v1227_v1  ;;  %878 = vmatprep.subr.bf16.mxu0 %v1236_v2 }
  0x41   :  { %931 = vmatprep.subr.bf16.mxu1 %v1260_v3 }
  0x42   :  { %805 = vmatmul.mubr.bf16.vlgmr.msra.gmra.mxu0 %v1228_v4 }
  0x43   :  { %858 = vmatmul.mubr.bf16.vlgmr.msra.gmra.mxu1 %v1231_v5  ;;  %879 = vmatpush1.bf16.msra.mxu0 %v1234_v6 }
  0x44   :  { %932 = vmatpush1.bf16.msra.mxu1 %v1258_v8  ;;  %880 = vmatprep.subr.bf16.mxu0 %v1239_v7 }
  0x45   :  { %933 = vmatprep.subr.bf16.mxu1 %v1266_v9  ;;  %814 = vmatprep.mubr.bf16.mxu0 %v1291_v18 }
  0x46   :  { %867 = vmatprep.mubr.bf16.mxu1 %v1293_v19 }
  0x47   :  { %881 = vmatpush1.bf16.msra.mxu0 %v1237_v10 }
  0x48   :  { %934 = vmatpush1.bf16.msra.mxu1 %v1264_v12  ;;  %882 = vmatprep.subr.bf16.mxu0 %v1242_v11 }
  0x49   :  { %935 = vmatprep.subr.bf16.mxu1 %v1272_v13 }
  0x4a   :  { %815 = vmatmul.mubr.bf16.gmra.mxu0 %v1295_v20 }
  0x4b   :  { %868 = vmatmul.mubr.bf16.gmra.mxu1 %v1296_v21  ;;  %883 = vmatpush1.bf16.msra.mxu0 %v1240_v14 }
  0x4c   :  { %936 = vmatpush1.bf16.msra.mxu1 %v1270_v15  ;;  %884 = vmatprep.subr.bf16.mxu0 %v1245_v16 }
  0x4d   :  { %937 = vmatprep.subr.bf16.mxu1 %v1278_v17  ;;  %963 = vmatprep.mubr.bf16.mxu1 %v1320_v26 }
  0x4e   :  { %910 = vmatprep.mubr.bf16.mxu0 %v1315_v31 }
  0x4f   :  { %885 = vmatpush1.bf16.msra.mxu0 %v1243_v22 }
  0x50   :  { %938 = vmatpush1.bf16.msra.mxu1 %v1276_v24  ;;  %886 = vmatprep.subr.bf16.mxu0 %v1248_v23 }
  0x51   :  { %939 = vmatprep.subr.bf16.mxu1 %v1284_v25 }
  0x53   :  { %887 = vmatpush1.bf16.msra.mxu0 %v1246_v27 }
  0x54   :  { %940 = vmatpush1.bf16.msra.mxu1 %v1282_v29  ;;  %888 = vmatprep.subr.bf16.mxu0 %v1251_v28 }
  0x55   :  { %941 = vmatprep.subr.bf16.mxu1 %v1290_v30 }
  0x57   :  { %889 = vmatpush1.bf16.msra.mxu0 %v1249_v32 }
  0x58   :  { %942 = vmatpush1.bf16.msra.mxu1 %v1288_v33  ;;  %890 = vmatprep.subr.bf16.mxu0 %v1254_v34 }
  0x59   :  { %943 = vmatprep.subr.bf16.mxu1 %v1302_v35 }
  0x5b   :  { %891 = vmatpush1.bf16.msra.mxu0 %v1252_v36 }
  0x5c   :  { %944 = vmatpush1.bf16.msra.mxu1 %v1300_v37  ;;  %892 = vmatprep.subr.bf16.mxu0 %v1257_v38 }
  0x5d   :  { %945 = vmatprep.subr.bf16.mxu1 %v1308_v39 }
  0x5f   :  { %893 = vmatpush1.bf16.msra.mxu0 %v1255_v40 }
  0x60   :  { %946 = vmatpush1.bf16.msra.mxu1 %v1306_v41  ;;  %894 = vmatprep.subr.bf16.mxu0 %v1263_v42 }
  0x63   :  { %964 = vmatmul.mubr.bf16.vlgmr.msra.gmra.mxu1 %v1312_v43  ;;  %895 = vmatpush2.bf16.msra.mxu0 %v1261_v44 }
  0x64   :  { %973 = vmatprep.mubr.bf16.mxu1 %v1320_v26  ;;  %896 = vmatprep.subr.bf16.mxu0 %v1269_v45 }
  0x67   :  { %897 = vmatpush2.bf16.msra.mxu0 %v1267_v46 }
  0x68   :  { %898 = vmatprep.subr.bf16.mxu0 %v1275_v47 }
  0x6b   :  { %974 = vmatmul.mubr.bf16.gmra.mxu1 %v1316_v48  ;;  %899 = vmatpush2.bf16.msra.mxu0 %v1273_v49 }
  0x6c   :  { %900 = vmatprep.subr.bf16.mxu0 %v1281_v50 }
  0x6f   :  { %901 = vmatpush2.bf16.msra.mxu0 %v1279_v51 }
  0x70   :  { %902 = vmatprep.subr.bf16.mxu0 %v1287_v52 }
  0x73   :  { %903 = vmatpush2.bf16.msra.mxu0 %v1285_v53 }
  0x74   :  { %904 = vmatprep.subr.bf16.mxu0 %v1299_v54 }
  0x77   :  { %905 = vmatpush2.bf16.msra.mxu0 %v1297_v55 }
  0x78   :  { %906 = vmatprep.subr.bf16.mxu0 %v1305_v56 }
  0x7b   :  { %907 = vmatpush2.bf16.msra.mxu0 %v1303_v57 }
  0x7c   :  { %908 = vmatprep.subr.bf16.mxu0 %v1311_v58 }
  0x7f   :  { %909 = vmatpush2.bf16.msra.mxu0 %v1309_v59 }
  0x82   :  { %911 = vmatmul.mubr.bf16.vlgmr.msra.gmra.mxu0 %v1313_v60 }
  0x83   :  { %920 = vmatprep.mubr.bf16.mxu0 %v1317_v61 }
  0x8a   :  { %921 = vmatmul.mubr.bf16.gmra.mxu0 %v1319_v62 }
 0x102   :  { %v806_v2 = vpop.f32.mrf.mxu0 }
 0x103   :  { %v859_v63 = vpop.f32.mrf.mxu1 }
 0x104   :  { %v808_v5 = vpop.f32.mrf.mxu0  ;;  %v860_v18 = vadd.f32 %v859_v63, %v806_v2 }
 0x105   :  { %v861_v0 = vpop.f32.mrf.mxu1 }
 0x106   :  { %v810_v7 = vpop.f32.mrf.mxu0  ;;  %v862_v21 = vadd.f32 %v861_v0, %v808_v5 }
 0x107   :  { %v863_v1 = vpop.f32.mrf.mxu1 }
 0x108   :  { %v812_v9 = vpop.f32.mrf.mxu0  ;;  %v864_v24 = vadd.f32 %v863_v1, %v810_v7 }
 0x109   :  { %v865_v3 = vpop.f32.mrf.mxu1 }
 0x10a   :  { %v816_v10 = vpop.f32.mrf.mxu0  ;;  %v866_v29 = vadd.f32 %v865_v3, %v812_v9 }
 0x10b   :  { %v869_v4 = vpop.f32.mrf.mxu1 }
 0x10c   :  { %v818_v13 = vpop.f32.mrf.mxu0  ;;  %v870_v34 = vadd.f32 %v869_v4, %v816_v10 }
 0x10d   :  { %v871_v6 = vpop.f32.mrf.mxu1 }
 0x10e   :  { %v820_v15 = vpop.f32.mrf.mxu0  ;;  %v872_v40 = vadd.f32 %v871_v6, %v818_v13 }
 0x10f   :  { %v873_v8 = vpop.f32.mrf.mxu1 }
 0x110   :  { %v822_v17 = vpop.f32.mrf.mxu0  ;;  %v874_v45 = vadd.f32 %v873_v8, %v820_v15 }
 0x111   :  { %v875_v11 = vpop.f32.mrf.mxu1 }
 0x112   :  { %v876_v51 = vadd.f32 %v875_v11, %v822_v17 }
 0x123   :  { %v965_v12 = vpop.f32.mrf.mxu1 }
 0x125   :  { %v967_v14 = vpop.f32.mrf.mxu1 }
 0x127   :  { %v969_v16 = vpop.f32.mrf.mxu1 }
 0x129   :  { %v971_v20 = vpop.f32.mrf.mxu1 }
 0x12b   :  { %v975_v28 = vpop.f32.mrf.mxu1 }
 0x12d   :  { %v977_v38 = vpop.f32.mrf.mxu1 }
 0x12f   :  { %v979_v49 = vpop.f32.mrf.mxu1 }
 0x131   :  { %v981_v59 = vpop.f32.mrf.mxu1 }
 0x142   :  { %v912_v19 = vpop.f32.mrf.mxu0 }
 0x143   :  { %v913_v22 = vadd.f32 %v912_v19, %v860_v18 }
 0x144   :  { %v914_v23 = vpop.f32.mrf.mxu0 }
 0x145   :  { %v966_v25 = vadd.f32 %v965_v12, %v913_v22  ;;  %v915_v26 = vadd.f32 %v914_v23, %v862_v21 }
 0x146   :  { %v916_v27 = vpop.f32.mrf.mxu0 }
 0x147   :  { %v984_v30 = vmax.f32 %v966_v25, 0.0  ;;  %v968_v31 = vadd.f32 %v967_v14, %v915_v26  ;;  %v917_v32 = vadd.f32 %v916_v27, %v864_v24 }
 0x148   :  { %v918_v33 = vpop.f32.mrf.mxu0 }
 0x149   :  { %992 = vst [vmem:[%s1744_s2] sm:$0xff] %v984_v30  ;;  %v985_v35 = vmax.f32 %v968_v31, 0.0  ;;  %v970_v36 = vadd.f32 %v969_v16, %v917_v32  ;;  %v919_v37 = vadd.f32 %v918_v33, %v866_v29 }
 0x14a   :  { %v922_v39 = vpop.f32.mrf.mxu0 }
 0x14b   :  { %994 = vst.msk [vmem:[%s1744_s2 + $0x8] sm:$0xff] %vm993_vm0, %v985_v35  ;;  %v986_v41 = vmax.f32 %v970_v36, 0.0  ;;  %v972_v42 = vadd.f32 %v971_v20, %v919_v37  ;;  %v923_v43 = vadd.f32 %v922_v39, %v870_v34 }
 0x14c   :  { %v924_v44 = vpop.f32.mrf.mxu0 }
 0x14d   :  { %995 = vst [vmem:[%s1744_s2 + $0x10] sm:$0xff] %v986_v41  ;;  %v987_v46 = vmax.f32 %v972_v42, 0.0  ;;  %v976_v47 = vadd.f32 %v975_v28, %v923_v43  ;;  %v925_v48 = vadd.f32 %v924_v44, %v872_v40 }
 0x14e   :  { %v926_v50 = vpop.f32.mrf.mxu0 }
 0x14f   :  { %996 = vst.msk [vmem:[%s1744_s2 + $0x18] sm:$0xff] %vm993_vm0, %v987_v46  ;;  %v988_v52 = vmax.f32 %v976_v47, 0.0  ;;  %v978_v53 = vadd.f32 %v977_v38, %v925_v48  ;;  %v927_v54 = vadd.f32 %v926_v50, %v874_v45 }
 0x150   :  { %v928_v55 = vpop.f32.mrf.mxu0 }
 0x151   :  { %997 = vst [vmem:[%s1744_s2 + $0x20] sm:$0xff] %v988_v52  ;;  %v989_v56 = vmax.f32 %v978_v53, 0.0  ;;  %v980_v57 = vadd.f32 %v979_v49, %v927_v54  ;;  %v929_v58 = vadd.f32 %v928_v55, %v876_v51 }
 0x153   :  { %998 = vst.msk [vmem:[%s1744_s2 + $0x28] sm:$0xff] %vm993_vm0, %v989_v56  ;;  %v990_v60 = vmax.f32 %v980_v57, 0.0  ;;  %v982_v61 = vadd.f32 %v981_v59, %v929_v58 }
 0x155   :  { %999 = vst [vmem:[%s1744_s2 + $0x30] sm:$0xff] %v990_v60  ;;  %v991_v62 = vmax.f32 %v982_v61, 0.0 }
 0x157   :  { %1000 = vst.msk [vmem:[%s1744_s2 + $0x38] sm:$0xff] %vm993_vm0, %v991_v62 }

// kernel: _lambda_.20
= control target key start
LH: loop header
LB: loop body
LE: loop exit
PB: predicated region body
PF: predicated region fallthrough
CT: control target
= control target key end

     0   :  { %s1625_s1 = inlined_call_operand.vmem [shape: bf16[640,128], index: 1, kind: input, shape index: {}]   ;;  %s1626_s0 = inlined_call_operand.vmem [shape: bf16[128,640], index: 0, kind: input, shape index: {}]   ;;  %s1627_s2 = inlined_call_operand.vmem [shape: f32[128,128], index: 2, kind: output, shape index: {}]  }
   0x1   :  { %v1187_v0 = vld [vmem:[%s1625_s1 + $0x78] sm:$0xff]   ;;  %v1191_v4 = vld [vmem:[%s1625_s1 + $0x70] sm:$0xff]   ;;  %v1195_v8 = vld [vmem:[%s1625_s1 + $0x68] sm:$0xff]  }
   0x2   :  { %v1188_v1 = vld [vmem:[%s1625_s1 + $0xf8] sm:$0xff]   ;;  %995 = vmatprep.subr.bf16.mxu0 %v1187_v0  ;;  %v1192_v5 = vld [vmem:[%s1625_s1 + $0xf0] sm:$0xff]   ;;  %v1196_v9 = vld [vmem:[%s1625_s1 + $0xe8] sm:$0xff]  }
   0x3   :  { %v1189_v2 = vld [vmem:[%s1625_s1 + $0x38] sm:$0xff]   ;;  %1059 = vmatprep.subr.bf16.mxu1 %v1188_v1  ;;  %v1193_v6 = vld [vmem:[%s1625_s1 + $0x30] sm:$0xff]   ;;  %v1197_v10 = vld [vmem:[%s1625_s1 + $0x28] sm:$0xff]  }
   0x4   :  { %v1190_v3 = vld [vmem:[%s1625_s1 + $0xb8] sm:$0xff]   ;;  %996 = vmatpush3.bf16.msra.mxu0 %v1189_v2  ;;  %v1194_v7 = vld [vmem:[%s1625_s1 + $0xb0] sm:$0xff]   ;;  %v1198_v11 = vld [vmem:[%s1625_s1 + $0xa8] sm:$0xff]  }
   0x5   :  { %1060 = vmatpush3.bf16.msra.mxu1 %v1190_v3  ;;  %997 = vmatprep.subr.bf16.mxu0 %v1191_v4  ;;  %v1199_v12 = vld [vmem:[%s1625_s1 + $0x60] sm:$0xff]   ;;  %v1203_v16 = vld [vmem:[%s1625_s1 + $0x58] sm:$0xff]   ;;  %v1207_v20 = vld [vmem:[%s1625_s1 + $0x50] sm:$0xff]  }
   0x6   :  { %1061 = vmatprep.subr.bf16.mxu1 %v1192_v5  ;;  %v1200_v13 = vld [vmem:[%s1625_s1 + $0xe0] sm:$0xff]   ;;  %v1204_v17 = vld [vmem:[%s1625_s1 + $0xd8] sm:$0xff]   ;;  %v1208_v21 = vld [vmem:[%s1625_s1 + $0xd0] sm:$0xff]  }
   0x7   :  { %v1201_v14 = vld [vmem:[%s1625_s1 + $0x20] sm:$0xff]   ;;  %v1205_v18 = vld [vmem:[%s1625_s1 + $0x18] sm:$0xff]   ;;  %v1209_v22 = vld [vmem:[%s1625_s1 + $0x10] sm:$0xff]  }
   0x8   :  { %998 = vmatpush3.bf16.msra.mxu0 %v1193_v6  ;;  %v1202_v15 = vld [vmem:[%s1625_s1 + $0xa0] sm:$0xff]   ;;  %v1206_v19 = vld [vmem:[%s1625_s1 + $0x98] sm:$0xff]   ;;  %v1210_v23 = vld [vmem:[%s1625_s1 + $0x90] sm:$0xff]  }
   0x9   :  { %1062 = vmatpush3.bf16.msra.mxu1 %v1194_v7  ;;  %999 = vmatprep.subr.bf16.mxu0 %v1195_v8  ;;  %v1211_v24 = vld [vmem:[%s1625_s1 + $0x48] sm:$0xff]   ;;  %v1215_v28 = vld [vmem:[%s1625_s1 + $0x40] sm:$0xff]   ;;  %v1225_v36 = vld [vmem:[%s1625_s1 + $0x138] sm:$0xff]  }
   0xa   :  { %1063 = vmatprep.subr.bf16.mxu1 %v1196_v9  ;;  %v1212_v25 = vld [vmem:[%s1625_s1 + $0xc8] sm:$0xff]   ;;  %v1216_v29 = vld [vmem:[%s1625_s1 + $0xc0] sm:$0xff]   ;;  %v1232_v39 = vld [vmem:[%s1625_s1 + $0x130] sm:$0xff]  }
   0xb   :  { %v1213_v26 = vld [vmem:[%s1625_s1 + $0x8] sm:$0xff]   ;;  %v1217_v30 = vld [vmem:[%s1625_s1] sm:$0xff]   ;;  %v1235_v43 = vld [vmem:[%s1626_s0 + $0x5c] ss:$20 sps:$4 sm:$0xff]  }
   0xc   :  { %1000 = vmatpush3.bf16.msra.mxu0 %v1197_v10  ;;  %v1214_v27 = vld [vmem:[%s1625_s1 + $0x88] sm:$0xff]   ;;  %v1218_v31 = vld [vmem:[%s1625_s1 + $0x80] sm:$0xff]   ;;  %v1240_v48 = vld [vmem:[%s1626_s0 + $0x7c] ss:$20 sps:$4 sm:$0xff]  }
   0xd   :  { %1064 = vmatpush3.bf16.msra.mxu1 %v1198_v11  ;;  %1001 = vmatprep.subr.bf16.mxu0 %v1199_v12  ;;  %v1219_v32 = vld [vmem:[%s1626_s0] ss:$20 sps:$4 sm:$0xff]   ;;  %v1221_v33 = vld [vmem:[%s1626_s0 + $0x4] ss:$20 sps:$4 sm:$0xff]   ;;  %v1222_v34 = vld [vmem:[%s1626_s0 + $0x8] ss:$20 sps:$4 sm:$0xff]  }
   0xe   :  { %1065 = vmatprep.subr.bf16.mxu1 %v1200_v13  ;;  %v1224_v35 = vld [vmem:[%s1626_s0 + $0xc] ss:$20 sps:$4 sm:$0xff]   ;;  %620 = vmatprep.mubr.bf16.mxu0 %v1221_v33  ;;  %v1228_v38 = vld [vmem:[%s1626_s0 + $0x34] ss:$20 sps:$4 sm:$0xff]   ;;  %v1231_v41 = vld [vmem:[%s1626_s0 + $0x30] ss:$20 sps:$4 sm:$0xff]  }
   0xf   :  { %717 = vmatprep.mubr.bf16.mxu1 %v1224_v35  ;;  %v1226_v37 = vld [vmem:[%s1626_s0 + $0x2c] ss:$20 sps:$4 sm:$0xff]   ;;  %v1230_v40 = vld [vmem:[%s1626_s0 + $0x28] ss:$20 sps:$4 sm:$0xff]   ;;  %v1237_v46 = vld [vmem:[%s1626_s0 + $0x50] ss:$20 sps:$4 sm:$0xff]  }
  0x10   :  { %1002 = vmatpush3.bf16.msra.mxu0 %v1201_v14  ;;  %v1233_v42 = vld [vmem:[%s1626_s0 + $0x54] ss:$20 sps:$4 sm:$0xff]   ;;  %v1246_v45 = vld [vmem:[%s1625_s1 + $0x120] sm:$0xff]   ;;  %v1238_v47 = vld [vmem:[%s1626_s0 + $0x58] ss:$20 sps:$4 sm:$0xff]  }
  0x11   :  { %1066 = vmatpush3.bf16.msra.mxu1 %v1202_v15  ;;  %1003 = vmatprep.subr.bf16.mxu0 %v1203_v16  ;;  %v1239_v44 = vld [vmem:[%s1625_s1 + $0x128] sm:$0xff]   ;;  %v1242_v49 = vld [vmem:[%s1626_s0 + $0x84] ss:$20 sps:$4 sm:$0xff]   ;;  %v1260_v51 = vld [vmem:[%s1625_s1 + $0x110] sm:$0xff]  }
  0x12   :  { %1067 = vmatprep.subr.bf16.mxu1 %v1204_v17  ;;  %v1253_v50 = vld [vmem:[%s1625_s1 + $0x118] sm:$0xff]   ;;  %v1245_v53 = vld [vmem:[%s1626_s0 + $0x80] ss:$20 sps:$4 sm:$0xff]   ;;  %v1267_v55 = vld [vmem:[%s1625_s1 + $0x108] sm:$0xff]  }
  0x13   :  { %v1244_v52 = vld [vmem:[%s1626_s0 + $0x78] ss:$20 sps:$4 sm:$0xff]   ;;  %v1274_v57 = vld [vmem:[%s1625_s1 + $0x100] sm:$0xff]   ;;  %v1252_v59 = vld [vmem:[%s1626_s0 + $0xa8] ss:$20 sps:$4 sm:$0xff]  }
  0x14   :  { %1004 = vmatpush3.bf16.msra.mxu0 %v1205_v18  ;;  %v1247_v54 = vld [vmem:[%s1626_s0 + $0xa4] ss:$20 sps:$4 sm:$0xff]   ;;  %v1249_v56 = vld [vmem:[%s1626_s0 + $0xac] ss:$20 sps:$4 sm:$0xff]   ;;  %v1256_v61 = vld [vmem:[%s1626_s0 + $0xd4] ss:$20 sps:$4 sm:$0xff]  }
  0x15   :  { %1068 = vmatpush3.bf16.msra.mxu1 %v1206_v19  ;;  %1005 = vmatprep.subr.bf16.mxu0 %v1207_v20  ;;  %v1251_v58 = vld [vmem:[%s1626_s0 + $0xa0] ss:$20 sps:$4 sm:$0xff]   ;;  %v1258_v62 = vld [vmem:[%s1626_s0 + $0xc8] ss:$20 sps:$4 sm:$0xff]   ;;  %v1259_v63 = vld [vmem:[%s1626_s0 + $0xd0] ss:$20 sps:$4 sm:$0xff]  }
  0x16   :  { %1069 = vmatprep.subr.bf16.mxu1 %v1208_v21  ;;  %v1254_v60 = vld [vmem:[%s1626_s0 + $0xcc] ss:$20 sps:$4 sm:$0xff]   ;;  %v1261_v0 = vld [vmem:[%s1626_s0 + $0xf4] ss:$20 sps:$4 sm:$0xff]   ;;  %v1263_v1 = vld [vmem:[%s1626_s0 + $0xfc] ss:$20 sps:$4 sm:$0xff]  }
  0x17   :  { %v1265_v2 = vld [vmem:[%s1626_s0 + $0xf0] ss:$20 sps:$4 sm:$0xff]   ;;  %v1266_v3 = vld [vmem:[%s1626_s0 + $0xf8] ss:$20 sps:$4 sm:$0xff]   ;;  %v1273_v7 = vld [vmem:[%s1626_s0 + $0x120] ss:$20 sps:$4 sm:$0xff]  }
  0x18   :  { %1006 = vmatpush3.bf16.msra.mxu0 %v1209_v22  ;;  %v1268_v4 = vld [vmem:[%s1626_s0 + $0x11c] ss:$20 sps:$4 sm:$0xff]   ;;  %v1270_v5 = vld [vmem:[%s1626_s0 + $0x124] ss:$20 sps:$4 sm:$0xff]   ;;  %v1279_v12 = vld [vmem:[%s1626_s0 + $0x60] ss:$20 sps:$4 sm:$0xff]  }
  0x19   :  { %1070 = vmatpush3.bf16.msra.mxu1 %v1210_v23  ;;  %1007 = vmatprep.subr.bf16.mxu0 %v1211_v24  ;;  %v1272_v6 = vld [vmem:[%s1626_s0 + $0x118] ss:$20 sps:$4 sm:$0xff]   ;;  %v1275_v8 = vld [vmem:[%s1626_s0 + $0x10] ss:$20 sps:$4 sm:$0xff]   ;;  %v1280_v13 = vld [vmem:[%s1626_s0 + $0x100] ss:$20 sps:$4 sm:$0xff]  }
  0x1a   :  { %1071 = vmatprep.subr.bf16.mxu1 %v1212_v25  ;;  %v1276_v9 = vld [vmem:[%s1626_s0 + $0xb0] ss:$20 sps:$4 sm:$0xff]   ;;  %v1277_v10 = vld [vmem:[%s1626_s0 + $0x38] ss:$20 sps:$4 sm:$0xff]   ;;  %v1281_v14 = vld [vmem:[%s1626_s0 + $0x88] ss:$20 sps:$4 sm:$0xff]  }
  0x1b   :  { %v1278_v11 = vld [vmem:[%s1626_s0 + $0xd8] ss:$20 sps:$4 sm:$0xff]   ;;  %v1282_v15 = vld [vmem:[%s1626_s0 + $0x128] ss:$20 sps:$4 sm:$0xff]  }
  0x1c   :  { %1008 = vmatpush3.bf16.msra.mxu0 %v1213_v26 }
  0x1d   :  { %1072 = vmatpush3.bf16.msra.mxu1 %v1214_v27  ;;  %1009 = vmatprep.subr.bf16.mxu0 %v1215_v28 }
  0x1e   :  { %1073 = vmatprep.subr.bf16.mxu1 %v1216_v29 }
  0x20   :  { %1010 = vmatpush3.bf16.msra.mxu0 %v1217_v30 }
  0x21   :  { %1074 = vmatpush3.bf16.msra.mxu1 %v1218_v31  ;;  %1139 = vmatprep.subr.bf16.mxu0 %v1225_v36 }
  0x22   :  { %1171 = vmatprep.subr.bf16.mxu1 %v1225_v36 }
  0x23   :  { %621 = vmatmul.mubr.bf16.vlgmr.msra.gmra.mxu0 %v1219_v32 }
  0x24   :  { %718 = vmatmul.mubr.bf16.vlgmr.msra.gmra.mxu1 %v1222_v34  ;;  %1140 = vmatpush3.bf16.msra.mxu0 %v1225_v36 }
  0x25   :  { %1179 = vmatpush3.bf16.msra.mxu1 %v1225_v36  ;;  %628 = vmatprep.mubr.bf16.mxu0 %v1226_v37 }
  0x26   :  { %725 = vmatprep.mubr.bf16.mxu1 %v1228_v38  ;;  %1141 = vmatprep.subr.bf16.mxu0 %v1232_v39 }
  0x27   :  { %1172 = vmatprep.subr.bf16.mxu1 %v1232_v39 }
  0x28   :  { %1142 = vmatpush3.bf16.msra.mxu0 %v1232_v39 }
  0x29   :  { %1180 = vmatpush3.bf16.msra.mxu1 %v1232_v39  ;;  %1143 = vmatprep.subr.bf16.mxu0 %v1239_v44 }
  0x2a   :  { %1173 = vmatprep.subr.bf16.mxu1 %v1239_v44 }
  0x2b   :  { %629 = vmatmul.mubr.bf16.gmra.mxu0 %v1230_v40 }
  0x2c   :  { %726 = vmatmul.mubr.bf16.gmra.mxu1 %v1231_v41  ;;  %636 = vmatprep.mubr.bf16.mxu0 %v1233_v42 }
  0x2d   :  { %733 = vmatprep.mubr.bf16.mxu1 %v1235_v43  ;;  %1144 = vmatpush3.bf16.msra.mxu0 %v1239_v44 }
  0x2e   :  { %1181 = vmatpush3.bf16.msra.mxu1 %v1239_v44  ;;  %1145 = vmatprep.subr.bf16.mxu0 %v1246_v45 }
  0x2f   :  { %1174 = vmatprep.subr.bf16.mxu1 %v1246_v45 }
  0x31   :  { %1146 = vmatpush3.bf16.msra.mxu0 %v1246_v45 }
  0x32   :  { %1182 = vmatpush3.bf16.msra.mxu1 %v1246_v45  ;;  %1147 = vmatprep.subr.bf16.mxu0 %v1253_v50 }
  0x33   :  { %637 = vmatmul.mubr.bf16.gmra.mxu0 %v1237_v46  ;;  %1175 = vmatprep.subr.bf16.mxu1 %v1253_v50 }
  0x34   :  { %734 = vmatmul.mubr.bf16.gmra.mxu1 %v1238_v47  ;;  %644 = vmatprep.mubr.bf16.mxu0 %v1240_v48 }
  0x35   :  { %741 = vmatprep.mubr.bf16.mxu1 %v1242_v49  ;;  %1148 = vmatpush3.bf16.msra.mxu0 %v1253_v50 }
  0x36   :  { %1183 = vmatpush3.bf16.msra.mxu1 %v1253_v50  ;;  %1149 = vmatprep.subr.bf16.mxu0 %v1260_v51 }
  0x37   :  { %1176 = vmatprep.subr.bf16.mxu1 %v1260_v51 }
  0x39   :  { %1150 = vmatpush3.bf16.msra.mxu0 %v1260_v51 }
  0x3a   :  { %1184 = vmatpush3.bf16.msra.mxu1 %v1260_v51  ;;  %1151 = vmatprep.subr.bf16.mxu0 %v1267_v55 }
  0x3b   :  { %645 = vmatmul.mubr.bf16.gmra.mxu0 %v1244_v52  ;;  %1177 = vmatprep.subr.bf16.mxu1 %v1267_v55 }
  0x3c   :  { %742 = vmatmul.mubr.bf16.gmra.mxu1 %v1245_v53  ;;  %652 = vmatprep.mubr.bf16.mxu0 %v1247_v54 }
  0x3d   :  { %749 = vmatprep.mubr.bf16.mxu1 %v1249_v56  ;;  %1152 = vmatpush3.bf16.msra.mxu0 %v1267_v55 }
  0x3e   :  { %1185 = vmatpush3.bf16.msra.mxu1 %v1267_v55  ;;  %1153 = vmatprep.subr.bf16.mxu0 %v1274_v57 }
  0x3f   :  { %1178 = vmatprep.subr.bf16.mxu1 %v1274_v57 }
  0x41   :  { %1154 = vmatpush3.bf16.msra.mxu0 %v1274_v57 }
  0x42   :  { %1186 = vmatpush3.bf16.msra.mxu1 %v1274_v57 }
  0x43   :  { %653 = vmatmul.mubr.bf16.gmra.mxu0 %v1251_v58 }
  0x44   :  { %750 = vmatmul.mubr.bf16.gmra.mxu1 %v1252_v59  ;;  %660 = vmatprep.mubr.bf16.mxu0 %v1254_v60 }
  0x45   :  { %757 = vmatprep.mubr.bf16.mxu1 %v1256_v61 }
  0x4b   :  { %661 = vmatmul.mubr.bf16.gmra.mxu0 %v1258_v62 }
  0x4c   :  { %758 = vmatmul.mubr.bf16.gmra.mxu1 %v1259_v63  ;;  %668 = vmatprep.mubr.bf16.mxu0 %v1261_v0 }
  0x4d   :  { %765 = vmatprep.mubr.bf16.mxu1 %v1263_v1 }
  0x53   :  { %669 = vmatmul.mubr.bf16.gmra.mxu0 %v1265_v2 }
  0x54   :  { %766 = vmatmul.mubr.bf16.gmra.mxu1 %v1266_v3  ;;  %676 = vmatprep.mubr.bf16.mxu0 %v1268_v4 }
  0x55   :  { %773 = vmatprep.mubr.bf16.mxu1 %v1270_v5 }
  0x5b   :  { %677 = vmatmul.mubr.bf16.gmra.mxu0 %v1272_v6 }
  0x5c   :  { %774 = vmatmul.mubr.bf16.gmra.mxu1 %v1273_v7  ;;  %1155 = vmatprep.mubr.bf16.mxu0 %v1275_v8 }
  0x5d   :  { %1163 = vmatprep.mubr.bf16.mxu1 %v1276_v9 }
  0x63   :  { %1156 = vmatmul.mubr.bf16.vlgmr.msra.gmra.mxu0 %v1277_v10 }
  0x64   :  { %1164 = vmatmul.mubr.bf16.vlgmr.msra.gmra.mxu1 %v1278_v11  ;;  %1159 = vmatprep.mubr.bf16.mxu0 %v1279_v12 }
  0x65   :  { %1167 = vmatprep.mubr.bf16.mxu1 %v1280_v13 }
  0x6b   :  { %1160 = vmatmul.mubr.bf16.gmra.mxu0 %v1281_v14 }
  0x6c   :  { %1168 = vmatmul.mubr.bf16.gmra.mxu1 %v1282_v15 }
  0xe3   :  { %v1011_v16 = vpop.f32.mrf.mxu0 }
  0xe4   :  { %v1075_v17 = vpop.f32.mrf.mxu1 }
  0xe5   :  { %v1012_v18 = vpop.f32.mrf.mxu0 }
  0xe6   :  { %v1076_v19 = vpop.f32.mrf.mxu1  ;;  %v1013_v10 = vadd.f32 %v1012_v18, %v1011_v16 }
  0xe7   :  { %v1014_v20 = vpop.f32.mrf.mxu0  ;;  %v1077_v11 = vadd.f32 %v1076_v19, %v1075_v17 }
  0xe8   :  { %v1078_v21 = vpop.f32.mrf.mxu1 }
  0xe9   :  { %v1015_v22 = vpop.f32.mrf.mxu0 }
  0xea   :  { %v1079_v23 = vpop.f32.mrf.mxu1  ;;  %v1016_v13 = vadd.f32 %v1015_v22, %v1014_v20  ;;  %v720_v20 = vadd.f32 %v1077_v11, %v1013_v10 }
  0xeb   :  { %v1017_v24 = vpop.f32.mrf.mxu0  ;;  %v1080_v14 = vadd.f32 %v1079_v23, %v1078_v21 }
  0xec   :  { %v1081_v25 = vpop.f32.mrf.mxu1 }
  0xed   :  { %v1018_v26 = vpop.f32.mrf.mxu0  ;;  %v723_v22 = vadd.f32 %v1080_v14, %v1016_v13 }
  0xee   :  { %v1082_v27 = vpop.f32.mrf.mxu1  ;;  %v1019_v15 = vadd.f32 %v1018_v26, %v1017_v24 }
  0xef   :  { %v1020_v28 = vpop.f32.mrf.mxu0 }
  0xf0   :  { %v1084_v29 = vpop.f32.mrf.mxu1 }
  0xf1   :  { %v1021_v30 = vpop.f32.mrf.mxu0 }
  0xf2   :  { %v1085_v31 = vpop.f32.mrf.mxu1 }
  0xf3   :  { %v1023_v32 = vpop.f32.mrf.mxu0 }
  0xf4   :  { %v1087_v33 = vpop.f32.mrf.mxu1 }
  0xf5   :  { %v1024_v34 = vpop.f32.mrf.mxu0 }
  0xf6   :  { %v1088_v35 = vpop.f32.mrf.mxu1 }
  0xf7   :  { %v1538_v36 = vpop.f32.mrf.mxu0 }
  0xf8   :  { %1628 = vst [vmem:[#allocation2_spill] sm:$0xff] %v1538_v36  ;;  %v1540_v37 = vpop.f32.mrf.mxu1 }
  0xf9   :  { %1629 = vst [vmem:[#allocation3_spill] sm:$0xff] %v1540_v37  ;;  %v1542_v38 = vpop.f32.mrf.mxu0 }
  0xfa   :  { %1630 = vst [vmem:[#allocation4_spill] sm:$0xff] %v1542_v38  ;;  %v1544_v39 = vpop.f32.mrf.mxu1  ;;  %v1089_v38 = vadd.f32 %v1088_v35, %v1087_v33 }
  0xfb   :  { %1631 = vst [vmem:[#allocation5_spill] sm:$0xff] %v1544_v39  ;;  %v1029_v40 = vpop.f32.mrf.mxu0  ;;  %v1083_v39 = vadd.f32 %v1082_v27, %v1081_v25 }
  0xfc   :  { %v1093_v41 = vpop.f32.mrf.mxu1 }
  0xfd   :  { %v1030_v42 = vpop.f32.mrf.mxu0  ;;  %v728_v19 = vadd.f32 %v1083_v39, %v1019_v15 }
  0xfe   :  { %v1094_v43 = vpop.f32.mrf.mxu1  ;;  %v1031_v18 = vadd.f32 %v1030_v42, %v1029_v40 }
  0xff   :  { %v1546_v44 = vpop.f32.mrf.mxu0  ;;  %v1095_v21 = vadd.f32 %v1094_v43, %v1093_v41  ;;  %v1640_v27 = vld [vmem:[#allocation2_spill] sm:$0xff] }
 0x100   :  { %1632 = vst [vmem:[#allocation6_spill] sm:$0xff] %v1546_v44  ;;  %v1548_v45 = vpop.f32.mrf.mxu1  ;;  %v1086_v44 = vadd.f32 %v1085_v31, %v1084_v29  ;;  %v1646_v11 = vld [vmem:[#allocation3_spill] sm:$0xff] }
 0x101   :  { %1633 = vst [vmem:[#allocation7_spill] sm:$0xff] %v1548_v45  ;;  %v1550_v46 = vpop.f32.mrf.mxu0 }
 0x102   :  { %1634 = vst [vmem:[#allocation8_spill] sm:$0xff] %v1550_v46  ;;  %v1552_v47 = vpop.f32.mrf.mxu1 }
 0x103   :  { %1635 = vst [vmem:[#allocation9_spill] sm:$0xff] %v1552_v47  ;;  %v1035_v48 = vpop.f32.mrf.mxu0 }
 0x104   :  { %v1099_v49 = vpop.f32.mrf.mxu1 }
 0x105   :  { %v1036_v50 = vpop.f32.mrf.mxu0 }
 0x106   :  { %v1100_v51 = vpop.f32.mrf.mxu1  ;;  %v1037_v36 = vadd.f32 %v1036_v50, %v1035_v48 }
 0x107   :  { %v1038_v52 = vpop.f32.mrf.mxu0 }
 0x108   :  { %v1102_v53 = vpop.f32.mrf.mxu1 }
 0x109   :  { %v1039_v54 = vpop.f32.mrf.mxu0 }
 0x10a   :  { %v1103_v55 = vpop.f32.mrf.mxu1  ;;  %v1040_v33 = vadd.f32 %v1039_v54, %v1038_v52 }
 0x10b   :  { %v1041_v56 = vpop.f32.mrf.mxu0 }
 0x10c   :  { %v1105_v57 = vpop.f32.mrf.mxu1 }
 0x10d   :  { %v1042_v58 = vpop.f32.mrf.mxu0 }
 0x10e   :  { %v1106_v59 = vpop.f32.mrf.mxu1  ;;  %v1043_v47 = vadd.f32 %v1042_v58, %v1041_v56  ;;  %v1641_v56 = vld [vmem:[#allocation4_spill] sm:$0xff] }
 0x10f   :  { %v1044_v60 = vpop.f32.mrf.mxu0  ;;  %v1107_v45 = vadd.f32 %v1106_v59, %v1105_v57  ;;  %v744_v57 = vadd.f32 %v1095_v21, %v1031_v18 }
 0x110   :  { %v1108_v61 = vpop.f32.mrf.mxu1 }
 0x111   :  { %v1045_v62 = vpop.f32.mrf.mxu0  ;;  %v760_v26 = vadd.f32 %v1107_v45, %v1043_v47 }
 0x112   :  { %v1109_v63 = vpop.f32.mrf.mxu1  ;;  %v1046_v23 = vadd.f32 %v1045_v62, %v1044_v60  ;;  %v1644_v62 = vld [vmem:[#allocation7_spill] sm:$0xff] }
 0x113   :  { %v1047_v0 = vpop.f32.mrf.mxu0  ;;  %v1110_v24 = vadd.f32 %v1109_v63, %v1108_v61  ;;  %v1645_v63 = vld [vmem:[#allocation9_spill] sm:$0xff] }
 0x114   :  { %v1111_v1 = vpop.f32.mrf.mxu1 }
 0x115   :  { %v1048_v2 = vpop.f32.mrf.mxu0 }
 0x116   :  { %v1112_v3 = vpop.f32.mrf.mxu1  ;;  %v1049_v58 = vadd.f32 %v1048_v2, %v1047_v0  ;;  %v1098_v0 = vadd.f32 %v1645_v63, %v1644_v62 }
 0x117   :  { %v1554_v4 = vpop.f32.mrf.mxu0  ;;  %v1113_v59 = vadd.f32 %v1112_v3, %v1111_v1 }
 0x118   :  { %1636 = vst [vmem:[#allocation10_spill] sm:$0xff] %v1554_v4  ;;  %v1556_v5 = vpop.f32.mrf.mxu1  ;;  %v1022_v4 = vadd.f32 %v1021_v30, %v1020_v28  ;;  %v1564_v28 = vadd.f32 %v1641_v56, %v1640_v27 }
 0x119   :  { %1637 = vst [vmem:[#allocation11_spill] sm:$0xff] %v1556_v5  ;;  %v1558_v6 = vpop.f32.mrf.mxu0  ;;  %v1025_v5 = vadd.f32 %v1024_v34, %v1023_v32  ;;  %v1104_v34 = vadd.f32 %v1103_v55, %v1102_v53  ;;  %v1643_v53 = vld [vmem:[#allocation8_spill] sm:$0xff] }
 0x11a   :  { %1638 = vst [vmem:[#allocation12_spill] sm:$0xff] %v1558_v6  ;;  %v1560_v7 = vpop.f32.mrf.mxu1  ;;  %v731_v31 = vadd.f32 %v1086_v44, %v1022_v4 }
 0x11b   :  { %1639 = vst [vmem:[#allocation13_spill] sm:$0xff] %v1560_v7  ;;  %v1053_v8 = vpop.f32.mrf.mxu0  ;;  %v1101_v7 = vadd.f32 %v1100_v51, %v1099_v49  ;;  %v736_v32 = vadd.f32 %v1089_v38, %v1025_v5  ;;  %v763_v51 = vadd.f32 %v1110_v24, %v1046_v23  ;;  %v755_v61 = vadd.f32 %v1104_v34, %v1040_v33 }
 0x11c   :  { %v1117_v9 = vpop.f32.mrf.mxu1 }
 0x11d   :  { %v1054_v12 = vpop.f32.mrf.mxu0  ;;  %v752_v39 = vadd.f32 %v1101_v7, %v1037_v36  ;;  %v1642_v36 = vld [vmem:[#allocation6_spill] sm:$0xff] }
 0x11e   :  { %v1118_v37 = vpop.f32.mrf.mxu1  ;;  %v1055_v42 = vadd.f32 %v1054_v12, %v1053_v8  ;;  %v1647_v12 = vld [vmem:[#allocation5_spill] sm:$0xff] }
 0x11f   :  { %v1056_v46 = vpop.f32.mrf.mxu0  ;;  %v1119_v48 = vadd.f32 %v1118_v37, %v1117_v9  ;;  %v1034_v37 = vadd.f32 %v1643_v53, %v1642_v36  ;;  %v1092_v13 = vadd.f32 %v1647_v12, %v1646_v11 }
 0x120   :  { %v1120_v6 = vpop.f32.mrf.mxu1 }
 0x121   :  { %v1057_v16 = vpop.f32.mrf.mxu0  ;;  %v776_v4 = vadd.f32 %v1119_v48, %v1055_v42  ;;  %v747_v56 = vadd.f32 %v1098_v0, %v1034_v37 }
 0x122   :  { %v1121_v17 = vpop.f32.mrf.mxu1  ;;  %v1058_v5 = vadd.f32 %v1057_v16, %v1056_v46  ;;  %v1648_v46 = vld [vmem:[#allocation10_spill] sm:$0xff] }
 0x123   :  { %v1157_v25 = vpop.f32.mrf.mxu0  ;;  %v1122_v7 = vadd.f32 %v1121_v17, %v1120_v6  ;;  %v1649_v6 = vld [vmem:[#allocation12_spill] sm:$0xff]  ;;  %v1650_v17 = vld [vmem:[#allocation11_spill] sm:$0xff] }
 0x124   :  { %v825_v29 = vadd.f32 %v1157_v25, %v728_v19  ;;  %v1165_v30 = vpop.f32.mrf.mxu1  ;;  %v768_v19 = vadd.f32 %v1113_v59, %v1049_v58  ;;  %v1052_v16 = vadd.f32 %v1649_v6, %v1648_v46 }
 0x125   :  { %v857_v35 = vadd.f32 %v1165_v30, %v760_v26  ;;  %v816_v40 = vpop.f32.mrf.mxu0  ;;  %v779_v33 = vadd.f32 %v1122_v7, %v1058_v5 }
 0x126   :  { %v881_v41 = vmax.f32 %v825_v29, 0.0  ;;  %v817_v43 = vadd.f32 %v816_v40, %v720_v20  ;;  %v848_v49 = vpop.f32.mrf.mxu1  ;;  %v1651_v20 = vld [vmem:[#allocation13_spill] sm:$0xff] }
 0x127   :  { %v889_v50 = vmax.f32 %v857_v35, 0.0  ;;  %v849_v45 = vadd.f32 %v848_v49, %v752_v39  ;;  %v1158_v47 = vpop.f32.mrf.mxu0  ;;  %v739_v39 = vadd.f32 %v1092_v13, %v1564_v28 }
 0x128   :  { %897 = vst [vmem:[%s1627_s2 + $0x10] sm:$0xff] %v881_v41  ;;  %v879_v38 = vmax.f32 %v817_v43, 0.0  ;;  %v828_v44 = vadd.f32 %v1158_v47, %v731_v31  ;;  %v1166_v52 = vpop.f32.mrf.mxu1 }
 0x129   :  { %905 = vst [vmem:[%s1627_s2 + $0x50] sm:$0xff] %v889_v50  ;;  %v887_v54 = vmax.f32 %v849_v45, 0.0  ;;  %v860_v55 = vadd.f32 %v1166_v52, %v763_v51  ;;  %v819_v60 = vpop.f32.mrf.mxu0 }
 0x12a   :  { %895 = vst [vmem:[%s1627_s2] sm:$0xff] %v879_v38  ;;  %v882_v1 = vmax.f32 %v828_v44, 0.0  ;;  %v820_v2 = vadd.f32 %v819_v60, %v723_v22  ;;  %v851_v3 = vpop.f32.mrf.mxu1  ;;  %v1116_v22 = vadd.f32 %v1651_v20, %v1650_v17 }
 0x12b   :  { %903 = vst [vmem:[%s1627_s2 + $0x40] sm:$0xff] %v887_v54  ;;  %v890_v8 = vmax.f32 %v860_v55, 0.0  ;;  %v852_v9 = vadd.f32 %v851_v3, %v755_v61  ;;  %v1161_v10 = vpop.f32.mrf.mxu0 }
 0x12c   :  { %898 = vst [vmem:[%s1627_s2 + $0x18] sm:$0xff] %v882_v1  ;;  %v880_v14 = vmax.f32 %v820_v2, 0.0  ;;  %v841_v15 = vadd.f32 %v1161_v10, %v744_v57  ;;  %v1169_v18 = vpop.f32.mrf.mxu1  ;;  %v771_v41 = vadd.f32 %v1116_v22, %v1052_v16 }
 0x12d   :  { %906 = vst [vmem:[%s1627_s2 + $0x58] sm:$0xff] %v890_v8  ;;  %v888_v21 = vmax.f32 %v852_v9, 0.0  ;;  %v873_v23 = vadd.f32 %v1169_v18, %v776_v4  ;;  %v832_v24 = vpop.f32.mrf.mxu0 }
 0x12e   :  { %896 = vst [vmem:[%s1627_s2 + $0x8] sm:$0xff] %v880_v14  ;;  %v885_v25 = vmax.f32 %v841_v15, 0.0  ;;  %v833_v26 = vadd.f32 %v832_v24, %v736_v32  ;;  %v864_v27 = vpop.f32.mrf.mxu1 }
 0x12f   :  { %904 = vst [vmem:[%s1627_s2 + $0x48] sm:$0xff] %v888_v21  ;;  %v893_v29 = vmax.f32 %v873_v23, 0.0  ;;  %v865_v30 = vadd.f32 %v864_v27, %v768_v19  ;;  %v1162_v31 = vpop.f32.mrf.mxu0 }
 0x130   :  { %901 = vst [vmem:[%s1627_s2 + $0x30] sm:$0xff] %v885_v25  ;;  %v883_v34 = vmax.f32 %v833_v26, 0.0  ;;  %v844_v35 = vadd.f32 %v1162_v31, %v747_v56  ;;  %v1170_v40 = vpop.f32.mrf.mxu1 }
 0x131   :  { %909 = vst [vmem:[%s1627_s2 + $0x70] sm:$0xff] %v893_v29  ;;  %v891_v32 = vmax.f32 %v865_v30, 0.0  ;;  %v876_v42 = vadd.f32 %v1170_v40, %v779_v33  ;;  %v835_v48 = vpop.f32.mrf.mxu0 }
 0x132   :  { %899 = vst [vmem:[%s1627_s2 + $0x20] sm:$0xff] %v883_v34  ;;  %v886_v43 = vmax.f32 %v844_v35, 0.0  ;;  %v836_v49 = vadd.f32 %v835_v48, %v739_v39  ;;  %v867_v50 = vpop.f32.mrf.mxu1 }
 0x133   :  { %907 = vst [vmem:[%s1627_s2 + $0x60] sm:$0xff] %v891_v32  ;;  %v894_v28 = vmax.f32 %v876_v42, 0.0  ;;  %v868_v45 = vadd.f32 %v867_v50, %v771_v41 }
 0x134   :  { %902 = vst [vmem:[%s1627_s2 + $0x38] sm:$0xff] %v886_v43  ;;  %v884_v47 = vmax.f32 %v836_v49, 0.0 }
 0x135   :  { %910 = vst [vmem:[%s1627_s2 + $0x78] sm:$0xff] %v894_v28  ;;  %v892_v51 = vmax.f32 %v868_v45, 0.0 }
 0x136   :  { %900 = vst [vmem:[%s1627_s2 + $0x28] sm:$0xff] %v884_v47 }
 0x137   :  { %908 = vst [vmem:[%s1627_s2 + $0x68] sm:$0xff] %v892_v51 }

// kernel: _lambda_.21
= control target key start
LH: loop header
LB: loop body
LE: loop exit
PB: predicated region body
PF: predicated region fallthrough
CT: control target
= control target key end

     0   :  { %v1980_v0 = vmov 0   ;;  %vm1486_vm0 = vcmask 130048   ;;  %s2767_s1 = inlined_call_operand.vmem [shape: bf16[384,16], index: 1, kind: input, shape index: {}]   ;;  %s2768_s0 = inlined_call_operand.vmem [shape: bf16[512,384], index: 0, kind: input, shape index: {}]   ;;  %s2769_s2 = inlined_call_operand.vmem [shape: f32[512,16], index: 2, kind: output, shape index: {}]  }
   0x1   :  { %844 = vmatprep.subr.bf16.mxu0 %v1980_v0  ;;  %1795 = vmatprep.subr.bf16.mxu1 %v1980_v0  ;;  %v1828_v1 = vld [vmem:[%s2767_s1 + $0x38] sm:$0xff]   ;;  %v1829_v2 = vld [vmem:[%s2767_s1 + $0x30] sm:$0xff]   ;;  %v1830_v3 = vld [vmem:[%s2767_s1 + $0x28] sm:$0xff]  }
   0x2   :  { %845 = vmatpush1.bf16.msra.mxu0 %v1828_v1  ;;  %1811 = vmatpush1.bf16.msra.mxu1 %v1828_v1  ;;  %v1831_v4 = vld [vmem:[%s2767_s1 + $0x20] sm:$0xff]   ;;  %v1832_v5 = vld [vmem:[%s2767_s1 + $0x18] sm:$0xff]   ;;  %v1833_v7 = vld [vmem:[%s2767_s1 + $0x10] sm:$0xff]  }
   0x3   :  { %846 = vmatprep.subr.bf16.mxu0 %v1980_v0  ;;  %1796 = vmatprep.subr.bf16.mxu1 %v1980_v0  ;;  %v1846_v6 = vld [vmem:[%s2768_s0 + $0x4] ss:$12 sps:$4 sm:$0xff]   ;;  %v1834_v9 = vld [vmem:[%s2767_s1 + $0x8] sm:$0xff]   ;;  %v1836_v11 = vld [vmem:[%s2767_s1 + $0x78] sm:$0xff]  }
   0x4   :  { %v1849_v8 = vld [vmem:[%s2768_s0 + $0x244] ss:$12 sps:$4 sm:$0xff]   ;;  %876 = vmatprep.mubr.bf16.mxu0 %v1846_v6  ;;  %v1838_v13 = vld [vmem:[%s2767_s1 + $0x68] sm:$0xff]   ;;  %v1840_v15 = vld [vmem:[%s2767_s1 + $0x58] sm:$0xff]  }
   0x5   :  { %1068 = vmatprep.mubr.bf16.mxu1 %v1849_v8  ;;  %v1835_v10 = vld [vmem:[%s2767_s1] sm:$0xff]   ;;  %v1837_v12 = vld [vmem:[%s2767_s1 + $0x70] sm:$0xff]   ;;  %v1842_v17 = vld [vmem:[%s2767_s1 + $0x48] sm:$0xff]  }
   0x6   :  { %847 = vmatpush1.bf16.msra.mxu0 %v1829_v2  ;;  %1812 = vmatpush1.bf16.msra.mxu1 %v1829_v2  ;;  %v1839_v14 = vld [vmem:[%s2767_s1 + $0x60] sm:$0xff]   ;;  %v1841_v16 = vld [vmem:[%s2767_s1 + $0x50] sm:$0xff]   ;;  %v1850_v19 = vld [vmem:[%s2767_s1 + $0xb8] sm:$0xff]  }
   0x7   :  { %848 = vmatprep.subr.bf16.mxu0 %v1980_v0  ;;  %1797 = vmatprep.subr.bf16.mxu1 %v1980_v0  ;;  %v1843_v18 = vld [vmem:[%s2767_s1 + $0x40] sm:$0xff]   ;;  %v1851_v22 = vld [vmem:[%s2768_s0 + $0x1c] ss:$12 sps:$4 sm:$0xff]   ;;  %v1857_v24 = vld [vmem:[%s2767_s1 + $0xb0] sm:$0xff]  }
   0x8   :  { %v1844_v20 = vld [vmem:[%s2768_s0] ss:$12 sps:$4 sm:$0xff]   ;;  %v1853_v23 = vld [vmem:[%s2768_s0 + $0x25c] ss:$12 sps:$4 sm:$0xff]   ;;  %v1855_v26 = vld [vmem:[%s2768_s0 + $0x18] ss:$12 sps:$4 sm:$0xff]  }
   0x9   :  { %v1847_v21 = vld [vmem:[%s2768_s0 + $0x240] ss:$12 sps:$4 sm:$0xff]   ;;  %v1856_v27 = vld [vmem:[%s2768_s0 + $0x258] ss:$12 sps:$4 sm:$0xff]   ;;  %v1862_v31 = vld [vmem:[%s2768_s0 + $0x30] ss:$12 sps:$4 sm:$0xff]  }
   0xa   :  { %849 = vmatpush1.bf16.msra.mxu0 %v1830_v3  ;;  %1813 = vmatpush1.bf16.msra.mxu1 %v1830_v3  ;;  %v1864_v25 = vld [vmem:[%s2767_s1 + $0xa8] sm:$0xff]   ;;  %v1858_v28 = vld [vmem:[%s2768_s0 + $0x34] ss:$12 sps:$4 sm:$0xff]   ;;  %v1878_v32 = vld [vmem:[%s2767_s1 + $0x98] sm:$0xff]  }
   0xb   :  { %850 = vmatprep.subr.bf16.mxu0 %v1980_v0  ;;  %1798 = vmatprep.subr.bf16.mxu1 %v1980_v0  ;;  %v1860_v29 = vld [vmem:[%s2768_s0 + $0x274] ss:$12 sps:$4 sm:$0xff]   ;;  %v1863_v33 = vld [vmem:[%s2768_s0 + $0x270] ss:$12 sps:$4 sm:$0xff]   ;;  %v1865_v34 = vld [vmem:[%s2768_s0 + $0x4c] ss:$12 sps:$4 sm:$0xff]  }
   0xc   :  { %v1871_v30 = vld [vmem:[%s2767_s1 + $0xa0] sm:$0xff]   ;;  %v1867_v35 = vld [vmem:[%s2768_s0 + $0x28c] ss:$12 sps:$4 sm:$0xff]   ;;  %v1885_v36 = vld [vmem:[%s2767_s1 + $0x90] sm:$0xff]  }
   0xd   :  { %v1869_v37 = vld [vmem:[%s2768_s0 + $0x48] ss:$12 sps:$4 sm:$0xff]   ;;  %v1872_v39 = vld [vmem:[%s2768_s0 + $0x64] ss:$12 sps:$4 sm:$0xff]   ;;  %v1876_v43 = vld [vmem:[%s2768_s0 + $0x60] ss:$12 sps:$4 sm:$0xff]  }
   0xe   :  { %851 = vmatpush1.bf16.msra.mxu0 %v1831_v4  ;;  %1814 = vmatpush1.bf16.msra.mxu1 %v1831_v4  ;;  %v1870_v38 = vld [vmem:[%s2768_s0 + $0x288] ss:$12 sps:$4 sm:$0xff]   ;;  %v1874_v40 = vld [vmem:[%s2768_s0 + $0x2a4] ss:$12 sps:$4 sm:$0xff]   ;;  %v1877_v44 = vld [vmem:[%s2768_s0 + $0x2a0] ss:$12 sps:$4 sm:$0xff]  }
   0xf   :  { %852 = vmatprep.subr.bf16.mxu0 %v1980_v0  ;;  %1799 = vmatprep.subr.bf16.mxu1 %v1980_v0  ;;  %v1892_v41 = vld [vmem:[%s2767_s1 + $0x88] sm:$0xff]   ;;  %v1899_v42 = vld [vmem:[%s2767_s1 + $0x80] sm:$0xff]   ;;  %v1890_v51 = vld [vmem:[%s2768_s0 + $0x90] ss:$12 sps:$4 sm:$0xff]  }
  0x10   :  { %v1879_v45 = vld [vmem:[%s2768_s0 + $0x7c] ss:$12 sps:$4 sm:$0xff]   ;;  %v1883_v47 = vld [vmem:[%s2768_s0 + $0x78] ss:$12 sps:$4 sm:$0xff]   ;;  %v1886_v49 = vld [vmem:[%s2768_s0 + $0x94] ss:$12 sps:$4 sm:$0xff]  }
  0x11   :  { %v1881_v46 = vld [vmem:[%s2768_s0 + $0x2bc] ss:$12 sps:$4 sm:$0xff]   ;;  %v1884_v48 = vld [vmem:[%s2768_s0 + $0x2b8] ss:$12 sps:$4 sm:$0xff]   ;;  %v1888_v50 = vld [vmem:[%s2768_s0 + $0x2d4] ss:$12 sps:$4 sm:$0xff]  }
  0x12   :  { %853 = vmatpush1.bf16.msra.mxu0 %v1832_v5  ;;  %1815 = vmatpush1.bf16.msra.mxu1 %v1832_v5  ;;  %v1891_v52 = vld [vmem:[%s2768_s0 + $0x2d0] ss:$12 sps:$4 sm:$0xff]   ;;  %v1893_v53 = vld [vmem:[%s2768_s0 + $0xac] ss:$12 sps:$4 sm:$0xff]   ;;  %v1897_v55 = vld [vmem:[%s2768_s0 + $0xa8] ss:$12 sps:$4 sm:$0xff]  }
  0x13   :  { %854 = vmatprep.subr.bf16.mxu0 %v1980_v0  ;;  %1800 = vmatprep.subr.bf16.mxu1 %v1980_v0  ;;  %v1895_v54 = vld [vmem:[%s2768_s0 + $0x2ec] ss:$12 sps:$4 sm:$0xff]   ;;  %v1898_v56 = vld [vmem:[%s2768_s0 + $0x2e8] ss:$12 sps:$4 sm:$0xff]   ;;  %v1900_v57 = vld [vmem:[%s2768_s0 + $0xc4] ss:$12 sps:$4 sm:$0xff]  }
  0x14   :  { %v1902_v58 = vld [vmem:[%s2768_s0 + $0x8] ss:$12 sps:$4 sm:$0xff]   ;;  %v1903_v59 = vld [vmem:[%s2768_s0 + $0xc0] ss:$12 sps:$4 sm:$0xff]   ;;  %v1907_v62 = vld [vmem:[%s2768_s0 + $0x38] ss:$12 sps:$4 sm:$0xff]  }
  0x15   :  { %v1904_v60 = vld [vmem:[%s2768_s0 + $0x20] ss:$12 sps:$4 sm:$0xff]   ;;  %v1905_v61 = vld [vmem:[%s2768_s0 + $0xdc] ss:$12 sps:$4 sm:$0xff]   ;;  %v1908_v63 = vld [vmem:[%s2768_s0 + $0xd8] ss:$12 sps:$4 sm:$0xff]  }
  0x16   :  { %855 = vmatpush1.bf16.msra.mxu0 %v1833_v7  ;;  %1816 = vmatpush1.bf16.msra.mxu1 %v1833_v7  ;;  %v1910_v1 = vld [vmem:[%s2768_s0 + $0xf4] ss:$12 sps:$4 sm:$0xff]   ;;  %v1913_v3 = vld [vmem:[%s2768_s0 + $0xf0] ss:$12 sps:$4 sm:$0xff]   ;;  %v1915_v5 = vld [vmem:[%s2768_s0 + $0x10c] ss:$12 sps:$4 sm:$0xff]  }
  0x17   :  { %856 = vmatprep.subr.bf16.mxu0 %v1980_v0  ;;  %1801 = vmatprep.subr.bf16.mxu1 %v1980_v0  ;;  %v1912_v2 = vld [vmem:[%s2768_s0 + $0x68] ss:$12 sps:$4 sm:$0xff]   ;;  %v1914_v4 = vld [vmem:[%s2768_s0 + $0x80] ss:$12 sps:$4 sm:$0xff]   ;;  %v1917_v6 = vld [vmem:[%s2768_s0 + $0x98] ss:$12 sps:$4 sm:$0xff]  }
  0x18   :  { %v1918_v7 = vld [vmem:[%s2768_s0 + $0x108] ss:$12 sps:$4 sm:$0xff]   ;;  %v1919_v8 = vld [vmem:[%s2768_s0 + $0xb0] ss:$12 sps:$4 sm:$0xff]  }
  0x1a   :  { %857 = vmatpush1.bf16.msra.mxu0 %v1834_v9  ;;  %1817 = vmatpush1.bf16.msra.mxu1 %v1834_v9  ;;  %v1920_v9 = vld [vmem:[%s2768_s0 + $0x124] ss:$12 sps:$4 sm:$0xff]  }
  0x1b   :  { %858 = vmatprep.subr.bf16.mxu0 %v1980_v0  ;;  %1802 = vmatprep.subr.bf16.mxu1 %v1980_v0 }
  0x1e   :  { %859 = vmatpush1.bf16.msra.mxu0 %v1835_v10  ;;  %1818 = vmatpush1.bf16.msra.mxu1 %v1835_v10  ;;  %v1922_v10 = vld [vmem:[%s2768_s0 + $0xc8] ss:$12 sps:$4 sm:$0xff]  }
  0x1f   :  { %860 = vmatprep.subr.bf16.mxu0 %v1980_v0  ;;  %1803 = vmatprep.subr.bf16.mxu1 %v1980_v0 }
  0x22   :  { %861 = vmatpush2.bf16.msra.mxu0 %v1836_v11  ;;  %1819 = vmatpush2.bf16.msra.mxu1 %v1836_v11  ;;  %v1923_v11 = vld [vmem:[%s2768_s0 + $0x120] ss:$12 sps:$4 sm:$0xff]  }
  0x23   :  { %862 = vmatprep.subr.bf16.mxu0 %v1980_v0  ;;  %1804 = vmatprep.subr.bf16.mxu1 %v1980_v0 }
  0x26   :  { %863 = vmatpush2.bf16.msra.mxu0 %v1837_v12  ;;  %1820 = vmatpush2.bf16.msra.mxu1 %v1837_v12  ;;  %v1924_v12 = vld [vmem:[%s2768_s0 + $0xe0] ss:$12 sps:$4 sm:$0xff]  }
  0x27   :  { %864 = vmatprep.subr.bf16.mxu0 %v1980_v0  ;;  %1805 = vmatprep.subr.bf16.mxu1 %v1980_v0 }
  0x2a   :  { %865 = vmatpush2.bf16.msra.mxu0 %v1838_v13  ;;  %1821 = vmatpush2.bf16.msra.mxu1 %v1838_v13  ;;  %v1925_v13 = vld [vmem:[%s2768_s0 + $0x13c] ss:$12 sps:$4 sm:$0xff]  }
  0x2b   :  { %866 = vmatprep.subr.bf16.mxu0 %v1980_v0  ;;  %1806 = vmatprep.subr.bf16.mxu1 %v1980_v0 }
  0x2e   :  { %867 = vmatpush2.bf16.msra.mxu0 %v1839_v14  ;;  %1822 = vmatpush2.bf16.msra.mxu1 %v1839_v14  ;;  %v1927_v14 = vld [vmem:[%s2768_s0 + $0xf8] ss:$12 sps:$4 sm:$0xff]  }
  0x2f   :  { %868 = vmatprep.subr.bf16.mxu0 %v1980_v0  ;;  %1807 = vmatprep.subr.bf16.mxu1 %v1980_v0 }
  0x32   :  { %869 = vmatpush2.bf16.msra.mxu0 %v1840_v15  ;;  %1823 = vmatpush2.bf16.msra.mxu1 %v1840_v15  ;;  %v1928_v15 = vld [vmem:[%s2768_s0 + $0x138] ss:$12 sps:$4 sm:$0xff]  }
  0x33   :  { %870 = vmatprep.subr.bf16.mxu0 %v1980_v0  ;;  %1808 = vmatprep.subr.bf16.mxu1 %v1980_v0 }
  0x36   :  { %871 = vmatpush2.bf16.msra.mxu0 %v1841_v16  ;;  %1824 = vmatpush2.bf16.msra.mxu1 %v1841_v16  ;;  %v1929_v16 = vld [vmem:[%s2768_s0 + $0x110] ss:$12 sps:$4 sm:$0xff]  }
  0x37   :  { %872 = vmatprep.subr.bf16.mxu0 %v1980_v0  ;;  %1809 = vmatprep.subr.bf16.mxu1 %v1980_v0 }
  0x3a   :  { %873 = vmatpush2.bf16.msra.mxu0 %v1842_v17  ;;  %1825 = vmatpush2.bf16.msra.mxu1 %v1842_v17  ;;  %v1930_v17 = vld [vmem:[%s2768_s0 + $0x154] ss:$12 sps:$4 sm:$0xff]  }
  0x3b   :  { %874 = vmatprep.subr.bf16.mxu0 %v1980_v0  ;;  %1810 = vmatprep.subr.bf16.mxu1 %v1980_v0  ;;  %v1909_v0 = vld [vmem:[%s2768_s0 + $0x50] ss:$12 sps:$4 sm:$0xff]  }
  0x3e   :  { %875 = vmatpush2.bf16.msra.mxu0 %v1843_v18  ;;  %1826 = vmatpush2.bf16.msra.mxu1 %v1843_v18  ;;  %v1932_v18 = vld [vmem:[%s2768_s0 + $0x128] ss:$12 sps:$4 sm:$0xff]  }
  0x3f   :  { %1715 = vmatprep.subr.bf16.mxu1 %v1850_v19 }
  0x41   :  { %877 = vmatmul.mubr.bf16.vlgmr.msra.gmra.mxu0 %v1844_v20  ;;  %1069 = vmatmul.mubr.bf16.vlgmr.msra.gmra.mxu1 %v1847_v21  ;;  %v1934_v20 = vld [vmem:[%s2768_s0 + $0x140] ss:$12 sps:$4 sm:$0xff]  }
  0x42   :  { %1716 = vmatpush3.bf16.msra.mxu1 %v1850_v19  ;;  %884 = vmatprep.mubr.bf16.mxu0 %v1851_v22  ;;  %v1933_v19 = vld [vmem:[%s2768_s0 + $0x150] ss:$12 sps:$4 sm:$0xff]   ;;  %v1935_v21 = vld [vmem:[%s2768_s0 + $0x16c] ss:$12 sps:$4 sm:$0xff]  }
  0x43   :  { %1076 = vmatprep.mubr.bf16.mxu1 %v1853_v23  ;;  %1717 = vmatprep.subr.bf16.mxu1 %v1857_v24  ;;  %v1937_v22 = vld [vmem:[%s2768_s0 + $0x158] ss:$12 sps:$4 sm:$0xff]   ;;  %v1938_v23 = vld [vmem:[%s2768_s0 + $0x168] ss:$12 sps:$4 sm:$0xff]  }
  0x46   :  { %1718 = vmatpush3.bf16.msra.mxu1 %v1857_v24  ;;  %v1939_v24 = vld [vmem:[%s2768_s0 + $0x170] ss:$12 sps:$4 sm:$0xff]  }
  0x47   :  { %1719 = vmatprep.subr.bf16.mxu1 %v1864_v25 }
  0x49   :  { %885 = vmatmul.mubr.bf16.gmra.mxu0 %v1855_v26  ;;  %1077 = vmatmul.mubr.bf16.gmra.mxu1 %v1856_v27  ;;  %v1942_v26 = vld [vmem:[%s2768_s0 + $0x188] ss:$12 sps:$4 sm:$0xff]   ;;  %v1943_v27 = vld [vmem:[%s2768_s0 + $0x180] ss:$12 sps:$4 sm:$0xff]  }
  0x4a   :  { %892 = vmatprep.mubr.bf16.mxu0 %v1858_v28  ;;  %1084 = vmatprep.mubr.bf16.mxu1 %v1860_v29  ;;  %v1944_v28 = vld [vmem:[%s2768_s0 + $0x1a0] ss:$12 sps:$4 sm:$0xff]   ;;  %v1945_v29 = vld [vmem:[%s2768_s0 + $0x19c] ss:$12 sps:$4 sm:$0xff]  }
  0x4b   :  { %1720 = vmatpush3.bf16.msra.mxu1 %v1864_v25  ;;  %v1940_v25 = vld [vmem:[%s2768_s0 + $0x184] ss:$12 sps:$4 sm:$0xff]  }
  0x4c   :  { %1721 = vmatprep.subr.bf16.mxu1 %v1871_v30 }
  0x4f   :  { %1722 = vmatpush3.bf16.msra.mxu1 %v1871_v30  ;;  %v1947_v30 = vld [vmem:[%s2768_s0 + $0x1b8] ss:$12 sps:$4 sm:$0xff]  }
  0x50   :  { %1723 = vmatprep.subr.bf16.mxu1 %v1878_v32 }
  0x51   :  { %893 = vmatmul.mubr.bf16.gmra.mxu0 %v1862_v31  ;;  %1085 = vmatmul.mubr.bf16.gmra.mxu1 %v1863_v33  ;;  %v1948_v31 = vld [vmem:[%s2768_s0 + $0x198] ss:$12 sps:$4 sm:$0xff]   ;;  %v1950_v33 = vld [vmem:[%s2768_s0 + $0x1b4] ss:$12 sps:$4 sm:$0xff]  }
  0x52   :  { %900 = vmatprep.mubr.bf16.mxu0 %v1865_v34  ;;  %1092 = vmatprep.mubr.bf16.mxu1 %v1867_v35  ;;  %v1952_v34 = vld [vmem:[%s2768_s0 + $0x1e8] ss:$12 sps:$4 sm:$0xff]   ;;  %v1953_v35 = vld [vmem:[%s2768_s0 + $0x1b0] ss:$12 sps:$4 sm:$0xff]  }
  0x53   :  { %1724 = vmatpush3.bf16.msra.mxu1 %v1878_v32  ;;  %v1949_v32 = vld [vmem:[%s2768_s0 + $0x1d0] ss:$12 sps:$4 sm:$0xff]  }
  0x54   :  { %1725 = vmatprep.subr.bf16.mxu1 %v1885_v36 }
  0x57   :  { %1726 = vmatpush3.bf16.msra.mxu1 %v1885_v36  ;;  %v1954_v36 = vld [vmem:[%s2768_s0 + $0x200] ss:$12 sps:$4 sm:$0xff]  }
  0x58   :  { %1727 = vmatprep.subr.bf16.mxu1 %v1892_v41 }
  0x59   :  { %901 = vmatmul.mubr.bf16.gmra.mxu0 %v1869_v37  ;;  %1093 = vmatmul.mubr.bf16.gmra.mxu1 %v1870_v38  ;;  %v1955_v37 = vld [vmem:[%s2768_s0 + $0x1cc] ss:$12 sps:$4 sm:$0xff]  }
  0x5a   :  { %908 = vmatprep.mubr.bf16.mxu0 %v1872_v39  ;;  %1100 = vmatprep.mubr.bf16.mxu1 %v1874_v40  ;;  %v1957_v38 = vld [vmem:[%s2768_s0 + $0x218] ss:$12 sps:$4 sm:$0xff]   ;;  %v1958_v39 = vld [vmem:[%s2768_s0 + $0x1c8] ss:$12 sps:$4 sm:$0xff]   ;;  %v1959_v40 = vld [vmem:[%s2768_s0 + $0x230] ss:$12 sps:$4 sm:$0xff]  }
  0x5b   :  { %1728 = vmatpush3.bf16.msra.mxu1 %v1892_v41  ;;  %v1960_v41 = vld [vmem:[%s2768_s0 + $0x1e4] ss:$12 sps:$4 sm:$0xff]  }
  0x5c   :  { %1729 = vmatprep.subr.bf16.mxu1 %v1899_v42 }
  0x5f   :  { %1730 = vmatpush3.bf16.msra.mxu1 %v1899_v42  ;;  %v1962_v42 = vld [vmem:[%s2768_s0 + $0x248] ss:$12 sps:$4 sm:$0xff]  }
  0x61   :  { %909 = vmatmul.mubr.bf16.gmra.mxu0 %v1876_v43  ;;  %1101 = vmatmul.mubr.bf16.gmra.mxu1 %v1877_v44  ;;  %v1963_v43 = vld [vmem:[%s2768_s0 + $0x1e0] ss:$12 sps:$4 sm:$0xff]  }
  0x62   :  { %916 = vmatprep.mubr.bf16.mxu0 %v1879_v45  ;;  %1108 = vmatprep.mubr.bf16.mxu1 %v1881_v46  ;;  %v1964_v44 = vld [vmem:[%s2768_s0 + $0x260] ss:$12 sps:$4 sm:$0xff]   ;;  %v1965_v45 = vld [vmem:[%s2768_s0 + $0x1fc] ss:$12 sps:$4 sm:$0xff]   ;;  %v1967_v46 = vld [vmem:[%s2768_s0 + $0x278] ss:$12 sps:$4 sm:$0xff]  }
  0x69   :  { %917 = vmatmul.mubr.bf16.gmra.mxu0 %v1883_v47  ;;  %1109 = vmatmul.mubr.bf16.gmra.mxu1 %v1884_v48  ;;  %v1968_v47 = vld [vmem:[%s2768_s0 + $0x1f8] ss:$12 sps:$4 sm:$0xff]   ;;  %v1969_v48 = vld [vmem:[%s2768_s0 + $0x290] ss:$12 sps:$4 sm:$0xff]  }
  0x6a   :  { %924 = vmatprep.mubr.bf16.mxu0 %v1886_v49  ;;  %1116 = vmatprep.mubr.bf16.mxu1 %v1888_v50  ;;  %v1970_v49 = vld [vmem:[%s2768_s0 + $0x214] ss:$12 sps:$4 sm:$0xff]  }
  0x6b   :  { %v1972_v50 = vld [vmem:[%s2768_s0 + $0x2a8] ss:$12 sps:$4 sm:$0xff]  }
  0x71   :  { %925 = vmatmul.mubr.bf16.gmra.mxu0 %v1890_v51  ;;  %1117 = vmatmul.mubr.bf16.gmra.mxu1 %v1891_v52  ;;  %v1973_v51 = vld [vmem:[%s2768_s0 + $0x210] ss:$12 sps:$4 sm:$0xff]   ;;  %v1974_v52 = vld [vmem:[%s2768_s0 + $0x2c0] ss:$12 sps:$4 sm:$0xff]  }
  0x72   :  { %932 = vmatprep.mubr.bf16.mxu0 %v1893_v53  ;;  %1124 = vmatprep.mubr.bf16.mxu1 %v1895_v54  ;;  %v1975_v53 = vld [vmem:[%s2768_s0 + $0x22c] ss:$12 sps:$4 sm:$0xff]  }
  0x73   :  { %v1977_v54 = vld [vmem:[%s2768_s0 + $0x2d8] ss:$12 sps:$4 sm:$0xff]  }
  0x79   :  { %933 = vmatmul.mubr.bf16.gmra.mxu0 %v1897_v55  ;;  %1125 = vmatmul.mubr.bf16.gmra.mxu1 %v1898_v56  ;;  %v1978_v55 = vld [vmem:[%s2768_s0 + $0x228] ss:$12 sps:$4 sm:$0xff]   ;;  %v1979_v56 = vld [vmem:[%s2768_s0 + $0x2f0] ss:$12 sps:$4 sm:$0xff]  }
  0x7a   :  { %940 = vmatprep.mubr.bf16.mxu0 %v1900_v57  ;;  %1731 = vmatprep.mubr.bf16.mxu1 %v1902_v58 }
  0x81   :  { %941 = vmatmul.mubr.bf16.gmra.mxu0 %v1903_v59  ;;  %1732 = vmatmul.mubr.bf16.vlgmr.msra.gmra.mxu1 %v1904_v60 }
  0x82   :  { %948 = vmatprep.mubr.bf16.mxu0 %v1905_v61  ;;  %1735 = vmatprep.mubr.bf16.mxu1 %v1907_v62 }
  0x89   :  { %949 = vmatmul.mubr.bf16.gmra.mxu0 %v1908_v63  ;;  %1736 = vmatmul.mubr.bf16.gmra.mxu1 %v1909_v0 }
  0x8a   :  { %956 = vmatprep.mubr.bf16.mxu0 %v1910_v1  ;;  %1739 = vmatprep.mubr.bf16.mxu1 %v1912_v2 }
  0x91   :  { %957 = vmatmul.mubr.bf16.gmra.mxu0 %v1913_v3  ;;  %1740 = vmatmul.mubr.bf16.gmra.mxu1 %v1914_v4 }
  0x92   :  { %964 = vmatprep.mubr.bf16.mxu0 %v1915_v5  ;;  %1743 = vmatprep.mubr.bf16.mxu1 %v1917_v6 }
  0x99   :  { %965 = vmatmul.mubr.bf16.gmra.mxu0 %v1918_v7  ;;  %1744 = vmatmul.mubr.bf16.gmra.mxu1 %v1919_v8 }
  0x9a   :  { %972 = vmatprep.mubr.bf16.mxu0 %v1920_v9  ;;  %1747 = vmatprep.mubr.bf16.mxu1 %v1922_v10 }
  0xa1   :  { %973 = vmatmul.mubr.bf16.gmra.mxu0 %v1923_v11  ;;  %1748 = vmatmul.mubr.bf16.gmra.mxu1 %v1924_v12 }
  0xa2   :  { %980 = vmatprep.mubr.bf16.mxu0 %v1925_v13  ;;  %1751 = vmatprep.mubr.bf16.mxu1 %v1927_v14 }
  0xa9   :  { %981 = vmatmul.mubr.bf16.gmra.mxu0 %v1928_v15  ;;  %1752 = vmatmul.mubr.bf16.gmra.mxu1 %v1929_v16 }
  0xaa   :  { %988 = vmatprep.mubr.bf16.mxu0 %v1930_v17  ;;  %1755 = vmatprep.mubr.bf16.mxu1 %v1932_v18 }
  0xb1   :  { %989 = vmatmul.mubr.bf16.gmra.mxu0 %v1933_v19  ;;  %1756 = vmatmul.mubr.bf16.gmra.mxu1 %v1934_v20 }
  0xb2   :  { %996 = vmatprep.mubr.bf16.mxu0 %v1935_v21  ;;  %1759 = vmatprep.mubr.bf16.mxu1 %v1937_v22 }
  0xb9   :  { %997 = vmatmul.mubr.bf16.gmra.mxu0 %v1938_v23  ;;  %1760 = vmatmul.mubr.bf16.gmra.mxu1 %v1939_v24 }
  0xba   :  { %1004 = vmatprep.mubr.bf16.mxu0 %v1940_v25  ;;  %1763 = vmatprep.mubr.bf16.mxu1 %v1942_v26 }
  0xc1   :  { %1005 = vmatmul.mubr.bf16.gmra.mxu0 %v1943_v27  ;;  %1764 = vmatmul.mubr.bf16.gmra.mxu1 %v1944_v28 }
  0xc2   :  { %1012 = vmatprep.mubr.bf16.mxu0 %v1945_v29  ;;  %1767 = vmatprep.mubr.bf16.mxu1 %v1947_v30 }
  0xc9   :  { %1013 = vmatmul.mubr.bf16.gmra.mxu0 %v1948_v31  ;;  %1768 = vmatmul.mubr.bf16.gmra.mxu1 %v1949_v32 }
  0xca   :  { %1020 = vmatprep.mubr.bf16.mxu0 %v1950_v33  ;;  %1771 = vmatprep.mubr.bf16.mxu1 %v1952_v34 }
  0xd1   :  { %1021 = vmatmul.mubr.bf16.gmra.mxu0 %v1953_v35  ;;  %1772 = vmatmul.mubr.bf16.gmra.mxu1 %v1954_v36 }
  0xd2   :  { %1028 = vmatprep.mubr.bf16.mxu0 %v1955_v37  ;;  %1775 = vmatprep.mubr.bf16.mxu1 %v1957_v38 }
  0xd9   :  { %1029 = vmatmul.mubr.bf16.gmra.mxu0 %v1958_v39  ;;  %1776 = vmatmul.mubr.bf16.gmra.mxu1 %v1959_v40 }
  0xda   :  { %1036 = vmatprep.mubr.bf16.mxu0 %v1960_v41  ;;  %1779 = vmatprep.mubr.bf16.mxu1 %v1962_v42 }
  0xe1   :  { %1037 = vmatmul.mubr.bf16.gmra.mxu0 %v1963_v43  ;;  %1780 = vmatmul.mubr.bf16.gmra.mxu1 %v1964_v44 }
  0xe2   :  { %1044 = vmatprep.mubr.bf16.mxu0 %v1965_v45  ;;  %1783 = vmatprep.mubr.bf16.mxu1 %v1967_v46 }
  0xe9   :  { %1045 = vmatmul.mubr.bf16.gmra.mxu0 %v1968_v47  ;;  %1784 = vmatmul.mubr.bf16.gmra.mxu1 %v1969_v48 }
  0xea   :  { %1052 = vmatprep.mubr.bf16.mxu0 %v1970_v49  ;;  %1787 = vmatprep.mubr.bf16.mxu1 %v1972_v50 }
  0xf1   :  { %1053 = vmatmul.mubr.bf16.gmra.mxu0 %v1973_v51  ;;  %1788 = vmatmul.mubr.bf16.gmra.mxu1 %v1974_v52 }
  0xf2   :  { %1060 = vmatprep.mubr.bf16.mxu0 %v1975_v53  ;;  %1791 = vmatprep.mubr.bf16.mxu1 %v1977_v54 }
  0xf9   :  { %1061 = vmatmul.mubr.bf16.gmra.mxu0 %v1978_v55  ;;  %1792 = vmatmul.mubr.bf16.gmra.mxu1 %v1979_v56 }
 0x101   :  { %v2388_v57 = vpop.f32.mrf.mxu0  ;;  %v2390_v58 = vpop.f32.mrf.mxu1 }
 0x103   :  { %v880_v59 = vpop.f32.mrf.mxu0  ;;  %v1072_v60 = vpop.f32.mrf.mxu1 }
 0x105   :  { %v2392_v61 = vpop.f32.mrf.mxu0  ;;  %v2394_v62 = vpop.f32.mrf.mxu1 }
 0x107   :  { %v883_v63 = vpop.f32.mrf.mxu0  ;;  %v1075_v0 = vpop.f32.mrf.mxu1 }
 0x109   :  { %v886_v1 = vpop.f32.mrf.mxu0  ;;  %v2396_v2 = vpop.f32.mrf.mxu1 }
 0x10b   :  { %v888_v3 = vpop.f32.mrf.mxu0  ;;  %v1080_v4 = vpop.f32.mrf.mxu1 }
 0x10d   :  { %v2398_v5 = vpop.f32.mrf.mxu0  ;;  %v2400_v6 = vpop.f32.mrf.mxu1 }
 0x10f   :  { %v891_v7 = vpop.f32.mrf.mxu0  ;;  %v1083_v8 = vpop.f32.mrf.mxu1 }
 0x111   :  { %v2402_v9 = vpop.f32.mrf.mxu0  ;;  %v2404_v10 = vpop.f32.mrf.mxu1 }
 0x113   :  { %v896_v11 = vpop.f32.mrf.mxu0  ;;  %v1088_v12 = vpop.f32.mrf.mxu1 }
 0x115   :  { %v2406_v13 = vpop.f32.mrf.mxu0  ;;  %v2408_v14 = vpop.f32.mrf.mxu1 }
 0x117   :  { %v899_v15 = vpop.f32.mrf.mxu0  ;;  %v1091_v16 = vpop.f32.mrf.mxu1 }
 0x119   :  { %v2410_v17 = vpop.f32.mrf.mxu0  ;;  %v2412_v18 = vpop.f32.mrf.mxu1 }
 0x11b   :  { %v904_v19 = vpop.f32.mrf.mxu0  ;;  %v1096_v20 = vpop.f32.mrf.mxu1 }
 0x11d   :  { %v2414_v21 = vpop.f32.mrf.mxu0  ;;  %v2416_v22 = vpop.f32.mrf.mxu1 }
 0x11f   :  { %v907_v23 = vpop.f32.mrf.mxu0  ;;  %v1099_v24 = vpop.f32.mrf.mxu1 }
 0x121   :  { %v2418_v25 = vpop.f32.mrf.mxu0  ;;  %v2420_v26 = vpop.f32.mrf.mxu1 }
 0x123   :  { %v912_v27 = vpop.f32.mrf.mxu0  ;;  %v1104_v28 = vpop.f32.mrf.mxu1 }
 0x125   :  { %v2422_v29 = vpop.f32.mrf.mxu0  ;;  %v2424_v30 = vpop.f32.mrf.mxu1 }
 0x127   :  { %v915_v31 = vpop.f32.mrf.mxu0  ;;  %v1107_v32 = vpop.f32.mrf.mxu1 }
 0x129   :  { %v2426_v33 = vpop.f32.mrf.mxu0  ;;  %v2428_v34 = vpop.f32.mrf.mxu1 }
 0x12b   :  { %v920_v35 = vpop.f32.mrf.mxu0  ;;  %v1112_v36 = vpop.f32.mrf.mxu1 }
 0x12d   :  { %v2430_v37 = vpop.f32.mrf.mxu0  ;;  %v2432_v38 = vpop.f32.mrf.mxu1 }
 0x12f   :  { %v923_v39 = vpop.f32.mrf.mxu0  ;;  %v1115_v40 = vpop.f32.mrf.mxu1 }
 0x131   :  { %v2434_v41 = vpop.f32.mrf.mxu0  ;;  %v2436_v42 = vpop.f32.mrf.mxu1 }
 0x133   :  { %v928_v43 = vpop.f32.mrf.mxu0  ;;  %v1120_v44 = vpop.f32.mrf.mxu1 }
 0x135   :  { %v2438_v45 = vpop.f32.mrf.mxu0  ;;  %v2440_v46 = vpop.f32.mrf.mxu1 }
 0x137   :  { %v931_v47 = vpop.f32.mrf.mxu0  ;;  %v1123_v48 = vpop.f32.mrf.mxu1 }
 0x139   :  { %v2442_v49 = vpop.f32.mrf.mxu0  ;;  %v2444_v50 = vpop.f32.mrf.mxu1 }
 0x13b   :  { %v936_v51 = vpop.f32.mrf.mxu0  ;;  %v1128_v52 = vpop.f32.mrf.mxu1 }
 0x13d   :  { %v2446_v53 = vpop.f32.mrf.mxu0  ;;  %v2448_v54 = vpop.f32.mrf.mxu1 }
 0x13f   :  { %v939_v55 = vpop.f32.mrf.mxu0  ;;  %v1131_v56 = vpop.f32.mrf.mxu1 }
 0x141   :  { %v2450_v59 = vpop.f32.mrf.mxu0  ;;  %v1733_v60 = vpop.f32.mrf.mxu1 }
 0x142   :  { %v1176_v63 = vadd.f32 %v1733_v60, %v886_v1 }
 0x143   :  { %v944_v0 = vpop.f32.mrf.mxu0  ;;  %v1167_v3 = vpop.f32.mrf.mxu1 }
 0x144   :  { %v1424_v4 = vmax.f32 %v1176_v63, 0.0  ;;  %v1168_v7 = vadd.f32 %v1167_v3, %v2388_v57 }
 0x145   :  { %v2453_v8 = vpop.f32.mrf.mxu0  ;;  %v1734_v11 = vpop.f32.mrf.mxu1 }
 0x146   :  { %1489 = vst.msk [vmem:[%s2769_s2 + $0x10] sm:$0xff] %vm1486_vm0, %v1424_v4  ;;  %v1422_v12 = vmax.f32 %v1168_v7, 0.0  ;;  %v1179_v15 = vadd.f32 %v1734_v11, %v2398_v5 }
 0x147   :  { %v947_v16 = vpop.f32.mrf.mxu0  ;;  %v1170_v19 = vpop.f32.mrf.mxu1 }
 0x148   :  { %1487 = vst.msk [vmem:[%s2769_s2] sm:$0xff] %vm1486_vm0, %v1422_v12  ;;  %v1425_v1 = vmax.f32 %v1179_v15, 0.0  ;;  %v1171_v57 = vadd.f32 %v1170_v19, %v2392_v61 }
 0x149   :  { %v2465_v20 = vpop.f32.mrf.mxu0  ;;  %v1737_v23 = vpop.f32.mrf.mxu1 }
 0x14a   :  { %1490 = vst.msk [vmem:[%s2769_s2 + $0x18] sm:$0xff] %vm1486_vm0, %v1425_v1  ;;  %v1423_v24 = vmax.f32 %v1171_v57, 0.0  ;;  %v1192_v5 = vadd.f32 %v1737_v23, %v2410_v17 }
 0x14b   :  { %v952_v27 = vpop.f32.mrf.mxu0  ;;  %v1183_v28 = vpop.f32.mrf.mxu1 }
 0x14c   :  { %1488 = vst.msk [vmem:[%s2769_s2 + $0x8] sm:$0xff] %vm1486_vm0, %v1423_v24  ;;  %v1428_v31 = vmax.f32 %v1192_v5, 0.0  ;;  %v1184_v61 = vadd.f32 %v1183_v28, %v2402_v9 }
 0x14d   :  { %v2477_v32 = vpop.f32.mrf.mxu0  ;;  %v1738_v35 = vpop.f32.mrf.mxu1 }
 0x14e   :  { %1493 = vst.msk [vmem:[%s2769_s2 + $0x30] sm:$0xff] %vm1486_vm0, %v1428_v31  ;;  %v1426_v36 = vmax.f32 %v1184_v61, 0.0  ;;  %v1195_v17 = vadd.f32 %v1738_v35, %v2414_v21 }
 0x14f   :  { %v955_v39 = vpop.f32.mrf.mxu0  ;;  %v1186_v40 = vpop.f32.mrf.mxu1 }
 0x150   :  { %1491 = vst.msk [vmem:[%s2769_s2 + $0x20] sm:$0xff] %vm1486_vm0, %v1426_v36  ;;  %v1429_v43 = vmax.f32 %v1195_v17, 0.0  ;;  %v1187_v9 = vadd.f32 %v1186_v40, %v2406_v13 }
 0x151   :  { %v2489_v44 = vpop.f32.mrf.mxu0  ;;  %v1741_v47 = vpop.f32.mrf.mxu1 }
 0x152   :  { %1494 = vst.msk [vmem:[%s2769_s2 + $0x38] sm:$0xff] %vm1486_vm0, %v1429_v43  ;;  %v1427_v48 = vmax.f32 %v1187_v9, 0.0  ;;  %v1208_v21 = vadd.f32 %v1741_v47, %v2426_v33 }
 0x153   :  { %v960_v51 = vpop.f32.mrf.mxu0  ;;  %v1199_v52 = vpop.f32.mrf.mxu1 }
 0x154   :  { %1492 = vst.msk [vmem:[%s2769_s2 + $0x28] sm:$0xff] %vm1486_vm0, %v1427_v48  ;;  %v1432_v55 = vmax.f32 %v1208_v21, 0.0  ;;  %v1200_v13 = vadd.f32 %v1199_v52, %v2418_v25 }
 0x155   :  { %v2501_v56 = vpop.f32.mrf.mxu0  ;;  %v1742_v60 = vpop.f32.mrf.mxu1 }
 0x156   :  { %1497 = vst.msk [vmem:[%s2769_s2 + $0x50] sm:$0xff] %vm1486_vm0, %v1432_v55  ;;  %v1430_v63 = vmax.f32 %v1200_v13, 0.0  ;;  %v1211_v33 = vadd.f32 %v1742_v60, %v2430_v37 }
 0x157   :  { %v963_v0 = vpop.f32.mrf.mxu0  ;;  %v1202_v3 = vpop.f32.mrf.mxu1 }
 0x158   :  { %1495 = vst.msk [vmem:[%s2769_s2 + $0x40] sm:$0xff] %vm1486_vm0, %v1430_v63  ;;  %v1433_v4 = vmax.f32 %v1211_v33, 0.0  ;;  %v1203_v25 = vadd.f32 %v1202_v3, %v2422_v29 }
 0x159   :  { %v966_v7 = vpop.f32.mrf.mxu0  ;;  %v1745_v11 = vpop.f32.mrf.mxu1 }
 0x15a   :  { %1498 = vst.msk [vmem:[%s2769_s2 + $0x58] sm:$0xff] %vm1486_vm0, %v1433_v4  ;;  %v1431_v12 = vmax.f32 %v1203_v25, 0.0  ;;  %v1224_v37 = vadd.f32 %v1745_v11, %v2442_v49 }
 0x15b   :  { %v968_v15 = vpop.f32.mrf.mxu0  ;;  %v1215_v16 = vpop.f32.mrf.mxu1 }
 0x15c   :  { %1496 = vst.msk [vmem:[%s2769_s2 + $0x48] sm:$0xff] %vm1486_vm0, %v1431_v12  ;;  %v1436_v19 = vmax.f32 %v1224_v37, 0.0  ;;  %v1216_v29 = vadd.f32 %v1215_v16, %v2434_v41 }
 0x15d   :  { %v969_v1 = vpop.f32.mrf.mxu0  ;;  %v1746_v57 = vpop.f32.mrf.mxu1 }
 0x15e   :  { %1501 = vst.msk [vmem:[%s2769_s2 + $0x70] sm:$0xff] %vm1486_vm0, %v1436_v19  ;;  %v1434_v23 = vmax.f32 %v1216_v29, 0.0  ;;  %v1227_v49 = vadd.f32 %v1746_v57, %v2446_v53 }
 0x15f   :  { %v971_v24 = vpop.f32.mrf.mxu0  ;;  %v1218_v5 = vpop.f32.mrf.mxu1 }
 0x160   :  { %1499 = vst.msk [vmem:[%s2769_s2 + $0x60] sm:$0xff] %vm1486_vm0, %v1434_v23  ;;  %v1437_v27 = vmax.f32 %v1227_v49, 0.0  ;;  %v1219_v41 = vadd.f32 %v1218_v5, %v2438_v45 }
 0x161   :  { %v974_v28 = vpop.f32.mrf.mxu0  ;;  %v1749_v31 = vpop.f32.mrf.mxu1 }
 0x162   :  { %1502 = vst.msk [vmem:[%s2769_s2 + $0x78] sm:$0xff] %vm1486_vm0, %v1437_v27  ;;  %v1435_v61 = vmax.f32 %v1219_v41, 0.0  ;;  %v1240_v53 = vadd.f32 %v1749_v31, %v2465_v20 }
 0x163   :  { %v976_v35 = vpop.f32.mrf.mxu0  ;;  %v1231_v36 = vpop.f32.mrf.mxu1 }
 0x164   :  { %1500 = vst.msk [vmem:[%s2769_s2 + $0x68] sm:$0xff] %vm1486_vm0, %v1435_v61  ;;  %v1440_v17 = vmax.f32 %v1240_v53, 0.0  ;;  %v1232_v45 = vadd.f32 %v1231_v36, %v2450_v59 }
 0x165   :  { %v977_v39 = vpop.f32.mrf.mxu0  ;;  %v1750_v40 = vpop.f32.mrf.mxu1 }
 0x166   :  { %1505 = vst.msk [vmem:[%s2769_s2 + $0x90] sm:$0xff] %vm1486_vm0, %v1440_v17  ;;  %v1438_v43 = vmax.f32 %v1232_v45, 0.0  ;;  %v1243_v20 = vadd.f32 %v1750_v40, %v2477_v32 }
 0x167   :  { %v979_v9 = vpop.f32.mrf.mxu0  ;;  %v1234_v47 = vpop.f32.mrf.mxu1 }
 0x168   :  { %1503 = vst.msk [vmem:[%s2769_s2 + $0x80] sm:$0xff] %vm1486_vm0, %v1438_v43  ;;  %v1441_v48 = vmax.f32 %v1243_v20, 0.0  ;;  %v1235_v59 = vadd.f32 %v1234_v47, %v2453_v8 }
 0x169   :  { %v982_v21 = vpop.f32.mrf.mxu0  ;;  %v1753_v51 = vpop.f32.mrf.mxu1 }
 0x16a   :  { %1506 = vst.msk [vmem:[%s2769_s2 + $0x98] sm:$0xff] %vm1486_vm0, %v1441_v48  ;;  %v1439_v52 = vmax.f32 %v1235_v59, 0.0  ;;  %v1256_v55 = vadd.f32 %v1753_v51, %v966_v7 }
 0x16b   :  { %v984_v32 = vpop.f32.mrf.mxu0  ;;  %v1247_v13 = vpop.f32.mrf.mxu1 }
 0x16c   :  { %1504 = vst.msk [vmem:[%s2769_s2 + $0x88] sm:$0xff] %vm1486_vm0, %v1439_v52  ;;  %v1444_v60 = vmax.f32 %v1256_v55, 0.0  ;;  %v1248_v63 = vadd.f32 %v1247_v13, %v2489_v44 }
 0x16d   :  { %v985_v8 = vpop.f32.mrf.mxu0  ;;  %v1754_v33 = vpop.f32.mrf.mxu1 }
 0x16e   :  { %1509 = vst.msk [vmem:[%s2769_s2 + $0xb0] sm:$0xff] %vm1486_vm0, %v1444_v60  ;;  %v1442_v0 = vmax.f32 %v1248_v63, 0.0  ;;  %v1259_v3 = vadd.f32 %v1754_v33, %v969_v1 }
 0x16f   :  { %v987_v4 = vpop.f32.mrf.mxu0  ;;  %v1250_v25 = vpop.f32.mrf.mxu1 }
 0x170   :  { %1507 = vst.msk [vmem:[%s2769_s2 + $0xa0] sm:$0xff] %vm1486_vm0, %v1442_v0  ;;  %v1445_v7 = vmax.f32 %v1259_v3, 0.0  ;;  %v1251_v11 = vadd.f32 %v1250_v25, %v2501_v56 }
 0x171   :  { %v990_v44 = vpop.f32.mrf.mxu0  ;;  %v1757_v12 = vpop.f32.mrf.mxu1 }
 0x172   :  { %1510 = vst.msk [vmem:[%s2769_s2 + $0xb8] sm:$0xff] %vm1486_vm0, %v1445_v7  ;;  %v1443_v37 = vmax.f32 %v1251_v11, 0.0  ;;  %v1272_v15 = vadd.f32 %v1757_v12, %v982_v21 }
 0x173   :  { %v992_v16 = vpop.f32.mrf.mxu0  ;;  %v1263_v19 = vpop.f32.mrf.mxu1 }
 0x174   :  { %1508 = vst.msk [vmem:[%s2769_s2 + $0xa8] sm:$0xff] %vm1486_vm0, %v1443_v37  ;;  %v1448_v29 = vmax.f32 %v1272_v15, 0.0  ;;  %v1264_v1 = vadd.f32 %v1263_v19, %v974_v28 }
 0x175   :  { %v993_v57 = vpop.f32.mrf.mxu0  ;;  %v1758_v56 = vpop.f32.mrf.mxu1 }
 0x176   :  { %1513 = vst.msk [vmem:[%s2769_s2 + $0xd0] sm:$0xff] %vm1486_vm0, %v1448_v29  ;;  %v1446_v23 = vmax.f32 %v1264_v1, 0.0  ;;  %v1275_v49 = vadd.f32 %v1758_v56, %v985_v8 }
 0x177   :  { %v995_v24 = vpop.f32.mrf.mxu0  ;;  %v1266_v5 = vpop.f32.mrf.mxu1 }
 0x178   :  { %1511 = vst.msk [vmem:[%s2769_s2 + $0xc0] sm:$0xff] %vm1486_vm0, %v1446_v23  ;;  %v1449_v27 = vmax.f32 %v1275_v49, 0.0  ;;  %v1267_v41 = vadd.f32 %v1266_v5, %v977_v39 }
 0x179   :  { %v998_v31 = vpop.f32.mrf.mxu0  ;;  %v1761_v28 = vpop.f32.mrf.mxu1 }
 0x17a   :  { %1514 = vst.msk [vmem:[%s2769_s2 + $0xd8] sm:$0xff] %vm1486_vm0, %v1449_v27  ;;  %v1447_v61 = vmax.f32 %v1267_v41, 0.0  ;;  %v1288_v53 = vadd.f32 %v1761_v28, %v998_v31 }
 0x17b   :  { %v1000_v35 = vpop.f32.mrf.mxu0  ;;  %v1279_v36 = vpop.f32.mrf.mxu1 }
 0x17c   :  { %1512 = vst.msk [vmem:[%s2769_s2 + $0xc8] sm:$0xff] %vm1486_vm0, %v1447_v61  ;;  %v1452_v17 = vmax.f32 %v1288_v53, 0.0  ;;  %v1280_v45 = vadd.f32 %v1279_v36, %v990_v44 }
 0x17d   :  { %v1001_v40 = vpop.f32.mrf.mxu0  ;;  %v1762_v39 = vpop.f32.mrf.mxu1 }
 0x17e   :  { %1517 = vst.msk [vmem:[%s2769_s2 + $0xf0] sm:$0xff] %vm1486_vm0, %v1452_v17  ;;  %v1450_v43 = vmax.f32 %v1280_v45, 0.0  ;;  %v1291_v20 = vadd.f32 %v1762_v39, %v1001_v40 }
 0x17f   :  { %v1003_v9 = vpop.f32.mrf.mxu0  ;;  %v1282_v47 = vpop.f32.mrf.mxu1 }
 0x180   :  { %1515 = vst.msk [vmem:[%s2769_s2 + $0xe0] sm:$0xff] %vm1486_vm0, %v1450_v43  ;;  %v1453_v48 = vmax.f32 %v1291_v20, 0.0  ;;  %v1283_v59 = vadd.f32 %v1282_v47, %v993_v57 }
 0x181   :  { %v1006_v21 = vpop.f32.mrf.mxu0  ;;  %v1765_v51 = vpop.f32.mrf.mxu1 }
 0x182   :  { %1518 = vst.msk [vmem:[%s2769_s2 + $0xf8] sm:$0xff] %vm1486_vm0, %v1453_v48  ;;  %v1451_v52 = vmax.f32 %v1283_v59, 0.0 }
 0x183   :  { %v1008_v55 = vpop.f32.mrf.mxu0  ;;  %v1295_v32 = vpop.f32.mrf.mxu1 }
 0x184   :  { %1516 = vst.msk [vmem:[%s2769_s2 + $0xe8] sm:$0xff] %vm1486_vm0, %v1451_v52  ;;  %v1296_v13 = vadd.f32 %v1295_v32, %v1006_v21 }
 0x185   :  { %v1009_v60 = vpop.f32.mrf.mxu0  ;;  %v1766_v63 = vpop.f32.mrf.mxu1 }
 0x186   :  { %v1454_v8 = vmax.f32 %v1296_v13, 0.0 }
 0x187   :  { %v1011_v33 = vpop.f32.mrf.mxu0  ;;  %v1298_v0 = vpop.f32.mrf.mxu1 }
 0x188   :  { %1519 = vst.msk [vmem:[%s2769_s2 + $0x100] sm:$0xff] %vm1486_vm0, %v1454_v8  ;;  %v1299_v3 = vadd.f32 %v1298_v0, %v1009_v60 }
 0x189   :  { %v1014_v4 = vpop.f32.mrf.mxu0  ;;  %v1769_v25 = vpop.f32.mrf.mxu1 }
 0x18a   :  { %v1455_v7 = vmax.f32 %v1299_v3, 0.0  ;;  %v1304_v11 = vadd.f32 %v1765_v51, %v1014_v4 }
 0x18b   :  { %v1016_v44 = vpop.f32.mrf.mxu0  ;;  %v1311_v12 = vpop.f32.mrf.mxu1 }
 0x18c   :  { %1520 = vst.msk [vmem:[%s2769_s2 + $0x108] sm:$0xff] %vm1486_vm0, %v1455_v7  ;;  %v1456_v37 = vmax.f32 %v1304_v11, 0.0 }
 0x18d   :  { %v1017_v15 = vpop.f32.mrf.mxu0  ;;  %v1770_v16 = vpop.f32.mrf.mxu1 }
 0x18e   :  { %1521 = vst.msk [vmem:[%s2769_s2 + $0x110] sm:$0xff] %vm1486_vm0, %v1456_v37  ;;  %v1307_v19 = vadd.f32 %v1766_v63, %v1017_v15 }
 0x18f   :  { %v1019_v29 = vpop.f32.mrf.mxu0  ;;  %v1314_v1 = vpop.f32.mrf.mxu1 }
 0x190   :  { %v1457_v57 = vmax.f32 %v1307_v19, 0.0 }
 0x191   :  { %v1022_v56 = vpop.f32.mrf.mxu0  ;;  %v1773_v23 = vpop.f32.mrf.mxu1 }
 0x192   :  { %1522 = vst.msk [vmem:[%s2769_s2 + $0x118] sm:$0xff] %vm1486_vm0, %v1457_v57  ;;  %v1312_v49 = vadd.f32 %v1311_v12, %v1022_v56 }
 0x193   :  { %v1024_v24 = vpop.f32.mrf.mxu0  ;;  %v1327_v5 = vpop.f32.mrf.mxu1 }
 0x194   :  { %v1458_v27 = vmax.f32 %v1312_v49, 0.0 }
 0x195   :  { %v1025_v41 = vpop.f32.mrf.mxu0  ;;  %v1774_v31 = vpop.f32.mrf.mxu1 }
 0x196   :  { %1523 = vst.msk [vmem:[%s2769_s2 + $0x120] sm:$0xff] %vm1486_vm0, %v1458_v27  ;;  %v1315_v28 = vadd.f32 %v1314_v1, %v1025_v41 }
 0x197   :  { %v1027_v61 = vpop.f32.mrf.mxu0  ;;  %v1330_v53 = vpop.f32.mrf.mxu1 }
 0x198   :  { %v1459_v35 = vmax.f32 %v1315_v28, 0.0 }
 0x199   :  { %v1030_v36 = vpop.f32.mrf.mxu0  ;;  %v2631_v17 = vpop.f32.mrf.mxu1 }
 0x19a   :  { %1524 = vst.msk [vmem:[%s2769_s2 + $0x128] sm:$0xff] %vm1486_vm0, %v1459_v35  ;;  %v1320_v45 = vadd.f32 %v1769_v25, %v1030_v36 }
 0x19b   :  { %v1032_v40 = vpop.f32.mrf.mxu0  ;;  %v2637_v39 = vpop.f32.mrf.mxu1 }
 0x19c   :  { %v1460_v43 = vmax.f32 %v1320_v45, 0.0 }
 0x19d   :  { %v1033_v20 = vpop.f32.mrf.mxu0  ;;  %v2639_v9 = vpop.f32.mrf.mxu1 }
 0x19e   :  { %1525 = vst.msk [vmem:[%s2769_s2 + $0x130] sm:$0xff] %vm1486_vm0, %v1460_v43  ;;  %v1323_v47 = vadd.f32 %v1770_v16, %v1033_v20 }
 0x19f   :  { %v1035_v48 = vpop.f32.mrf.mxu0  ;;  %v2645_v59 = vpop.f32.mrf.mxu1 }
 0x1a0   :  { %v1461_v21 = vmax.f32 %v1323_v47, 0.0 }
 0x1a1   :  { %v1038_v51 = vpop.f32.mrf.mxu0  ;;  %v1781_v52 = vpop.f32.mrf.mxu1 }
 0x1a2   :  { %1526 = vst.msk [vmem:[%s2769_s2 + $0x138] sm:$0xff] %vm1486_vm0, %v1461_v21  ;;  %v1328_v55 = vadd.f32 %v1327_v5, %v1038_v51  ;;  %v1368_v32 = vadd.f32 %v1781_v52, %v2396_v2 }
 0x1a3   :  { %v1040_v13 = vpop.f32.mrf.mxu0  ;;  %v1359_v60 = vpop.f32.mrf.mxu1 }
 0x1a4   :  { %v1462_v63 = vmax.f32 %v1328_v55, 0.0  ;;  %v1472_v8 = vmax.f32 %v1368_v32, 0.0  ;;  %v1360_v33 = vadd.f32 %v1359_v60, %v2390_v58 }
 0x1a5   :  { %v1041_v0 = vpop.f32.mrf.mxu0  ;;  %v1782_v3 = vpop.f32.mrf.mxu1 }
 0x1a6   :  { %1527 = vst.msk [vmem:[%s2769_s2 + $0x140] sm:$0xff] %vm1486_vm0, %v1462_v63  ;;  %1537 = vst.msk [vmem:[%s2769_s2 + $0x190] sm:$0xff] %vm1486_vm0, %v1472_v8  ;;  %v1470_v4 = vmax.f32 %v1360_v33, 0.0  ;;  %v1331_v2 = vadd.f32 %v1330_v53, %v1041_v0  ;;  %v1371_v25 = vadd.f32 %v1782_v3, %v2400_v6 }
 0x1a7   :  { %v1043_v7 = vpop.f32.mrf.mxu0  ;;  %v1362_v11 = vpop.f32.mrf.mxu1 }
 0x1a8   :  { %1535 = vst.msk [vmem:[%s2769_s2 + $0x180] sm:$0xff] %vm1486_vm0, %v1470_v4  ;;  %v1463_v58 = vmax.f32 %v1331_v2, 0.0  ;;  %v1473_v44 = vmax.f32 %v1371_v25, 0.0  ;;  %v1363_v12 = vadd.f32 %v1362_v11, %v2394_v62 }
 0x1a9   :  { %v1046_v37 = vpop.f32.mrf.mxu0  ;;  %v1785_v15 = vpop.f32.mrf.mxu1 }
 0x1aa   :  { %1528 = vst.msk [vmem:[%s2769_s2 + $0x148] sm:$0xff] %vm1486_vm0, %v1463_v58  ;;  %1538 = vst.msk [vmem:[%s2769_s2 + $0x198] sm:$0xff] %vm1486_vm0, %v1473_v44  ;;  %v1471_v6 = vmax.f32 %v1363_v12, 0.0  ;;  %v1336_v16 = vadd.f32 %v1773_v23, %v1046_v37  ;;  %v1384_v19 = vadd.f32 %v1785_v15, %v2412_v18 }
 0x1ab   :  { %v1048_v29 = vpop.f32.mrf.mxu0  ;;  %v1375_v1 = vpop.f32.mrf.mxu1 }
 0x1ac   :  { %1536 = vst.msk [vmem:[%s2769_s2 + $0x188] sm:$0xff] %vm1486_vm0, %v1471_v6  ;;  %v1464_v62 = vmax.f32 %v1336_v16, 0.0  ;;  %v1476_v57 = vmax.f32 %v1384_v19, 0.0  ;;  %v1376_v56 = vadd.f32 %v1375_v1, %v2404_v10 }
 0x1ad   :  { %v1049_v49 = vpop.f32.mrf.mxu0  ;;  %v1786_v24 = vpop.f32.mrf.mxu1 }
 0x1ae   :  { %1529 = vst.msk [vmem:[%s2769_s2 + $0x150] sm:$0xff] %vm1486_vm0, %v1464_v62  ;;  %1541 = vst.msk [vmem:[%s2769_s2 + $0x1b0] sm:$0xff] %vm1486_vm0, %v1476_v57  ;;  %v1474_v18 = vmax.f32 %v1376_v56, 0.0  ;;  %v1339_v23 = vadd.f32 %v1774_v31, %v1049_v49  ;;  %v1387_v5 = vadd.f32 %v1786_v24, %v2416_v22 }
 0x1af   :  { %v1051_v27 = vpop.f32.mrf.mxu0  ;;  %v1378_v41 = vpop.f32.mrf.mxu1 }
 0x1b0   :  { %1539 = vst.msk [vmem:[%s2769_s2 + $0x1a0] sm:$0xff] %vm1486_vm0, %v1474_v18  ;;  %v1465_v10 = vmax.f32 %v1339_v23, 0.0  ;;  %v1477_v28 = vmax.f32 %v1387_v5, 0.0  ;;  %v1379_v61 = vadd.f32 %v1378_v41, %v2408_v14 }
 0x1b1   :  { %v1054_v53 = vpop.f32.mrf.mxu0  ;;  %v1789_v35 = vpop.f32.mrf.mxu1 }
 0x1b2   :  { %1530 = vst.msk [vmem:[%s2769_s2 + $0x158] sm:$0xff] %vm1486_vm0, %v1465_v10  ;;  %1542 = vst.msk [vmem:[%s2769_s2 + $0x1b8] sm:$0xff] %vm1486_vm0, %v1477_v28  ;;  %v1475_v22 = vmax.f32 %v1379_v61, 0.0  ;;  %v1344_v31 = vadd.f32 %v2637_v39, %v1054_v53  ;;  %v1400_v36 = vadd.f32 %v1789_v35, %v2428_v34 }
 0x1b3   :  { %v1056_v45 = vpop.f32.mrf.mxu0  ;;  %v1391_v40 = vpop.f32.mrf.mxu1 }
 0x1b4   :  { %1540 = vst.msk [vmem:[%s2769_s2 + $0x1a8] sm:$0xff] %vm1486_vm0, %v1475_v22  ;;  %v1466_v14 = vmax.f32 %v1344_v31, 0.0  ;;  %v1480_v43 = vmax.f32 %v1400_v36, 0.0  ;;  %v1392_v20 = vadd.f32 %v1391_v40, %v2420_v26 }
 0x1b5   :  { %v1057_v47 = vpop.f32.mrf.mxu0  ;;  %v1790_v48 = vpop.f32.mrf.mxu1 }
 0x1b6   :  { %1531 = vst.msk [vmem:[%s2769_s2 + $0x160] sm:$0xff] %vm1486_vm0, %v1466_v14  ;;  %1545 = vst.msk [vmem:[%s2769_s2 + $0x1d0] sm:$0xff] %vm1486_vm0, %v1480_v43  ;;  %v1478_v34 = vmax.f32 %v1392_v20, 0.0  ;;  %v1347_v39 = vadd.f32 %v2645_v59, %v1057_v47  ;;  %v1403_v21 = vadd.f32 %v1790_v48, %v2432_v38 }
 0x1b7   :  { %v1059_v51 = vpop.f32.mrf.mxu0  ;;  %v1394_v52 = vpop.f32.mrf.mxu1 }
 0x1b8   :  { %1543 = vst.msk [vmem:[%s2769_s2 + $0x1c0] sm:$0xff] %vm1486_vm0, %v1478_v34  ;;  %v1467_v26 = vmax.f32 %v1347_v39, 0.0  ;;  %v1481_v55 = vmax.f32 %v1403_v21, 0.0  ;;  %v1395_v32 = vadd.f32 %v1394_v52, %v2424_v30 }
 0x1b9   :  { %v1062_v13 = vpop.f32.mrf.mxu0  ;;  %v1793_v60 = vpop.f32.mrf.mxu1 }
 0x1ba   :  { %1532 = vst.msk [vmem:[%s2769_s2 + $0x168] sm:$0xff] %vm1486_vm0, %v1467_v26  ;;  %1546 = vst.msk [vmem:[%s2769_s2 + $0x1d8] sm:$0xff] %vm1486_vm0, %v1481_v55  ;;  %v1479_v38 = vmax.f32 %v1395_v32, 0.0  ;;  %v1352_v59 = vadd.f32 %v2631_v17, %v1062_v13  ;;  %v1416_v63 = vadd.f32 %v1793_v60, %v2444_v50 }
 0x1bb   :  { %v1064_v8 = vpop.f32.mrf.mxu0  ;;  %v1407_v33 = vpop.f32.mrf.mxu1 }
 0x1bc   :  { %1544 = vst.msk [vmem:[%s2769_s2 + $0x1c8] sm:$0xff] %vm1486_vm0, %v1479_v38  ;;  %v1468_v30 = vmax.f32 %v1352_v59, 0.0  ;;  %v1484_v0 = vmax.f32 %v1416_v63, 0.0  ;;  %v1408_v3 = vadd.f32 %v1407_v33, %v2436_v42 }
 0x1bd   :  { %v1065_v4 = vpop.f32.mrf.mxu0  ;;  %v1794_v2 = vpop.f32.mrf.mxu1 }
 0x1be   :  { %1533 = vst.msk [vmem:[%s2769_s2 + $0x170] sm:$0xff] %vm1486_vm0, %v1468_v30  ;;  %1549 = vst.msk [vmem:[%s2769_s2 + $0x1f0] sm:$0xff] %vm1486_vm0, %v1484_v0  ;;  %v1482_v50 = vmax.f32 %v1408_v3, 0.0  ;;  %v1355_v17 = vadd.f32 %v2639_v9, %v1065_v4  ;;  %v1419_v25 = vadd.f32 %v1794_v2, %v2448_v54 }
 0x1bf   :  { %v1067_v7 = vpop.f32.mrf.mxu0  ;;  %v1410_v11 = vpop.f32.mrf.mxu1 }
 0x1c0   :  { %1547 = vst.msk [vmem:[%s2769_s2 + $0x1e0] sm:$0xff] %vm1486_vm0, %v1482_v50  ;;  %v1469_v42 = vmax.f32 %v1355_v17, 0.0  ;;  %v1485_v58 = vmax.f32 %v1419_v25, 0.0  ;;  %v1411_v44 = vadd.f32 %v1410_v11, %v2440_v46 }
 0x1c2   :  { %1534 = vst.msk [vmem:[%s2769_s2 + $0x178] sm:$0xff] %vm1486_vm0, %v1469_v42  ;;  %1550 = vst.msk [vmem:[%s2769_s2 + $0x1f8] sm:$0xff] %vm1486_vm0, %v1485_v58  ;;  %v1483_v54 = vmax.f32 %v1411_v44, 0.0 }
 0x1c4   :  { %1548 = vst.msk [vmem:[%s2769_s2 + $0x1e8] sm:$0xff] %vm1486_vm0, %v1483_v54 }

// kernel: _lambda_.22
= control target key start
LH: loop header
LB: loop body
LE: loop exit
PB: predicated region body
PF: predicated region fallthrough
CT: control target
= control target key end

     0   :  { %v1171_v0 = vmov 0   ;;  %vm877_vm0 = vcmask 64512   ;;  %s1715_s1 = inlined_call_operand.vmem [shape: bf16[256,8], index: 1, kind: input, shape index: {}]   ;;  %s1716_s0 = inlined_call_operand.vmem [shape: bf16[512,256], index: 0, kind: input, shape index: {}]   ;;  %s1717_s2 = inlined_call_operand.vmem [shape: f32[512,8], index: 2, kind: output, shape index: {}]  }
   0x1   :  { %524 = vmatprep.subr.bf16.mxu0 %v1171_v0  ;;  %1026 = vmatprep.subr.bf16.mxu1 %v1171_v0  ;;  %v1059_v1 = vld [vmem:[%s1715_s1 + $0x38] sm:$0xff]   ;;  %v1060_v2 = vld [vmem:[%s1715_s1 + $0x30] sm:$0xff]   ;;  %v1061_v3 = vld [vmem:[%s1715_s1 + $0x28] sm:$0xff]  }
   0x2   :  { %525 = vmatpush1.bf16.msra.mxu0 %v1059_v1  ;;  %1042 = vmatpush1.bf16.msra.mxu1 %v1059_v1  ;;  %v1062_v4 = vld [vmem:[%s1715_s1 + $0x20] sm:$0xff]   ;;  %v1063_v5 = vld [vmem:[%s1715_s1 + $0x18] sm:$0xff]   ;;  %v1064_v7 = vld [vmem:[%s1715_s1 + $0x10] sm:$0xff]  }
   0x3   :  { %526 = vmatprep.subr.bf16.mxu0 %v1171_v0  ;;  %1027 = vmatprep.subr.bf16.mxu1 %v1171_v0  ;;  %v1077_v6 = vld [vmem:[%s1716_s0 + $0x4] ss:$8 sps:$4 sm:$0xff]   ;;  %v1067_v11 = vld [vmem:[%s1715_s1 + $0x78] sm:$0xff]   ;;  %v1068_v12 = vld [vmem:[%s1715_s1 + $0x70] sm:$0xff]  }
   0x4   :  { %v1080_v8 = vld [vmem:[%s1716_s0 + $0x104] ss:$8 sps:$4 sm:$0xff]   ;;  %556 = vmatprep.mubr.bf16.mxu0 %v1077_v6  ;;  %v1071_v15 = vld [vmem:[%s1715_s1 + $0x58] sm:$0xff]   ;;  %v1072_v16 = vld [vmem:[%s1715_s1 + $0x50] sm:$0xff]  }
   0x5   :  { %684 = vmatprep.mubr.bf16.mxu1 %v1080_v8  ;;  %v1065_v9 = vld [vmem:[%s1715_s1 + $0x8] sm:$0xff]   ;;  %v1066_v10 = vld [vmem:[%s1715_s1] sm:$0xff]   ;;  %v1081_v21 = vld [vmem:[%s1716_s0 + $0x14] ss:$8 sps:$4 sm:$0xff]  }
   0x6   :  { %527 = vmatpush1.bf16.msra.mxu0 %v1060_v2  ;;  %1043 = vmatpush1.bf16.msra.mxu1 %v1060_v2  ;;  %v1069_v13 = vld [vmem:[%s1715_s1 + $0x68] sm:$0xff]   ;;  %v1070_v14 = vld [vmem:[%s1715_s1 + $0x60] sm:$0xff]   ;;  %v1083_v22 = vld [vmem:[%s1716_s0 + $0x114] ss:$8 sps:$4 sm:$0xff]  }
   0x7   :  { %528 = vmatprep.subr.bf16.mxu0 %v1171_v0  ;;  %1028 = vmatprep.subr.bf16.mxu1 %v1171_v0  ;;  %v1073_v17 = vld [vmem:[%s1715_s1 + $0x48] sm:$0xff]   ;;  %v1074_v18 = vld [vmem:[%s1715_s1 + $0x40] sm:$0xff]   ;;  %v1085_v23 = vld [vmem:[%s1716_s0 + $0x10] ss:$8 sps:$4 sm:$0xff]  }
   0x8   :  { %v1075_v19 = vld [vmem:[%s1716_s0] ss:$8 sps:$4 sm:$0xff]   ;;  %v1086_v24 = vld [vmem:[%s1716_s0 + $0x110] ss:$8 sps:$4 sm:$0xff]   ;;  %v1087_v25 = vld [vmem:[%s1716_s0 + $0x24] ss:$8 sps:$4 sm:$0xff]  }
   0x9   :  { %v1078_v20 = vld [vmem:[%s1716_s0 + $0x100] ss:$8 sps:$4 sm:$0xff]   ;;  %v1089_v26 = vld [vmem:[%s1716_s0 + $0x124] ss:$8 sps:$4 sm:$0xff]   ;;  %v1093_v29 = vld [vmem:[%s1716_s0 + $0x34] ss:$8 sps:$4 sm:$0xff]  }
   0xa   :  { %529 = vmatpush1.bf16.msra.mxu0 %v1061_v3  ;;  %1044 = vmatpush1.bf16.msra.mxu1 %v1061_v3  ;;  %v1091_v27 = vld [vmem:[%s1716_s0 + $0x20] ss:$8 sps:$4 sm:$0xff]   ;;  %v1095_v30 = vld [vmem:[%s1716_s0 + $0x134] ss:$8 sps:$4 sm:$0xff]   ;;  %v1097_v31 = vld [vmem:[%s1716_s0 + $0x30] ss:$8 sps:$4 sm:$0xff]  }
   0xb   :  { %530 = vmatprep.subr.bf16.mxu0 %v1171_v0  ;;  %1029 = vmatprep.subr.bf16.mxu1 %v1171_v0  ;;  %v1092_v28 = vld [vmem:[%s1716_s0 + $0x120] ss:$8 sps:$4 sm:$0xff]   ;;  %v1098_v32 = vld [vmem:[%s1716_s0 + $0x130] ss:$8 sps:$4 sm:$0xff]   ;;  %v1099_v33 = vld [vmem:[%s1716_s0 + $0x44] ss:$8 sps:$4 sm:$0xff]  }
   0xc   :  { %v1101_v34 = vld [vmem:[%s1716_s0 + $0x144] ss:$8 sps:$4 sm:$0xff]   ;;  %v1103_v35 = vld [vmem:[%s1716_s0 + $0x40] ss:$8 sps:$4 sm:$0xff]   ;;  %v1105_v37 = vld [vmem:[%s1716_s0 + $0x54] ss:$8 sps:$4 sm:$0xff]  }
   0xd   :  { %v1104_v36 = vld [vmem:[%s1716_s0 + $0x140] ss:$8 sps:$4 sm:$0xff]   ;;  %v1107_v38 = vld [vmem:[%s1716_s0 + $0x154] ss:$8 sps:$4 sm:$0xff]   ;;  %v1109_v39 = vld [vmem:[%s1716_s0 + $0x50] ss:$8 sps:$4 sm:$0xff]  }
   0xe   :  { %531 = vmatpush1.bf16.msra.mxu0 %v1062_v4  ;;  %1045 = vmatpush1.bf16.msra.mxu1 %v1062_v4  ;;  %v1110_v40 = vld [vmem:[%s1716_s0 + $0x150] ss:$8 sps:$4 sm:$0xff]   ;;  %v1111_v41 = vld [vmem:[%s1716_s0 + $0x64] ss:$8 sps:$4 sm:$0xff]   ;;  %v1115_v43 = vld [vmem:[%s1716_s0 + $0x60] ss:$8 sps:$4 sm:$0xff]  }
   0xf   :  { %532 = vmatprep.subr.bf16.mxu0 %v1171_v0  ;;  %1030 = vmatprep.subr.bf16.mxu1 %v1171_v0  ;;  %v1113_v42 = vld [vmem:[%s1716_s0 + $0x164] ss:$8 sps:$4 sm:$0xff]   ;;  %v1116_v44 = vld [vmem:[%s1716_s0 + $0x160] ss:$8 sps:$4 sm:$0xff]   ;;  %v1117_v45 = vld [vmem:[%s1716_s0 + $0x74] ss:$8 sps:$4 sm:$0xff]  }
  0x10   :  { %v1119_v46 = vld [vmem:[%s1716_s0 + $0x174] ss:$8 sps:$4 sm:$0xff]   ;;  %v1121_v47 = vld [vmem:[%s1716_s0 + $0x70] ss:$8 sps:$4 sm:$0xff]   ;;  %v1123_v49 = vld [vmem:[%s1716_s0 + $0x84] ss:$8 sps:$4 sm:$0xff]  }
  0x11   :  { %v1122_v48 = vld [vmem:[%s1716_s0 + $0x170] ss:$8 sps:$4 sm:$0xff]   ;;  %v1125_v50 = vld [vmem:[%s1716_s0 + $0x184] ss:$8 sps:$4 sm:$0xff]   ;;  %v1127_v51 = vld [vmem:[%s1716_s0 + $0x80] ss:$8 sps:$4 sm:$0xff]  }
  0x12   :  { %533 = vmatpush1.bf16.msra.mxu0 %v1063_v5  ;;  %1046 = vmatpush1.bf16.msra.mxu1 %v1063_v5  ;;  %v1128_v52 = vld [vmem:[%s1716_s0 + $0x180] ss:$8 sps:$4 sm:$0xff]   ;;  %v1129_v53 = vld [vmem:[%s1716_s0 + $0x94] ss:$8 sps:$4 sm:$0xff]   ;;  %v1133_v55 = vld [vmem:[%s1716_s0 + $0x90] ss:$8 sps:$4 sm:$0xff]  }
  0x13   :  { %534 = vmatprep.subr.bf16.mxu0 %v1171_v0  ;;  %1031 = vmatprep.subr.bf16.mxu1 %v1171_v0  ;;  %v1131_v54 = vld [vmem:[%s1716_s0 + $0x194] ss:$8 sps:$4 sm:$0xff]   ;;  %v1134_v56 = vld [vmem:[%s1716_s0 + $0x190] ss:$8 sps:$4 sm:$0xff]   ;;  %v1135_v57 = vld [vmem:[%s1716_s0 + $0xa4] ss:$8 sps:$4 sm:$0xff]  }
  0x14   :  { %v1137_v58 = vld [vmem:[%s1716_s0 + $0x1a4] ss:$8 sps:$4 sm:$0xff]   ;;  %v1139_v59 = vld [vmem:[%s1716_s0 + $0xa0] ss:$8 sps:$4 sm:$0xff]   ;;  %v1141_v61 = vld [vmem:[%s1716_s0 + $0xb4] ss:$8 sps:$4 sm:$0xff]  }
  0x15   :  { %v1140_v60 = vld [vmem:[%s1716_s0 + $0x1a0] ss:$8 sps:$4 sm:$0xff]   ;;  %v1143_v62 = vld [vmem:[%s1716_s0 + $0x1b4] ss:$8 sps:$4 sm:$0xff]   ;;  %v1145_v63 = vld [vmem:[%s1716_s0 + $0xb0] ss:$8 sps:$4 sm:$0xff]  }
  0x16   :  { %535 = vmatpush1.bf16.msra.mxu0 %v1064_v7  ;;  %1047 = vmatpush1.bf16.msra.mxu1 %v1064_v7  ;;  %v1147_v1 = vld [vmem:[%s1716_s0 + $0xc4] ss:$8 sps:$4 sm:$0xff]   ;;  %v1151_v3 = vld [vmem:[%s1716_s0 + $0xc0] ss:$8 sps:$4 sm:$0xff]   ;;  %v1153_v5 = vld [vmem:[%s1716_s0 + $0xd4] ss:$8 sps:$4 sm:$0xff]  }
  0x17   :  { %536 = vmatprep.subr.bf16.mxu0 %v1171_v0  ;;  %1032 = vmatprep.subr.bf16.mxu1 %v1171_v0  ;;  %v1149_v2 = vld [vmem:[%s1716_s0 + $0x1c4] ss:$8 sps:$4 sm:$0xff]   ;;  %v1152_v4 = vld [vmem:[%s1716_s0 + $0x1c0] ss:$8 sps:$4 sm:$0xff]   ;;  %v1155_v6 = vld [vmem:[%s1716_s0 + $0x1d4] ss:$8 sps:$4 sm:$0xff]  }
  0x18   :  { %v1157_v7 = vld [vmem:[%s1716_s0 + $0xd0] ss:$8 sps:$4 sm:$0xff]  }
  0x19   :  { %v1158_v8 = vld [vmem:[%s1716_s0 + $0x1d0] ss:$8 sps:$4 sm:$0xff]  }
  0x1a   :  { %537 = vmatpush1.bf16.msra.mxu0 %v1065_v9  ;;  %1048 = vmatpush1.bf16.msra.mxu1 %v1065_v9  ;;  %v1159_v9 = vld [vmem:[%s1716_s0 + $0xe4] ss:$8 sps:$4 sm:$0xff]  }
  0x1b   :  { %538 = vmatprep.subr.bf16.mxu0 %v1171_v0  ;;  %1033 = vmatprep.subr.bf16.mxu1 %v1171_v0 }
  0x1e   :  { %539 = vmatpush1.bf16.msra.mxu0 %v1066_v10  ;;  %1049 = vmatpush1.bf16.msra.mxu1 %v1066_v10  ;;  %v1161_v10 = vld [vmem:[%s1716_s0 + $0x1e4] ss:$8 sps:$4 sm:$0xff]  }
  0x1f   :  { %540 = vmatprep.subr.bf16.mxu0 %v1171_v0  ;;  %1034 = vmatprep.subr.bf16.mxu1 %v1171_v0 }
  0x22   :  { %541 = vmatpush2.bf16.msra.mxu0 %v1067_v11  ;;  %1050 = vmatpush2.bf16.msra.mxu1 %v1067_v11  ;;  %v1163_v11 = vld [vmem:[%s1716_s0 + $0xe0] ss:$8 sps:$4 sm:$0xff]  }
  0x23   :  { %542 = vmatprep.subr.bf16.mxu0 %v1171_v0  ;;  %1035 = vmatprep.subr.bf16.mxu1 %v1171_v0 }
  0x26   :  { %543 = vmatpush2.bf16.msra.mxu0 %v1068_v12  ;;  %1051 = vmatpush2.bf16.msra.mxu1 %v1068_v12  ;;  %v1164_v12 = vld [vmem:[%s1716_s0 + $0x1e0] ss:$8 sps:$4 sm:$0xff]  }
  0x27   :  { %544 = vmatprep.subr.bf16.mxu0 %v1171_v0  ;;  %1036 = vmatprep.subr.bf16.mxu1 %v1171_v0 }
  0x2a   :  { %545 = vmatpush2.bf16.msra.mxu0 %v1069_v13  ;;  %1052 = vmatpush2.bf16.msra.mxu1 %v1069_v13  ;;  %v1165_v13 = vld [vmem:[%s1716_s0 + $0xf4] ss:$8 sps:$4 sm:$0xff]  }
  0x2b   :  { %546 = vmatprep.subr.bf16.mxu0 %v1171_v0  ;;  %1037 = vmatprep.subr.bf16.mxu1 %v1171_v0 }
  0x2e   :  { %547 = vmatpush2.bf16.msra.mxu0 %v1070_v14  ;;  %1053 = vmatpush2.bf16.msra.mxu1 %v1070_v14  ;;  %v1167_v14 = vld [vmem:[%s1716_s0 + $0x1f4] ss:$8 sps:$4 sm:$0xff]  }
  0x2f   :  { %548 = vmatprep.subr.bf16.mxu0 %v1171_v0  ;;  %1038 = vmatprep.subr.bf16.mxu1 %v1171_v0 }
  0x32   :  { %549 = vmatpush2.bf16.msra.mxu0 %v1071_v15  ;;  %1054 = vmatpush2.bf16.msra.mxu1 %v1071_v15  ;;  %v1169_v15 = vld [vmem:[%s1716_s0 + $0xf0] ss:$8 sps:$4 sm:$0xff]  }
  0x33   :  { %550 = vmatprep.subr.bf16.mxu0 %v1171_v0  ;;  %1039 = vmatprep.subr.bf16.mxu1 %v1171_v0 }
  0x36   :  { %551 = vmatpush2.bf16.msra.mxu0 %v1072_v16  ;;  %1055 = vmatpush2.bf16.msra.mxu1 %v1072_v16  ;;  %v1170_v16 = vld [vmem:[%s1716_s0 + $0x1f0] ss:$8 sps:$4 sm:$0xff]  }
  0x37   :  { %552 = vmatprep.subr.bf16.mxu0 %v1171_v0  ;;  %1040 = vmatprep.subr.bf16.mxu1 %v1171_v0 }
  0x3a   :  { %553 = vmatpush2.bf16.msra.mxu0 %v1073_v17  ;;  %1056 = vmatpush2.bf16.msra.mxu1 %v1073_v17 }
  0x3b   :  { %554 = vmatprep.subr.bf16.mxu0 %v1171_v0  ;;  %1041 = vmatprep.subr.bf16.mxu1 %v1171_v0  ;;  %v1146_v0 = vld [vmem:[%s1716_s0 + $0x1b0] ss:$8 sps:$4 sm:$0xff]  }
  0x3e   :  { %555 = vmatpush2.bf16.msra.mxu0 %v1074_v18  ;;  %1057 = vmatpush2.bf16.msra.mxu1 %v1074_v18 }
  0x41   :  { %557 = vmatmul.mubr.bf16.vlgmr.msra.gmra.mxu0 %v1075_v19  ;;  %685 = vmatmul.mubr.bf16.vlgmr.msra.gmra.mxu1 %v1078_v20 }
  0x42   :  { %564 = vmatprep.mubr.bf16.mxu0 %v1081_v21  ;;  %692 = vmatprep.mubr.bf16.mxu1 %v1083_v22 }
  0x49   :  { %565 = vmatmul.mubr.bf16.gmra.mxu0 %v1085_v23  ;;  %693 = vmatmul.mubr.bf16.gmra.mxu1 %v1086_v24 }
  0x4a   :  { %572 = vmatprep.mubr.bf16.mxu0 %v1087_v25  ;;  %700 = vmatprep.mubr.bf16.mxu1 %v1089_v26 }
  0x51   :  { %573 = vmatmul.mubr.bf16.gmra.mxu0 %v1091_v27  ;;  %701 = vmatmul.mubr.bf16.gmra.mxu1 %v1092_v28 }
  0x52   :  { %580 = vmatprep.mubr.bf16.mxu0 %v1093_v29  ;;  %708 = vmatprep.mubr.bf16.mxu1 %v1095_v30 }
  0x59   :  { %581 = vmatmul.mubr.bf16.gmra.mxu0 %v1097_v31  ;;  %709 = vmatmul.mubr.bf16.gmra.mxu1 %v1098_v32 }
  0x5a   :  { %588 = vmatprep.mubr.bf16.mxu0 %v1099_v33  ;;  %716 = vmatprep.mubr.bf16.mxu1 %v1101_v34 }
  0x61   :  { %589 = vmatmul.mubr.bf16.gmra.mxu0 %v1103_v35  ;;  %717 = vmatmul.mubr.bf16.gmra.mxu1 %v1104_v36 }
  0x62   :  { %596 = vmatprep.mubr.bf16.mxu0 %v1105_v37  ;;  %724 = vmatprep.mubr.bf16.mxu1 %v1107_v38 }
  0x69   :  { %597 = vmatmul.mubr.bf16.gmra.mxu0 %v1109_v39  ;;  %725 = vmatmul.mubr.bf16.gmra.mxu1 %v1110_v40 }
  0x6a   :  { %604 = vmatprep.mubr.bf16.mxu0 %v1111_v41  ;;  %732 = vmatprep.mubr.bf16.mxu1 %v1113_v42 }
  0x71   :  { %605 = vmatmul.mubr.bf16.gmra.mxu0 %v1115_v43  ;;  %733 = vmatmul.mubr.bf16.gmra.mxu1 %v1116_v44 }
  0x72   :  { %612 = vmatprep.mubr.bf16.mxu0 %v1117_v45  ;;  %740 = vmatprep.mubr.bf16.mxu1 %v1119_v46 }
  0x79   :  { %613 = vmatmul.mubr.bf16.gmra.mxu0 %v1121_v47  ;;  %741 = vmatmul.mubr.bf16.gmra.mxu1 %v1122_v48 }
  0x7a   :  { %620 = vmatprep.mubr.bf16.mxu0 %v1123_v49  ;;  %748 = vmatprep.mubr.bf16.mxu1 %v1125_v50 }
  0x81   :  { %621 = vmatmul.mubr.bf16.gmra.mxu0 %v1127_v51  ;;  %749 = vmatmul.mubr.bf16.gmra.mxu1 %v1128_v52 }
  0x82   :  { %628 = vmatprep.mubr.bf16.mxu0 %v1129_v53  ;;  %756 = vmatprep.mubr.bf16.mxu1 %v1131_v54 }
  0x89   :  { %629 = vmatmul.mubr.bf16.gmra.mxu0 %v1133_v55  ;;  %757 = vmatmul.mubr.bf16.gmra.mxu1 %v1134_v56 }
  0x8a   :  { %636 = vmatprep.mubr.bf16.mxu0 %v1135_v57  ;;  %764 = vmatprep.mubr.bf16.mxu1 %v1137_v58 }
  0x91   :  { %637 = vmatmul.mubr.bf16.gmra.mxu0 %v1139_v59  ;;  %765 = vmatmul.mubr.bf16.gmra.mxu1 %v1140_v60 }
  0x92   :  { %644 = vmatprep.mubr.bf16.mxu0 %v1141_v61  ;;  %772 = vmatprep.mubr.bf16.mxu1 %v1143_v62 }
  0x99   :  { %645 = vmatmul.mubr.bf16.gmra.mxu0 %v1145_v63  ;;  %773 = vmatmul.mubr.bf16.gmra.mxu1 %v1146_v0 }
  0x9a   :  { %652 = vmatprep.mubr.bf16.mxu0 %v1147_v1  ;;  %780 = vmatprep.mubr.bf16.mxu1 %v1149_v2 }
  0xa1   :  { %653 = vmatmul.mubr.bf16.gmra.mxu0 %v1151_v3  ;;  %781 = vmatmul.mubr.bf16.gmra.mxu1 %v1152_v4 }
  0xa2   :  { %660 = vmatprep.mubr.bf16.mxu0 %v1153_v5  ;;  %788 = vmatprep.mubr.bf16.mxu1 %v1155_v6 }
  0xa9   :  { %661 = vmatmul.mubr.bf16.gmra.mxu0 %v1157_v7  ;;  %789 = vmatmul.mubr.bf16.gmra.mxu1 %v1158_v8 }
  0xaa   :  { %668 = vmatprep.mubr.bf16.mxu0 %v1159_v9  ;;  %796 = vmatprep.mubr.bf16.mxu1 %v1161_v10 }
  0xb1   :  { %669 = vmatmul.mubr.bf16.gmra.mxu0 %v1163_v11  ;;  %797 = vmatmul.mubr.bf16.gmra.mxu1 %v1164_v12 }
  0xb2   :  { %676 = vmatprep.mubr.bf16.mxu0 %v1165_v13  ;;  %804 = vmatprep.mubr.bf16.mxu1 %v1167_v14 }
  0xb9   :  { %677 = vmatmul.mubr.bf16.gmra.mxu0 %v1169_v15  ;;  %805 = vmatmul.mubr.bf16.gmra.mxu1 %v1170_v16 }
 0x101   :  { %v558_v17 = vpop.f32.mrf.mxu0  ;;  %v686_v18 = vpop.f32.mrf.mxu1 }
 0x102   :  { %v813_v19 = vmax.f32 %v558_v17, 0.0  ;;  %v845_v20 = vmax.f32 %v686_v18, 0.0 }
 0x103   :  { %v560_v21 = vpop.f32.mrf.mxu0  ;;  %v688_v22 = vpop.f32.mrf.mxu1 }
 0x104   :  { %878 = vst.msk [vmem:[%s1717_s2] sm:$0xff] %vm877_vm0, %v813_v19  ;;  %910 = vst.msk [vmem:[%s1717_s2 + $0x100] sm:$0xff] %vm877_vm0, %v845_v20 }
 0x105   :  { %v561_v23 = vpop.f32.mrf.mxu0  ;;  %v689_v24 = vpop.f32.mrf.mxu1 }
 0x106   :  { %v814_v25 = vmax.f32 %v561_v23, 0.0  ;;  %v846_v26 = vmax.f32 %v689_v24, 0.0 }
 0x107   :  { %v563_v27 = vpop.f32.mrf.mxu0  ;;  %v691_v28 = vpop.f32.mrf.mxu1 }
 0x108   :  { %879 = vst.msk [vmem:[%s1717_s2 + $0x8] sm:$0xff] %vm877_vm0, %v814_v25  ;;  %911 = vst.msk [vmem:[%s1717_s2 + $0x108] sm:$0xff] %vm877_vm0, %v846_v26 }
 0x109   :  { %v566_v29 = vpop.f32.mrf.mxu0  ;;  %v694_v30 = vpop.f32.mrf.mxu1 }
 0x10a   :  { %v815_v31 = vmax.f32 %v566_v29, 0.0  ;;  %v847_v32 = vmax.f32 %v694_v30, 0.0 }
 0x10b   :  { %v568_v33 = vpop.f32.mrf.mxu0  ;;  %v696_v34 = vpop.f32.mrf.mxu1 }
 0x10c   :  { %880 = vst.msk [vmem:[%s1717_s2 + $0x10] sm:$0xff] %vm877_vm0, %v815_v31  ;;  %912 = vst.msk [vmem:[%s1717_s2 + $0x110] sm:$0xff] %vm877_vm0, %v847_v32 }
 0x10d   :  { %v569_v35 = vpop.f32.mrf.mxu0  ;;  %v697_v36 = vpop.f32.mrf.mxu1 }
 0x10e   :  { %v816_v37 = vmax.f32 %v569_v35, 0.0  ;;  %v848_v38 = vmax.f32 %v697_v36, 0.0 }
 0x10f   :  { %v571_v39 = vpop.f32.mrf.mxu0  ;;  %v699_v40 = vpop.f32.mrf.mxu1 }
 0x110   :  { %881 = vst.msk [vmem:[%s1717_s2 + $0x18] sm:$0xff] %vm877_vm0, %v816_v37  ;;  %913 = vst.msk [vmem:[%s1717_s2 + $0x118] sm:$0xff] %vm877_vm0, %v848_v38 }
 0x111   :  { %v574_v41 = vpop.f32.mrf.mxu0  ;;  %v702_v42 = vpop.f32.mrf.mxu1 }
 0x112   :  { %v817_v43 = vmax.f32 %v574_v41, 0.0  ;;  %v849_v44 = vmax.f32 %v702_v42, 0.0 }
 0x113   :  { %v576_v45 = vpop.f32.mrf.mxu0  ;;  %v704_v46 = vpop.f32.mrf.mxu1 }
 0x114   :  { %882 = vst.msk [vmem:[%s1717_s2 + $0x20] sm:$0xff] %vm877_vm0, %v817_v43  ;;  %914 = vst.msk [vmem:[%s1717_s2 + $0x120] sm:$0xff] %vm877_vm0, %v849_v44 }
 0x115   :  { %v577_v47 = vpop.f32.mrf.mxu0  ;;  %v705_v48 = vpop.f32.mrf.mxu1 }
 0x116   :  { %v818_v49 = vmax.f32 %v577_v47, 0.0  ;;  %v850_v50 = vmax.f32 %v705_v48, 0.0 }
 0x117   :  { %v579_v51 = vpop.f32.mrf.mxu0  ;;  %v707_v52 = vpop.f32.mrf.mxu1 }
 0x118   :  { %883 = vst.msk [vmem:[%s1717_s2 + $0x28] sm:$0xff] %vm877_vm0, %v818_v49  ;;  %915 = vst.msk [vmem:[%s1717_s2 + $0x128] sm:$0xff] %vm877_vm0, %v850_v50 }
 0x119   :  { %v582_v53 = vpop.f32.mrf.mxu0  ;;  %v710_v54 = vpop.f32.mrf.mxu1 }
 0x11a   :  { %v819_v55 = vmax.f32 %v582_v53, 0.0  ;;  %v851_v56 = vmax.f32 %v710_v54, 0.0 }
 0x11b   :  { %v584_v57 = vpop.f32.mrf.mxu0  ;;  %v712_v58 = vpop.f32.mrf.mxu1 }
 0x11c   :  { %884 = vst.msk [vmem:[%s1717_s2 + $0x30] sm:$0xff] %vm877_vm0, %v819_v55  ;;  %916 = vst.msk [vmem:[%s1717_s2 + $0x130] sm:$0xff] %vm877_vm0, %v851_v56 }
 0x11d   :  { %v585_v59 = vpop.f32.mrf.mxu0  ;;  %v713_v60 = vpop.f32.mrf.mxu1 }
 0x11e   :  { %v820_v61 = vmax.f32 %v585_v59, 0.0  ;;  %v852_v62 = vmax.f32 %v713_v60, 0.0 }
 0x11f   :  { %v587_v63 = vpop.f32.mrf.mxu0  ;;  %v715_v0 = vpop.f32.mrf.mxu1 }
 0x120   :  { %885 = vst.msk [vmem:[%s1717_s2 + $0x38] sm:$0xff] %vm877_vm0, %v820_v61  ;;  %917 = vst.msk [vmem:[%s1717_s2 + $0x138] sm:$0xff] %vm877_vm0, %v852_v62 }
 0x121   :  { %v590_v1 = vpop.f32.mrf.mxu0  ;;  %v718_v2 = vpop.f32.mrf.mxu1 }
 0x122   :  { %v821_v3 = vmax.f32 %v590_v1, 0.0  ;;  %v853_v4 = vmax.f32 %v718_v2, 0.0 }
 0x123   :  { %v592_v5 = vpop.f32.mrf.mxu0  ;;  %v720_v6 = vpop.f32.mrf.mxu1 }
 0x124   :  { %886 = vst.msk [vmem:[%s1717_s2 + $0x40] sm:$0xff] %vm877_vm0, %v821_v3  ;;  %918 = vst.msk [vmem:[%s1717_s2 + $0x140] sm:$0xff] %vm877_vm0, %v853_v4 }
 0x125   :  { %v593_v7 = vpop.f32.mrf.mxu0  ;;  %v721_v8 = vpop.f32.mrf.mxu1 }
 0x126   :  { %v822_v9 = vmax.f32 %v593_v7, 0.0  ;;  %v854_v10 = vmax.f32 %v721_v8, 0.0 }
 0x127   :  { %v595_v11 = vpop.f32.mrf.mxu0  ;;  %v723_v12 = vpop.f32.mrf.mxu1 }
 0x128   :  { %887 = vst.msk [vmem:[%s1717_s2 + $0x48] sm:$0xff] %vm877_vm0, %v822_v9  ;;  %919 = vst.msk [vmem:[%s1717_s2 + $0x148] sm:$0xff] %vm877_vm0, %v854_v10 }
 0x129   :  { %v598_v13 = vpop.f32.mrf.mxu0  ;;  %v726_v14 = vpop.f32.mrf.mxu1 }
 0x12a   :  { %v823_v15 = vmax.f32 %v598_v13, 0.0  ;;  %v855_v16 = vmax.f32 %v726_v14, 0.0 }
 0x12b   :  { %v600_v17 = vpop.f32.mrf.mxu0  ;;  %v728_v18 = vpop.f32.mrf.mxu1 }
 0x12c   :  { %888 = vst.msk [vmem:[%s1717_s2 + $0x50] sm:$0xff] %vm877_vm0, %v823_v15  ;;  %920 = vst.msk [vmem:[%s1717_s2 + $0x150] sm:$0xff] %vm877_vm0, %v855_v16 }
 0x12d   :  { %v601_v19 = vpop.f32.mrf.mxu0  ;;  %v729_v20 = vpop.f32.mrf.mxu1 }
 0x12e   :  { %v824_v21 = vmax.f32 %v601_v19, 0.0  ;;  %v856_v22 = vmax.f32 %v729_v20, 0.0 }
 0x12f   :  { %v603_v23 = vpop.f32.mrf.mxu0  ;;  %v731_v24 = vpop.f32.mrf.mxu1 }
 0x130   :  { %889 = vst.msk [vmem:[%s1717_s2 + $0x58] sm:$0xff] %vm877_vm0, %v824_v21  ;;  %921 = vst.msk [vmem:[%s1717_s2 + $0x158] sm:$0xff] %vm877_vm0, %v856_v22 }
 0x131   :  { %v606_v25 = vpop.f32.mrf.mxu0  ;;  %v734_v26 = vpop.f32.mrf.mxu1 }
 0x132   :  { %v825_v27 = vmax.f32 %v606_v25, 0.0  ;;  %v857_v28 = vmax.f32 %v734_v26, 0.0 }
 0x133   :  { %v608_v29 = vpop.f32.mrf.mxu0  ;;  %v736_v30 = vpop.f32.mrf.mxu1 }
 0x134   :  { %890 = vst.msk [vmem:[%s1717_s2 + $0x60] sm:$0xff] %vm877_vm0, %v825_v27  ;;  %922 = vst.msk [vmem:[%s1717_s2 + $0x160] sm:$0xff] %vm877_vm0, %v857_v28 }
 0x135   :  { %v609_v31 = vpop.f32.mrf.mxu0  ;;  %v737_v32 = vpop.f32.mrf.mxu1 }
 0x136   :  { %v826_v33 = vmax.f32 %v609_v31, 0.0  ;;  %v858_v34 = vmax.f32 %v737_v32, 0.0 }
 0x137   :  { %v611_v35 = vpop.f32.mrf.mxu0  ;;  %v739_v36 = vpop.f32.mrf.mxu1 }
 0x138   :  { %891 = vst.msk [vmem:[%s1717_s2 + $0x68] sm:$0xff] %vm877_vm0, %v826_v33  ;;  %923 = vst.msk [vmem:[%s1717_s2 + $0x168] sm:$0xff] %vm877_vm0, %v858_v34 }
 0x139   :  { %v614_v37 = vpop.f32.mrf.mxu0  ;;  %v742_v38 = vpop.f32.mrf.mxu1 }
 0x13a   :  { %v827_v39 = vmax.f32 %v614_v37, 0.0  ;;  %v859_v40 = vmax.f32 %v742_v38, 0.0 }
 0x13b   :  { %v616_v41 = vpop.f32.mrf.mxu0  ;;  %v744_v42 = vpop.f32.mrf.mxu1 }
 0x13c   :  { %892 = vst.msk [vmem:[%s1717_s2 + $0x70] sm:$0xff] %vm877_vm0, %v827_v39  ;;  %924 = vst.msk [vmem:[%s1717_s2 + $0x170] sm:$0xff] %vm877_vm0, %v859_v40 }
 0x13d   :  { %v617_v43 = vpop.f32.mrf.mxu0  ;;  %v745_v44 = vpop.f32.mrf.mxu1 }
 0x13e   :  { %v828_v45 = vmax.f32 %v617_v43, 0.0  ;;  %v860_v46 = vmax.f32 %v745_v44, 0.0 }
 0x13f   :  { %v619_v47 = vpop.f32.mrf.mxu0  ;;  %v747_v48 = vpop.f32.mrf.mxu1 }
 0x140   :  { %893 = vst.msk [vmem:[%s1717_s2 + $0x78] sm:$0xff] %vm877_vm0, %v828_v45  ;;  %925 = vst.msk [vmem:[%s1717_s2 + $0x178] sm:$0xff] %vm877_vm0, %v860_v46 }
 0x141   :  { %v622_v49 = vpop.f32.mrf.mxu0  ;;  %v750_v50 = vpop.f32.mrf.mxu1 }
 0x142   :  { %v829_v51 = vmax.f32 %v622_v49, 0.0  ;;  %v861_v52 = vmax.f32 %v750_v50, 0.0 }
 0x143   :  { %v624_v53 = vpop.f32.mrf.mxu0  ;;  %v752_v54 = vpop.f32.mrf.mxu1 }
 0x144   :  { %894 = vst.msk [vmem:[%s1717_s2 + $0x80] sm:$0xff] %vm877_vm0, %v829_v51  ;;  %926 = vst.msk [vmem:[%s1717_s2 + $0x180] sm:$0xff] %vm877_vm0, %v861_v52 }
 0x145   :  { %v625_v55 = vpop.f32.mrf.mxu0  ;;  %v753_v56 = vpop.f32.mrf.mxu1 }
 0x146   :  { %v830_v57 = vmax.f32 %v625_v55, 0.0  ;;  %v862_v58 = vmax.f32 %v753_v56, 0.0 }
 0x147   :  { %v627_v59 = vpop.f32.mrf.mxu0  ;;  %v755_v60 = vpop.f32.mrf.mxu1 }
 0x148   :  { %895 = vst.msk [vmem:[%s1717_s2 + $0x88] sm:$0xff] %vm877_vm0, %v830_v57  ;;  %927 = vst.msk [vmem:[%s1717_s2 + $0x188] sm:$0xff] %vm877_vm0, %v862_v58 }
 0x149   :  { %v630_v61 = vpop.f32.mrf.mxu0  ;;  %v758_v62 = vpop.f32.mrf.mxu1 }
 0x14a   :  { %v831_v63 = vmax.f32 %v630_v61, 0.0  ;;  %v863_v0 = vmax.f32 %v758_v62, 0.0 }
 0x14b   :  { %v632_v1 = vpop.f32.mrf.mxu0  ;;  %v760_v2 = vpop.f32.mrf.mxu1 }
 0x14c   :  { %896 = vst.msk [vmem:[%s1717_s2 + $0x90] sm:$0xff] %vm877_vm0, %v831_v63  ;;  %928 = vst.msk [vmem:[%s1717_s2 + $0x190] sm:$0xff] %vm877_vm0, %v863_v0 }
 0x14d   :  { %v633_v3 = vpop.f32.mrf.mxu0  ;;  %v761_v4 = vpop.f32.mrf.mxu1 }
 0x14e   :  { %v832_v5 = vmax.f32 %v633_v3, 0.0  ;;  %v864_v6 = vmax.f32 %v761_v4, 0.0 }
 0x14f   :  { %v635_v7 = vpop.f32.mrf.mxu0  ;;  %v763_v8 = vpop.f32.mrf.mxu1 }
 0x150   :  { %897 = vst.msk [vmem:[%s1717_s2 + $0x98] sm:$0xff] %vm877_vm0, %v832_v5  ;;  %929 = vst.msk [vmem:[%s1717_s2 + $0x198] sm:$0xff] %vm877_vm0, %v864_v6 }
 0x151   :  { %v638_v9 = vpop.f32.mrf.mxu0  ;;  %v766_v10 = vpop.f32.mrf.mxu1 }
 0x152   :  { %v833_v11 = vmax.f32 %v638_v9, 0.0  ;;  %v865_v12 = vmax.f32 %v766_v10, 0.0 }
 0x153   :  { %v640_v13 = vpop.f32.mrf.mxu0  ;;  %v768_v14 = vpop.f32.mrf.mxu1 }
 0x154   :  { %898 = vst.msk [vmem:[%s1717_s2 + $0xa0] sm:$0xff] %vm877_vm0, %v833_v11  ;;  %930 = vst.msk [vmem:[%s1717_s2 + $0x1a0] sm:$0xff] %vm877_vm0, %v865_v12 }
 0x155   :  { %v641_v15 = vpop.f32.mrf.mxu0  ;;  %v769_v16 = vpop.f32.mrf.mxu1 }
 0x156   :  { %v834_v17 = vmax.f32 %v641_v15, 0.0  ;;  %v866_v18 = vmax.f32 %v769_v16, 0.0 }
 0x157   :  { %v643_v19 = vpop.f32.mrf.mxu0  ;;  %v771_v20 = vpop.f32.mrf.mxu1 }
 0x158   :  { %899 = vst.msk [vmem:[%s1717_s2 + $0xa8] sm:$0xff] %vm877_vm0, %v834_v17  ;;  %931 = vst.msk [vmem:[%s1717_s2 + $0x1a8] sm:$0xff] %vm877_vm0, %v866_v18 }
 0x159   :  { %v646_v21 = vpop.f32.mrf.mxu0  ;;  %v774_v22 = vpop.f32.mrf.mxu1 }
 0x15a   :  { %v835_v23 = vmax.f32 %v646_v21, 0.0  ;;  %v867_v24 = vmax.f32 %v774_v22, 0.0 }
 0x15b   :  { %v648_v25 = vpop.f32.mrf.mxu0  ;;  %v776_v26 = vpop.f32.mrf.mxu1 }
 0x15c   :  { %900 = vst.msk [vmem:[%s1717_s2 + $0xb0] sm:$0xff] %vm877_vm0, %v835_v23  ;;  %932 = vst.msk [vmem:[%s1717_s2 + $0x1b0] sm:$0xff] %vm877_vm0, %v867_v24 }
 0x15d   :  { %v649_v27 = vpop.f32.mrf.mxu0  ;;  %v777_v28 = vpop.f32.mrf.mxu1 }
 0x15e   :  { %v836_v29 = vmax.f32 %v649_v27, 0.0  ;;  %v868_v30 = vmax.f32 %v777_v28, 0.0 }
 0x15f   :  { %v651_v31 = vpop.f32.mrf.mxu0  ;;  %v779_v32 = vpop.f32.mrf.mxu1 }
 0x160   :  { %901 = vst.msk [vmem:[%s1717_s2 + $0xb8] sm:$0xff] %vm877_vm0, %v836_v29  ;;  %933 = vst.msk [vmem:[%s1717_s2 + $0x1b8] sm:$0xff] %vm877_vm0, %v868_v30 }
 0x161   :  { %v654_v33 = vpop.f32.mrf.mxu0  ;;  %v782_v34 = vpop.f32.mrf.mxu1 }
 0x162   :  { %v837_v35 = vmax.f32 %v654_v33, 0.0  ;;  %v869_v36 = vmax.f32 %v782_v34, 0.0 }
 0x163   :  { %v656_v37 = vpop.f32.mrf.mxu0  ;;  %v784_v38 = vpop.f32.mrf.mxu1 }
 0x164   :  { %902 = vst.msk [vmem:[%s1717_s2 + $0xc0] sm:$0xff] %vm877_vm0, %v837_v35  ;;  %934 = vst.msk [vmem:[%s1717_s2 + $0x1c0] sm:$0xff] %vm877_vm0, %v869_v36 }
 0x165   :  { %v657_v39 = vpop.f32.mrf.mxu0  ;;  %v785_v40 = vpop.f32.mrf.mxu1 }
 0x166   :  { %v838_v41 = vmax.f32 %v657_v39, 0.0  ;;  %v870_v42 = vmax.f32 %v785_v40, 0.0 }
 0x167   :  { %v659_v43 = vpop.f32.mrf.mxu0  ;;  %v787_v44 = vpop.f32.mrf.mxu1 }
 0x168   :  { %903 = vst.msk [vmem:[%s1717_s2 + $0xc8] sm:$0xff] %vm877_vm0, %v838_v41  ;;  %935 = vst.msk [vmem:[%s1717_s2 + $0x1c8] sm:$0xff] %vm877_vm0, %v870_v42 }
 0x169   :  { %v662_v45 = vpop.f32.mrf.mxu0  ;;  %v790_v46 = vpop.f32.mrf.mxu1 }
 0x16a   :  { %v839_v47 = vmax.f32 %v662_v45, 0.0  ;;  %v871_v48 = vmax.f32 %v790_v46, 0.0 }
 0x16b   :  { %v664_v49 = vpop.f32.mrf.mxu0  ;;  %v792_v50 = vpop.f32.mrf.mxu1 }
 0x16c   :  { %904 = vst.msk [vmem:[%s1717_s2 + $0xd0] sm:$0xff] %vm877_vm0, %v839_v47  ;;  %936 = vst.msk [vmem:[%s1717_s2 + $0x1d0] sm:$0xff] %vm877_vm0, %v871_v48 }
 0x16d   :  { %v665_v51 = vpop.f32.mrf.mxu0  ;;  %v793_v52 = vpop.f32.mrf.mxu1 }
 0x16e   :  { %v840_v53 = vmax.f32 %v665_v51, 0.0  ;;  %v872_v54 = vmax.f32 %v793_v52, 0.0 }
 0x16f   :  { %v667_v55 = vpop.f32.mrf.mxu0  ;;  %v795_v56 = vpop.f32.mrf.mxu1 }
 0x170   :  { %905 = vst.msk [vmem:[%s1717_s2 + $0xd8] sm:$0xff] %vm877_vm0, %v840_v53  ;;  %937 = vst.msk [vmem:[%s1717_s2 + $0x1d8] sm:$0xff] %vm877_vm0, %v872_v54 }
 0x171   :  { %v670_v57 = vpop.f32.mrf.mxu0  ;;  %v798_v58 = vpop.f32.mrf.mxu1 }
 0x172   :  { %v841_v59 = vmax.f32 %v670_v57, 0.0  ;;  %v873_v60 = vmax.f32 %v798_v58, 0.0 }
 0x173   :  { %v672_v61 = vpop.f32.mrf.mxu0  ;;  %v800_v62 = vpop.f32.mrf.mxu1 }
 0x174   :  { %906 = vst.msk [vmem:[%s1717_s2 + $0xe0] sm:$0xff] %vm877_vm0, %v841_v59  ;;  %938 = vst.msk [vmem:[%s1717_s2 + $0x1e0] sm:$0xff] %vm877_vm0, %v873_v60 }
 0x175   :  { %v673_v63 = vpop.f32.mrf.mxu0  ;;  %v801_v0 = vpop.f32.mrf.mxu1 }
 0x176   :  { %v842_v1 = vmax.f32 %v673_v63, 0.0  ;;  %v874_v2 = vmax.f32 %v801_v0, 0.0 }
 0x177   :  { %v675_v3 = vpop.f32.mrf.mxu0  ;;  %v803_v4 = vpop.f32.mrf.mxu1 }
 0x178   :  { %907 = vst.msk [vmem:[%s1717_s2 + $0xe8] sm:$0xff] %vm877_vm0, %v842_v1  ;;  %939 = vst.msk [vmem:[%s1717_s2 + $0x1e8] sm:$0xff] %vm877_vm0, %v874_v2 }
 0x179   :  { %v678_v5 = vpop.f32.mrf.mxu0  ;;  %v806_v6 = vpop.f32.mrf.mxu1 }
 0x17a   :  { %v843_v7 = vmax.f32 %v678_v5, 0.0  ;;  %v875_v8 = vmax.f32 %v806_v6, 0.0 }
 0x17b   :  { %v680_v9 = vpop.f32.mrf.mxu0  ;;  %v808_v10 = vpop.f32.mrf.mxu1 }
 0x17c   :  { %908 = vst.msk [vmem:[%s1717_s2 + $0xf0] sm:$0xff] %vm877_vm0, %v843_v7  ;;  %940 = vst.msk [vmem:[%s1717_s2 + $0x1f0] sm:$0xff] %vm877_vm0, %v875_v8 }
 0x17d   :  { %v681_v11 = vpop.f32.mrf.mxu0  ;;  %v809_v12 = vpop.f32.mrf.mxu1 }
 0x17e   :  { %v844_v13 = vmax.f32 %v681_v11, 0.0  ;;  %v876_v14 = vmax.f32 %v809_v12, 0.0 }
 0x17f   :  { %v683_v15 = vpop.f32.mrf.mxu0  ;;  %v811_v16 = vpop.f32.mrf.mxu1 }
 0x180   :  { %909 = vst.msk [vmem:[%s1717_s2 + $0xf8] sm:$0xff] %vm877_vm0, %v844_v13  ;;  %941 = vst.msk [vmem:[%s1717_s2 + $0x1f8] sm:$0xff] %vm877_vm0, %v876_v14 }

// kernel: _lambda_.23
= control target key start
LH: loop header
LB: loop body
LE: loop exit
PB: predicated region body
PF: predicated region fallthrough
CT: control target
= control target key end

     0   :  { %vm685_vm0 = vcmask 7168   ;;  %s1489_s1 = inlined_call_operand.vmem [shape: bf16[128,1], index: 1, kind: input, shape index: {}]   ;;  %s1490_s0 = inlined_call_operand.vmem [shape: bf16[512,128], index: 0, kind: input, shape index: {}]   ;;  %s1491_s2 = inlined_call_operand.vmem [shape: f32[512,1], index: 2, kind: output, shape index: {}]  }
   0x1   :  { %v930_v0 = vld [vmem:[%s1489_s1 + $0x38] sm:$0xff]   ;;  %v931_v1 = vld [vmem:[%s1489_s1 + $0x30] sm:$0xff]   ;;  %v932_v2 = vld [vmem:[%s1489_s1 + $0x28] sm:$0xff]  }
   0x2   :  { %834 = vmatprep.subr.bf16.mxu0 %v930_v0  ;;  %914 = vmatprep.subr.bf16.mxu1 %v930_v0  ;;  %v933_v3 = vld [vmem:[%s1489_s1 + $0x20] sm:$0xff]   ;;  %v934_v6 = vld [vmem:[%s1489_s1 + $0x18] sm:$0xff]   ;;  %v935_v7 = vld [vmem:[%s1489_s1 + $0x10] sm:$0xff]  }
   0x3   :  { %835 = vmatpush3.bf16.msra.mxu0 %v930_v0  ;;  %922 = vmatpush3.bf16.msra.mxu1 %v930_v0  ;;  %v938_v4 = vld [vmem:[%s1490_s0] sm:$0xff]   ;;  %v936_v8 = vld [vmem:[%s1489_s1 + $0x8] sm:$0xff]   ;;  %v942_v12 = vld [vmem:[%s1490_s0 + $0x10] sm:$0xff]  }
   0x4   :  { %836 = vmatprep.subr.bf16.mxu0 %v931_v1  ;;  %915 = vmatprep.subr.bf16.mxu1 %v931_v1  ;;  %v939_v5 = vld [vmem:[%s1490_s0 + $0x80] sm:$0xff]   ;;  %v940_v10 = vld [vmem:[%s1490_s0 + $0x8] sm:$0xff]   ;;  %v943_v13 = vld [vmem:[%s1490_s0 + $0x90] sm:$0xff]  }
   0x5   :  { %850 = vmatprep.mubr.bf16.mxu0 %v938_v4  ;;  %882 = vmatprep.mubr.bf16.mxu1 %v939_v5  ;;  %v937_v9 = vld [vmem:[%s1489_s1] sm:$0xff]   ;;  %v941_v11 = vld [vmem:[%s1490_s0 + $0x88] sm:$0xff]   ;;  %v944_v14 = vld [vmem:[%s1490_s0 + $0x18] sm:$0xff]  }
   0x6   :  { %v945_v15 = vld [vmem:[%s1490_s0 + $0x98] sm:$0xff]   ;;  %v946_v16 = vld [vmem:[%s1490_s0 + $0x20] sm:$0xff]   ;;  %v948_v18 = vld [vmem:[%s1490_s0 + $0x28] sm:$0xff]  }
   0x7   :  { %837 = vmatpush3.bf16.msra.mxu0 %v931_v1  ;;  %923 = vmatpush3.bf16.msra.mxu1 %v931_v1  ;;  %v947_v17 = vld [vmem:[%s1490_s0 + $0xa0] sm:$0xff]   ;;  %v949_v19 = vld [vmem:[%s1490_s0 + $0xa8] sm:$0xff]   ;;  %v950_v20 = vld [vmem:[%s1490_s0 + $0x30] sm:$0xff]  }
   0x8   :  { %838 = vmatprep.subr.bf16.mxu0 %v932_v2  ;;  %916 = vmatprep.subr.bf16.mxu1 %v932_v2  ;;  %v951_v21 = vld [vmem:[%s1490_s0 + $0xb0] sm:$0xff]   ;;  %v952_v22 = vld [vmem:[%s1490_s0 + $0x38] sm:$0xff]   ;;  %v954_v24 = vld [vmem:[%s1490_s0 + $0x40] sm:$0xff]  }
   0x9   :  { %v953_v23 = vld [vmem:[%s1490_s0 + $0xb8] sm:$0xff]   ;;  %v955_v25 = vld [vmem:[%s1490_s0 + $0xc0] sm:$0xff]   ;;  %v956_v26 = vld [vmem:[%s1490_s0 + $0x48] sm:$0xff]  }
   0xa   :  { %v957_v27 = vld [vmem:[%s1490_s0 + $0xc8] sm:$0xff]   ;;  %v958_v28 = vld [vmem:[%s1490_s0 + $0x50] sm:$0xff]   ;;  %v960_v30 = vld [vmem:[%s1490_s0 + $0x58] sm:$0xff]  }
   0xb   :  { %839 = vmatpush3.bf16.msra.mxu0 %v932_v2  ;;  %924 = vmatpush3.bf16.msra.mxu1 %v932_v2  ;;  %v959_v29 = vld [vmem:[%s1490_s0 + $0xd0] sm:$0xff]   ;;  %v961_v31 = vld [vmem:[%s1490_s0 + $0xd8] sm:$0xff]   ;;  %v962_v32 = vld [vmem:[%s1490_s0 + $0x60] sm:$0xff]  }
   0xc   :  { %840 = vmatprep.subr.bf16.mxu0 %v933_v3  ;;  %917 = vmatprep.subr.bf16.mxu1 %v933_v3  ;;  %v963_v33 = vld [vmem:[%s1490_s0 + $0xe0] sm:$0xff]   ;;  %v964_v34 = vld [vmem:[%s1490_s0 + $0x68] sm:$0xff]   ;;  %v966_v36 = vld [vmem:[%s1490_s0 + $0x70] sm:$0xff]  }
   0xd   :  { %v965_v35 = vld [vmem:[%s1490_s0 + $0xe8] sm:$0xff]   ;;  %v967_v37 = vld [vmem:[%s1490_s0 + $0xf0] sm:$0xff]   ;;  %v968_v38 = vld [vmem:[%s1490_s0 + $0x78] sm:$0xff]  }
   0xe   :  { %v969_v39 = vld [vmem:[%s1490_s0 + $0xf8] sm:$0xff]  }
   0xf   :  { %841 = vmatpush3.bf16.msra.mxu0 %v933_v3  ;;  %925 = vmatpush3.bf16.msra.mxu1 %v933_v3 }
  0x10   :  { %842 = vmatprep.subr.bf16.mxu0 %v934_v6  ;;  %918 = vmatprep.subr.bf16.mxu1 %v934_v6 }
  0x13   :  { %843 = vmatpush3.bf16.msra.mxu0 %v934_v6  ;;  %926 = vmatpush3.bf16.msra.mxu1 %v934_v6 }
  0x14   :  { %844 = vmatprep.subr.bf16.mxu0 %v935_v7  ;;  %919 = vmatprep.subr.bf16.mxu1 %v935_v7 }
  0x17   :  { %845 = vmatpush3.bf16.msra.mxu0 %v935_v7  ;;  %927 = vmatpush3.bf16.msra.mxu1 %v935_v7 }
  0x18   :  { %846 = vmatprep.subr.bf16.mxu0 %v936_v8  ;;  %920 = vmatprep.subr.bf16.mxu1 %v936_v8 }
  0x1b   :  { %847 = vmatpush3.bf16.msra.mxu0 %v936_v8  ;;  %928 = vmatpush3.bf16.msra.mxu1 %v936_v8 }
  0x1c   :  { %848 = vmatprep.subr.bf16.mxu0 %v937_v9  ;;  %921 = vmatprep.subr.bf16.mxu1 %v937_v9 }
  0x1f   :  { %849 = vmatpush3.bf16.msra.mxu0 %v937_v9  ;;  %929 = vmatpush3.bf16.msra.mxu1 %v937_v9 }
  0x22   :  { %851 = vmatmul.mubr.bf16.vlgmr.msra.gmra.mxu0 %v940_v10  ;;  %883 = vmatmul.mubr.bf16.vlgmr.msra.gmra.mxu1 %v941_v11 }
  0x23   :  { %854 = vmatprep.mubr.bf16.mxu0 %v942_v12  ;;  %886 = vmatprep.mubr.bf16.mxu1 %v943_v13 }
  0x2a   :  { %855 = vmatmul.mubr.bf16.gmra.mxu0 %v944_v14  ;;  %887 = vmatmul.mubr.bf16.gmra.mxu1 %v945_v15 }
  0x2b   :  { %858 = vmatprep.mubr.bf16.mxu0 %v946_v16  ;;  %890 = vmatprep.mubr.bf16.mxu1 %v947_v17 }
  0x32   :  { %859 = vmatmul.mubr.bf16.gmra.mxu0 %v948_v18  ;;  %891 = vmatmul.mubr.bf16.gmra.mxu1 %v949_v19 }
  0x33   :  { %862 = vmatprep.mubr.bf16.mxu0 %v950_v20  ;;  %894 = vmatprep.mubr.bf16.mxu1 %v951_v21 }
  0x3a   :  { %863 = vmatmul.mubr.bf16.gmra.mxu0 %v952_v22  ;;  %895 = vmatmul.mubr.bf16.gmra.mxu1 %v953_v23 }
  0x3b   :  { %866 = vmatprep.mubr.bf16.mxu0 %v954_v24  ;;  %898 = vmatprep.mubr.bf16.mxu1 %v955_v25 }
  0x42   :  { %867 = vmatmul.mubr.bf16.gmra.mxu0 %v956_v26  ;;  %899 = vmatmul.mubr.bf16.gmra.mxu1 %v957_v27 }
  0x43   :  { %870 = vmatprep.mubr.bf16.mxu0 %v958_v28  ;;  %902 = vmatprep.mubr.bf16.mxu1 %v959_v29 }
  0x4a   :  { %871 = vmatmul.mubr.bf16.gmra.mxu0 %v960_v30  ;;  %903 = vmatmul.mubr.bf16.gmra.mxu1 %v961_v31 }
  0x4b   :  { %874 = vmatprep.mubr.bf16.mxu0 %v962_v32  ;;  %906 = vmatprep.mubr.bf16.mxu1 %v963_v33 }
  0x52   :  { %875 = vmatmul.mubr.bf16.gmra.mxu0 %v964_v34  ;;  %907 = vmatmul.mubr.bf16.gmra.mxu1 %v965_v35 }
  0x53   :  { %878 = vmatprep.mubr.bf16.mxu0 %v966_v36  ;;  %910 = vmatprep.mubr.bf16.mxu1 %v967_v37 }
  0x5a   :  { %879 = vmatmul.mubr.bf16.gmra.mxu0 %v968_v38  ;;  %911 = vmatmul.mubr.bf16.gmra.mxu1 %v969_v39 }
  0xe2   :  { %v852_v40 = vpop.f32.mrf.mxu0  ;;  %v884_v41 = vpop.f32.mrf.mxu1 }
  0xe3   :  { %970 = vtanh.f32 %v852_v40 }
  0xe4   :  { %972 = vtanh.f32 %v884_v41  ;;  %v366_v42 = vpop.f32.mrf.mxu0  ;;  %v494_v43 = vpop.f32.mrf.mxu1 }
  0xe5   :  { %974 = vtanh.f32 %v366_v42 }
  0xe6   :  { %976 = vtanh.f32 %v494_v43  ;;  %v853_v44 = vpop.f32.mrf.mxu0  ;;  %v885_v45 = vpop.f32.mrf.mxu1 }
  0xe7   :  { %978 = vtanh.f32 %v853_v44 }
  0xe8   :  { %980 = vtanh.f32 %v885_v45  ;;  %v369_v46 = vpop.f32.mrf.mxu0  ;;  %v497_v47 = vpop.f32.mrf.mxu1 }
  0xe9   :  { %982 = vtanh.f32 %v369_v46 }
  0xea   :  { %984 = vtanh.f32 %v497_v47  ;;  %v856_v48 = vpop.f32.mrf.mxu0  ;;  %v888_v49 = vpop.f32.mrf.mxu1 }
  0xeb   :  { %986 = vtanh.f32 %v856_v48 }
  0xec   :  { %988 = vtanh.f32 %v888_v49  ;;  %v382_v50 = vpop.f32.mrf.mxu0  ;;  %v510_v51 = vpop.f32.mrf.mxu1 }
  0xed   :  { %990 = vtanh.f32 %v382_v50 }
  0xee   :  { %992 = vtanh.f32 %v510_v51  ;;  %v857_v52 = vpop.f32.mrf.mxu0  ;;  %v889_v53 = vpop.f32.mrf.mxu1 }
  0xef   :  { %994 = vtanh.f32 %v857_v52 }
  0xf0   :  { %v971_v54 = vpop.eup %970  ;;  %996 = vtanh.f32 %v889_v53  ;;  %v385_v55 = vpop.f32.mrf.mxu0 }
  0xf1   :  { %v513_v56 = vpop.f32.mrf.mxu1  ;;  %v973_v57 = vpop.eup %972  ;;  %688 = vst.msk [vmem:[%s1491_s2 + $0x10] sm:$0xff] %vm685_vm0, %v971_v54  ;;  %998 = vtanh.f32 %v385_v55 }
  0xf2   :  { %v975_v58 = vpop.eup %974  ;;  %720 = vst.msk [vmem:[%s1491_s2 + $0x110] sm:$0xff] %vm685_vm0, %v973_v57  ;;  %1000 = vtanh.f32 %v513_v56  ;;  %v860_v59 = vpop.f32.mrf.mxu0 }
  0xf3   :  { %v892_v60 = vpop.f32.mrf.mxu1  ;;  %v977_v61 = vpop.eup %976  ;;  %686 = vst.msk [vmem:[%s1491_s2] sm:$0xff] %vm685_vm0, %v975_v58  ;;  %1002 = vtanh.f32 %v860_v59 }
  0xf4   :  { %v979_v62 = vpop.eup %978  ;;  %718 = vst.msk [vmem:[%s1491_s2 + $0x100] sm:$0xff] %vm685_vm0, %v977_v61  ;;  %1004 = vtanh.f32 %v892_v60  ;;  %v398_v63 = vpop.f32.mrf.mxu0 }
  0xf5   :  { %v526_v0 = vpop.f32.mrf.mxu1  ;;  %v981_v1 = vpop.eup %980  ;;  %689 = vst.msk [vmem:[%s1491_s2 + $0x18] sm:$0xff] %vm685_vm0, %v979_v62  ;;  %1006 = vtanh.f32 %v398_v63 }
  0xf6   :  { %v983_v2 = vpop.eup %982  ;;  %721 = vst.msk [vmem:[%s1491_s2 + $0x118] sm:$0xff] %vm685_vm0, %v981_v1  ;;  %1008 = vtanh.f32 %v526_v0  ;;  %v861_v3 = vpop.f32.mrf.mxu0 }
  0xf7   :  { %v893_v4 = vpop.f32.mrf.mxu1  ;;  %v985_v5 = vpop.eup %984  ;;  %687 = vst.msk [vmem:[%s1491_s2 + $0x8] sm:$0xff] %vm685_vm0, %v983_v2  ;;  %1010 = vtanh.f32 %v861_v3 }
  0xf8   :  { %v987_v6 = vpop.eup %986  ;;  %719 = vst.msk [vmem:[%s1491_s2 + $0x108] sm:$0xff] %vm685_vm0, %v985_v5  ;;  %1012 = vtanh.f32 %v893_v4  ;;  %v401_v7 = vpop.f32.mrf.mxu0 }
  0xf9   :  { %v529_v8 = vpop.f32.mrf.mxu1  ;;  %v989_v9 = vpop.eup %988  ;;  %692 = vst.msk [vmem:[%s1491_s2 + $0x30] sm:$0xff] %vm685_vm0, %v987_v6  ;;  %1014 = vtanh.f32 %v401_v7 }
  0xfa   :  { %v991_v10 = vpop.eup %990  ;;  %724 = vst.msk [vmem:[%s1491_s2 + $0x130] sm:$0xff] %vm685_vm0, %v989_v9  ;;  %1016 = vtanh.f32 %v529_v8  ;;  %v864_v11 = vpop.f32.mrf.mxu0 }
  0xfb   :  { %v896_v12 = vpop.f32.mrf.mxu1  ;;  %v993_v13 = vpop.eup %992  ;;  %690 = vst.msk [vmem:[%s1491_s2 + $0x20] sm:$0xff] %vm685_vm0, %v991_v10  ;;  %1018 = vtanh.f32 %v864_v11 }
  0xfc   :  { %v995_v14 = vpop.eup %994  ;;  %722 = vst.msk [vmem:[%s1491_s2 + $0x120] sm:$0xff] %vm685_vm0, %v993_v13  ;;  %1020 = vtanh.f32 %v896_v12  ;;  %v414_v15 = vpop.f32.mrf.mxu0 }
  0xfd   :  { %v542_v16 = vpop.f32.mrf.mxu1  ;;  %v997_v17 = vpop.eup %996  ;;  %693 = vst.msk [vmem:[%s1491_s2 + $0x38] sm:$0xff] %vm685_vm0, %v995_v14  ;;  %1022 = vtanh.f32 %v414_v15 }
  0xfe   :  { %v999_v18 = vpop.eup %998  ;;  %725 = vst.msk [vmem:[%s1491_s2 + $0x138] sm:$0xff] %vm685_vm0, %v997_v17  ;;  %1024 = vtanh.f32 %v542_v16  ;;  %v865_v19 = vpop.f32.mrf.mxu0 }
  0xff   :  { %v897_v20 = vpop.f32.mrf.mxu1  ;;  %v1001_v21 = vpop.eup %1000  ;;  %691 = vst.msk [vmem:[%s1491_s2 + $0x28] sm:$0xff] %vm685_vm0, %v999_v18  ;;  %1026 = vtanh.f32 %v865_v19 }
 0x100   :  { %v1003_v22 = vpop.eup %1002  ;;  %723 = vst.msk [vmem:[%s1491_s2 + $0x128] sm:$0xff] %vm685_vm0, %v1001_v21  ;;  %1028 = vtanh.f32 %v897_v20  ;;  %v417_v23 = vpop.f32.mrf.mxu0 }
 0x101   :  { %v545_v24 = vpop.f32.mrf.mxu1  ;;  %v1005_v25 = vpop.eup %1004  ;;  %696 = vst.msk [vmem:[%s1491_s2 + $0x50] sm:$0xff] %vm685_vm0, %v1003_v22  ;;  %1030 = vtanh.f32 %v417_v23 }
 0x102   :  { %v1007_v26 = vpop.eup %1006  ;;  %728 = vst.msk [vmem:[%s1491_s2 + $0x150] sm:$0xff] %vm685_vm0, %v1005_v25  ;;  %1032 = vtanh.f32 %v545_v24  ;;  %v868_v27 = vpop.f32.mrf.mxu0 }
 0x103   :  { %v900_v28 = vpop.f32.mrf.mxu1  ;;  %v1009_v29 = vpop.eup %1008  ;;  %694 = vst.msk [vmem:[%s1491_s2 + $0x40] sm:$0xff] %vm685_vm0, %v1007_v26  ;;  %1034 = vtanh.f32 %v868_v27 }
 0x104   :  { %v1011_v30 = vpop.eup %1010  ;;  %726 = vst.msk [vmem:[%s1491_s2 + $0x140] sm:$0xff] %vm685_vm0, %v1009_v29  ;;  %1036 = vtanh.f32 %v900_v28  ;;  %v430_v31 = vpop.f32.mrf.mxu0 }
 0x105   :  { %v558_v32 = vpop.f32.mrf.mxu1  ;;  %v1013_v33 = vpop.eup %1012  ;;  %697 = vst.msk [vmem:[%s1491_s2 + $0x58] sm:$0xff] %vm685_vm0, %v1011_v30  ;;  %1038 = vtanh.f32 %v430_v31 }
 0x106   :  { %v1015_v34 = vpop.eup %1014  ;;  %729 = vst.msk [vmem:[%s1491_s2 + $0x158] sm:$0xff] %vm685_vm0, %v1013_v33  ;;  %1040 = vtanh.f32 %v558_v32  ;;  %v869_v35 = vpop.f32.mrf.mxu0 }
 0x107   :  { %v901_v36 = vpop.f32.mrf.mxu1  ;;  %v1017_v37 = vpop.eup %1016  ;;  %695 = vst.msk [vmem:[%s1491_s2 + $0x48] sm:$0xff] %vm685_vm0, %v1015_v34  ;;  %1042 = vtanh.f32 %v869_v35 }
 0x108   :  { %v1019_v38 = vpop.eup %1018  ;;  %727 = vst.msk [vmem:[%s1491_s2 + $0x148] sm:$0xff] %vm685_vm0, %v1017_v37  ;;  %1044 = vtanh.f32 %v901_v36  ;;  %v433_v39 = vpop.f32.mrf.mxu0 }
 0x109   :  { %v561_v40 = vpop.f32.mrf.mxu1  ;;  %v1021_v41 = vpop.eup %1020  ;;  %700 = vst.msk [vmem:[%s1491_s2 + $0x70] sm:$0xff] %vm685_vm0, %v1019_v38  ;;  %1046 = vtanh.f32 %v433_v39 }
 0x10a   :  { %v1023_v42 = vpop.eup %1022  ;;  %732 = vst.msk [vmem:[%s1491_s2 + $0x170] sm:$0xff] %vm685_vm0, %v1021_v41  ;;  %1048 = vtanh.f32 %v561_v40  ;;  %v872_v43 = vpop.f32.mrf.mxu0 }
 0x10b   :  { %v904_v44 = vpop.f32.mrf.mxu1  ;;  %v1025_v45 = vpop.eup %1024  ;;  %698 = vst.msk [vmem:[%s1491_s2 + $0x60] sm:$0xff] %vm685_vm0, %v1023_v42  ;;  %1050 = vtanh.f32 %v872_v43 }
 0x10c   :  { %v1027_v46 = vpop.eup %1026  ;;  %730 = vst.msk [vmem:[%s1491_s2 + $0x160] sm:$0xff] %vm685_vm0, %v1025_v45  ;;  %1052 = vtanh.f32 %v904_v44  ;;  %v446_v47 = vpop.f32.mrf.mxu0 }
 0x10d   :  { %v574_v48 = vpop.f32.mrf.mxu1  ;;  %v1029_v49 = vpop.eup %1028  ;;  %701 = vst.msk [vmem:[%s1491_s2 + $0x78] sm:$0xff] %vm685_vm0, %v1027_v46  ;;  %1054 = vtanh.f32 %v446_v47 }
 0x10e   :  { %v1031_v50 = vpop.eup %1030  ;;  %733 = vst.msk [vmem:[%s1491_s2 + $0x178] sm:$0xff] %vm685_vm0, %v1029_v49  ;;  %1056 = vtanh.f32 %v574_v48  ;;  %v873_v51 = vpop.f32.mrf.mxu0 }
 0x10f   :  { %v905_v52 = vpop.f32.mrf.mxu1  ;;  %v1033_v53 = vpop.eup %1032  ;;  %699 = vst.msk [vmem:[%s1491_s2 + $0x68] sm:$0xff] %vm685_vm0, %v1031_v50  ;;  %1058 = vtanh.f32 %v873_v51 }
 0x110   :  { %v1035_v54 = vpop.eup %1034  ;;  %731 = vst.msk [vmem:[%s1491_s2 + $0x168] sm:$0xff] %vm685_vm0, %v1033_v53  ;;  %1060 = vtanh.f32 %v905_v52  ;;  %v449_v55 = vpop.f32.mrf.mxu0 }
 0x111   :  { %v577_v56 = vpop.f32.mrf.mxu1  ;;  %v1037_v57 = vpop.eup %1036  ;;  %704 = vst.msk [vmem:[%s1491_s2 + $0x90] sm:$0xff] %vm685_vm0, %v1035_v54  ;;  %1062 = vtanh.f32 %v449_v55 }
 0x112   :  { %v1039_v58 = vpop.eup %1038  ;;  %736 = vst.msk [vmem:[%s1491_s2 + $0x190] sm:$0xff] %vm685_vm0, %v1037_v57  ;;  %1064 = vtanh.f32 %v577_v56  ;;  %v876_v59 = vpop.f32.mrf.mxu0 }
 0x113   :  { %v908_v60 = vpop.f32.mrf.mxu1  ;;  %v1041_v61 = vpop.eup %1040  ;;  %702 = vst.msk [vmem:[%s1491_s2 + $0x80] sm:$0xff] %vm685_vm0, %v1039_v58  ;;  %1066 = vtanh.f32 %v876_v59 }
 0x114   :  { %v1043_v62 = vpop.eup %1042  ;;  %734 = vst.msk [vmem:[%s1491_s2 + $0x180] sm:$0xff] %vm685_vm0, %v1041_v61  ;;  %1068 = vtanh.f32 %v908_v60  ;;  %v462_v63 = vpop.f32.mrf.mxu0 }
 0x115   :  { %v590_v0 = vpop.f32.mrf.mxu1  ;;  %v1045_v1 = vpop.eup %1044  ;;  %705 = vst.msk [vmem:[%s1491_s2 + $0x98] sm:$0xff] %vm685_vm0, %v1043_v62  ;;  %1070 = vtanh.f32 %v462_v63 }
 0x116   :  { %v1047_v2 = vpop.eup %1046  ;;  %737 = vst.msk [vmem:[%s1491_s2 + $0x198] sm:$0xff] %vm685_vm0, %v1045_v1  ;;  %1072 = vtanh.f32 %v590_v0  ;;  %v877_v3 = vpop.f32.mrf.mxu0 }
 0x117   :  { %v909_v4 = vpop.f32.mrf.mxu1  ;;  %v1049_v5 = vpop.eup %1048  ;;  %703 = vst.msk [vmem:[%s1491_s2 + $0x88] sm:$0xff] %vm685_vm0, %v1047_v2  ;;  %1074 = vtanh.f32 %v877_v3 }
 0x118   :  { %v1051_v6 = vpop.eup %1050  ;;  %735 = vst.msk [vmem:[%s1491_s2 + $0x188] sm:$0xff] %vm685_vm0, %v1049_v5  ;;  %1076 = vtanh.f32 %v909_v4  ;;  %v465_v7 = vpop.f32.mrf.mxu0 }
 0x119   :  { %v593_v8 = vpop.f32.mrf.mxu1  ;;  %v1053_v9 = vpop.eup %1052  ;;  %708 = vst.msk [vmem:[%s1491_s2 + $0xb0] sm:$0xff] %vm685_vm0, %v1051_v6  ;;  %1078 = vtanh.f32 %v465_v7 }
 0x11a   :  { %v1055_v10 = vpop.eup %1054  ;;  %740 = vst.msk [vmem:[%s1491_s2 + $0x1b0] sm:$0xff] %vm685_vm0, %v1053_v9  ;;  %1080 = vtanh.f32 %v593_v8  ;;  %v880_v11 = vpop.f32.mrf.mxu0 }
 0x11b   :  { %v912_v12 = vpop.f32.mrf.mxu1  ;;  %v1057_v13 = vpop.eup %1056  ;;  %706 = vst.msk [vmem:[%s1491_s2 + $0xa0] sm:$0xff] %vm685_vm0, %v1055_v10  ;;  %1082 = vtanh.f32 %v880_v11 }
 0x11c   :  { %v1059_v14 = vpop.eup %1058  ;;  %738 = vst.msk [vmem:[%s1491_s2 + $0x1a0] sm:$0xff] %vm685_vm0, %v1057_v13  ;;  %1084 = vtanh.f32 %v912_v12  ;;  %v478_v15 = vpop.f32.mrf.mxu0 }
 0x11d   :  { %v606_v16 = vpop.f32.mrf.mxu1  ;;  %v1061_v17 = vpop.eup %1060  ;;  %709 = vst.msk [vmem:[%s1491_s2 + $0xb8] sm:$0xff] %vm685_vm0, %v1059_v14  ;;  %1086 = vtanh.f32 %v478_v15 }
 0x11e   :  { %v1063_v18 = vpop.eup %1062  ;;  %741 = vst.msk [vmem:[%s1491_s2 + $0x1b8] sm:$0xff] %vm685_vm0, %v1061_v17  ;;  %1088 = vtanh.f32 %v606_v16  ;;  %v881_v19 = vpop.f32.mrf.mxu0 }
 0x11f   :  { %v913_v20 = vpop.f32.mrf.mxu1  ;;  %v1065_v21 = vpop.eup %1064  ;;  %707 = vst.msk [vmem:[%s1491_s2 + $0xa8] sm:$0xff] %vm685_vm0, %v1063_v18  ;;  %1090 = vtanh.f32 %v881_v19 }
 0x120   :  { %v1067_v22 = vpop.eup %1066  ;;  %739 = vst.msk [vmem:[%s1491_s2 + $0x1a8] sm:$0xff] %vm685_vm0, %v1065_v21  ;;  %1092 = vtanh.f32 %v913_v20  ;;  %v481_v23 = vpop.f32.mrf.mxu0 }
 0x121   :  { %v609_v24 = vpop.f32.mrf.mxu1  ;;  %v1069_v25 = vpop.eup %1068  ;;  %712 = vst.msk [vmem:[%s1491_s2 + $0xd0] sm:$0xff] %vm685_vm0, %v1067_v22  ;;  %1094 = vtanh.f32 %v481_v23 }
 0x122   :  { %v1071_v26 = vpop.eup %1070  ;;  %744 = vst.msk [vmem:[%s1491_s2 + $0x1d0] sm:$0xff] %vm685_vm0, %v1069_v25  ;;  %1096 = vtanh.f32 %v609_v24 }
 0x123   :  { %v1073_v27 = vpop.eup %1072  ;;  %710 = vst.msk [vmem:[%s1491_s2 + $0xc0] sm:$0xff] %vm685_vm0, %v1071_v26 }
 0x124   :  { %v1075_v28 = vpop.eup %1074  ;;  %742 = vst.msk [vmem:[%s1491_s2 + $0x1c0] sm:$0xff] %vm685_vm0, %v1073_v27 }
 0x125   :  { %v1077_v29 = vpop.eup %1076  ;;  %713 = vst.msk [vmem:[%s1491_s2 + $0xd8] sm:$0xff] %vm685_vm0, %v1075_v28 }
 0x126   :  { %v1079_v30 = vpop.eup %1078  ;;  %745 = vst.msk [vmem:[%s1491_s2 + $0x1d8] sm:$0xff] %vm685_vm0, %v1077_v29 }
 0x127   :  { %v1081_v31 = vpop.eup %1080  ;;  %711 = vst.msk [vmem:[%s1491_s2 + $0xc8] sm:$0xff] %vm685_vm0, %v1079_v30 }
 0x128   :  { %v1083_v32 = vpop.eup %1082  ;;  %743 = vst.msk [vmem:[%s1491_s2 + $0x1c8] sm:$0xff] %vm685_vm0, %v1081_v31 }
 0x129   :  { %v1085_v33 = vpop.eup %1084  ;;  %716 = vst.msk [vmem:[%s1491_s2 + $0xf0] sm:$0xff] %vm685_vm0, %v1083_v32 }
 0x12a   :  { %v1087_v34 = vpop.eup %1086  ;;  %748 = vst.msk [vmem:[%s1491_s2 + $0x1f0] sm:$0xff] %vm685_vm0, %v1085_v33 }
 0x12b   :  { %v1089_v35 = vpop.eup %1088  ;;  %714 = vst.msk [vmem:[%s1491_s2 + $0xe0] sm:$0xff] %vm685_vm0, %v1087_v34 }
 0x12c   :  { %v1091_v36 = vpop.eup %1090  ;;  %746 = vst.msk [vmem:[%s1491_s2 + $0x1e0] sm:$0xff] %vm685_vm0, %v1089_v35 }
 0x12d   :  { %v1093_v37 = vpop.eup %1092  ;;  %717 = vst.msk [vmem:[%s1491_s2 + $0xf8] sm:$0xff] %vm685_vm0, %v1091_v36 }
 0x12e   :  { %v1095_v38 = vpop.eup %1094  ;;  %749 = vst.msk [vmem:[%s1491_s2 + $0x1f8] sm:$0xff] %vm685_vm0, %v1093_v37 }
 0x12f   :  { %v1097_v39 = vpop.eup %1096  ;;  %715 = vst.msk [vmem:[%s1491_s2 + $0xe8] sm:$0xff] %vm685_vm0, %v1095_v38 }
 0x130   :  { %747 = vst.msk [vmem:[%s1491_s2 + $0x1e8] sm:$0xff] %vm685_vm0, %v1097_v39 }

</bundles_post_ra>
